<compile_context>
chip_gen: v7x
topology: tpu7x:2x2x1
jax: 0.10.0
libtpu: 0.0.40
codegen_flags: <defaults>
</compile_context>

<pallas_src>
import jax
import jax.numpy as jnp
from jax.experimental import pallas as pl
from jax.experimental.pallas import tpu as pltpu

IMAGENET_MEAN = (0.485, 0.456, 0.406)
IMAGENET_STD = (0.229, 0.224, 0.225)

# (name, Cin, Cout) of the 16 conv layers of torchvision VGG19 `features`.
_VGG_CFG = (
    ("1_1", 3, 64), ("1_2", 64, 64),
    ("2_1", 64, 128), ("2_2", 128, 128),
    ("3_1", 128, 256), ("3_2", 256, 256), ("3_3", 256, 256), ("3_4", 256, 256),
    ("4_1", 256, 512), ("4_2", 512, 512), ("4_3", 512, 512), ("4_4", 512, 512),
    ("5_1", 512, 512), ("5_2", 512, 512), ("5_3", 512, 512), ("5_4", 512, 512),
)


def _round_up(x, m):
    return (x + m - 1) // m * m


# ---------------------------------------------------------------------------
# Fused conv kernel: tiled matmul (im2col) + bias + ReLU
# ---------------------------------------------------------------------------
def _matmul_bias_relu_kernel(x_ref, w_ref, b_ref, o_ref, acc_ref):
    """Computes one (tm, tn) output tile; grid axis 2 iterates over K tiles."""

    @pl.when(pl.program_id(2) == 0)
    def _():
        acc_ref[...] = jnp.zeros_like(acc_ref)

    acc_ref[...] += jnp.dot(x_ref[...], w_ref[...],
                            preferred_element_type=jnp.float32)

    @pl.when(pl.program_id(2) == pl.num_programs(2) - 1)
    def _():
        # Fused epilogue: bias add + ReLU, single writeback per output tile.
        o_ref[...] = jnp.maximum(acc_ref[...] + b_ref[...], 0.0).astype(o_ref.dtype)


def _matmul_bias_relu(x, w, b):
    """relu(x @ w + b) with x:(M,K), w:(K,N), b:(1,N), all float32."""
    M, K = x.shape
    Kw, N = w.shape
    assert K == Kw and b.shape == (1, N), (x.shape, w.shape, b.shape)

    tm = 256 if M >= 256 else 128
    tn = 256 if N >= 256 else 128
    tk = 256 if K >= 256 else 128
    Mp, Kp, Np = _round_up(M, tm), _round_up(K, tk), _round_up(N, tn)

    xp = jnp.pad(x, ((0, Mp - M), (0, Kp - K)))
    wp = jnp.pad(w, ((0, Kp - K), (0, Np - N)))
    bp = jnp.pad(b, ((0, 0), (0, Np - N)))

    out = pl.pallas_call(
        _matmul_bias_relu_kernel,
        out_shape=jax.ShapeDtypeStruct((Mp, Np), jnp.float32),
        grid_spec=pltpu.PrefetchScalarGridSpec(
            num_scalar_prefetch=0,
            grid=(Mp // tm, Np // tn, Kp // tk),
            in_specs=[
                pl.BlockSpec((tm, tk), lambda i, j, k: (i, k)),
                pl.BlockSpec((tk, tn), lambda i, j, k: (k, j)),
                pl.BlockSpec((1, tn), lambda i, j, k: (0, j)),
            ],
            out_specs=pl.BlockSpec((tm, tn), lambda i, j, k: (i, j)),
            scratch_shapes=[pltpu.VMEM((tm, tn), jnp.float32)],
        ),
        compiler_params=pltpu.CompilerParams(
            dimension_semantics=("parallel", "parallel", "arbitrary")),
    )(xp, wp, bp)
    return out[:M, :N]


def conv3x3_bias_relu_pallas(x, w, b):
    """3x3 'SAME' conv + bias + ReLU. x:(N,H,W,Cin), w:(3,3,Cin,Cout), b:(Cout,)."""
    N, H, W, Cin = x.shape
    Cout = w.shape[-1]
    xp = jnp.pad(x, ((0, 0), (1, 1), (1, 1), (0, 0)))
    # im2col (layout plumbing in the wrapper); tap order (dy, dx, ci) matches
    # w.reshape(9*Cin, Cout) enumeration.
    patches = jnp.concatenate(
        [xp[:, dy:dy + H, dx:dx + W, :] for dy in range(3) for dx in range(3)],
        axis=-1).reshape(N * H * W, 9 * Cin)
    out = _matmul_bias_relu(patches, w.reshape(9 * Cin, Cout), b.reshape(1, Cout))
    return out.reshape(N, H, W, Cout)


# ---------------------------------------------------------------------------
# Input normalization kernel: x = ((x + 1)/2 - mean) / std   (per channel)
# ---------------------------------------------------------------------------
def _normalize_kernel(x_ref, m_ref, s_ref, o_ref):
    o_ref[...] = ((x_ref[...] + 1.0) * 0.5 - m_ref[...]) / s_ref[...]


def normalize_input_pallas(x_nchw):
    N, C, H, W = x_nchw.shape
    assert C == len(IMAGENET_MEAN)
    rows, cols = N * C, H * W                     # lane-dense (H*W on lanes)
    x2 = x_nchw.reshape(rows, cols)
    mean = jnp.tile(jnp.asarray(IMAGENET_MEAN, jnp.float32), N).reshape(rows, 1)
    std = jnp.tile(jnp.asarray(IMAGENET_STD, jnp.float32), N).reshape(rows, 1)
    out = pl.pallas_call(
        _normalize_kernel,
        out_shape=jax.ShapeDtypeStruct((rows, cols), jnp.float32),
        grid=(1,),
        in_specs=[
            pl.BlockSpec((rows, cols), lambda i: (0, 0)),
            pl.BlockSpec((rows, 1), lambda i: (0, 0)),
            pl.BlockSpec((rows, 1), lambda i: (0, 0)),
        ],
        out_specs=pl.BlockSpec((rows, cols), lambda i: (0, 0)),
    )(x2, mean, std)
    return out.reshape(N, C, H, W)


# ---------------------------------------------------------------------------
# 2x2 / stride-2 max pool kernel (elementwise max of the 4 pooling phases)
# ---------------------------------------------------------------------------
def _max4_kernel(a_ref, b_ref, c_ref, d_ref, o_ref):
    o_ref[...] = jnp.maximum(jnp.maximum(a_ref[...], b_ref[...]),
                             jnp.maximum(c_ref[...], d_ref[...]))


def _row_tile(rows, max_rows=512):
    if rows <= max_rows or rows % 8 != 0:
        return rows
    best = rows
    for t in range(8, max_rows + 1, 8):
        if rows % t == 0:
            best = t
    return best


def maxpool2x2_pallas(x):
    """2x2 stride-2 max pool on NHWC, computed on a lane-dense (rows, Wo*C) view."""
    N, H, W, C = x.shape
    Ho, Wo = H // 2, W // 2
    rows, cols = N * Ho, Wo * C
    phases = [x[:, dy::2, dx::2, :].reshape(rows, cols)
              for dy in range(2) for dx in range(2)]
    tr = _row_tile(rows)
    out = pl.pallas_call(
        _max4_kernel,
        out_shape=jax.ShapeDtypeStruct((rows, cols), x.dtype),
        grid=(rows // tr,),
        in_specs=[pl.BlockSpec((tr, cols), lambda i: (i, 0)) for _ in range(4)],
        out_specs=pl.BlockSpec((tr, cols), lambda i: (i, 0)),
        compiler_params=pltpu.CompilerParams(dimension_semantics=("parallel",)),
    )(*phases)
    return out.reshape(N, Ho, Wo, C)


# ---------------------------------------------------------------------------
# VGG19 wiring (shared between the Pallas forward and the pure-JAX reference)
# ---------------------------------------------------------------------------
def _vgg19_graph(params, x_nchw, apply_stat, norm_fn, conv_fn, pool_fn):
    if apply_stat:
        x_nchw = norm_fn(x_nchw)
    h = jnp.transpose(x_nchw, (0, 2, 3, 1))      # NCHW -> NHWC

    def conv(t, name):
        w, b = params[name]
        return conv_fn(t, w, b)

    r1_1 = conv(h, "1_1")
    r1_2 = conv(r1_1, "1_2")
    r2_1 = conv(pool_fn(r1_2), "2_1")
    r2_2 = conv(r2_1, "2_2")
    r3_1 = conv(pool_fn(r2_2), "3_1")
    # Reference-module quirk: conv3_2 AND conv3_3 both live in the relu3_2
    # branch; relu3_3 is an empty Sequential (identity).
    r3_2 = conv(conv(r3_1, "3_2"), "3_3")
    r3_3 = r3_2
    r3_4 = conv(r3_3, "3_4")
    r4_1 = conv(pool_fn(r3_4), "4_1")
    r4_2 = conv(r4_1, "4_2")
    r4_3 = conv(r4_2, "4_3")
    r4_4 = conv(r4_3, "4_4")
    r5_1 = conv(pool_fn(r4_4), "5_1")
    r5_2 = conv(r5_1, "5_2")
    r5_3 = conv(r5_2, "5_3")
    r5_4 = conv(r5_3, "5_4")

    feats = {
        "relu1_1": r1_1, "relu1_2": r1_2,
        "relu2_1": r2_1, "relu2_2": r2_2,
        "relu3_1": r3_1, "relu3_2": r3_2, "relu3_3": r3_3, "relu3_4": r3_4,
        "relu4_1": r4_1, "relu4_2": r4_2, "relu4_3": r4_3, "relu4_4": r4_4,
        "relu5_1": r5_1, "relu5_2": r5_2, "relu5_3": r5_3, "relu5_4": r5_4,
    }
    return {k: jnp.transpose(v, (0, 3, 1, 2)) for k, v in feats.items()}  # -> NCHW


def _pallas_forward(params, x, apply_stat=True):
    return _vgg19_graph(params, x, apply_stat,
                        norm_fn=normalize_input_pallas,
                        conv_fn=conv3x3_bias_relu_pallas,
                        pool_fn=maxpool2x2_pallas)


def _reference_forward(params, x, apply_stat=True):
    mean = jnp.asarray(IMAGENET_MEAN, jnp.float32).reshape(1, 3, 1, 1)
    std = jnp.asarray(IMAGENET_STD, jnp.float32).reshape(1, 3, 1, 1)

    def norm_fn(t):
        return ((t + 1.0) / 2.0 - mean) / std

    def conv_fn(t, w, b):
        y = jax.lax.conv_general_dilated(
            t, w, window_strides=(1, 1), padding="SAME",
            dimension_numbers=("NHWC", "HWIO", "NHWC"),
            precision=jax.lax.Precision.HIGHEST)
        return jnp.maximum(y + b, 0.0)

    def pool_fn(t):
        return jax.lax.reduce_window(t, -jnp.inf, jax.lax.max,
                                     (1, 2, 2, 1), (1, 2, 2, 1), "VALID")

    return _vgg19_graph(params, x, apply_stat, norm_fn, conv_fn, pool_fn)


def init_vgg19_params(key):
    params = {}
    for name, cin, cout in _VGG_CFG:
        key, kw, kb = jax.random.split(key, 3)
        w = jax.random.normal(kw, (3, 3, cin, cout), jnp.float32) * jnp.sqrt(
            2.0 / (9.0 * cin))
        b = 0.01 * jax.random.normal(kb, (cout,), jnp.float32)
        params[name] = (w, b)
    return params


class VGG19:
    """JAX/Pallas port of the PyTorch VGG19 feature extractor."""

    def __init__(self, key):
        # TODO(synk): pretrained torchvision VGG19 weights cannot be loaded
        # in-script (no file / network access); deterministic He-initialized
        # random weights with the identical architecture are used instead.
        self.params = init_vgg19_params(key)
        self._fwd = jax.jit(_pallas_forward, static_argnums=2)

    def __call__(self, x, apply_stat=True):
        return self._fwd(self.params, x, apply_stat)


if __name__ == "__main__":
    key = jax.random.PRNGKey(0)
    key, kp, kx = jax.random.split(key, 3)

    model = VGG19(kp)
    # Small input consistent with the module: batch=2, 3 channels, 32x32, in [-1, 1].
    x = jax.random.uniform(kx, (2, 3, 32, 32), jnp.float32, minval=-1.0, maxval=1.0)

    out = model(x, apply_stat=True)
    out = jax.block_until_ready(out)

    ref_fn = jax.jit(_reference_forward, static_argnums=2)
    ref = jax.block_until_ready(ref_fn(model.params, x, True))

    assert set(out.keys()) == set(ref.keys())
    for name in sorted(out):
        a, b = out[name], ref[name]
        assert a.shape == b.shape, (name, a.shape, b.shape)
        err = float(jnp.max(jnp.abs(a - b)))
        assert jnp.allclose(a, b, rtol=2e-2, atol=2e-2), (name, err)

    print("KERNEL_OK")
</pallas_src>

<mosaic_0001>
module attributes {stable_mosaic.version = 11 : i64} {
  func.func @_normalize_kernel(%arg0: i32, %arg1: memref<6x1024xf32, #tpu.memory_space<vmem>>, %arg2: memref<6x1xf32, #tpu.memory_space<vmem>>, %arg3: memref<6x1xf32, #tpu.memory_space<vmem>>, %arg4: memref<6x1024xf32, #tpu.memory_space<vmem>>) attributes {dimension_semantics = [#tpu.dimension_semantics<arbitrary>], iteration_bounds = array<i64: 1>, scalar_prefetch = 0 : i64, scratch_operands = 0 : i64, tpu.core_type = #tpu.core_type<tc>, window_params = [{pipeline_mode = #tpu.pipeline_mode<synchronous>, transform_indices = @transform_0, window_bounds = array<i64: 6, 1024>}, {pipeline_mode = #tpu.pipeline_mode<synchronous>, transform_indices = @transform_1, window_bounds = array<i64: 6, 1>}, {pipeline_mode = #tpu.pipeline_mode<synchronous>, transform_indices = @transform_2, window_bounds = array<i64: 6, 1>}, {pipeline_mode = #tpu.pipeline_mode<synchronous>, transform_indices = @transform_3, window_bounds = array<i64: 6, 1024>}]} {
    %c0 = arith.constant 0 : index
    %c0_0 = arith.constant 0 : index
    %0 = vector.load %arg1[%c0, %c0_0] : memref<6x1024xf32, #tpu.memory_space<vmem>>, vector<6x1024xf32>
    %cst = arith.constant 1.000000e+00 : f32
    %1 = vector.broadcast %cst : f32 to vector<6x1024xf32>
    %2 = arith.addf %0, %1 : vector<6x1024xf32>
    %cst_1 = arith.constant 5.000000e-01 : f32
    %3 = vector.broadcast %cst_1 : f32 to vector<6x1024xf32>
    %4 = arith.mulf %2, %3 : vector<6x1024xf32>
    %c0_2 = arith.constant 0 : index
    %c0_3 = arith.constant 0 : index
    %5 = vector.load %arg2[%c0_2, %c0_3] : memref<6x1xf32, #tpu.memory_space<vmem>>, vector<6x1xf32>
    %6 = vector.broadcast %5 : vector<6x1xf32> to vector<6x1024xf32>
    %7 = arith.subf %4, %6 : vector<6x1024xf32>
    %c0_4 = arith.constant 0 : index
    %c0_5 = arith.constant 0 : index
    %8 = vector.load %arg3[%c0_4, %c0_5] : memref<6x1xf32, #tpu.memory_space<vmem>>, vector<6x1xf32>
    %9 = vector.broadcast %8 : vector<6x1xf32> to vector<6x1024xf32>
    %10 = arith.divf %7, %9 : vector<6x1024xf32>
    %c0_6 = arith.constant 0 : index
    %c0_7 = arith.constant 0 : index
    %11 = vector.load %arg4[%c0_6, %c0_7] : memref<6x1024xf32, #tpu.memory_space<vmem>>, vector<6x1024xf32>
    tpu.vector_store %arg4[%c0_6, %c0_7], %10 {strides = array<i32>} : memref<6x1024xf32, #tpu.memory_space<vmem>>, vector<6x1024xf32>,
    return
  }
  func.func @transform_0(%arg0: i32) -> (i32, i32) {
    %c0_i32 = arith.constant 0 : i32
    %c0_i32_0 = arith.constant 0 : i32
    %c0_i32_1 = arith.constant 0 : i32
    return %c0_i32, %c0_i32_0 : i32, i32
  }
  func.func @transform_1(%arg0: i32) -> (i32, i32) {
    %c0_i32 = arith.constant 0 : i32
    %c0_i32_0 = arith.constant 0 : i32
    %c0_i32_1 = arith.constant 0 : i32
    return %c0_i32, %c0_i32_0 : i32, i32
  }
  func.func @transform_2(%arg0: i32) -> (i32, i32) {
    %c0_i32 = arith.constant 0 : i32
    %c0_i32_0 = arith.constant 0 : i32
    %c0_i32_1 = arith.constant 0 : i32
    return %c0_i32, %c0_i32_0 : i32, i32
  }
  func.func @transform_3(%arg0: i32) -> (i32, i32) {
    %c0_i32 = arith.constant 0 : i32
    %c0_i32_0 = arith.constant 0 : i32
    %c0_i32_1 = arith.constant 0 : i32
    return %c0_i32, %c0_i32_0 : i32, i32
  }
}

module attributes {stable_mosaic.version = 11 : i64} {
  func.func @_matmul_bias_relu_kernel(%arg0: i32, %arg1: i32, %arg2: i32, %arg3: memref<256x128xf32, #tpu.memory_space<vmem>>, %arg4: memref<128x128xf32, #tpu.memory_space<vmem>>, %arg5: memref<1x128xf32, #tpu.memory_space<vmem>>, %arg6: memref<256x128xf32, #tpu.memory_space<vmem>>, %arg7: memref<256x128xf32, #tpu.memory_space<vmem>>) attributes {dimension_semantics = [#tpu.dimension_semantics<parallel>, #tpu.dimension_semantics<parallel>, #tpu.dimension_semantics<arbitrary>], iteration_bounds = array<i64: 8, 1, 1>, scalar_prefetch = 0 : i64, scratch_operands = 1 : i64, tpu.core_type = #tpu.core_type<tc>, window_params = [{transform_indices = @transform_0, window_bounds = array<i64: 256, 128>}, {transform_indices = @transform_1, window_bounds = array<i64: 128, 128>}, {transform_indices = @transform_2, window_bounds = array<i64: 1, 128>}, {transform_indices = @transform_3, window_bounds = array<i64: 256, 128>}]} {
    %c0_i32 = arith.constant 0 : i32
    %0 = arith.cmpi eq, %arg2, %c0_i32 : i32
    %1 = arith.extui %0 : i1 to i32
    %c0_i32_0 = arith.constant 0 : i32
    %2 = arith.cmpi ne, %1, %c0_i32_0 : i32
    scf.if %2 {
      %cst_10 = arith.constant 0.000000e+00 : f32
      %12 = vector.broadcast %cst_10 : f32 to vector<256x128xf32>
      %c0_11 = arith.constant 0 : index
      %c0_12 = arith.constant 0 : index
      %13 = vector.load %arg7[%c0_11, %c0_12] : memref<256x128xf32, #tpu.memory_space<vmem>>, vector<256x128xf32>
      tpu.vector_store %arg7[%c0_11, %c0_12], %12 {strides = array<i32>} : memref<256x128xf32, #tpu.memory_space<vmem>>, vector<256x128xf32>,
    } else {
    }
    %c0 = arith.constant 0 : index
    %c0_1 = arith.constant 0 : index
    %3 = vector.load %arg7[%c0, %c0_1] : memref<256x128xf32, #tpu.memory_space<vmem>>, vector<256x128xf32>
    %c0_2 = arith.constant 0 : index
    %c0_3 = arith.constant 0 : index
    %4 = vector.load %arg3[%c0_2, %c0_3] : memref<256x128xf32, #tpu.memory_space<vmem>>, vector<256x128xf32>
    %c0_4 = arith.constant 0 : index
    %c0_5 = arith.constant 0 : index
    %5 = vector.load %arg4[%c0_4, %c0_5] : memref<128x128xf32, #tpu.memory_space<vmem>>, vector<128x128xf32>
    %cst = arith.constant dense<0.000000e+00> : vector<256x128xf32>
    %6 = tpu.matmul %4, %5, %cst {dimension_numbers = #tpu.dot_dimension_numbers<[1], [0], [0], [1], [0, 0, 1, 1], [], []>} : vector<256x128xf32>, vector<128x128xf32>, vector<256x128xf32> -> vector<256x128xf32>
    %7 = arith.addf %3, %6 : vector<256x128xf32>
    %c0_6 = arith.constant 0 : index
    %c0_7 = arith.constant 0 : index
    %8 = vector.load %arg7[%c0_6, %c0_7] : memref<256x128xf32, #tpu.memory_space<vmem>>, vector<256x128xf32>
    tpu.vector_store %arg7[%c0_6, %c0_7], %7 {strides = array<i32>} : memref<256x128xf32, #tpu.memory_space<vmem>>, vector<256x128xf32>,
    %c0_i32_8 = arith.constant 0 : i32
    %9 = arith.cmpi eq, %arg2, %c0_i32_8 : i32
    %10 = arith.extui %9 : i1 to i32
    %c0_i32_9 = arith.constant 0 : i32
    %11 = arith.cmpi ne, %10, %c0_i32_9 : i32
    scf.if %11 {
      %c0_10 = arith.constant 0 : index
      %c0_11 = arith.constant 0 : index
      %12 = vector.load %arg7[%c0_10, %c0_11] : memref<256x128xf32, #tpu.memory_space<vmem>>, vector<256x128xf32>
      %c0_12 = arith.constant 0 : index
      %c0_13 = arith.constant 0 : index
      %13 = vector.load %arg5[%c0_12, %c0_13] : memref<1x128xf32, #tpu.memory_space<vmem>>, vector<1x128xf32>
      %14 = vector.broadcast %13 : vector<1x128xf32> to vector<256x128xf32>
      %15 = arith.addf %12, %14 : vector<256x128xf32>
      %cst_14 = arith.constant 0.000000e+00 : f32
      %16 = vector.broadcast %cst_14 : f32 to vector<256x128xf32>
      %17 = arith.maximumf %15, %16 : vector<256x128xf32>
      %c0_15 = arith.constant 0 : index
      %c0_16 = arith.constant 0 : index
      %18 = vector.load %arg6[%c0_15, %c0_16] : memref<256x128xf32, #tpu.memory_space<vmem>>, vector<256x128xf32>
      tpu.vector_store %arg6[%c0_15, %c0_16], %17 {strides = array<i32>} : memref<256x128xf32, #tpu.memory_space<vmem>>, vector<256x128xf32>,
    } else {
    }
    return
  }
  func.func @transform_0(%arg0: i32, %arg1: i32, %arg2: i32) -> (i32, i32) {
    %c0_i32 = arith.constant 0 : i32
    return %arg0, %arg2 : i32, i32
  }
  func.func @transform_1(%arg0: i32, %arg1: i32, %arg2: i32) -> (i32, i32) {
    %c0_i32 = arith.constant 0 : i32
    return %arg2, %arg1 : i32, i32
  }
  func.func @transform_2(%arg0: i32, %arg1: i32, %arg2: i32) -> (i32, i32) {
    %c0_i32 = arith.constant 0 : i32
    %c0_i32_0 = arith.constant 0 : i32
    return %c0_i32, %arg1 : i32, i32
  }
  func.func @transform_3(%arg0: i32, %arg1: i32, %arg2: i32) -> (i32, i32) {
    %c0_i32 = arith.constant 0 : i32
    return %arg0, %arg1 : i32, i32
  }
}

module attributes {stable_mosaic.version = 11 : i64} {
  func.func @_matmul_bias_relu_kernel(%arg0: i32, %arg1: i32, %arg2: i32, %arg3: memref<256x256xf32, #tpu.memory_space<vmem>>, %arg4: memref<256x128xf32, #tpu.memory_space<vmem>>, %arg5: memref<1x128xf32, #tpu.memory_space<vmem>>, %arg6: memref<256x128xf32, #tpu.memory_space<vmem>>, %arg7: memref<256x128xf32, #tpu.memory_space<vmem>>) attributes {dimension_semantics = [#tpu.dimension_semantics<parallel>, #tpu.dimension_semantics<parallel>, #tpu.dimension_semantics<arbitrary>], iteration_bounds = array<i64: 8, 1, 3>, scalar_prefetch = 0 : i64, scratch_operands = 1 : i64, tpu.core_type = #tpu.core_type<tc>, window_params = [{transform_indices = @transform_0, window_bounds = array<i64: 256, 256>}, {transform_indices = @transform_1, window_bounds = array<i64: 256, 128>}, {transform_indices = @transform_2, window_bounds = array<i64: 1, 128>}, {transform_indices = @transform_3, window_bounds = array<i64: 256, 128>}]} {
    %c0_i32 = arith.constant 0 : i32
    %0 = arith.cmpi eq, %arg2, %c0_i32 : i32
    %1 = arith.extui %0 : i1 to i32
    %c0_i32_0 = arith.constant 0 : i32
    %2 = arith.cmpi ne, %1, %c0_i32_0 : i32
    scf.if %2 {
      %cst_9 = arith.constant 0.000000e+00 : f32
      %12 = vector.broadcast %cst_9 : f32 to vector<256x128xf32>
      %c0_10 = arith.constant 0 : index
      %c0_11 = arith.constant 0 : index
      %13 = vector.load %arg7[%c0_10, %c0_11] : memref<256x128xf32, #tpu.memory_space<vmem>>, vector<256x128xf32>
      tpu.vector_store %arg7[%c0_10, %c0_11], %12 {strides = array<i32>} : memref<256x128xf32, #tpu.memory_space<vmem>>, vector<256x128xf32>,
    } else {
    }
    %c0 = arith.constant 0 : index
    %c0_1 = arith.constant 0 : index
    %3 = vector.load %arg7[%c0, %c0_1] : memref<256x128xf32, #tpu.memory_space<vmem>>, vector<256x128xf32>
    %c0_2 = arith.constant 0 : index
    %c0_3 = arith.constant 0 : index
    %4 = vector.load %arg3[%c0_2, %c0_3] : memref<256x256xf32, #tpu.memory_space<vmem>>, vector<256x256xf32>
    %c0_4 = arith.constant 0 : index
    %c0_5 = arith.constant 0 : index
    %5 = vector.load %arg4[%c0_4, %c0_5] : memref<256x128xf32, #tpu.memory_space<vmem>>, vector<256x128xf32>
    %cst = arith.constant dense<0.000000e+00> : vector<256x128xf32>
    %6 = tpu.matmul %4, %5, %cst {dimension_numbers = #tpu.dot_dimension_numbers<[1], [0], [0], [1], [0, 0, 1, 1], [], []>} : vector<256x256xf32>, vector<256x128xf32>, vector<256x128xf32> -> vector<256x128xf32>
    %7 = arith.addf %3, %6 : vector<256x128xf32>
    %c0_6 = arith.constant 0 : index
    %c0_7 = arith.constant 0 : index
    %8 = vector.load %arg7[%c0_6, %c0_7] : memref<256x128xf32, #tpu.memory_space<vmem>>, vector<256x128xf32>
    tpu.vector_store %arg7[%c0_6, %c0_7], %7 {strides = array<i32>} : memref<256x128xf32, #tpu.memory_space<vmem>>, vector<256x128xf32>,
    %c2_i32 = arith.constant 2 : i32
    %9 = arith.cmpi eq, %arg2, %c2_i32 : i32
    %10 = arith.extui %9 : i1 to i32
    %c0_i32_8 = arith.constant 0 : i32
    %11 = arith.cmpi ne, %10, %c0_i32_8 : i32
    scf.if %11 {
      %c0_9 = arith.constant 0 : index
      %c0_10 = arith.constant 0 : index
      %12 = vector.load %arg7[%c0_9, %c0_10] : memref<256x128xf32, #tpu.memory_space<vmem>>, vector<256x128xf32>
      %c0_11 = arith.constant 0 : index
      %c0_12 = arith.constant 0 : index
      %13 = vector.load %arg5[%c0_11, %c0_12] : memref<1x128xf32, #tpu.memory_space<vmem>>, vector<1x128xf32>
      %14 = vector.broadcast %13 : vector<1x128xf32> to vector<256x128xf32>
      %15 = arith.addf %12, %14 : vector<256x128xf32>
      %cst_13 = arith.constant 0.000000e+00 : f32
      %16 = vector.broadcast %cst_13 : f32 to vector<256x128xf32>
      %17 = arith.maximumf %15, %16 : vector<256x128xf32>
      %c0_14 = arith.constant 0 : index
      %c0_15 = arith.constant 0 : index
      %18 = vector.load %arg6[%c0_14, %c0_15] : memref<256x128xf32, #tpu.memory_space<vmem>>, vector<256x128xf32>
      tpu.vector_store %arg6[%c0_14, %c0_15], %17 {strides = array<i32>} : memref<256x128xf32, #tpu.memory_space<vmem>>, vector<256x128xf32>,
    } else {
    }
    return
  }
  func.func @transform_0(%arg0: i32, %arg1: i32, %arg2: i32) -> (i32, i32) {
    %c0_i32 = arith.constant 0 : i32
    return %arg0, %arg2 : i32, i32
  }
  func.func @transform_1(%arg0: i32, %arg1: i32, %arg2: i32) -> (i32, i32) {
    %c0_i32 = arith.constant 0 : i32
    return %arg2, %arg1 : i32, i32
  }
  func.func @transform_2(%arg0: i32, %arg1: i32, %arg2: i32) -> (i32, i32) {
    %c0_i32 = arith.constant 0 : i32
    %c0_i32_0 = arith.constant 0 : i32
    return %c0_i32, %arg1 : i32, i32
  }
  func.func @transform_3(%arg0: i32, %arg1: i32, %arg2: i32) -> (i32, i32) {
    %c0_i32 = arith.constant 0 : i32
    return %arg0, %arg1 : i32, i32
  }
}

module attributes {stable_mosaic.version = 11 : i64} {
  func.func @_max4_kernel(%arg0: i32, %arg1: memref<32x1024xf32, #tpu.memory_space<vmem>>, %arg2: memref<32x1024xf32, #tpu.memory_space<vmem>>, %arg3: memref<32x1024xf32, #tpu.memory_space<vmem>>, %arg4: memref<32x1024xf32, #tpu.memory_space<vmem>>, %arg5: memref<32x1024xf32, #tpu.memory_space<vmem>>) attributes {dimension_semantics = [#tpu.dimension_semantics<parallel>], iteration_bounds = array<i64: 1>, scalar_prefetch = 0 : i64, scratch_operands = 0 : i64, tpu.core_type = #tpu.core_type<tc>, window_params = [{transform_indices = @transform_0, window_bounds = array<i64: 32, 1024>}, {transform_indices = @transform_1, window_bounds = array<i64: 32, 1024>}, {transform_indices = @transform_2, window_bounds = array<i64: 32, 1024>}, {transform_indices = @transform_3, window_bounds = array<i64: 32, 1024>}, {transform_indices = @transform_4, window_bounds = array<i64: 32, 1024>}]} {
    %c0 = arith.constant 0 : index
    %c0_0 = arith.constant 0 : index
    %0 = vector.load %arg1[%c0, %c0_0] : memref<32x1024xf32, #tpu.memory_space<vmem>>, vector<32x1024xf32>
    %c0_1 = arith.constant 0 : index
    %c0_2 = arith.constant 0 : index
    %1 = vector.load %arg2[%c0_1, %c0_2] : memref<32x1024xf32, #tpu.memory_space<vmem>>, vector<32x1024xf32>
    %2 = arith.maximumf %0, %1 : vector<32x1024xf32>
    %c0_3 = arith.constant 0 : index
    %c0_4 = arith.constant 0 : index
    %3 = vector.load %arg3[%c0_3, %c0_4] : memref<32x1024xf32, #tpu.memory_space<vmem>>, vector<32x1024xf32>
    %c0_5 = arith.constant 0 : index
    %c0_6 = arith.constant 0 : index
    %4 = vector.load %arg4[%c0_5, %c0_6] : memref<32x1024xf32, #tpu.memory_space<vmem>>, vector<32x1024xf32>
    %5 = arith.maximumf %3, %4 : vector<32x1024xf32>
    %6 = arith.maximumf %2, %5 : vector<32x1024xf32>
    %c0_7 = arith.constant 0 : index
    %c0_8 = arith.constant 0 : index
    %7 = vector.load %arg5[%c0_7, %c0_8] : memref<32x1024xf32, #tpu.memory_space<vmem>>, vector<32x1024xf32>
    tpu.vector_store %arg5[%c0_7, %c0_8], %6 {strides = array<i32>} : memref<32x1024xf32, #tpu.memory_space<vmem>>, vector<32x1024xf32>,
    return
  }
  func.func @transform_0(%arg0: i32) -> (i32, i32) {
    %c0_i32 = arith.constant 0 : i32
    %c0_i32_0 = arith.constant 0 : i32
    return %arg0, %c0_i32 : i32, i32
  }
  func.func @transform_1(%arg0: i32) -> (i32, i32) {
    %c0_i32 = arith.constant 0 : i32
    %c0_i32_0 = arith.constant 0 : i32
    return %arg0, %c0_i32 : i32, i32
  }
  func.func @transform_2(%arg0: i32) -> (i32, i32) {
    %c0_i32 = arith.constant 0 : i32
    %c0_i32_0 = arith.constant 0 : i32
    return %arg0, %c0_i32 : i32, i32
  }
  func.func @transform_3(%arg0: i32) -> (i32, i32) {
    %c0_i32 = arith.constant 0 : i32
    %c0_i32_0 = arith.constant 0 : i32
    return %arg0, %c0_i32 : i32, i32
  }
  func.func @transform_4(%arg0: i32) -> (i32, i32) {
    %c0_i32 = arith.constant 0 : i32
    %c0_i32_0 = arith.constant 0 : i32
    return %arg0, %c0_i32 : i32, i32
  }
}

module attributes {stable_mosaic.version = 11 : i64} {
  func.func @_matmul_bias_relu_kernel(%arg0: i32, %arg1: i32, %arg2: i32, %arg3: memref<256x256xf32, #tpu.memory_space<vmem>>, %arg4: memref<256x128xf32, #tpu.memory_space<vmem>>, %arg5: memref<1x128xf32, #tpu.memory_space<vmem>>, %arg6: memref<256x128xf32, #tpu.memory_space<vmem>>, %arg7: memref<256x128xf32, #tpu.memory_space<vmem>>) attributes {dimension_semantics = [#tpu.dimension_semantics<parallel>, #tpu.dimension_semantics<parallel>, #tpu.dimension_semantics<arbitrary>], iteration_bounds = array<i64: 2, 1, 3>, scalar_prefetch = 0 : i64, scratch_operands = 1 : i64, tpu.core_type = #tpu.core_type<tc>, window_params = [{transform_indices = @transform_0, window_bounds = array<i64: 256, 256>}, {transform_indices = @transform_1, window_bounds = array<i64: 256, 128>}, {transform_indices = @transform_2, window_bounds = array<i64: 1, 128>}, {transform_indices = @transform_3, window_bounds = array<i64: 256, 128>}]} {
    %c0_i32 = arith.constant 0 : i32
    %0 = arith.cmpi eq, %arg2, %c0_i32 : i32
    %1 = arith.extui %0 : i1 to i32
    %c0_i32_0 = arith.constant 0 : i32
    %2 = arith.cmpi ne, %1, %c0_i32_0 : i32
    scf.if %2 {
      %cst_9 = arith.constant 0.000000e+00 : f32
      %12 = vector.broadcast %cst_9 : f32 to vector<256x128xf32>
      %c0_10 = arith.constant 0 : index
      %c0_11 = arith.constant 0 : index
      %13 = vector.load %arg7[%c0_10, %c0_11] : memref<256x128xf32, #tpu.memory_space<vmem>>, vector<256x128xf32>
      tpu.vector_store %arg7[%c0_10, %c0_11], %12 {strides = array<i32>} : memref<256x128xf32, #tpu.memory_space<vmem>>, vector<256x128xf32>,
    } else {
    }
    %c0 = arith.constant 0 : index
    %c0_1 = arith.constant 0 : index
    %3 = vector.load %arg7[%c0, %c0_1] : memref<256x128xf32, #tpu.memory_space<vmem>>, vector<256x128xf32>
    %c0_2 = arith.constant 0 : index
    %c0_3 = arith.constant 0 : index
    %4 = vector.load %arg3[%c0_2, %c0_3] : memref<256x256xf32, #tpu.memory_space<vmem>>, vector<256x256xf32>
    %c0_4 = arith.constant 0 : index
    %c0_5 = arith.constant 0 : index
    %5 = vector.load %arg4[%c0_4, %c0_5] : memref<256x128xf32, #tpu.memory_space<vmem>>, vector<256x128xf32>
    %cst = arith.constant dense<0.000000e+00> : vector<256x128xf32>
    %6 = tpu.matmul %4, %5, %cst {dimension_numbers = #tpu.dot_dimension_numbers<[1], [0], [0], [1], [0, 0, 1, 1], [], []>} : vector<256x256xf32>, vector<256x128xf32>, vector<256x128xf32> -> vector<256x128xf32>
    %7 = arith.addf %3, %6 : vector<256x128xf32>
    %c0_6 = arith.constant 0 : index
    %c0_7 = arith.constant 0 : index
    %8 = vector.load %arg7[%c0_6, %c0_7] : memref<256x128xf32, #tpu.memory_space<vmem>>, vector<256x128xf32>
    tpu.vector_store %arg7[%c0_6, %c0_7], %7 {strides = array<i32>} : memref<256x128xf32, #tpu.memory_space<vmem>>, vector<256x128xf32>,
    %c2_i32 = arith.constant 2 : i32
    %9 = arith.cmpi eq, %arg2, %c2_i32 : i32
    %10 = arith.extui %9 : i1 to i32
    %c0_i32_8 = arith.constant 0 : i32
    %11 = arith.cmpi ne, %10, %c0_i32_8 : i32
    scf.if %11 {
      %c0_9 = arith.constant 0 : index
      %c0_10 = arith.constant 0 : index
      %12 = vector.load %arg7[%c0_9, %c0_10] : memref<256x128xf32, #tpu.memory_space<vmem>>, vector<256x128xf32>
      %c0_11 = arith.constant 0 : index
      %c0_12 = arith.constant 0 : index
      %13 = vector.load %arg5[%c0_11, %c0_12] : memref<1x128xf32, #tpu.memory_space<vmem>>, vector<1x128xf32>
      %14 = vector.broadcast %13 : vector<1x128xf32> to vector<256x128xf32>
      %15 = arith.addf %12, %14 : vector<256x128xf32>
      %cst_13 = arith.constant 0.000000e+00 : f32
      %16 = vector.broadcast %cst_13 : f32 to vector<256x128xf32>
      %17 = arith.maximumf %15, %16 : vector<256x128xf32>
      %c0_14 = arith.constant 0 : index
      %c0_15 = arith.constant 0 : index
      %18 = vector.load %arg6[%c0_14, %c0_15] : memref<256x128xf32, #tpu.memory_space<vmem>>, vector<256x128xf32>
      tpu.vector_store %arg6[%c0_14, %c0_15], %17 {strides = array<i32>} : memref<256x128xf32, #tpu.memory_space<vmem>>, vector<256x128xf32>,
    } else {
    }
    return
  }
  func.func @transform_0(%arg0: i32, %arg1: i32, %arg2: i32) -> (i32, i32) {
    %c0_i32 = arith.constant 0 : i32
    return %arg0, %arg2 : i32, i32
  }
  func.func @transform_1(%arg0: i32, %arg1: i32, %arg2: i32) -> (i32, i32) {
    %c0_i32 = arith.constant 0 : i32
    return %arg2, %arg1 : i32, i32
  }
  func.func @transform_2(%arg0: i32, %arg1: i32, %arg2: i32) -> (i32, i32) {
    %c0_i32 = arith.constant 0 : i32
    %c0_i32_0 = arith.constant 0 : i32
    return %c0_i32, %arg1 : i32, i32
  }
  func.func @transform_3(%arg0: i32, %arg1: i32, %arg2: i32) -> (i32, i32) {
    %c0_i32 = arith.constant 0 : i32
    return %arg0, %arg1 : i32, i32
  }
}

module attributes {stable_mosaic.version = 11 : i64} {
  func.func @_matmul_bias_relu_kernel(%arg0: i32, %arg1: i32, %arg2: i32, %arg3: memref<256x256xf32, #tpu.memory_space<vmem>>, %arg4: memref<256x128xf32, #tpu.memory_space<vmem>>, %arg5: memref<1x128xf32, #tpu.memory_space<vmem>>, %arg6: memref<256x128xf32, #tpu.memory_space<vmem>>, %arg7: memref<256x128xf32, #tpu.memory_space<vmem>>) attributes {dimension_semantics = [#tpu.dimension_semantics<parallel>, #tpu.dimension_semantics<parallel>, #tpu.dimension_semantics<arbitrary>], iteration_bounds = array<i64: 2, 1, 5>, scalar_prefetch = 0 : i64, scratch_operands = 1 : i64, tpu.core_type = #tpu.core_type<tc>, window_params = [{transform_indices = @transform_0, window_bounds = array<i64: 256, 256>}, {transform_indices = @transform_1, window_bounds = array<i64: 256, 128>}, {transform_indices = @transform_2, window_bounds = array<i64: 1, 128>}, {transform_indices = @transform_3, window_bounds = array<i64: 256, 128>}]} {
    %c0_i32 = arith.constant 0 : i32
    %0 = arith.cmpi eq, %arg2, %c0_i32 : i32
    %1 = arith.extui %0 : i1 to i32
    %c0_i32_0 = arith.constant 0 : i32
    %2 = arith.cmpi ne, %1, %c0_i32_0 : i32
    scf.if %2 {
      %cst_9 = arith.constant 0.000000e+00 : f32
      %12 = vector.broadcast %cst_9 : f32 to vector<256x128xf32>
      %c0_10 = arith.constant 0 : index
      %c0_11 = arith.constant 0 : index
      %13 = vector.load %arg7[%c0_10, %c0_11] : memref<256x128xf32, #tpu.memory_space<vmem>>, vector<256x128xf32>
      tpu.vector_store %arg7[%c0_10, %c0_11], %12 {strides = array<i32>} : memref<256x128xf32, #tpu.memory_space<vmem>>, vector<256x128xf32>,
    } else {
    }
    %c0 = arith.constant 0 : index
    %c0_1 = arith.constant 0 : index
    %3 = vector.load %arg7[%c0, %c0_1] : memref<256x128xf32, #tpu.memory_space<vmem>>, vector<256x128xf32>
    %c0_2 = arith.constant 0 : index
    %c0_3 = arith.constant 0 : index
    %4 = vector.load %arg3[%c0_2, %c0_3] : memref<256x256xf32, #tpu.memory_space<vmem>>, vector<256x256xf32>
    %c0_4 = arith.constant 0 : index
    %c0_5 = arith.constant 0 : index
    %5 = vector.load %arg4[%c0_4, %c0_5] : memref<256x128xf32, #tpu.memory_space<vmem>>, vector<256x128xf32>
    %cst = arith.constant dense<0.000000e+00> : vector<256x128xf32>
    %6 = tpu.matmul %4, %5, %cst {dimension_numbers = #tpu.dot_dimension_numbers<[1], [0], [0], [1], [0, 0, 1, 1], [], []>} : vector<256x256xf32>, vector<256x128xf32>, vector<256x128xf32> -> vector<256x128xf32>
    %7 = arith.addf %3, %6 : vector<256x128xf32>
    %c0_6 = arith.constant 0 : index
    %c0_7 = arith.constant 0 : index
    %8 = vector.load %arg7[%c0_6, %c0_7] : memref<256x128xf32, #tpu.memory_space<vmem>>, vector<256x128xf32>
    tpu.vector_store %arg7[%c0_6, %c0_7], %7 {strides = array<i32>} : memref<256x128xf32, #tpu.memory_space<vmem>>, vector<256x128xf32>,
    %c4_i32 = arith.constant 4 : i32
    %9 = arith.cmpi eq, %arg2, %c4_i32 : i32
    %10 = arith.extui %9 : i1 to i32
    %c0_i32_8 = arith.constant 0 : i32
    %11 = arith.cmpi ne, %10, %c0_i32_8 : i32
    scf.if %11 {
      %c0_9 = arith.constant 0 : index
      %c0_10 = arith.constant 0 : index
      %12 = vector.load %arg7[%c0_9, %c0_10] : memref<256x128xf32, #tpu.memory_space<vmem>>, vector<256x128xf32>
      %c0_11 = arith.constant 0 : index
      %c0_12 = arith.constant 0 : index
      %13 = vector.load %arg5[%c0_11, %c0_12] : memref<1x128xf32, #tpu.memory_space<vmem>>, vector<1x128xf32>
      %14 = vector.broadcast %13 : vector<1x128xf32> to vector<256x128xf32>
      %15 = arith.addf %12, %14 : vector<256x128xf32>
      %cst_13 = arith.constant 0.000000e+00 : f32
      %16 = vector.broadcast %cst_13 : f32 to vector<256x128xf32>
      %17 = arith.maximumf %15, %16 : vector<256x128xf32>
      %c0_14 = arith.constant 0 : index
      %c0_15 = arith.constant 0 : index
      %18 = vector.load %arg6[%c0_14, %c0_15] : memref<256x128xf32, #tpu.memory_space<vmem>>, vector<256x128xf32>
      tpu.vector_store %arg6[%c0_14, %c0_15], %17 {strides = array<i32>} : memref<256x128xf32, #tpu.memory_space<vmem>>, vector<256x128xf32>,
    } else {
    }
    return
  }
  func.func @transform_0(%arg0: i32, %arg1: i32, %arg2: i32) -> (i32, i32) {
    %c0_i32 = arith.constant 0 : i32
    return %arg0, %arg2 : i32, i32
  }
  func.func @transform_1(%arg0: i32, %arg1: i32, %arg2: i32) -> (i32, i32) {
    %c0_i32 = arith.constant 0 : i32
    return %arg2, %arg1 : i32, i32
  }
  func.func @transform_2(%arg0: i32, %arg1: i32, %arg2: i32) -> (i32, i32) {
    %c0_i32 = arith.constant 0 : i32
    %c0_i32_0 = arith.constant 0 : i32
    return %c0_i32, %arg1 : i32, i32
  }
  func.func @transform_3(%arg0: i32, %arg1: i32, %arg2: i32) -> (i32, i32) {
    %c0_i32 = arith.constant 0 : i32
    return %arg0, %arg1 : i32, i32
  }
}

module attributes {stable_mosaic.version = 11 : i64} {
  func.func @_max4_kernel(%arg0: i32, %arg1: memref<16x1024xf32, #tpu.memory_space<vmem>>, %arg2: memref<16x1024xf32, #tpu.memory_space<vmem>>, %arg3: memref<16x1024xf32, #tpu.memory_space<vmem>>, %arg4: memref<16x1024xf32, #tpu.memory_space<vmem>>, %arg5: memref<16x1024xf32, #tpu.memory_space<vmem>>) attributes {dimension_semantics = [#tpu.dimension_semantics<parallel>], iteration_bounds = array<i64: 1>, scalar_prefetch = 0 : i64, scratch_operands = 0 : i64, tpu.core_type = #tpu.core_type<tc>, window_params = [{transform_indices = @transform_0, window_bounds = array<i64: 16, 1024>}, {transform_indices = @transform_1, window_bounds = array<i64: 16, 1024>}, {transform_indices = @transform_2, window_bounds = array<i64: 16, 1024>}, {transform_indices = @transform_3, window_bounds = array<i64: 16, 1024>}, {transform_indices = @transform_4, window_bounds = array<i64: 16, 1024>}]} {
    %c0 = arith.constant 0 : index
    %c0_0 = arith.constant 0 : index
    %0 = vector.load %arg1[%c0, %c0_0] : memref<16x1024xf32, #tpu.memory_space<vmem>>, vector<16x1024xf32>
    %c0_1 = arith.constant 0 : index
    %c0_2 = arith.constant 0 : index
    %1 = vector.load %arg2[%c0_1, %c0_2] : memref<16x1024xf32, #tpu.memory_space<vmem>>, vector<16x1024xf32>
    %2 = arith.maximumf %0, %1 : vector<16x1024xf32>
    %c0_3 = arith.constant 0 : index
    %c0_4 = arith.constant 0 : index
    %3 = vector.load %arg3[%c0_3, %c0_4] : memref<16x1024xf32, #tpu.memory_space<vmem>>, vector<16x1024xf32>
    %c0_5 = arith.constant 0 : index
    %c0_6 = arith.constant 0 : index
    %4 = vector.load %arg4[%c0_5, %c0_6] : memref<16x1024xf32, #tpu.memory_space<vmem>>, vector<16x1024xf32>
    %5 = arith.maximumf %3, %4 : vector<16x1024xf32>
    %6 = arith.maximumf %2, %5 : vector<16x1024xf32>
    %c0_7 = arith.constant 0 : index
    %c0_8 = arith.constant 0 : index
    %7 = vector.load %arg5[%c0_7, %c0_8] : memref<16x1024xf32, #tpu.memory_space<vmem>>, vector<16x1024xf32>
    tpu.vector_store %arg5[%c0_7, %c0_8], %6 {strides = array<i32>} : memref<16x1024xf32, #tpu.memory_space<vmem>>, vector<16x1024xf32>,
    return
  }
  func.func @transform_0(%arg0: i32) -> (i32, i32) {
    %c0_i32 = arith.constant 0 : i32
    %c0_i32_0 = arith.constant 0 : i32
    return %arg0, %c0_i32 : i32, i32
  }
  func.func @transform_1(%arg0: i32) -> (i32, i32) {
    %c0_i32 = arith.constant 0 : i32
    %c0_i32_0 = arith.constant 0 : i32
    return %arg0, %c0_i32 : i32, i32
  }
  func.func @transform_2(%arg0: i32) -> (i32, i32) {
    %c0_i32 = arith.constant 0 : i32
    %c0_i32_0 = arith.constant 0 : i32
    return %arg0, %c0_i32 : i32, i32
  }
  func.func @transform_3(%arg0: i32) -> (i32, i32) {
    %c0_i32 = arith.constant 0 : i32
    %c0_i32_0 = arith.constant 0 : i32
    return %arg0, %c0_i32 : i32, i32
  }
  func.func @transform_4(%arg0: i32) -> (i32, i32) {
    %c0_i32 = arith.constant 0 : i32
    %c0_i32_0 = arith.constant 0 : i32
    return %arg0, %c0_i32 : i32, i32
  }
}

module attributes {stable_mosaic.version = 11 : i64} {
  func.func @_matmul_bias_relu_kernel(%arg0: i32, %arg1: i32, %arg2: i32, %arg3: memref<128x256xf32, #tpu.memory_space<vmem>>, %arg4: memref<256x256xf32, #tpu.memory_space<vmem>>, %arg5: memref<1x256xf32, #tpu.memory_space<vmem>>, %arg6: memref<128x256xf32, #tpu.memory_space<vmem>>, %arg7: memref<128x256xf32, #tpu.memory_space<vmem>>) attributes {dimension_semantics = [#tpu.dimension_semantics<parallel>, #tpu.dimension_semantics<parallel>, #tpu.dimension_semantics<arbitrary>], iteration_bounds = array<i64: 1, 1, 5>, scalar_prefetch = 0 : i64, scratch_operands = 1 : i64, tpu.core_type = #tpu.core_type<tc>, window_params = [{transform_indices = @transform_0, window_bounds = array<i64: 128, 256>}, {transform_indices = @transform_1, window_bounds = array<i64: 256, 256>}, {transform_indices = @transform_2, window_bounds = array<i64: 1, 256>}, {transform_indices = @transform_3, window_bounds = array<i64: 128, 256>}]} {
    %c0_i32 = arith.constant 0 : i32
    %0 = arith.cmpi eq, %arg2, %c0_i32 : i32
    %1 = arith.extui %0 : i1 to i32
    %c0_i32_0 = arith.constant 0 : i32
    %2 = arith.cmpi ne, %1, %c0_i32_0 : i32
    scf.if %2 {
      %cst_9 = arith.constant 0.000000e+00 : f32
      %12 = vector.broadcast %cst_9 : f32 to vector<128x256xf32>
      %c0_10 = arith.constant 0 : index
      %c0_11 = arith.constant 0 : index
      %13 = vector.load %arg7[%c0_10, %c0_11] : memref<128x256xf32, #tpu.memory_space<vmem>>, vector<128x256xf32>
      tpu.vector_store %arg7[%c0_10, %c0_11], %12 {strides = array<i32>} : memref<128x256xf32, #tpu.memory_space<vmem>>, vector<128x256xf32>,
    } else {
    }
    %c0 = arith.constant 0 : index
    %c0_1 = arith.constant 0 : index
    %3 = vector.load %arg7[%c0, %c0_1] : memref<128x256xf32, #tpu.memory_space<vmem>>, vector<128x256xf32>
    %c0_2 = arith.constant 0 : index
    %c0_3 = arith.constant 0 : index
    %4 = vector.load %arg3[%c0_2, %c0_3] : memref<128x256xf32, #tpu.memory_space<vmem>>, vector<128x256xf32>
    %c0_4 = arith.constant 0 : index
    %c0_5 = arith.constant 0 : index
    %5 = vector.load %arg4[%c0_4, %c0_5] : memref<256x256xf32, #tpu.memory_space<vmem>>, vector<256x256xf32>
    %cst = arith.constant dense<0.000000e+00> : vector<128x256xf32>
    %6 = tpu.matmul %4, %5, %cst {dimension_numbers = #tpu.dot_dimension_numbers<[1], [0], [0], [1], [0, 0, 1, 1], [], []>} : vector<128x256xf32>, vector<256x256xf32>, vector<128x256xf32> -> vector<128x256xf32>
    %7 = arith.addf %3, %6 : vector<128x256xf32>
    %c0_6 = arith.constant 0 : index
    %c0_7 = arith.constant 0 : index
    %8 = vector.load %arg7[%c0_6, %c0_7] : memref<128x256xf32, #tpu.memory_space<vmem>>, vector<128x256xf32>
    tpu.vector_store %arg7[%c0_6, %c0_7], %7 {strides = array<i32>} : memref<128x256xf32, #tpu.memory_space<vmem>>, vector<128x256xf32>,
    %c4_i32 = arith.constant 4 : i32
    %9 = arith.cmpi eq, %arg2, %c4_i32 : i32
    %10 = arith.extui %9 : i1 to i32
    %c0_i32_8 = arith.constant 0 : i32
    %11 = arith.cmpi ne, %10, %c0_i32_8 : i32
    scf.if %11 {
      %c0_9 = arith.constant 0 : index
      %c0_10 = arith.constant 0 : index
      %12 = vector.load %arg7[%c0_9, %c0_10] : memref<128x256xf32, #tpu.memory_space<vmem>>, vector<128x256xf32>
      %c0_11 = arith.constant 0 : index
      %c0_12 = arith.constant 0 : index
      %13 = vector.load %arg5[%c0_11, %c0_12] : memref<1x256xf32, #tpu.memory_space<vmem>>, vector<1x256xf32>
      %14 = vector.broadcast %13 : vector<1x256xf32> to vector<128x256xf32>
      %15 = arith.addf %12, %14 : vector<128x256xf32>
      %cst_13 = arith.constant 0.000000e+00 : f32
      %16 = vector.broadcast %cst_13 : f32 to vector<128x256xf32>
      %17 = arith.maximumf %15, %16 : vector<128x256xf32>
      %c0_14 = arith.constant 0 : index
      %c0_15 = arith.constant 0 : index
      %18 = vector.load %arg6[%c0_14, %c0_15] : memref<128x256xf32, #tpu.memory_space<vmem>>, vector<128x256xf32>
      tpu.vector_store %arg6[%c0_14, %c0_15], %17 {strides = array<i32>} : memref<128x256xf32, #tpu.memory_space<vmem>>, vector<128x256xf32>,
    } else {
    }
    return
  }
  func.func @transform_0(%arg0: i32, %arg1: i32, %arg2: i32) -> (i32, i32) {
    %c0_i32 = arith.constant 0 : i32
    return %arg0, %arg2 : i32, i32
  }
  func.func @transform_1(%arg0: i32, %arg1: i32, %arg2: i32) -> (i32, i32) {
    %c0_i32 = arith.constant 0 : i32
    return %arg2, %arg1 : i32, i32
  }
  func.func @transform_2(%arg0: i32, %arg1: i32, %arg2: i32) -> (i32, i32) {
    %c0_i32 = arith.constant 0 : i32
    %c0_i32_0 = arith.constant 0 : i32
    return %c0_i32, %arg1 : i32, i32
  }
  func.func @transform_3(%arg0: i32, %arg1: i32, %arg2: i32) -> (i32, i32) {
    %c0_i32 = arith.constant 0 : i32
    return %arg0, %arg1 : i32, i32
  }
}

module attributes {stable_mosaic.version = 11 : i64} {
  func.func @_matmul_bias_relu_kernel(%arg0: i32, %arg1: i32, %arg2: i32, %arg3: memref<128x256xf32, #tpu.memory_space<vmem>>, %arg4: memref<256x256xf32, #tpu.memory_space<vmem>>, %arg5: memref<1x256xf32, #tpu.memory_space<vmem>>, %arg6: memref<128x256xf32, #tpu.memory_space<vmem>>, %arg7: memref<128x256xf32, #tpu.memory_space<vmem>>) attributes {dimension_semantics = [#tpu.dimension_semantics<parallel>, #tpu.dimension_semantics<parallel>, #tpu.dimension_semantics<arbitrary>], iteration_bounds = array<i64: 1, 1, 9>, scalar_prefetch = 0 : i64, scratch_operands = 1 : i64, tpu.core_type = #tpu.core_type<tc>, window_params = [{transform_indices = @transform_0, window_bounds = array<i64: 128, 256>}, {transform_indices = @transform_1, window_bounds = array<i64: 256, 256>}, {transform_indices = @transform_2, window_bounds = array<i64: 1, 256>}, {transform_indices = @transform_3, window_bounds = array<i64: 128, 256>}]} {
    %c0_i32 = arith.constant 0 : i32
    %0 = arith.cmpi eq, %arg2, %c0_i32 : i32
    %1 = arith.extui %0 : i1 to i32
    %c0_i32_0 = arith.constant 0 : i32
    %2 = arith.cmpi ne, %1, %c0_i32_0 : i32
    scf.if %2 {
      %cst_9 = arith.constant 0.000000e+00 : f32
      %12 = vector.broadcast %cst_9 : f32 to vector<128x256xf32>
      %c0_10 = arith.constant 0 : index
      %c0_11 = arith.constant 0 : index
      %13 = vector.load %arg7[%c0_10, %c0_11] : memref<128x256xf32, #tpu.memory_space<vmem>>, vector<128x256xf32>
      tpu.vector_store %arg7[%c0_10, %c0_11], %12 {strides = array<i32>} : memref<128x256xf32, #tpu.memory_space<vmem>>, vector<128x256xf32>,
    } else {
    }
    %c0 = arith.constant 0 : index
    %c0_1 = arith.constant 0 : index
    %3 = vector.load %arg7[%c0, %c0_1] : memref<128x256xf32, #tpu.memory_space<vmem>>, vector<128x256xf32>
    %c0_2 = arith.constant 0 : index
    %c0_3 = arith.constant 0 : index
    %4 = vector.load %arg3[%c0_2, %c0_3] : memref<128x256xf32, #tpu.memory_space<vmem>>, vector<128x256xf32>
    %c0_4 = arith.constant 0 : index
    %c0_5 = arith.constant 0 : index
    %5 = vector.load %arg4[%c0_4, %c0_5] : memref<256x256xf32, #tpu.memory_space<vmem>>, vector<256x256xf32>
    %cst = arith.constant dense<0.000000e+00> : vector<128x256xf32>
    %6 = tpu.matmul %4, %5, %cst {dimension_numbers = #tpu.dot_dimension_numbers<[1], [0], [0], [1], [0, 0, 1, 1], [], []>} : vector<128x256xf32>, vector<256x256xf32>, vector<128x256xf32> -> vector<128x256xf32>
    %7 = arith.addf %3, %6 : vector<128x256xf32>
    %c0_6 = arith.constant 0 : index
    %c0_7 = arith.constant 0 : index
    %8 = vector.load %arg7[%c0_6, %c0_7] : memref<128x256xf32, #tpu.memory_space<vmem>>, vector<128x256xf32>
    tpu.vector_store %arg7[%c0_6, %c0_7], %7 {strides = array<i32>} : memref<128x256xf32, #tpu.memory_space<vmem>>, vector<128x256xf32>,
    %c8_i32 = arith.constant 8 : i32
    %9 = arith.cmpi eq, %arg2, %c8_i32 : i32
    %10 = arith.extui %9 : i1 to i32
    %c0_i32_8 = arith.constant 0 : i32
    %11 = arith.cmpi ne, %10, %c0_i32_8 : i32
    scf.if %11 {
      %c0_9 = arith.constant 0 : index
      %c0_10 = arith.constant 0 : index
      %12 = vector.load %arg7[%c0_9, %c0_10] : memref<128x256xf32, #tpu.memory_space<vmem>>, vector<128x256xf32>
      %c0_11 = arith.constant 0 : index
      %c0_12 = arith.constant 0 : index
      %13 = vector.load %arg5[%c0_11, %c0_12] : memref<1x256xf32, #tpu.memory_space<vmem>>, vector<1x256xf32>
      %14 = vector.broadcast %13 : vector<1x256xf32> to vector<128x256xf32>
      %15 = arith.addf %12, %14 : vector<128x256xf32>
      %cst_13 = arith.constant 0.000000e+00 : f32
      %16 = vector.broadcast %cst_13 : f32 to vector<128x256xf32>
      %17 = arith.maximumf %15, %16 : vector<128x256xf32>
      %c0_14 = arith.constant 0 : index
      %c0_15 = arith.constant 0 : index
      %18 = vector.load %arg6[%c0_14, %c0_15] : memref<128x256xf32, #tpu.memory_space<vmem>>, vector<128x256xf32>
      tpu.vector_store %arg6[%c0_14, %c0_15], %17 {strides = array<i32>} : memref<128x256xf32, #tpu.memory_space<vmem>>, vector<128x256xf32>,
    } else {
    }
    return
  }
  func.func @transform_0(%arg0: i32, %arg1: i32, %arg2: i32) -> (i32, i32) {
    %c0_i32 = arith.constant 0 : i32
    return %arg0, %arg2 : i32, i32
  }
  func.func @transform_1(%arg0: i32, %arg1: i32, %arg2: i32) -> (i32, i32) {
    %c0_i32 = arith.constant 0 : i32
    return %arg2, %arg1 : i32, i32
  }
  func.func @transform_2(%arg0: i32, %arg1: i32, %arg2: i32) -> (i32, i32) {
    %c0_i32 = arith.constant 0 : i32
    %c0_i32_0 = arith.constant 0 : i32
    return %c0_i32, %arg1 : i32, i32
  }
  func.func @transform_3(%arg0: i32, %arg1: i32, %arg2: i32) -> (i32, i32) {
    %c0_i32 = arith.constant 0 : i32
    return %arg0, %arg1 : i32, i32
  }
}

module attributes {stable_mosaic.version = 11 : i64} {
  func.func @_max4_kernel(%arg0: i32, %arg1: memref<8x1024xf32, #tpu.memory_space<vmem>>, %arg2: memref<8x1024xf32, #tpu.memory_space<vmem>>, %arg3: memref<8x1024xf32, #tpu.memory_space<vmem>>, %arg4: memref<8x1024xf32, #tpu.memory_space<vmem>>, %arg5: memref<8x1024xf32, #tpu.memory_space<vmem>>) attributes {dimension_semantics = [#tpu.dimension_semantics<parallel>], iteration_bounds = array<i64: 1>, scalar_prefetch = 0 : i64, scratch_operands = 0 : i64, tpu.core_type = #tpu.core_type<tc>, window_params = [{transform_indices = @transform_0, window_bounds = array<i64: 8, 1024>}, {transform_indices = @transform_1, window_bounds = array<i64: 8, 1024>}, {transform_indices = @transform_2, window_bounds = array<i64: 8, 1024>}, {transform_indices = @transform_3, window_bounds = array<i64: 8, 1024>}, {transform_indices = @transform_4, window_bounds = array<i64: 8, 1024>}]} {
    %c0 = arith.constant 0 : index
    %c0_0 = arith.constant 0 : index
    %0 = vector.load %arg1[%c0, %c0_0] : memref<8x1024xf32, #tpu.memory_space<vmem>>, vector<8x1024xf32>
    %c0_1 = arith.constant 0 : index
    %c0_2 = arith.constant 0 : index
    %1 = vector.load %arg2[%c0_1, %c0_2] : memref<8x1024xf32, #tpu.memory_space<vmem>>, vector<8x1024xf32>
    %2 = arith.maximumf %0, %1 : vector<8x1024xf32>
    %c0_3 = arith.constant 0 : index
    %c0_4 = arith.constant 0 : index
    %3 = vector.load %arg3[%c0_3, %c0_4] : memref<8x1024xf32, #tpu.memory_space<vmem>>, vector<8x1024xf32>
    %c0_5 = arith.constant 0 : index
    %c0_6 = arith.constant 0 : index
    %4 = vector.load %arg4[%c0_5, %c0_6] : memref<8x1024xf32, #tpu.memory_space<vmem>>, vector<8x1024xf32>
    %5 = arith.maximumf %3, %4 : vector<8x1024xf32>
    %6 = arith.maximumf %2, %5 : vector<8x1024xf32>
    %c0_7 = arith.constant 0 : index
    %c0_8 = arith.constant 0 : index
    %7 = vector.load %arg5[%c0_7, %c0_8] : memref<8x1024xf32, #tpu.memory_space<vmem>>, vector<8x1024xf32>
    tpu.vector_store %arg5[%c0_7, %c0_8], %6 {strides = array<i32>} : memref<8x1024xf32, #tpu.memory_space<vmem>>, vector<8x1024xf32>,
    return
  }
  func.func @transform_0(%arg0: i32) -> (i32, i32) {
    %c0_i32 = arith.constant 0 : i32
    %c0_i32_0 = arith.constant 0 : i32
    return %arg0, %c0_i32 : i32, i32
  }
  func.func @transform_1(%arg0: i32) -> (i32, i32) {
    %c0_i32 = arith.constant 0 : i32
    %c0_i32_0 = arith.constant 0 : i32
    return %arg0, %c0_i32 : i32, i32
  }
  func.func @transform_2(%arg0: i32) -> (i32, i32) {
    %c0_i32 = arith.constant 0 : i32
    %c0_i32_0 = arith.constant 0 : i32
    return %arg0, %c0_i32 : i32, i32
  }
  func.func @transform_3(%arg0: i32) -> (i32, i32) {
    %c0_i32 = arith.constant 0 : i32
    %c0_i32_0 = arith.constant 0 : i32
    return %arg0, %c0_i32 : i32, i32
  }
  func.func @transform_4(%arg0: i32) -> (i32, i32) {
    %c0_i32 = arith.constant 0 : i32
    %c0_i32_0 = arith.constant 0 : i32
    return %arg0, %c0_i32 : i32, i32
  }
}

module attributes {stable_mosaic.version = 11 : i64} {
  func.func @_matmul_bias_relu_kernel(%arg0: i32, %arg1: i32, %arg2: i32, %arg3: memref<128x256xf32, #tpu.memory_space<vmem>>, %arg4: memref<256x256xf32, #tpu.memory_space<vmem>>, %arg5: memref<1x256xf32, #tpu.memory_space<vmem>>, %arg6: memref<128x256xf32, #tpu.memory_space<vmem>>, %arg7: memref<128x256xf32, #tpu.memory_space<vmem>>) attributes {dimension_semantics = [#tpu.dimension_semantics<parallel>, #tpu.dimension_semantics<parallel>, #tpu.dimension_semantics<arbitrary>], iteration_bounds = array<i64: 1, 2, 9>, scalar_prefetch = 0 : i64, scratch_operands = 1 : i64, tpu.core_type = #tpu.core_type<tc>, window_params = [{transform_indices = @transform_0, window_bounds = array<i64: 128, 256>}, {transform_indices = @transform_1, window_bounds = array<i64: 256, 256>}, {transform_indices = @transform_2, window_bounds = array<i64: 1, 256>}, {transform_indices = @transform_3, window_bounds = array<i64: 128, 256>}]} {
    %c0_i32 = arith.constant 0 : i32
    %0 = arith.cmpi eq, %arg2, %c0_i32 : i32
    %1 = arith.extui %0 : i1 to i32
    %c0_i32_0 = arith.constant 0 : i32
    %2 = arith.cmpi ne, %1, %c0_i32_0 : i32
    scf.if %2 {
      %cst_9 = arith.constant 0.000000e+00 : f32
      %12 = vector.broadcast %cst_9 : f32 to vector<128x256xf32>
      %c0_10 = arith.constant 0 : index
      %c0_11 = arith.constant 0 : index
      %13 = vector.load %arg7[%c0_10, %c0_11] : memref<128x256xf32, #tpu.memory_space<vmem>>, vector<128x256xf32>
      tpu.vector_store %arg7[%c0_10, %c0_11], %12 {strides = array<i32>} : memref<128x256xf32, #tpu.memory_space<vmem>>, vector<128x256xf32>,
    } else {
    }
    %c0 = arith.constant 0 : index
    %c0_1 = arith.constant 0 : index
    %3 = vector.load %arg7[%c0, %c0_1] : memref<128x256xf32, #tpu.memory_space<vmem>>, vector<128x256xf32>
    %c0_2 = arith.constant 0 : index
    %c0_3 = arith.constant 0 : index
    %4 = vector.load %arg3[%c0_2, %c0_3] : memref<128x256xf32, #tpu.memory_space<vmem>>, vector<128x256xf32>
    %c0_4 = arith.constant 0 : index
    %c0_5 = arith.constant 0 : index
    %5 = vector.load %arg4[%c0_4, %c0_5] : memref<256x256xf32, #tpu.memory_space<vmem>>, vector<256x256xf32>
    %cst = arith.constant dense<0.000000e+00> : vector<128x256xf32>
    %6 = tpu.matmul %4, %5, %cst {dimension_numbers = #tpu.dot_dimension_numbers<[1], [0], [0], [1], [0, 0, 1, 1], [], []>} : vector<128x256xf32>, vector<256x256xf32>, vector<128x256xf32> -> vector<128x256xf32>
    %7 = arith.addf %3, %6 : vector<128x256xf32>
    %c0_6 = arith.constant 0 : index
    %c0_7 = arith.constant 0 : index
    %8 = vector.load %arg7[%c0_6, %c0_7] : memref<128x256xf32, #tpu.memory_space<vmem>>, vector<128x256xf32>
    tpu.vector_store %arg7[%c0_6, %c0_7], %7 {strides = array<i32>} : memref<128x256xf32, #tpu.memory_space<vmem>>, vector<128x256xf32>,
    %c8_i32 = arith.constant 8 : i32
    %9 = arith.cmpi eq, %arg2, %c8_i32 : i32
    %10 = arith.extui %9 : i1 to i32
    %c0_i32_8 = arith.constant 0 : i32
    %11 = arith.cmpi ne, %10, %c0_i32_8 : i32
    scf.if %11 {
      %c0_9 = arith.constant 0 : index
      %c0_10 = arith.constant 0 : index
      %12 = vector.load %arg7[%c0_9, %c0_10] : memref<128x256xf32, #tpu.memory_space<vmem>>, vector<128x256xf32>
      %c0_11 = arith.constant 0 : index
      %c0_12 = arith.constant 0 : index
      %13 = vector.load %arg5[%c0_11, %c0_12] : memref<1x256xf32, #tpu.memory_space<vmem>>, vector<1x256xf32>
      %14 = vector.broadcast %13 : vector<1x256xf32> to vector<128x256xf32>
      %15 = arith.addf %12, %14 : vector<128x256xf32>
      %cst_13 = arith.constant 0.000000e+00 : f32
      %16 = vector.broadcast %cst_13 : f32 to vector<128x256xf32>
      %17 = arith.maximumf %15, %16 : vector<128x256xf32>
      %c0_14 = arith.constant 0 : index
      %c0_15 = arith.constant 0 : index
      %18 = vector.load %arg6[%c0_14, %c0_15] : memref<128x256xf32, #tpu.memory_space<vmem>>, vector<128x256xf32>
      tpu.vector_store %arg6[%c0_14, %c0_15], %17 {strides = array<i32>} : memref<128x256xf32, #tpu.memory_space<vmem>>, vector<128x256xf32>,
    } else {
    }
    return
  }
  func.func @transform_0(%arg0: i32, %arg1: i32, %arg2: i32) -> (i32, i32) {
    %c0_i32 = arith.constant 0 : i32
    return %arg0, %arg2 : i32, i32
  }
  func.func @transform_1(%arg0: i32, %arg1: i32, %arg2: i32) -> (i32, i32) {
    %c0_i32 = arith.constant 0 : i32
    return %arg2, %arg1 : i32, i32
  }
  func.func @transform_2(%arg0: i32, %arg1: i32, %arg2: i32) -> (i32, i32) {
    %c0_i32 = arith.constant 0 : i32
    %c0_i32_0 = arith.constant 0 : i32
    return %c0_i32, %arg1 : i32, i32
  }
  func.func @transform_3(%arg0: i32, %arg1: i32, %arg2: i32) -> (i32, i32) {
    %c0_i32 = arith.constant 0 : i32
    return %arg0, %arg1 : i32, i32
  }
}

module attributes {stable_mosaic.version = 11 : i64} {
  func.func @_matmul_bias_relu_kernel(%arg0: i32, %arg1: i32, %arg2: i32, %arg3: memref<128x256xf32, #tpu.memory_space<vmem>>, %arg4: memref<256x256xf32, #tpu.memory_space<vmem>>, %arg5: memref<1x256xf32, #tpu.memory_space<vmem>>, %arg6: memref<128x256xf32, #tpu.memory_space<vmem>>, %arg7: memref<128x256xf32, #tpu.memory_space<vmem>>) attributes {dimension_semantics = [#tpu.dimension_semantics<parallel>, #tpu.dimension_semantics<parallel>, #tpu.dimension_semantics<arbitrary>], iteration_bounds = array<i64: 1, 2, 18>, scalar_prefetch = 0 : i64, scratch_operands = 1 : i64, tpu.core_type = #tpu.core_type<tc>, window_params = [{transform_indices = @transform_0, window_bounds = array<i64: 128, 256>}, {transform_indices = @transform_1, window_bounds = array<i64: 256, 256>}, {transform_indices = @transform_2, window_bounds = array<i64: 1, 256>}, {transform_indices = @transform_3, window_bounds = array<i64: 128, 256>}]} {
    %c0_i32 = arith.constant 0 : i32
    %0 = arith.cmpi eq, %arg2, %c0_i32 : i32
    %1 = arith.extui %0 : i1 to i32
    %c0_i32_0 = arith.constant 0 : i32
    %2 = arith.cmpi ne, %1, %c0_i32_0 : i32
    scf.if %2 {
      %cst_9 = arith.constant 0.000000e+00 : f32
      %12 = vector.broadcast %cst_9 : f32 to vector<128x256xf32>
      %c0_10 = arith.constant 0 : index
      %c0_11 = arith.constant 0 : index
      %13 = vector.load %arg7[%c0_10, %c0_11] : memref<128x256xf32, #tpu.memory_space<vmem>>, vector<128x256xf32>
      tpu.vector_store %arg7[%c0_10, %c0_11], %12 {strides = array<i32>} : memref<128x256xf32, #tpu.memory_space<vmem>>, vector<128x256xf32>,
    } else {
    }
    %c0 = arith.constant 0 : index
    %c0_1 = arith.constant 0 : index
    %3 = vector.load %arg7[%c0, %c0_1] : memref<128x256xf32, #tpu.memory_space<vmem>>, vector<128x256xf32>
    %c0_2 = arith.constant 0 : index
    %c0_3 = arith.constant 0 : index
    %4 = vector.load %arg3[%c0_2, %c0_3] : memref<128x256xf32, #tpu.memory_space<vmem>>, vector<128x256xf32>
    %c0_4 = arith.constant 0 : index
    %c0_5 = arith.constant 0 : index
    %5 = vector.load %arg4[%c0_4, %c0_5] : memref<256x256xf32, #tpu.memory_space<vmem>>, vector<256x256xf32>
    %cst = arith.constant dense<0.000000e+00> : vector<128x256xf32>
    %6 = tpu.matmul %4, %5, %cst {dimension_numbers = #tpu.dot_dimension_numbers<[1], [0], [0], [1], [0, 0, 1, 1], [], []>} : vector<128x256xf32>, vector<256x256xf32>, vector<128x256xf32> -> vector<128x256xf32>
    %7 = arith.addf %3, %6 : vector<128x256xf32>
    %c0_6 = arith.constant 0 : index
    %c0_7 = arith.constant 0 : index
    %8 = vector.load %arg7[%c0_6, %c0_7] : memref<128x256xf32, #tpu.memory_space<vmem>>, vector<128x256xf32>
    tpu.vector_store %arg7[%c0_6, %c0_7], %7 {strides = array<i32>} : memref<128x256xf32, #tpu.memory_space<vmem>>, vector<128x256xf32>,
    %c17_i32 = arith.constant 17 : i32
    %9 = arith.cmpi eq, %arg2, %c17_i32 : i32
    %10 = arith.extui %9 : i1 to i32
    %c0_i32_8 = arith.constant 0 : i32
    %11 = arith.cmpi ne, %10, %c0_i32_8 : i32
    scf.if %11 {
      %c0_9 = arith.constant 0 : index
      %c0_10 = arith.constant 0 : index
      %12 = vector.load %arg7[%c0_9, %c0_10] : memref<128x256xf32, #tpu.memory_space<vmem>>, vector<128x256xf32>
      %c0_11 = arith.constant 0 : index
      %c0_12 = arith.constant 0 : index
      %13 = vector.load %arg5[%c0_11, %c0_12] : memref<1x256xf32, #tpu.memory_space<vmem>>, vector<1x256xf32>
      %14 = vector.broadcast %13 : vector<1x256xf32> to vector<128x256xf32>
      %15 = arith.addf %12, %14 : vector<128x256xf32>
      %cst_13 = arith.constant 0.000000e+00 : f32
      %16 = vector.broadcast %cst_13 : f32 to vector<128x256xf32>
      %17 = arith.maximumf %15, %16 : vector<128x256xf32>
      %c0_14 = arith.constant 0 : index
      %c0_15 = arith.constant 0 : index
      %18 = vector.load %arg6[%c0_14, %c0_15] : memref<128x256xf32, #tpu.memory_space<vmem>>, vector<128x256xf32>
      tpu.vector_store %arg6[%c0_14, %c0_15], %17 {strides = array<i32>} : memref<128x256xf32, #tpu.memory_space<vmem>>, vector<128x256xf32>,
    } else {
    }
    return
  }
  func.func @transform_0(%arg0: i32, %arg1: i32, %arg2: i32) -> (i32, i32) {
    %c0_i32 = arith.constant 0 : i32
    return %arg0, %arg2 : i32, i32
  }
  func.func @transform_1(%arg0: i32, %arg1: i32, %arg2: i32) -> (i32, i32) {
    %c0_i32 = arith.constant 0 : i32
    return %arg2, %arg1 : i32, i32
  }
  func.func @transform_2(%arg0: i32, %arg1: i32, %arg2: i32) -> (i32, i32) {
    %c0_i32 = arith.constant 0 : i32
    %c0_i32_0 = arith.constant 0 : i32
    return %c0_i32, %arg1 : i32, i32
  }
  func.func @transform_3(%arg0: i32, %arg1: i32, %arg2: i32) -> (i32, i32) {
    %c0_i32 = arith.constant 0 : i32
    return %arg0, %arg1 : i32, i32
  }
}

module attributes {stable_mosaic.version = 11 : i64} {
  func.func @_max4_kernel(%arg0: i32, %arg1: memref<4x1024xf32, #tpu.memory_space<vmem>>, %arg2: memref<4x1024xf32, #tpu.memory_space<vmem>>, %arg3: memref<4x1024xf32, #tpu.memory_space<vmem>>, %arg4: memref<4x1024xf32, #tpu.memory_space<vmem>>, %arg5: memref<4x1024xf32, #tpu.memory_space<vmem>>) attributes {dimension_semantics = [#tpu.dimension_semantics<parallel>], iteration_bounds = array<i64: 1>, scalar_prefetch = 0 : i64, scratch_operands = 0 : i64, tpu.core_type = #tpu.core_type<tc>, window_params = [{transform_indices = @transform_0, window_bounds = array<i64: 4, 1024>}, {transform_indices = @transform_1, window_bounds = array<i64: 4, 1024>}, {transform_indices = @transform_2, window_bounds = array<i64: 4, 1024>}, {transform_indices = @transform_3, window_bounds = array<i64: 4, 1024>}, {transform_indices = @transform_4, window_bounds = array<i64: 4, 1024>}]} {
    %c0 = arith.constant 0 : index
    %c0_0 = arith.constant 0 : index
    %0 = vector.load %arg1[%c0, %c0_0] : memref<4x1024xf32, #tpu.memory_space<vmem>>, vector<4x1024xf32>
    %c0_1 = arith.constant 0 : index
    %c0_2 = arith.constant 0 : index
    %1 = vector.load %arg2[%c0_1, %c0_2] : memref<4x1024xf32, #tpu.memory_space<vmem>>, vector<4x1024xf32>
    %2 = arith.maximumf %0, %1 : vector<4x1024xf32>
    %c0_3 = arith.constant 0 : index
    %c0_4 = arith.constant 0 : index
    %3 = vector.load %arg3[%c0_3, %c0_4] : memref<4x1024xf32, #tpu.memory_space<vmem>>, vector<4x1024xf32>
    %c0_5 = arith.constant 0 : index
    %c0_6 = arith.constant 0 : index
    %4 = vector.load %arg4[%c0_5, %c0_6] : memref<4x1024xf32, #tpu.memory_space<vmem>>, vector<4x1024xf32>
    %5 = arith.maximumf %3, %4 : vector<4x1024xf32>
    %6 = arith.maximumf %2, %5 : vector<4x1024xf32>
    %c0_7 = arith.constant 0 : index
    %c0_8 = arith.constant 0 : index
    %7 = vector.load %arg5[%c0_7, %c0_8] : memref<4x1024xf32, #tpu.memory_space<vmem>>, vector<4x1024xf32>
    tpu.vector_store %arg5[%c0_7, %c0_8], %6 {strides = array<i32>} : memref<4x1024xf32, #tpu.memory_space<vmem>>, vector<4x1024xf32>,
    return
  }
  func.func @transform_0(%arg0: i32) -> (i32, i32) {
    %c0_i32 = arith.constant 0 : i32
    %c0_i32_0 = arith.constant 0 : i32
    return %arg0, %c0_i32 : i32, i32
  }
  func.func @transform_1(%arg0: i32) -> (i32, i32) {
    %c0_i32 = arith.constant 0 : i32
    %c0_i32_0 = arith.constant 0 : i32
    return %arg0, %c0_i32 : i32, i32
  }
  func.func @transform_2(%arg0: i32) -> (i32, i32) {
    %c0_i32 = arith.constant 0 : i32
    %c0_i32_0 = arith.constant 0 : i32
    return %arg0, %c0_i32 : i32, i32
  }
  func.func @transform_3(%arg0: i32) -> (i32, i32) {
    %c0_i32 = arith.constant 0 : i32
    %c0_i32_0 = arith.constant 0 : i32
    return %arg0, %c0_i32 : i32, i32
  }
  func.func @transform_4(%arg0: i32) -> (i32, i32) {
    %c0_i32 = arith.constant 0 : i32
    %c0_i32_0 = arith.constant 0 : i32
    return %arg0, %c0_i32 : i32, i32
  }
}

</mosaic_0001>

<bundles_post_ra>
// kernel: tile.0
= control target key start
LH: loop header
LB: loop body
LE: loop exit
PB: predicated region body
PF: predicated region fallthrough
CT: control target
= control target key end

     0   :  { %vm7_vm0 = vcmask 7168   ;;  %s26_s10 = smov 126   ;;  %s49_s0 = inlined_call_operand.vmem [shape: f32[2,3], index: 0, kind: input, shape index: {}]   ;;  %s50_s1 = inlined_call_operand.vmem [shape: f32[6,1], index: 1, kind: output, shape index: {}]  }
   0x1   :  { %v4_v0 = vld [vmem:[%s49_s0] sm:$0x3]  ;;  %s25_s0 = smov 127  }
   0x2   :  { %5 = vst [vmem:[#allocation0] sm:$0x3] %v4_v0 }
   0x9   :  { %v9_v1 = vld [vmem:[#allocation0] sm:$0x3]  }
   0xa   :  { %v6_v2 = vld [vmem:[#allocation0] sm:$0x3]   ;;  %10 = vrot.lane.b32.xlu0 %v9_v1, %s25_s0 }
   0xb   :  { %8 = vst.msk [vmem:[%s50_s1] ss:$3 sm:$0x3] %vm7_vm0, %v6_v2   ;;  %v15_v3 = vld [vmem:[#allocation0] sm:$0x3]  }
   0xe   :  { %16 = vrot.lane.b32.xlu0 %v15_v3, %s26_s10 }
  0x7c   :  { %v11_v4 = vpop.permute.xlu0 %10  }
  0x7d   :  { %21 = vst.msk [vmem:[%s50_s1 + $0x1] ss:$3 sm:$0x3] %vm7_vm0, %v11_v4  }
  0x80   :  { %v17_v5 = vpop.permute.xlu0 %16  }
  0x81   :  { %22 = vst.msk [vmem:[%s50_s1 + $0x2] ss:$3 sm:$0x3] %vm7_vm0, %v17_v5  }

// kernel: tile.10
= control target key start
LH: loop header
LB: loop body
LE: loop exit
PB: predicated region body
PF: predicated region fallthrough
CT: control target
= control target key end

     0   :  { %2 = vsyncpa [#allocation1], 0  ;;  %s44_s6 = smov [#allocation0]   ;;  %s70_s0 = inlined_call_operand.hbm [shape: f32[3], index: 0, kind: input, shape index: {}]   ;;  %s71_s1 = inlined_call_operand.vmem [shape: f32[2,3], index: 1, kind: output, shape index: {}]  }
   0x1   :  { %s9_s7 = sshll.u32 %s44_s6, 4  ;;  %s20_s10 = scalar_lea.hbm %s70_s0, 16  ;;  %s10_s7 = int_to_ptr.vmem [resolvable:$true] %s9_s7 }
   0x2   :  { %p21_p0 = scmp.ne.s32.totalorder %s70_s0, %s20_s10  ;;  %p24_p1 = scmp.lt.u32.totalorder %s20_s10, %s70_s0 }
   0x4   :  { %p26_p2 = pnand %p24_p1, %p21_p0 }
   0x6   :  { %29 = shalt.err (!%p26_p2)
}
   0x7   :  { %s30_s15 = scalar_lea.vmem %s10_s7, 16  ;;  %s34_s16 = scalar_lea.vmem %s10_s7, 32 }
   0x8   :  { %p31_p3 = scmp.ne.s32.totalorder %s10_s7, %s30_s15  ;;  %p35_p4 = scmp.lt.s32.totalorder %s10_s7, %s10_s7 }
   0x9   :  { %p36_p5 = scmp.lt.s32.totalorder %s34_s16, %s30_s15 }
   0xb   :  { %p37_p6 = por %p36_p5, %p35_p4 }
   0xd   :  { %p38_p7 = pnand %p37_p6, %p31_p3 }
   0xf   :  { %41 = shalt.err (!%p38_p7)
}
  0x10   :  { %12 = dma.hbm_to_vmem [thread:$0]  %s70_s0, 16, %s10_s7, [#allocation1]  }
  0x11   :  { %42 = dma.done.wait [#allocation1], 16  }
  0x12   :  { %43 = vsyncadd [#allocation1], 4294967280  ;;  %v16_v0 = vld [vmem:[#allocation0] ss:$0 sm:$0xff] }
  0x13   :  { %17 = vst [vmem:[%s71_s1] sm:$0x3] %v16_v0 }
  0x14   :  { %18 = vsyncpa [#allocation1], 1 }

// kernel: _pallas_forward.21
= control target key start
LH: loop header
LB: loop body
LE: loop exit
PB: predicated region body
PF: predicated region fallthrough
CT: control target
= control target key end

     0   :  { %v83_v0 = vmov 0   ;;  %s158_s2 = inlined_call_operand.vmem [shape: f32[6,1], index: 2, kind: input, shape index: {}]   ;;  %s159_s1 = inlined_call_operand.vmem [shape: f32[6,1], index: 1, kind: input, shape index: {}]   ;;  %s160_s0 = inlined_call_operand.vmem [shape: f32[6,1024], index: 0, kind: input, shape index: {}]   ;;  %s161_s3 = inlined_call_operand.vmem [shape: f32[6,1024], index: 3, kind: output, shape index: {}]  }
   0x1   :  { %80 = vset.pattern.permute.xlu0 %v83_v0  ;;  %v52_v1 = vld [vmem:[%s158_s2] sm:$0x3f]  ;;  %v15_v4 = vld [vmem:[%s160_s0 + $0x8] sm:$0x3f]  ;;  %v16_v5 = vld [vmem:[%s160_s0 + $0x10] sm:$0x3f] }
   0x2   :  { %55 = vperm.xlu0 %80, %v52_v1   ;;  %v38_v2 = vld [vmem:[%s159_s1] sm:$0x3f]  ;;  %v17_v6 = vld [vmem:[%s160_s0 + $0x18] sm:$0x3f]  ;;  %v19_v9 = vld [vmem:[%s160_s0 + $0x28] sm:$0x3f] }
   0x3   :  { %v14_v3 = vld [vmem:[%s160_s0] sm:$0x3f]  ;;  %v20_v10 = vld [vmem:[%s160_s0 + $0x30] sm:$0x3f]  ;;  %v21_v11 = vld [vmem:[%s160_s0 + $0x38] sm:$0x3f] }
   0x4   :  { %v18_v7 = vld [vmem:[%s160_s0 + $0x20] sm:$0x3f]  ;;  %v22_v12 = vadd.f32 1.0, %v14_v3  ;;  %v23_v13 = vadd.f32 1.0, %v15_v4  ;;  %v24_v14 = vadd.f32 1.0, %v16_v5  ;;  %v25_v15 = vadd.f32 1.0, %v17_v6 }
   0x5   :  { %v26_v16 = vadd.f32 1.0, %v18_v7  ;;  %v27_v17 = vadd.f32 1.0, %v19_v9  ;;  %v28_v18 = vadd.f32 1.0, %v20_v10  ;;  %v29_v19 = vadd.f32 1.0, %v21_v11 }
   0x6   :  { %41 = vperm.xlu0 %80, %v38_v2   ;;  %v30_v20 = vmul.f32 0.5, %v22_v12  ;;  %v31_v21 = vmul.f32 0.5, %v23_v13  ;;  %v32_v22 = vmul.f32 0.5, %v24_v14  ;;  %v33_v23 = vmul.f32 0.5, %v25_v15 }
   0x7   :  { %v34_v25 = vmul.f32 0.5, %v26_v16  ;;  %v35_v26 = vmul.f32 0.5, %v27_v17  ;;  %v36_v27 = vmul.f32 0.5, %v28_v18  ;;  %v37_v28 = vmul.f32 0.5, %v29_v19 }
  0x81   :  { %v56_v8 = vpop.permute.xlu0 %55 }
  0x82   :  { %81 = vrcp.f32 %v56_v8 }
  0x85   :  { %v42_v24 = vpop.permute.xlu0 %41 }
  0x86   :  { %v44_v29 = vsub.f32 %v30_v20, %v42_v24  ;;  %v45_v30 = vsub.f32 %v31_v21, %v42_v24  ;;  %v46_v31 = vsub.f32 %v32_v22, %v42_v24  ;;  %v47_v32 = vsub.f32 %v33_v23, %v42_v24 }
  0x87   :  { %v48_v34 = vsub.f32 %v34_v25, %v42_v24  ;;  %v49_v35 = vsub.f32 %v35_v26, %v42_v24  ;;  %v50_v36 = vsub.f32 %v36_v27, %v42_v24  ;;  %v51_v37 = vsub.f32 %v37_v28, %v42_v24 }
  0x8c   :  { %v82_v33 = vpop.eup %81 }
  0x8d   :  { %v59_v38 = vmul.f32 %v82_v33, %v44_v29  ;;  %v60_v39 = vmul.f32 %v82_v33, %v45_v30  ;;  %v61_v40 = vmul.f32 %v82_v33, %v46_v31  ;;  %v62_v41 = vmul.f32 %v82_v33, %v47_v32 }
  0x8e   :  { %v63_v42 = vmul.f32 %v82_v33, %v48_v34  ;;  %v64_v43 = vmul.f32 %v82_v33, %v49_v35  ;;  %v65_v44 = vmul.f32 %v82_v33, %v50_v36  ;;  %v66_v45 = vmul.f32 %v82_v33, %v51_v37 }
  0x8f   :  { %67 = vst [vmem:[%s161_s3] sm:$0x3f] %v59_v38  ;;  %68 = vst [vmem:[%s161_s3 + $0x8] sm:$0x3f] %v60_v39 }
  0x90   :  { %69 = vst [vmem:[%s161_s3 + $0x10] sm:$0x3f] %v61_v40  ;;  %70 = vst [vmem:[%s161_s3 + $0x18] sm:$0x3f] %v62_v41 }
  0x91   :  { %71 = vst [vmem:[%s161_s3 + $0x20] sm:$0x3f] %v63_v42  ;;  %72 = vst [vmem:[%s161_s3 + $0x28] sm:$0x3f] %v64_v43 }
  0x92   :  { %73 = vst [vmem:[%s161_s3 + $0x30] sm:$0x3f] %v65_v44  ;;  %74 = vst [vmem:[%s161_s3 + $0x38] sm:$0x3f] %v66_v45 }

// kernel: _pallas_forward.22
= control target key start
LH: loop header
LB: loop body
LE: loop exit
PB: predicated region body
PF: predicated region fallthrough
CT: control target
= control target key end

     0   :  { %s1171_s12 = smov 0   ;;  %s1173_s13 = smov 0   ;;  %s1364_s0 = inlined_call_operand.vmem [shape: f32[2048,128], index: 0, kind: input, shape index: {}]   ;;  %s1365_s1 = inlined_call_operand.vmem [shape: f32[128,128], index: 1, kind: input, shape index: {}]   ;;  %s1366_s2 = inlined_call_operand.vmem [shape: f32[1,128], index: 2, kind: input, shape index: {}]   ;;  %s1367_s3 = inlined_call_operand.vmem [shape: f32[2048,128], index: 3, kind: output, shape index: {}]  }
   0x1   :  { %s1175_s14 = smov 0  }
   0x2 LB: > { %s32_s15 = sadd.s32 1, %s1145_s13  ;;  %p919_p0 = scmp.ge.s32.totalorder %s1149_s14, 1  ;;  %s1149_s14 = sphi %s1175_s14, %s13_s14   ;;  %s1145_s13 = sphi %s1173_s13, %s1369_s13   ;;  %s1141_s12 = sphi %s1171_s12, %s1368_s12  }
   0x3   : > { %p34_p1 = scmp.ge.s32.totalorder %s32_s15, 8  ;;  %p188_p2 = scmp.lt.s32.totalorder %s1149_s14, 9 }
   0x5   : > { %s1371_s15 = smov (%p34_p1, %s32_s15), 0  ;;  %p189_p3 = pnand %p919_p0, %p188_p2 }
   0x6   : > { %v359_v0 = vld [vmem:[%s1365_s1] sm:$0xff] (!%p189_p3)  ;;  %v360_v1 = vld [vmem:[%s1365_s1 + $0x8] sm:$0xff] (!%p189_p3)  ;;  %v361_v2 = vld [vmem:[%s1365_s1 + $0x10] sm:$0xff] (!%p189_p3)  ;;  %s920_s22 = sshll.u32 (!%p189_p3), %s1141_s12, 5 }
   0x7   : > { %192 = sbr.rel (%p189_p3) target bundleno = 288 (0x120), region = 32  ;;  %v1055_v3 = vpack.c.bf16 (!%p189_p3), %v360_v1, %v359_v0  ;;  %v362_v4 = vld [vmem:[%s1365_s1 + $0x18] sm:$0xff] (!%p189_p3)  ;;  %p230_p4 = scmp.lt.s32.totalorder (!%p189_p3), %s920_s22, 255  ;;  %v363_v6 = vld [vmem:[%s1365_s1 + $0x20] sm:$0xff] (!%p189_p3)  ;;  %v364_v7 = vld [vmem:[%s1365_s1 + $0x28] sm:$0xff] (!%p189_p3) }
   0x8   : > { %v1059_v5 = vpack.c.bf16 (!%p189_p3), %v362_v4, %v361_v2  ;;  %v1063_v8 = vpack.c.bf16 (!%p189_p3), %v364_v7, %v363_v6  ;;  %v365_v9 = vld [vmem:[%s1365_s1 + $0x30] sm:$0xff] (!%p189_p3)  ;;  %v366_v10 = vld [vmem:[%s1365_s1 + $0x38] sm:$0xff] (!%p189_p3)  ;;  %v367_v14 = vld [vmem:[%s1365_s1 + $0x40] sm:$0xff] (!%p189_p3) }
   0x9   : > { %1056 = vmatprep.subr.bf16.mxu0 (!%p189_p3), %v1055_v3  ;;  %1087 = vmatprep.subr.bf16.mxu1 (!%p189_p3), %v1055_v3  ;;  %v1067_v13 = vpack.c.bf16 (!%p189_p3), %v366_v10, %v365_v9  ;;  %v368_v15 = vld [vmem:[%s1365_s1 + $0x48] sm:$0xff] (!%p189_p3)  ;;  %v369_v17 = vld [vmem:[%s1365_s1 + $0x50] sm:$0xff] (!%p189_p3)  ;;  %v370_v18 = vld [vmem:[%s1365_s1 + $0x58] sm:$0xff] (!%p189_p3) }
   0xa   : > { %1058 = vmatpush3.bf16.msra.mxu0 (!%p189_p3), %v1055_v3  ;;  %1095 = vmatpush3.bf16.msra.mxu1 (!%p189_p3), %v1055_v3  ;;  %v1071_v16 = vpack.c.bf16 (!%p189_p3), %v368_v15, %v367_v14  ;;  %v1075_v19 = vpack.c.bf16 (!%p189_p3), %v370_v18, %v369_v17  ;;  %v371_v20 = vld [vmem:[%s1365_s1 + $0x60] sm:$0xff] (!%p189_p3)  ;;  %v372_v21 = vld [vmem:[%s1365_s1 + $0x68] sm:$0xff] (!%p189_p3)  ;;  %v373_v23 = vld [vmem:[%s1365_s1 + $0x70] sm:$0xff] (!%p189_p3) }
   0xb   : > { %1060 = vmatprep.subr.bf16.mxu0 (!%p189_p3), %v1059_v5  ;;  %1088 = vmatprep.subr.bf16.mxu1 (!%p189_p3), %v1059_v5  ;;  %v1079_v22 = vpack.c.bf16 (!%p189_p3), %v372_v21, %v371_v20  ;;  %v374_v24 = vld [vmem:[%s1365_s1 + $0x78] sm:$0xff] (!%p189_p3)  ;;  %v1282_v56 = vld [vmem:[%s1366_s2] ss:$0 sm:$0xff] (!%p189_p3) }
   0xc   : > { %v1083_v25 = vpack.c.bf16 (!%p189_p3), %v374_v24, %v373_v23 }
   0xe   : > { %s1373_s22 = smov (!%p230_p4, %s920_s22), 255  ;;  %1062 = vmatpush3.bf16.msra.mxu0 %v1059_v5  ;;  %1096 = vmatpush3.bf16.msra.mxu1 %v1059_v5 }
   0xf   : > { %s921_s29 = sshll.u32 %s1373_s22, 3  ;;  %1064 = vmatprep.subr.bf16.mxu0 %v1063_v8  ;;  %1089 = vmatprep.subr.bf16.mxu1 %v1063_v8 }
  0x10   : > { %s1221_s9 = scalar_lea.vmem %s1364_s0, %s921_s29  ;;  %s1291_s8 = scalar_lea.vmem %s1367_s3, %s921_s29 }
  0x11   : > { %v327_v11 = vld [vmem:[%s1221_s9] sm:$0xff]  ;;  %v328_v26 = vld [vmem:[%s1221_s9 + $0x8] sm:$0xff]  ;;  %v329_v28 = vld [vmem:[%s1221_s9 + $0x10] sm:$0xff] }
  0x12   : > { %v343_v12 = vld [vmem:[%s1221_s9 + $0x80] sm:$0xff]  ;;  %1007 = vmatprep.mubr.f32.mxu0 %v327_v11  ;;  %1066 = vmatpush3.bf16.msra.mxu0 %v1063_v8  ;;  %v344_v27 = vld [vmem:[%s1221_s9 + $0x88] sm:$0xff]  ;;  %v345_v29 = vld [vmem:[%s1221_s9 + $0x90] sm:$0xff] }
  0x13   : > { %1031 = vmatprep.mubr.f32.mxu1 %v343_v12  ;;  %1097 = vmatpush3.bf16.msra.mxu1 %v1063_v8  ;;  %v330_v30 = vld [vmem:[%s1221_s9 + $0x18] sm:$0xff]  ;;  %v331_v32 = vld [vmem:[%s1221_s9 + $0x20] sm:$0xff]  ;;  %v332_v34 = vld [vmem:[%s1221_s9 + $0x28] sm:$0xff] }
  0x14   : > { %1068 = vmatprep.subr.bf16.mxu0 %v1067_v13  ;;  %1090 = vmatprep.subr.bf16.mxu1 %v1067_v13  ;;  %v346_v31 = vld [vmem:[%s1221_s9 + $0x98] sm:$0xff]  ;;  %v347_v33 = vld [vmem:[%s1221_s9 + $0xa0] sm:$0xff]  ;;  %v348_v35 = vld [vmem:[%s1221_s9 + $0xa8] sm:$0xff] }
  0x15   : > { %v333_v36 = vld [vmem:[%s1221_s9 + $0x30] sm:$0xff]  ;;  %v334_v38 = vld [vmem:[%s1221_s9 + $0x38] sm:$0xff]  ;;  %v335_v40 = vld [vmem:[%s1221_s9 + $0x40] sm:$0xff] }
  0x16   : > { %1070 = vmatpush3.bf16.msra.mxu0 %v1067_v13  ;;  %v349_v37 = vld [vmem:[%s1221_s9 + $0xb0] sm:$0xff]  ;;  %v350_v39 = vld [vmem:[%s1221_s9 + $0xb8] sm:$0xff]  ;;  %v351_v41 = vld [vmem:[%s1221_s9 + $0xc0] sm:$0xff] }
  0x17   : > { %1098 = vmatpush3.bf16.msra.mxu1 %v1067_v13  ;;  %1072 = vmatprep.subr.bf16.mxu0 %v1071_v16  ;;  %v336_v42 = vld [vmem:[%s1221_s9 + $0x48] sm:$0xff]  ;;  %v337_v44 = vld [vmem:[%s1221_s9 + $0x50] sm:$0xff]  ;;  %v338_v46 = vld [vmem:[%s1221_s9 + $0x58] sm:$0xff] }
  0x18   : > { %1091 = vmatprep.subr.bf16.mxu1 %v1071_v16  ;;  %v352_v43 = vld [vmem:[%s1221_s9 + $0xc8] sm:$0xff]  ;;  %v353_v45 = vld [vmem:[%s1221_s9 + $0xd0] sm:$0xff]  ;;  %v354_v47 = vld [vmem:[%s1221_s9 + $0xd8] sm:$0xff] }
  0x19   : > { %v339_v48 = vld [vmem:[%s1221_s9 + $0x60] sm:$0xff]  ;;  %v340_v50 = vld [vmem:[%s1221_s9 + $0x68] sm:$0xff]  ;;  %v341_v52 = vld [vmem:[%s1221_s9 + $0x70] sm:$0xff] }
  0x1a   : > { %1074 = vmatpush3.bf16.msra.mxu0 %v1071_v16  ;;  %v355_v49 = vld [vmem:[%s1221_s9 + $0xe0] sm:$0xff]  ;;  %v356_v51 = vld [vmem:[%s1221_s9 + $0xe8] sm:$0xff]  ;;  %v357_v53 = vld [vmem:[%s1221_s9 + $0xf0] sm:$0xff] }
  0x1b   : > { %1099 = vmatpush3.bf16.msra.mxu1 %v1071_v16  ;;  %1076 = vmatprep.subr.bf16.mxu0 %v1075_v19  ;;  %v342_v54 = vld [vmem:[%s1221_s9 + $0x78] sm:$0xff] }
  0x1c   : > { %1092 = vmatprep.subr.bf16.mxu1 %v1075_v19  ;;  %v358_v55 = vld [vmem:[%s1221_s9 + $0xf8] sm:$0xff] }
  0x1e   : > { %1078 = vmatpush3.bf16.msra.mxu0 %v1075_v19 }
  0x1f   : > { %1100 = vmatpush3.bf16.msra.mxu1 %v1075_v19  ;;  %1080 = vmatprep.subr.bf16.mxu0 %v1079_v22 }
  0x20   : > { %1093 = vmatprep.subr.bf16.mxu1 %v1079_v22 }
  0x22   : > { %1082 = vmatpush3.bf16.msra.mxu0 %v1079_v22 }
  0x23   : > { %1101 = vmatpush3.bf16.msra.mxu1 %v1079_v22  ;;  %1084 = vmatprep.subr.bf16.mxu0 %v1083_v25 }
  0x24   : > { %1094 = vmatprep.subr.bf16.mxu1 %v1083_v25 }
  0x26   : > { %1086 = vmatpush3.bf16.msra.mxu0 %v1083_v25 }
  0x27   : > { %1102 = vmatpush3.bf16.msra.mxu1 %v1083_v25 }
  0x29   : > { %1008 = vmatmul.mubr.f32.vlgmr.msra.gmra.mrb[0].mxu0 %v328_v26 }
  0x2a   : > { %1032 = vmatmul.mubr.f32.vlgmr.msra.gmra.mrb[0].mxu1 %v344_v27  ;;  %1010 = vmatprep.mubr.f32.mxu0 %v329_v28 }
  0x2b   : > { %1034 = vmatprep.mubr.f32.mxu1 %v345_v29 }
  0x2d   : > { %1011 = vmatmul.mubr.f32.gmra.mrb[2].mxu0 %v330_v30 }
  0x2e   : > { %1035 = vmatmul.mubr.f32.gmra.mrb[2].mxu1 %v346_v31  ;;  %1013 = vmatprep.mubr.f32.mxu0 %v331_v32 }
  0x2f   : > { %1037 = vmatprep.mubr.f32.mxu1 %v347_v33 }
  0x31   : > { %1014 = vmatmul.mubr.f32.gmra.mrb[4].mxu0 %v332_v34 }
  0x32   : > { %1038 = vmatmul.mubr.f32.gmra.mrb[4].mxu1 %v348_v35  ;;  %1016 = vmatprep.mubr.f32.mxu0 %v333_v36 }
  0x33   : > { %1040 = vmatprep.mubr.f32.mxu1 %v349_v37 }
  0x35   : > { %1017 = vmatmul.mubr.f32.gmra.mrb[6].mxu0 %v334_v38 }
  0x36   : > { %1041 = vmatmul.mubr.f32.gmra.mrb[6].mxu1 %v350_v39  ;;  %1019 = vmatprep.mubr.f32.mxu0 %v335_v40 }
  0x37   : > { %1043 = vmatprep.mubr.f32.mxu1 %v351_v41 }
  0x39   : > { %1020 = vmatmul.mubr.f32.gmra.mrb[8].mxu0 %v336_v42 }
  0x3a   : > { %1044 = vmatmul.mubr.f32.gmra.mrb[8].mxu1 %v352_v43  ;;  %1022 = vmatprep.mubr.f32.mxu0 %v337_v44 }
  0x3b   : > { %1046 = vmatprep.mubr.f32.mxu1 %v353_v45 }
  0x3d   : > { %1023 = vmatmul.mubr.f32.gmra.mrb[10].mxu0 %v338_v46 }
  0x3e   : > { %1047 = vmatmul.mubr.f32.gmra.mrb[10].mxu1 %v354_v47  ;;  %1025 = vmatprep.mubr.f32.mxu0 %v339_v48 }
  0x3f   : > { %1049 = vmatprep.mubr.f32.mxu1 %v355_v49 }
  0x41   : > { %1026 = vmatmul.mubr.f32.gmra.mrb[12].mxu0 %v340_v50 }
  0x42   : > { %1050 = vmatmul.mubr.f32.gmra.mrb[12].mxu1 %v356_v51  ;;  %1028 = vmatprep.mubr.f32.mxu0 %v341_v52 }
  0x43   : > { %1052 = vmatprep.mubr.f32.mxu1 %v357_v53 }
  0x45   : > { %1029 = vmatmul.mubr.f32.gmra.mrb[14].mxu0 %v342_v54 }
  0x46   : > { %1053 = vmatmul.mubr.f32.gmra.mrb[14].mxu1 %v358_v55 }
  0xfc   : > { %v1009_v57 = vpop.f32.mrb[0].mxu0 }
  0xfd   : > { %v1033_v58 = vpop.f32.mrb[0].mxu1  ;;  %v707_v59 = vadd.f32 %v1009_v57, %v1282_v56  ;;  %v441_v61 = vpop.f32.mrb[1].mxu0 }
  0xfe   : > { %v723_v60 = vadd.f32 %v1033_v58, %v1282_v56  ;;  %v521_v62 = vpop.f32.mrb[1].mxu1  ;;  %v706_v63 = vadd.f32 %v1282_v56, %v441_v61 }
  0xff   : > { %v722_v0 = vadd.f32 %v1282_v56, %v521_v62  ;;  %v739_v1 = vmax.f32 %v707_v59, 0.0 }
 0x100   : > { %v755_v2 = vmax.f32 %v723_v60, 0.0  ;;  %v738_v3 = vmax.f32 %v706_v63, 0.0  ;;  %v1012_v5 = vpop.f32.mrb[2].mxu0 }
 0x101   : > { %v754_v4 = vmax.f32 %v722_v0, 0.0  ;;  %v1036_v6 = vpop.f32.mrb[2].mxu1  ;;  %771 = vst [vmem:[%s1291_s8 + $0x8] sm:$0xff] %v739_v1  ;;  %v709_v7 = vadd.f32 %v1012_v5, %v1282_v56  ;;  %v451_v9 = vpop.f32.mrb[3].mxu0 }
 0x102   : > { %787 = vst [vmem:[%s1291_s8 + $0x88] sm:$0xff] %v755_v2  ;;  %v725_v8 = vadd.f32 %v1036_v6, %v1282_v56  ;;  %v531_v10 = vpop.f32.mrb[3].mxu1  ;;  %770 = vst [vmem:[%s1291_s8] sm:$0xff] %v738_v3  ;;  %v708_v11 = vadd.f32 %v1282_v56, %v451_v9 }
 0x103   : > { %786 = vst [vmem:[%s1291_s8 + $0x80] sm:$0xff] %v754_v4  ;;  %v724_v12 = vadd.f32 %v1282_v56, %v531_v10  ;;  %v741_v13 = vmax.f32 %v709_v7, 0.0 }
 0x104   : > { %v757_v14 = vmax.f32 %v725_v8, 0.0  ;;  %v740_v15 = vmax.f32 %v708_v11, 0.0  ;;  %v1015_v17 = vpop.f32.mrb[4].mxu0 }
 0x105   : > { %v756_v16 = vmax.f32 %v724_v12, 0.0  ;;  %v1039_v18 = vpop.f32.mrb[4].mxu1  ;;  %773 = vst [vmem:[%s1291_s8 + $0x18] sm:$0xff] %v741_v13  ;;  %v711_v19 = vadd.f32 %v1015_v17, %v1282_v56  ;;  %v461_v21 = vpop.f32.mrb[5].mxu0 }
 0x106   : > { %789 = vst [vmem:[%s1291_s8 + $0x98] sm:$0xff] %v757_v14  ;;  %v727_v20 = vadd.f32 %v1039_v18, %v1282_v56  ;;  %v541_v22 = vpop.f32.mrb[5].mxu1  ;;  %772 = vst [vmem:[%s1291_s8 + $0x10] sm:$0xff] %v740_v15  ;;  %v710_v23 = vadd.f32 %v1282_v56, %v461_v21 }
 0x107   : > { %788 = vst [vmem:[%s1291_s8 + $0x90] sm:$0xff] %v756_v16  ;;  %v726_v24 = vadd.f32 %v1282_v56, %v541_v22  ;;  %v743_v25 = vmax.f32 %v711_v19, 0.0 }
 0x108   : > { %v759_v26 = vmax.f32 %v727_v20, 0.0  ;;  %v742_v27 = vmax.f32 %v710_v23, 0.0  ;;  %v1018_v29 = vpop.f32.mrb[6].mxu0 }
 0x109   : > { %v758_v28 = vmax.f32 %v726_v24, 0.0  ;;  %v1042_v30 = vpop.f32.mrb[6].mxu1  ;;  %775 = vst [vmem:[%s1291_s8 + $0x28] sm:$0xff] %v743_v25  ;;  %v713_v31 = vadd.f32 %v1018_v29, %v1282_v56  ;;  %v471_v33 = vpop.f32.mrb[7].mxu0 }
 0x10a   : > { %791 = vst [vmem:[%s1291_s8 + $0xa8] sm:$0xff] %v759_v26  ;;  %v729_v32 = vadd.f32 %v1042_v30, %v1282_v56  ;;  %v551_v34 = vpop.f32.mrb[7].mxu1  ;;  %774 = vst [vmem:[%s1291_s8 + $0x20] sm:$0xff] %v742_v27  ;;  %v712_v35 = vadd.f32 %v1282_v56, %v471_v33 }
 0x10b   : > { %790 = vst [vmem:[%s1291_s8 + $0xa0] sm:$0xff] %v758_v28  ;;  %v728_v36 = vadd.f32 %v1282_v56, %v551_v34  ;;  %v745_v37 = vmax.f32 %v713_v31, 0.0 }
 0x10c   : > { %v761_v38 = vmax.f32 %v729_v32, 0.0  ;;  %v744_v39 = vmax.f32 %v712_v35, 0.0  ;;  %v1021_v41 = vpop.f32.mrb[8].mxu0 }
 0x10d   : > { %v760_v40 = vmax.f32 %v728_v36, 0.0  ;;  %v1045_v42 = vpop.f32.mrb[8].mxu1  ;;  %777 = vst [vmem:[%s1291_s8 + $0x38] sm:$0xff] %v745_v37  ;;  %v715_v43 = vadd.f32 %v1021_v41, %v1282_v56  ;;  %v481_v45 = vpop.f32.mrb[9].mxu0 }
 0x10e   : > { %793 = vst [vmem:[%s1291_s8 + $0xb8] sm:$0xff] %v761_v38  ;;  %v731_v44 = vadd.f32 %v1045_v42, %v1282_v56  ;;  %v561_v46 = vpop.f32.mrb[9].mxu1  ;;  %776 = vst [vmem:[%s1291_s8 + $0x30] sm:$0xff] %v744_v39  ;;  %v714_v47 = vadd.f32 %v1282_v56, %v481_v45 }
 0x10f   : > { %792 = vst [vmem:[%s1291_s8 + $0xb0] sm:$0xff] %v760_v40  ;;  %v730_v48 = vadd.f32 %v1282_v56, %v561_v46  ;;  %v747_v49 = vmax.f32 %v715_v43, 0.0 }
 0x110   : > { %v763_v50 = vmax.f32 %v731_v44, 0.0  ;;  %v746_v51 = vmax.f32 %v714_v47, 0.0  ;;  %v1024_v53 = vpop.f32.mrb[10].mxu0 }
 0x111   : > { %v762_v52 = vmax.f32 %v730_v48, 0.0  ;;  %v1048_v54 = vpop.f32.mrb[10].mxu1  ;;  %779 = vst [vmem:[%s1291_s8 + $0x48] sm:$0xff] %v747_v49  ;;  %v717_v55 = vadd.f32 %v1024_v53, %v1282_v56  ;;  %v491_v58 = vpop.f32.mrb[11].mxu0 }
 0x112   : > { %795 = vst [vmem:[%s1291_s8 + $0xc8] sm:$0xff] %v763_v50  ;;  %v733_v57 = vadd.f32 %v1048_v54, %v1282_v56  ;;  %v571_v59 = vpop.f32.mrb[11].mxu1  ;;  %778 = vst [vmem:[%s1291_s8 + $0x40] sm:$0xff] %v746_v51  ;;  %v716_v60 = vadd.f32 %v1282_v56, %v491_v58 }
 0x113   : > { %794 = vst [vmem:[%s1291_s8 + $0xc0] sm:$0xff] %v762_v52  ;;  %v732_v61 = vadd.f32 %v1282_v56, %v571_v59  ;;  %v749_v62 = vmax.f32 %v717_v55, 0.0 }
 0x114   : > { %v765_v63 = vmax.f32 %v733_v57, 0.0  ;;  %v748_v0 = vmax.f32 %v716_v60, 0.0  ;;  %v1027_v2 = vpop.f32.mrb[12].mxu0 }
 0x115   : > { %v764_v1 = vmax.f32 %v732_v61, 0.0  ;;  %v1051_v3 = vpop.f32.mrb[12].mxu1  ;;  %781 = vst [vmem:[%s1291_s8 + $0x58] sm:$0xff] %v749_v62  ;;  %v719_v4 = vadd.f32 %v1027_v2, %v1282_v56  ;;  %v501_v6 = vpop.f32.mrb[13].mxu0 }
 0x116   : > { %797 = vst [vmem:[%s1291_s8 + $0xd8] sm:$0xff] %v765_v63  ;;  %v735_v5 = vadd.f32 %v1051_v3, %v1282_v56  ;;  %v581_v7 = vpop.f32.mrb[13].mxu1  ;;  %780 = vst [vmem:[%s1291_s8 + $0x50] sm:$0xff] %v748_v0  ;;  %v718_v8 = vadd.f32 %v1282_v56, %v501_v6 }
 0x117   : > { %796 = vst [vmem:[%s1291_s8 + $0xd0] sm:$0xff] %v764_v1  ;;  %v734_v9 = vadd.f32 %v1282_v56, %v581_v7  ;;  %v751_v10 = vmax.f32 %v719_v4, 0.0 }
 0x118   : > { %v767_v11 = vmax.f32 %v735_v5, 0.0  ;;  %v750_v12 = vmax.f32 %v718_v8, 0.0  ;;  %v1030_v14 = vpop.f32.mrb[14].mxu0 }
 0x119   : > { %v766_v13 = vmax.f32 %v734_v9, 0.0  ;;  %v1054_v15 = vpop.f32.mrb[14].mxu1  ;;  %783 = vst [vmem:[%s1291_s8 + $0x68] sm:$0xff] %v751_v10  ;;  %v721_v16 = vadd.f32 %v1030_v14, %v1282_v56  ;;  %v511_v18 = vpop.f32.mrb[15].mxu0 }
 0x11a   : > { %799 = vst [vmem:[%s1291_s8 + $0xe8] sm:$0xff] %v767_v11  ;;  %v737_v17 = vadd.f32 %v1054_v15, %v1282_v56  ;;  %v591_v19 = vpop.f32.mrb[15].mxu1  ;;  %782 = vst [vmem:[%s1291_s8 + $0x60] sm:$0xff] %v750_v12  ;;  %v720_v20 = vadd.f32 %v1282_v56, %v511_v18 }
 0x11b   : > { %798 = vst [vmem:[%s1291_s8 + $0xe0] sm:$0xff] %v766_v13  ;;  %v736_v21 = vadd.f32 %v1282_v56, %v591_v19  ;;  %v753_v22 = vmax.f32 %v721_v16, 0.0 }
 0x11c   : > { %v769_v23 = vmax.f32 %v737_v17, 0.0  ;;  %v752_v24 = vmax.f32 %v720_v20, 0.0 }
 0x11d   : > { %v768_v25 = vmax.f32 %v736_v21, 0.0  ;;  %785 = vst [vmem:[%s1291_s8 + $0x78] sm:$0xff] %v753_v22 }
 0x11e   : > { %801 = vst [vmem:[%s1291_s8 + $0xf8] sm:$0xff] %v769_v23  ;;  %784 = vst [vmem:[%s1291_s8 + $0x70] sm:$0xff] %v752_v24 }
 0x11f   : > { %800 = vst [vmem:[%s1291_s8 + $0xf0] sm:$0xff] %v768_v25 }
 0x120 PF: > { %s13_s14 = sadd.s32 1, %s1149_s14   ;;  %s1368_s12 = smov %s1145_s13 }
 0x121   : > { %p10_p5 = scmp.ge.s32.totalorder %s13_s14, 10   ;;  %s1369_s13 = smov %s1371_s15 }
 0x123   :  { %12 = sbr.rel (!%p10_p5) target bundleno = 2 (0x2), region = 76 }

// kernel: _pallas_forward.23
= control target key start
LH: loop header
LB: loop body
LE: loop exit
PB: predicated region body
PF: predicated region fallthrough
CT: control target
= control target key end

     0   :  { %s1346_s12 = smov 0   ;;  %s1348_s13 = smov 0   ;;  %s1775_s0 = inlined_call_operand.vmem [shape: f32[2048,768], index: 0, kind: input, shape index: {}]   ;;  %s1776_s1 = inlined_call_operand.vmem [shape: f32[768,128], index: 1, kind: input, shape index: {}]   ;;  %s1777_s2 = inlined_call_operand.vmem [shape: f32[1,128], index: 2, kind: input, shape index: {}]   ;;  %s1778_s3 = inlined_call_operand.vmem [shape: f32[2048,128], index: 3, kind: output, shape index: {}]  }
   0x1   :  { %s1350_s14 = smov 0   ;;  %s1352_s15 = smov 0  }
   0x2   :  { %s1354_s16 = smov 0   ;;  %s1356_s17 = smov 0  }
   0x3   :  { %s1358_s18 = smov 0  }
   0x4 LB: > { %s25_s19 = sadd.s32 1, %s1314_s16  ;;  %s32_s20 = sadd.s32 1, %s1318_s17  ;;  %s1322_s18 = sphi %s1358_s18, %s13_s18   ;;  %s1318_s17 = sphi %s1356_s17, %s1784_s17   ;;  %s1314_s16 = sphi %s1354_s16, %s1783_s16   ;;  %s1310_s15 = sphi %s1352_s15, %s1782_s15   ;;  %s1306_s14 = sphi %s1350_s14, %s1781_s14   ;;  %s1302_s13 = sphi %s1348_s13, %s1780_s13   ;;  %s1298_s12 = sphi %s1346_s12, %s1779_s12  }
   0x5   : > { %p26_p0 = scmp.ge.s32.totalorder %s25_s19, 3  ;;  %p48_p1 = scmp.ne.s32.totalorder %s1302_s13, %s1298_s12 }
   0x6   : > { %p49_p2 = scmp.eq.s32.totalorder %s1322_s18, 0  ;;  %s41_s24 = sadd.s32 1, %s1302_s13 }
   0x7   : > { %s1786_s19 = smov (%p26_p0, %s25_s19), 0  ;;  %s1788_s20 = smov (!%p26_p0, %s32_s20), %s1318_s17 }
   0x8   : > { %p50_p3 = por %p49_p2, %p48_p1  ;;  %p34_p4 = scmp.ge.s32.totalorder %s1788_s20, 8 }
   0x9   : > { %s37_s21 = ssub.s32 %s1314_s16, %s1786_s19  ;;  %p1112_p6 = scmp.ge.s32.totalorder %s1322_s18, 24 }
   0xa   : > { %s1790_s20 = smov (%p34_p4, %s1788_s20), 0 }
   0xb   : > { %s36_s22 = ssub.s32 %s1318_s17, %s1790_s20  ;;  %162 = sbr.rel (%p1112_p6) target bundleno = 58 (0x3a), region = 20 }
   0xc   : > { %s38_s23 = sor.u32 %s37_s21, %s36_s22 }
   0xd   : > { %p39_p5 = scmp.eq.s32.totalorder %s38_s23, 0 }
   0xf   : > { %s1397_s25 = scalar_select %p39_p5, %s1302_s13, %s41_s24  }
  0x12   : > { %165 = sbr.rel (!%p50_p3) target bundleno = 58 (0x3a), region = 24  ;;  %s167_s26 = sand.u32 (%p50_p3), 1, %s1302_s13  }
  0x13   : > { %s1115_s27 = sshll.u32 (%p50_p3), %s1314_s16, 1  ;;  %s1113_s28 = sshll.u32 (%p50_p3), %s167_s26, 9 }
  0x14   : > { %s1209_s29 = smul.u32 (%p50_p3), 192, %s1318_s17  ;;  %s1411_s8 = scalar_lea.vmem (%p50_p3), [#allocation3], %s1113_s28 }
  0x16   : > { %s173_s30 = sadd.s32 (%p50_p3), %s1209_s29, %s1115_s27 }
  0x17   : > { %s1117_s4 = sshll.u32 (%p50_p3), %s173_s30, 3 }
  0x18   : > { %s1406_s7 = scalar_lea.vmem (%p50_p3), %s1775_s0, %s1117_s4 }
  0x19   : > { %v188_v0 = vld [vmem:[%s1406_s7] sm:$0xff]  ;;  %v190_v1 = vld [vmem:[%s1406_s7 + $0x8] sm:$0xff]  ;;  %v192_v2 = vld [vmem:[%s1406_s7 + $0x30] sm:$0xff] }
  0x1a   : > { %189 = vst [vmem:[%s1411_s8] sm:$0xff] %v188_v0  ;;  %191 = vst [vmem:[%s1411_s8 + $0x8] sm:$0xff] %v190_v1  ;;  %v194_v3 = vld [vmem:[%s1406_s7 + $0x38] sm:$0xff]  ;;  %v196_v4 = vld [vmem:[%s1406_s7 + $0x60] sm:$0xff] }
  0x1b   : > { %193 = vst [vmem:[%s1411_s8 + $0x10] sm:$0xff] %v192_v2  ;;  %v198_v5 = vld [vmem:[%s1406_s7 + $0x68] sm:$0xff]  ;;  %195 = vst [vmem:[%s1411_s8 + $0x18] sm:$0xff] %v194_v3  ;;  %v200_v6 = vld [vmem:[%s1406_s7 + $0x90] sm:$0xff] }
  0x1c   : > { %197 = vst [vmem:[%s1411_s8 + $0x20] sm:$0xff] %v196_v4  ;;  %199 = vst [vmem:[%s1411_s8 + $0x28] sm:$0xff] %v198_v5  ;;  %v202_v7 = vld [vmem:[%s1406_s7 + $0x98] sm:$0xff]  ;;  %v204_v8 = vld [vmem:[%s1406_s7 + $0xc0] sm:$0xff] }
  0x1d   : > { %201 = vst [vmem:[%s1411_s8 + $0x30] sm:$0xff] %v200_v6  ;;  %203 = vst [vmem:[%s1411_s8 + $0x38] sm:$0xff] %v202_v7  ;;  %v206_v9 = vld [vmem:[%s1406_s7 + $0xc8] sm:$0xff]  ;;  %v208_v10 = vld [vmem:[%s1406_s7 + $0xf0] sm:$0xff] }
  0x1e   : > { %205 = vst [vmem:[%s1411_s8 + $0x40] sm:$0xff] %v204_v8  ;;  %v210_v11 = vld [vmem:[%s1406_s7 + $0xf8] sm:$0xff]  ;;  %207 = vst [vmem:[%s1411_s8 + $0x48] sm:$0xff] %v206_v9  ;;  %v212_v12 = vld [vmem:[%s1406_s7 + $0x120] sm:$0xff] }
  0x1f   : > { %209 = vst [vmem:[%s1411_s8 + $0x50] sm:$0xff] %v208_v10  ;;  %211 = vst [vmem:[%s1411_s8 + $0x58] sm:$0xff] %v210_v11  ;;  %v214_v13 = vld [vmem:[%s1406_s7 + $0x128] sm:$0xff]  ;;  %v216_v14 = vld [vmem:[%s1406_s7 + $0x150] sm:$0xff] }
  0x20   : > { %213 = vst [vmem:[%s1411_s8 + $0x60] sm:$0xff] %v212_v12  ;;  %215 = vst [vmem:[%s1411_s8 + $0x68] sm:$0xff] %v214_v13  ;;  %v218_v15 = vld [vmem:[%s1406_s7 + $0x158] sm:$0xff]  ;;  %v220_v16 = vld [vmem:[%s1406_s7 + $0x180] sm:$0xff] }
  0x21   : > { %217 = vst [vmem:[%s1411_s8 + $0x70] sm:$0xff] %v216_v14  ;;  %v222_v17 = vld [vmem:[%s1406_s7 + $0x188] sm:$0xff]  ;;  %219 = vst [vmem:[%s1411_s8 + $0x78] sm:$0xff] %v218_v15  ;;  %v224_v18 = vld [vmem:[%s1406_s7 + $0x1b0] sm:$0xff] }
  0x22   : > { %221 = vst [vmem:[%s1411_s8 + $0x80] sm:$0xff] %v220_v16  ;;  %223 = vst [vmem:[%s1411_s8 + $0x88] sm:$0xff] %v222_v17  ;;  %v226_v19 = vld [vmem:[%s1406_s7 + $0x1b8] sm:$0xff]  ;;  %v228_v20 = vld [vmem:[%s1406_s7 + $0x1e0] sm:$0xff] }
  0x23   : > { %225 = vst [vmem:[%s1411_s8 + $0x90] sm:$0xff] %v224_v18  ;;  %227 = vst [vmem:[%s1411_s8 + $0x98] sm:$0xff] %v226_v19  ;;  %v230_v21 = vld [vmem:[%s1406_s7 + $0x1e8] sm:$0xff]  ;;  %v232_v22 = vld [vmem:[%s1406_s7 + $0x210] sm:$0xff] }
  0x24   : > { %229 = vst [vmem:[%s1411_s8 + $0xa0] sm:$0xff] %v228_v20  ;;  %v234_v23 = vld [vmem:[%s1406_s7 + $0x218] sm:$0xff]  ;;  %231 = vst [vmem:[%s1411_s8 + $0xa8] sm:$0xff] %v230_v21  ;;  %v236_v24 = vld [vmem:[%s1406_s7 + $0x240] sm:$0xff] }
  0x25   : > { %233 = vst [vmem:[%s1411_s8 + $0xb0] sm:$0xff] %v232_v22  ;;  %235 = vst [vmem:[%s1411_s8 + $0xb8] sm:$0xff] %v234_v23  ;;  %v238_v25 = vld [vmem:[%s1406_s7 + $0x248] sm:$0xff]  ;;  %v240_v26 = vld [vmem:[%s1406_s7 + $0x270] sm:$0xff] }
  0x26   : > { %237 = vst [vmem:[%s1411_s8 + $0xc0] sm:$0xff] %v236_v24  ;;  %239 = vst [vmem:[%s1411_s8 + $0xc8] sm:$0xff] %v238_v25  ;;  %v242_v27 = vld [vmem:[%s1406_s7 + $0x278] sm:$0xff]  ;;  %v244_v28 = vld [vmem:[%s1406_s7 + $0x2a0] sm:$0xff] }
  0x27   : > { %241 = vst [vmem:[%s1411_s8 + $0xd0] sm:$0xff] %v240_v26  ;;  %v246_v29 = vld [vmem:[%s1406_s7 + $0x2a8] sm:$0xff]  ;;  %243 = vst [vmem:[%s1411_s8 + $0xd8] sm:$0xff] %v242_v27  ;;  %v248_v30 = vld [vmem:[%s1406_s7 + $0x2d0] sm:$0xff] }
  0x28   : > { %245 = vst [vmem:[%s1411_s8 + $0xe0] sm:$0xff] %v244_v28  ;;  %247 = vst [vmem:[%s1411_s8 + $0xe8] sm:$0xff] %v246_v29  ;;  %v250_v31 = vld [vmem:[%s1406_s7 + $0x2d8] sm:$0xff]  ;;  %v252_v32 = vld [vmem:[%s1406_s7 + $0x300] sm:$0xff] }
  0x29   : > { %249 = vst [vmem:[%s1411_s8 + $0xf0] sm:$0xff] %v248_v30  ;;  %251 = vst [vmem:[%s1411_s8 + $0xf8] sm:$0xff] %v250_v31  ;;  %v254_v33 = vld [vmem:[%s1406_s7 + $0x308] sm:$0xff]  ;;  %v256_v34 = vld [vmem:[%s1406_s7 + $0x330] sm:$0xff] }
  0x2a   : > { %253 = vst [vmem:[%s1411_s8 + $0x100] sm:$0xff] %v252_v32  ;;  %v258_v35 = vld [vmem:[%s1406_s7 + $0x338] sm:$0xff]  ;;  %255 = vst [vmem:[%s1411_s8 + $0x108] sm:$0xff] %v254_v33  ;;  %v260_v36 = vld [vmem:[%s1406_s7 + $0x360] sm:$0xff] }
  0x2b   : > { %257 = vst [vmem:[%s1411_s8 + $0x110] sm:$0xff] %v256_v34  ;;  %259 = vst [vmem:[%s1411_s8 + $0x118] sm:$0xff] %v258_v35  ;;  %v262_v37 = vld [vmem:[%s1406_s7 + $0x368] sm:$0xff]  ;;  %v264_v38 = vld [vmem:[%s1406_s7 + $0x390] sm:$0xff] }
  0x2c   : > { %261 = vst [vmem:[%s1411_s8 + $0x120] sm:$0xff] %v260_v36  ;;  %263 = vst [vmem:[%s1411_s8 + $0x128] sm:$0xff] %v262_v37  ;;  %v266_v39 = vld [vmem:[%s1406_s7 + $0x398] sm:$0xff]  ;;  %v268_v40 = vld [vmem:[%s1406_s7 + $0x3c0] sm:$0xff] }
  0x2d   : > { %265 = vst [vmem:[%s1411_s8 + $0x130] sm:$0xff] %v264_v38  ;;  %v270_v41 = vld [vmem:[%s1406_s7 + $0x3c8] sm:$0xff]  ;;  %267 = vst [vmem:[%s1411_s8 + $0x138] sm:$0xff] %v266_v39  ;;  %v272_v42 = vld [vmem:[%s1406_s7 + $0x3f0] sm:$0xff] }
  0x2e   : > { %269 = vst [vmem:[%s1411_s8 + $0x140] sm:$0xff] %v268_v40  ;;  %271 = vst [vmem:[%s1411_s8 + $0x148] sm:$0xff] %v270_v41  ;;  %v274_v43 = vld [vmem:[%s1406_s7 + $0x3f8] sm:$0xff]  ;;  %v276_v44 = vld [vmem:[%s1406_s7 + $0x420] sm:$0xff] }
  0x2f   : > { %273 = vst [vmem:[%s1411_s8 + $0x150] sm:$0xff] %v272_v42  ;;  %275 = vst [vmem:[%s1411_s8 + $0x158] sm:$0xff] %v274_v43  ;;  %v278_v45 = vld [vmem:[%s1406_s7 + $0x428] sm:$0xff]  ;;  %v280_v46 = vld [vmem:[%s1406_s7 + $0x450] sm:$0xff] }
  0x30   : > { %277 = vst [vmem:[%s1411_s8 + $0x160] sm:$0xff] %v276_v44  ;;  %v282_v47 = vld [vmem:[%s1406_s7 + $0x458] sm:$0xff]  ;;  %279 = vst [vmem:[%s1411_s8 + $0x168] sm:$0xff] %v278_v45  ;;  %v284_v48 = vld [vmem:[%s1406_s7 + $0x480] sm:$0xff] }
  0x31   : > { %281 = vst [vmem:[%s1411_s8 + $0x170] sm:$0xff] %v280_v46  ;;  %283 = vst [vmem:[%s1411_s8 + $0x178] sm:$0xff] %v282_v47  ;;  %v286_v49 = vld [vmem:[%s1406_s7 + $0x488] sm:$0xff]  ;;  %v288_v50 = vld [vmem:[%s1406_s7 + $0x4b0] sm:$0xff] }
  0x32   : > { %285 = vst [vmem:[%s1411_s8 + $0x180] sm:$0xff] %v284_v48  ;;  %287 = vst [vmem:[%s1411_s8 + $0x188] sm:$0xff] %v286_v49  ;;  %v290_v51 = vld [vmem:[%s1406_s7 + $0x4b8] sm:$0xff]  ;;  %v292_v52 = vld [vmem:[%s1406_s7 + $0x4e0] sm:$0xff] }
  0x33   : > { %289 = vst [vmem:[%s1411_s8 + $0x190] sm:$0xff] %v288_v50  ;;  %v294_v53 = vld [vmem:[%s1406_s7 + $0x4e8] sm:$0xff]  ;;  %291 = vst [vmem:[%s1411_s8 + $0x198] sm:$0xff] %v290_v51  ;;  %v296_v54 = vld [vmem:[%s1406_s7 + $0x510] sm:$0xff] }
  0x34   : > { %293 = vst [vmem:[%s1411_s8 + $0x1a0] sm:$0xff] %v292_v52  ;;  %295 = vst [vmem:[%s1411_s8 + $0x1a8] sm:$0xff] %v294_v53  ;;  %v298_v55 = vld [vmem:[%s1406_s7 + $0x518] sm:$0xff]  ;;  %v300_v56 = vld [vmem:[%s1406_s7 + $0x540] sm:$0xff] }
  0x35   : > { %297 = vst [vmem:[%s1411_s8 + $0x1b0] sm:$0xff] %v296_v54  ;;  %299 = vst [vmem:[%s1411_s8 + $0x1b8] sm:$0xff] %v298_v55  ;;  %v302_v57 = vld [vmem:[%s1406_s7 + $0x548] sm:$0xff]  ;;  %v304_v58 = vld [vmem:[%s1406_s7 + $0x570] sm:$0xff] }
  0x36   : > { %301 = vst [vmem:[%s1411_s8 + $0x1c0] sm:$0xff] %v300_v56  ;;  %v306_v59 = vld [vmem:[%s1406_s7 + $0x578] sm:$0xff]  ;;  %303 = vst [vmem:[%s1411_s8 + $0x1c8] sm:$0xff] %v302_v57  ;;  %v308_v60 = vld [vmem:[%s1406_s7 + $0x5a0] sm:$0xff] }
  0x37   : > { %305 = vst [vmem:[%s1411_s8 + $0x1d0] sm:$0xff] %v304_v58  ;;  %307 = vst [vmem:[%s1411_s8 + $0x1d8] sm:$0xff] %v306_v59  ;;  %v310_v61 = vld [vmem:[%s1406_s7 + $0x5a8] sm:$0xff]  ;;  %v312_v62 = vld [vmem:[%s1406_s7 + $0x5d0] sm:$0xff] }
  0x38   : > { %309 = vst [vmem:[%s1411_s8 + $0x1e0] sm:$0xff] %v308_v60  ;;  %311 = vst [vmem:[%s1411_s8 + $0x1e8] sm:$0xff] %v310_v61  ;;  %v314_v63 = vld [vmem:[%s1406_s7 + $0x5d8] sm:$0xff] }
  0x39   : > { %313 = vst [vmem:[%s1411_s8 + $0x1f0] sm:$0xff] %v312_v62  ;;  %315 = vst [vmem:[%s1411_s8 + $0x1f8] sm:$0xff] %v314_v63 }
  0x3a PF: > { %p1118_p7 = scmp.ge.s32.totalorder %s1322_s18, 1  ;;  %p332_p8 = scmp.lt.s32.totalorder %s1322_s18, 25 }
  0x3c   : > { %p333_p9 = pnand %p1118_p7, %p332_p8 }
  0x3d   : > { %s339_s9 = sand.u32 (!%p333_p9), 1, %s1298_s12   ;;  %s1120_s10 = sshll.u32 (!%p333_p9), %s1306_s14, 5 }
  0x3e   : > { %336 = sbr.rel (%p333_p9) target bundleno = 441 (0x1b9), region = 51  ;;  %s1119_s11 = sshll.u32 (!%p333_p9), %s339_s9, 9 }
  0x3f   : > { %p379_p10 = scmp.lt.s32.totalorder (!%p333_p9), %s1120_s10, 95  ;;  %s1122_s21 = sshll.u32 (!%p333_p9), %s1310_s15, 5 }
  0x40   : > { %p391_p11 = scmp.lt.s32.totalorder (!%p333_p9), %s1122_s21, 255  ;;  %s1553_s12 = scalar_lea.vmem (!%p333_p9), [#allocation3], %s1119_s11 }
  0x41   : > { %p1124_p12 = scmp.ne.s32.totalorder (!%p333_p9), %s1306_s14, 0 }
  0x45   : > { %s1792_s10 = smov (!%p379_p10, %s1120_s10), 95  ;;  %s1794_s21 = smov (!%p391_p11, %s1122_s21), 255 }
  0x46   : > { %s1121_s22 = sshll.u32 %s1792_s10, 3  ;;  %s1123_s27 = sshll.u32 %s1794_s21, 3  ;;  %v1324_v0 = vmov (!%p1124_p12), 0.0  }
  0x47   : > { %s1546_s26 = scalar_lea.vmem %s1776_s1, %s1121_s22  ;;  %s1551_s30 = scalar_lea.vmem %s1778_s3, %s1123_s27  ;;  %403 = vst [vmem:[#allocation2] sm:$0xff] (!%p1124_p12), %v1324_v0  ;;  %404 = vst [vmem:[#allocation2 + $0x8] sm:$0xff] (!%p1124_p12), %v1324_v0 }
  0x48   : > { %402 = sbr.rel (%p1124_p12) target bundleno = 87 (0x57), region = 59  ;;  %405 = vst [vmem:[#allocation2 + $0x10] sm:$0xff] (!%p1124_p12), %v1324_v0  ;;  %406 = vst [vmem:[#allocation2 + $0x18] sm:$0xff] (!%p1124_p12), %v1324_v0 }
  0x49   : > { %407 = vst [vmem:[#allocation2 + $0x20] sm:$0xff] (!%p1124_p12), %v1324_v0  ;;  %408 = vst [vmem:[#allocation2 + $0x28] sm:$0xff] (!%p1124_p12), %v1324_v0 }
  0x4a   : > { %409 = vst [vmem:[#allocation2 + $0x30] sm:$0xff] (!%p1124_p12), %v1324_v0  ;;  %410 = vst [vmem:[#allocation2 + $0x38] sm:$0xff] (!%p1124_p12), %v1324_v0 }
  0x4b   : > { %411 = vst [vmem:[#allocation2 + $0x40] sm:$0xff] (!%p1124_p12), %v1324_v0  ;;  %412 = vst [vmem:[#allocation2 + $0x48] sm:$0xff] (!%p1124_p12), %v1324_v0 }
  0x4c   : > { %413 = vst [vmem:[#allocation2 + $0x50] sm:$0xff] (!%p1124_p12), %v1324_v0  ;;  %414 = vst [vmem:[#allocation2 + $0x58] sm:$0xff] (!%p1124_p12), %v1324_v0 }
  0x4d   : > { %415 = vst [vmem:[#allocation2 + $0x60] sm:$0xff] (!%p1124_p12), %v1324_v0  ;;  %416 = vst [vmem:[#allocation2 + $0x68] sm:$0xff] (!%p1124_p12), %v1324_v0 }
  0x4e   : > { %417 = vst [vmem:[#allocation2 + $0x70] sm:$0xff] (!%p1124_p12), %v1324_v0  ;;  %418 = vst [vmem:[#allocation2 + $0x78] sm:$0xff] (!%p1124_p12), %v1324_v0 }
  0x4f   : > { %419 = vst [vmem:[#allocation2 + $0x80] sm:$0xff] %v1324_v0  ;;  %420 = vst [vmem:[#allocation2 + $0x88] sm:$0xff] %v1324_v0 }
  0x50   : > { %421 = vst [vmem:[#allocation2 + $0x90] sm:$0xff] %v1324_v0  ;;  %422 = vst [vmem:[#allocation2 + $0x98] sm:$0xff] %v1324_v0 }
  0x51   : > { %423 = vst [vmem:[#allocation2 + $0xa0] sm:$0xff] %v1324_v0  ;;  %424 = vst [vmem:[#allocation2 + $0xa8] sm:$0xff] %v1324_v0 }
  0x52   : > { %425 = vst [vmem:[#allocation2 + $0xb0] sm:$0xff] %v1324_v0  ;;  %426 = vst [vmem:[#allocation2 + $0xb8] sm:$0xff] %v1324_v0 }
  0x53   : > { %427 = vst [vmem:[#allocation2 + $0xc0] sm:$0xff] %v1324_v0  ;;  %428 = vst [vmem:[#allocation2 + $0xc8] sm:$0xff] %v1324_v0 }
  0x54   : > { %429 = vst [vmem:[#allocation2 + $0xd0] sm:$0xff] %v1324_v0  ;;  %430 = vst [vmem:[#allocation2 + $0xd8] sm:$0xff] %v1324_v0 }
  0x55   : > { %431 = vst [vmem:[#allocation2 + $0xe0] sm:$0xff] %v1324_v0  ;;  %432 = vst [vmem:[#allocation2 + $0xe8] sm:$0xff] %v1324_v0 }
  0x56   : > { %433 = vst [vmem:[#allocation2 + $0xf0] sm:$0xff] %v1324_v0  ;;  %434 = vst [vmem:[#allocation2 + $0xf8] sm:$0xff] %v1324_v0 }
  0x57 PF: > { %v531_v1 = vld [vmem:[%s1546_s26] sm:$0xff]  ;;  %v532_v2 = vld [vmem:[%s1546_s26 + $0x8] sm:$0xff]  ;;  %v533_v3 = vld [vmem:[%s1546_s26 + $0x10] sm:$0xff]  ;;  %v1325_v4 = vmov 0.0|0.0   ;;  %p1125_p13 = scmp.ne.s32.totalorder %s1306_s14, 2 }
  0x58   : > { %1129 = vmatprep.subr.bf16.mxu0 %v1325_v4  ;;  %1177 = vmatprep.subr.bf16.mxu1 %v1325_v4  ;;  %v1130_v5 = vpack.c.bf16 %v532_v2, %v531_v1  ;;  %v534_v6 = vld [vmem:[%s1546_s26 + $0x18] sm:$0xff]  ;;  %v535_v8 = vld [vmem:[%s1546_s26 + $0x20] sm:$0xff]  ;;  %v536_v9 = vld [vmem:[%s1546_s26 + $0x28] sm:$0xff] }
  0x59   : > { %v1133_v7 = vpack.c.bf16 %v534_v6, %v533_v3  ;;  %v1136_v10 = vpack.c.bf16 %v536_v9, %v535_v8  ;;  %v537_v11 = vld [vmem:[%s1546_s26 + $0x30] sm:$0xff]  ;;  %v538_v12 = vld [vmem:[%s1546_s26 + $0x38] sm:$0xff]  ;;  %v468_v13 = vld [vmem:[%s1553_s12 + $0x8] sm:$0xff] }
  0x5a   : > { %1131 = vmatpush1.bf16.msra.mxu0 %v1130_v5  ;;  %1193 = vmatpush1.bf16.msra.mxu1 %v1130_v5  ;;  %v1139_v14 = vpack.c.bf16 %v538_v12, %v537_v11  ;;  %v500_v15 = vld [vmem:[%s1553_s12 + $0x108] sm:$0xff]  ;;  %v539_v16 = vld [vmem:[%s1546_s26 + $0x40] sm:$0xff]  ;;  %v541_v19 = vld [vmem:[%s1546_s26 + $0x50] sm:$0xff] }
  0x5b   : > { %1132 = vmatprep.subr.bf16.mxu0 %v1325_v4  ;;  %1178 = vmatprep.subr.bf16.mxu1 %v1325_v4  ;;  %v540_v17 = vld [vmem:[%s1546_s26 + $0x48] sm:$0xff]  ;;  %v542_v20 = vld [vmem:[%s1546_s26 + $0x58] sm:$0xff]  ;;  %v543_v22 = vld [vmem:[%s1546_s26 + $0x60] sm:$0xff] }
  0x5c   : > { %627 = vmatprep.mubr.f32.mxu0 %v468_v13  ;;  %707 = vmatprep.mubr.f32.mxu1 %v500_v15  ;;  %v1142_v18 = vpack.c.bf16 %v540_v17, %v539_v16  ;;  %v1145_v21 = vpack.c.bf16 %v542_v20, %v541_v19  ;;  %v544_v23 = vld [vmem:[%s1546_s26 + $0x68] sm:$0xff]  ;;  %v545_v25 = vld [vmem:[%s1546_s26 + $0x70] sm:$0xff]  ;;  %v546_v26 = vld [vmem:[%s1546_s26 + $0x78] sm:$0xff] }
  0x5d   : > { %v1148_v24 = vpack.c.bf16 %v544_v23, %v543_v22  ;;  %v1151_v27 = vpack.c.bf16 %v546_v26, %v545_v25  ;;  %v547_v28 = vld [vmem:[%s1546_s26 + $0x80] sm:$0xff]  ;;  %v548_v29 = vld [vmem:[%s1546_s26 + $0x88] sm:$0xff]  ;;  %v549_v31 = vld [vmem:[%s1546_s26 + $0x90] sm:$0xff] }
  0x5e   : > { %1134 = vmatpush1.bf16.msra.mxu0 %v1133_v7  ;;  %1194 = vmatpush1.bf16.msra.mxu1 %v1133_v7  ;;  %v1154_v30 = vpack.c.bf16 %v548_v29, %v547_v28  ;;  %v550_v32 = vld [vmem:[%s1546_s26 + $0x98] sm:$0xff]  ;;  %v551_v34 = vld [vmem:[%s1546_s26 + $0xa0] sm:$0xff]  ;;  %v552_v35 = vld [vmem:[%s1546_s26 + $0xa8] sm:$0xff] }
  0x5f   : > { %1135 = vmatprep.subr.bf16.mxu0 %v1325_v4  ;;  %1179 = vmatprep.subr.bf16.mxu1 %v1325_v4  ;;  %v1157_v33 = vpack.c.bf16 %v550_v32, %v549_v31  ;;  %v1160_v36 = vpack.c.bf16 %v552_v35, %v551_v34  ;;  %v553_v37 = vld [vmem:[%s1546_s26 + $0xb0] sm:$0xff]  ;;  %v554_v38 = vld [vmem:[%s1546_s26 + $0xb8] sm:$0xff]  ;;  %v555_v40 = vld [vmem:[%s1546_s26 + $0xc0] sm:$0xff] }
  0x60   : > { %v1163_v39 = vpack.c.bf16 %v554_v38, %v553_v37  ;;  %v556_v41 = vld [vmem:[%s1546_s26 + $0xc8] sm:$0xff]  ;;  %v557_v43 = vld [vmem:[%s1546_s26 + $0xd0] sm:$0xff]  ;;  %v558_v44 = vld [vmem:[%s1546_s26 + $0xd8] sm:$0xff] }
  0x61   : > { %v1166_v42 = vpack.c.bf16 %v556_v41, %v555_v40  ;;  %v1169_v45 = vpack.c.bf16 %v558_v44, %v557_v43  ;;  %v559_v46 = vld [vmem:[%s1546_s26 + $0xe0] sm:$0xff]  ;;  %v560_v47 = vld [vmem:[%s1546_s26 + $0xe8] sm:$0xff]  ;;  %v561_v49 = vld [vmem:[%s1546_s26 + $0xf0] sm:$0xff] }
  0x62   : > { %1137 = vmatpush1.bf16.msra.mxu0 %v1136_v10  ;;  %1195 = vmatpush1.bf16.msra.mxu1 %v1136_v10  ;;  %v1172_v48 = vpack.c.bf16 %v560_v47, %v559_v46  ;;  %v562_v50 = vld [vmem:[%s1546_s26 + $0xf8] sm:$0xff]  ;;  %v467_v52 = vld [vmem:[%s1553_s12] sm:$0xff]  ;;  %v469_v56 = vld [vmem:[%s1553_s12 + $0x10] sm:$0xff] }
  0x63   : > { %1138 = vmatprep.subr.bf16.mxu0 %v1325_v4  ;;  %1180 = vmatprep.subr.bf16.mxu1 %v1325_v4  ;;  %v1175_v51 = vpack.c.bf16 %v562_v50, %v561_v49  ;;  %v499_v53 = vld [vmem:[%s1553_s12 + $0x100] sm:$0xff]  ;;  %v470_v54 = vld [vmem:[%s1553_s12 + $0x18] sm:$0xff]  ;;  %v501_v57 = vld [vmem:[%s1553_s12 + $0x110] sm:$0xff] }
  0x64   : > { %v502_v55 = vld [vmem:[%s1553_s12 + $0x118] sm:$0xff]  ;;  %v472_v58 = vld [vmem:[%s1553_s12 + $0x28] sm:$0xff]  ;;  %v471_v60 = vld [vmem:[%s1553_s12 + $0x20] sm:$0xff] }
  0x65   : > { %v504_v59 = vld [vmem:[%s1553_s12 + $0x128] sm:$0xff]  ;;  %v503_v61 = vld [vmem:[%s1553_s12 + $0x120] sm:$0xff]  ;;  %v474_v62 = vld [vmem:[%s1553_s12 + $0x38] sm:$0xff] }
  0x66   : > { %1140 = vmatpush1.bf16.msra.mxu0 %v1139_v14  ;;  %1196 = vmatpush1.bf16.msra.mxu1 %v1139_v14  ;;  %v506_v63 = vld [vmem:[%s1553_s12 + $0x138] sm:$0xff]  ;;  %v473_v0 = vld [vmem:[%s1553_s12 + $0x30] sm:$0xff]  ;;  %v476_v2 = vld [vmem:[%s1553_s12 + $0x48] sm:$0xff] }
  0x67   : > { %1141 = vmatprep.subr.bf16.mxu0 %v1325_v4  ;;  %1181 = vmatprep.subr.bf16.mxu1 %v1325_v4  ;;  %v505_v1 = vld [vmem:[%s1553_s12 + $0x130] sm:$0xff]  ;;  %v508_v3 = vld [vmem:[%s1553_s12 + $0x148] sm:$0xff]  ;;  %v507_v5 = vld [vmem:[%s1553_s12 + $0x140] sm:$0xff] }
  0x68   : > { %v478_v6 = vld [vmem:[%s1553_s12 + $0x58] sm:$0xff]  ;;  %v477_v8 = vld [vmem:[%s1553_s12 + $0x50] sm:$0xff]  ;;  %v480_v10 = vld [vmem:[%s1553_s12 + $0x68] sm:$0xff] }
  0x69   : > { %v510_v7 = vld [vmem:[%s1553_s12 + $0x158] sm:$0xff]  ;;  %v509_v9 = vld [vmem:[%s1553_s12 + $0x150] sm:$0xff]  ;;  %v512_v11 = vld [vmem:[%s1553_s12 + $0x168] sm:$0xff] }
  0x6a   : > { %1143 = vmatpush1.bf16.msra.mxu0 %v1142_v18  ;;  %1197 = vmatpush1.bf16.msra.mxu1 %v1142_v18  ;;  %v479_v12 = vld [vmem:[%s1553_s12 + $0x60] sm:$0xff]  ;;  %v482_v14 = vld [vmem:[%s1553_s12 + $0x78] sm:$0xff]  ;;  %v481_v16 = vld [vmem:[%s1553_s12 + $0x70] sm:$0xff] }
  0x6b   : > { %1144 = vmatprep.subr.bf16.mxu0 %v1325_v4  ;;  %1182 = vmatprep.subr.bf16.mxu1 %v1325_v4  ;;  %v511_v13 = vld [vmem:[%s1553_s12 + $0x160] sm:$0xff]  ;;  %v514_v15 = vld [vmem:[%s1553_s12 + $0x178] sm:$0xff]  ;;  %v513_v17 = vld [vmem:[%s1553_s12 + $0x170] sm:$0xff] }
  0x6c   : > { %v484_v18 = vld [vmem:[%s1553_s12 + $0x88] sm:$0xff]  ;;  %v483_v20 = vld [vmem:[%s1553_s12 + $0x80] sm:$0xff]  ;;  %v486_v22 = vld [vmem:[%s1553_s12 + $0x98] sm:$0xff] }
  0x6d   : > { %v516_v19 = vld [vmem:[%s1553_s12 + $0x188] sm:$0xff]  ;;  %v518_v23 = vld [vmem:[%s1553_s12 + $0x198] sm:$0xff]  ;;  %v517_v25 = vld [vmem:[%s1553_s12 + $0x190] sm:$0xff] }
  0x6e   : > { %1146 = vmatpush1.bf16.msra.mxu0 %v1145_v21  ;;  %1198 = vmatpush1.bf16.msra.mxu1 %v1145_v21  ;;  %v515_v21 = vld [vmem:[%s1553_s12 + $0x180] sm:$0xff]  ;;  %v488_v26 = vld [vmem:[%s1553_s12 + $0xa8] sm:$0xff]  ;;  %v522_v31 = vld [vmem:[%s1553_s12 + $0x1b8] sm:$0xff] }
  0x6f   : > { %1147 = vmatprep.subr.bf16.mxu0 %v1325_v4  ;;  %1183 = vmatprep.subr.bf16.mxu1 %v1325_v4  ;;  %v487_v28 = vld [vmem:[%s1553_s12 + $0xa0] sm:$0xff]  ;;  %v489_v32 = vld [vmem:[%s1553_s12 + $0xb0] sm:$0xff]  ;;  %v492_v34 = vld [vmem:[%s1553_s12 + $0xc8] sm:$0xff] }
  0x70   : > { %v519_v29 = vld [vmem:[%s1553_s12 + $0x1a0] sm:$0xff]  ;;  %v524_v35 = vld [vmem:[%s1553_s12 + $0x1c8] sm:$0xff]  ;;  %v494_v38 = vld [vmem:[%s1553_s12 + $0xd8] sm:$0xff] }
  0x71   : > { %v523_v37 = vld [vmem:[%s1553_s12 + $0x1c0] sm:$0xff]  ;;  %v493_v40 = vld [vmem:[%s1553_s12 + $0xd0] sm:$0xff]  ;;  %v528_v43 = vld [vmem:[%s1553_s12 + $0x1e8] sm:$0xff] }
  0x72   : > { %1149 = vmatpush1.bf16.msra.mxu0 %v1148_v24  ;;  %1199 = vmatpush1.bf16.msra.mxu1 %v1148_v24  ;;  %v485_v24 = vld [vmem:[%s1553_s12 + $0x90] sm:$0xff]  ;;  %v495_v44 = vld [vmem:[%s1553_s12 + $0xe0] sm:$0xff]  ;;  %v498_v46 = vld [vmem:[%s1553_s12 + $0xf8] sm:$0xff] }
  0x73   : > { %1150 = vmatprep.subr.bf16.mxu0 %v1325_v4  ;;  %1184 = vmatprep.subr.bf16.mxu1 %v1325_v4  ;;  %v525_v41 = vld [vmem:[%s1553_s12 + $0x1d0] sm:$0xff]  ;;  %v530_v47 = vld [vmem:[%s1553_s12 + $0x1f8] sm:$0xff]  ;;  %v435_v50 = vld [vmem:[#allocation2] sm:$0xff] }
  0x74   : > { %v529_v49 = vld [vmem:[%s1553_s12 + $0x1f0] sm:$0xff] }
  0x76   : > { %1152 = vmatpush1.bf16.msra.mxu0 %v1151_v27  ;;  %1200 = vmatpush1.bf16.msra.mxu1 %v1151_v27  ;;  %v520_v27 = vld [vmem:[%s1553_s12 + $0x1a8] sm:$0xff] }
  0x77   : > { %1153 = vmatprep.subr.bf16.mxu0 %v1325_v4  ;;  %1185 = vmatprep.subr.bf16.mxu1 %v1325_v4 }
  0x7a   : > { %1155 = vmatpush1.bf16.msra.mxu0 %v1154_v30  ;;  %1201 = vmatpush1.bf16.msra.mxu1 %v1154_v30  ;;  %v490_v30 = vld [vmem:[%s1553_s12 + $0xb8] sm:$0xff] }
  0x7b   : > { %1156 = vmatprep.subr.bf16.mxu0 %v1325_v4  ;;  %1186 = vmatprep.subr.bf16.mxu1 %v1325_v4 }
  0x7e   : > { %1158 = vmatpush1.bf16.msra.mxu0 %v1157_v33  ;;  %1202 = vmatpush1.bf16.msra.mxu1 %v1157_v33  ;;  %v521_v33 = vld [vmem:[%s1553_s12 + $0x1b0] sm:$0xff] }
  0x7f   : > { %1159 = vmatprep.subr.bf16.mxu0 %v1325_v4  ;;  %1187 = vmatprep.subr.bf16.mxu1 %v1325_v4 }
  0x82   : > { %1161 = vmatpush1.bf16.msra.mxu0 %v1160_v36  ;;  %1203 = vmatpush1.bf16.msra.mxu1 %v1160_v36  ;;  %v491_v36 = vld [vmem:[%s1553_s12 + $0xc0] sm:$0xff] }
  0x83   : > { %1162 = vmatprep.subr.bf16.mxu0 %v1325_v4  ;;  %1188 = vmatprep.subr.bf16.mxu1 %v1325_v4 }
  0x86   : > { %1164 = vmatpush1.bf16.msra.mxu0 %v1163_v39  ;;  %1204 = vmatpush1.bf16.msra.mxu1 %v1163_v39  ;;  %v526_v39 = vld [vmem:[%s1553_s12 + $0x1d8] sm:$0xff] }
  0x87   : > { %1165 = vmatprep.subr.bf16.mxu0 %v1325_v4  ;;  %1189 = vmatprep.subr.bf16.mxu1 %v1325_v4 }
  0x8a   : > { %1167 = vmatpush1.bf16.msra.mxu0 %v1166_v42  ;;  %1205 = vmatpush1.bf16.msra.mxu1 %v1166_v42  ;;  %v496_v42 = vld [vmem:[%s1553_s12 + $0xe8] sm:$0xff] }
  0x8b   : > { %1168 = vmatprep.subr.bf16.mxu0 %v1325_v4  ;;  %1190 = vmatprep.subr.bf16.mxu1 %v1325_v4 }
  0x8e   : > { %1170 = vmatpush1.bf16.msra.mxu0 %v1169_v45  ;;  %1206 = vmatpush1.bf16.msra.mxu1 %v1169_v45  ;;  %v527_v45 = vld [vmem:[%s1553_s12 + $0x1e0] sm:$0xff] }
  0x8f   : > { %1171 = vmatprep.subr.bf16.mxu0 %v1325_v4  ;;  %1191 = vmatprep.subr.bf16.mxu1 %v1325_v4 }
  0x92   : > { %1173 = vmatpush1.bf16.msra.mxu0 %v1172_v48  ;;  %1207 = vmatpush1.bf16.msra.mxu1 %v1172_v48  ;;  %v497_v48 = vld [vmem:[%s1553_s12 + $0xf0] sm:$0xff] }
  0x93   : > { %1174 = vmatprep.subr.bf16.mxu0 %v1325_v4  ;;  %1192 = vmatprep.subr.bf16.mxu1 %v1325_v4  ;;  %v475_v4 = vld [vmem:[%s1553_s12 + $0x40] sm:$0xff] }
  0x96   : > { %1176 = vmatpush1.bf16.msra.mxu0 %v1175_v51  ;;  %1208 = vmatpush1.bf16.msra.mxu1 %v1175_v51  ;;  %v451_v51 = vld [vmem:[#allocation2 + $0x80] sm:$0xff] }
  0x99   : > { %628 = vmatmul.mubr.f32.vlgmr.msra.gmra.mrb[0].mxu0 %v467_v52  ;;  %708 = vmatmul.mubr.f32.vlgmr.msra.gmra.mrb[0].mxu1 %v499_v53 }
  0x9a   : > { %632 = vmatprep.mubr.f32.mxu0 %v470_v54  ;;  %712 = vmatprep.mubr.f32.mxu1 %v502_v55 }
  0x9d   : > { %633 = vmatmul.mubr.f32.gmra.mrb[2].mxu0 %v469_v56  ;;  %713 = vmatmul.mubr.f32.gmra.mrb[2].mxu1 %v501_v57 }
  0x9e   : > { %637 = vmatprep.mubr.f32.mxu0 %v472_v58  ;;  %717 = vmatprep.mubr.f32.mxu1 %v504_v59  ;;  %v436_v58 = vld [vmem:[#allocation2 + $0x8] sm:$0xff] }
  0x9f   : > { %v452_v59 = vld [vmem:[#allocation2 + $0x88] sm:$0xff] }
  0xa1   : > { %638 = vmatmul.mubr.f32.gmra.mrb[4].mxu0 %v471_v60  ;;  %718 = vmatmul.mubr.f32.gmra.mrb[4].mxu1 %v503_v61 }
  0xa2   : > { %642 = vmatprep.mubr.f32.mxu0 %v474_v62  ;;  %722 = vmatprep.mubr.f32.mxu1 %v506_v63 }
  0xa5   : > { %643 = vmatmul.mubr.f32.gmra.mrb[6].mxu0 %v473_v0  ;;  %723 = vmatmul.mubr.f32.gmra.mrb[6].mxu1 %v505_v1 }
  0xa6   : > { %647 = vmatprep.mubr.f32.mxu0 %v476_v2  ;;  %727 = vmatprep.mubr.f32.mxu1 %v508_v3  ;;  %v437_v2 = vld [vmem:[#allocation2 + $0x10] sm:$0xff] }
  0xa7   : > { %v453_v3 = vld [vmem:[#allocation2 + $0x90] sm:$0xff] }
  0xa9   : > { %648 = vmatmul.mubr.f32.gmra.mrb[8].mxu0 %v475_v4  ;;  %728 = vmatmul.mubr.f32.gmra.mrb[8].mxu1 %v507_v5 }
  0xaa   : > { %652 = vmatprep.mubr.f32.mxu0 %v478_v6  ;;  %732 = vmatprep.mubr.f32.mxu1 %v510_v7 }
  0xad   : > { %653 = vmatmul.mubr.f32.gmra.mrb[10].mxu0 %v477_v8  ;;  %733 = vmatmul.mubr.f32.gmra.mrb[10].mxu1 %v509_v9 }
  0xae   : > { %657 = vmatprep.mubr.f32.mxu0 %v480_v10  ;;  %737 = vmatprep.mubr.f32.mxu1 %v512_v11  ;;  %v438_v10 = vld [vmem:[#allocation2 + $0x18] sm:$0xff] }
  0xaf   : > { %v454_v11 = vld [vmem:[#allocation2 + $0x98] sm:$0xff] }
  0xb1   : > { %658 = vmatmul.mubr.f32.gmra.mrb[12].mxu0 %v479_v12  ;;  %738 = vmatmul.mubr.f32.gmra.mrb[12].mxu1 %v511_v13 }
  0xb2   : > { %662 = vmatprep.mubr.f32.mxu0 %v482_v14  ;;  %742 = vmatprep.mubr.f32.mxu1 %v514_v15 }
  0xb5   : > { %663 = vmatmul.mubr.f32.gmra.mrb[14].mxu0 %v481_v16  ;;  %743 = vmatmul.mubr.f32.gmra.mrb[14].mxu1 %v513_v17 }
  0xb6   : > { %667 = vmatprep.mubr.f32.mxu0 %v484_v18  ;;  %747 = vmatprep.mubr.f32.mxu1 %v516_v19  ;;  %v439_v18 = vld [vmem:[#allocation2 + $0x20] sm:$0xff] }
  0xb7   : > { %v455_v19 = vld [vmem:[#allocation2 + $0xa0] sm:$0xff] }
  0xb9   : > { %668 = vmatmul.mubr.f32.gmra.mrb[16].mxu0 %v483_v20  ;;  %748 = vmatmul.mubr.f32.gmra.mrb[16].mxu1 %v515_v21 }
  0xba   : > { %672 = vmatprep.mubr.f32.mxu0 %v486_v22  ;;  %752 = vmatprep.mubr.f32.mxu1 %v518_v23 }
  0xbd   : > { %673 = vmatmul.mubr.f32.gmra.mrb[18].mxu0 %v485_v24  ;;  %753 = vmatmul.mubr.f32.gmra.mrb[18].mxu1 %v517_v25 }
  0xbe   : > { %677 = vmatprep.mubr.f32.mxu0 %v488_v26  ;;  %757 = vmatprep.mubr.f32.mxu1 %v520_v27  ;;  %v440_v26 = vld [vmem:[#allocation2 + $0x28] sm:$0xff] }
  0xbf   : > { %v456_v27 = vld [vmem:[#allocation2 + $0xa8] sm:$0xff] }
  0xc1   : > { %678 = vmatmul.mubr.f32.gmra.mrb[20].mxu0 %v487_v28  ;;  %758 = vmatmul.mubr.f32.gmra.mrb[20].mxu1 %v519_v29 }
  0xc2   : > { %682 = vmatprep.mubr.f32.mxu0 %v490_v30  ;;  %762 = vmatprep.mubr.f32.mxu1 %v522_v31 }
  0xc5   : > { %683 = vmatmul.mubr.f32.gmra.mrb[22].mxu0 %v489_v32  ;;  %763 = vmatmul.mubr.f32.gmra.mrb[22].mxu1 %v521_v33 }
  0xc6   : > { %687 = vmatprep.mubr.f32.mxu0 %v492_v34  ;;  %767 = vmatprep.mubr.f32.mxu1 %v524_v35  ;;  %v441_v34 = vld [vmem:[#allocation2 + $0x30] sm:$0xff] }
  0xc7   : > { %v457_v35 = vld [vmem:[#allocation2 + $0xb0] sm:$0xff] }
  0xc9   : > { %688 = vmatmul.mubr.f32.gmra.mrb[24].mxu0 %v491_v36  ;;  %768 = vmatmul.mubr.f32.gmra.mrb[24].mxu1 %v523_v37 }
  0xca   : > { %692 = vmatprep.mubr.f32.mxu0 %v494_v38  ;;  %772 = vmatprep.mubr.f32.mxu1 %v526_v39 }
  0xcd   : > { %693 = vmatmul.mubr.f32.gmra.mrb[26].mxu0 %v493_v40  ;;  %773 = vmatmul.mubr.f32.gmra.mrb[26].mxu1 %v525_v41 }
  0xce   : > { %697 = vmatprep.mubr.f32.mxu0 %v496_v42  ;;  %777 = vmatprep.mubr.f32.mxu1 %v528_v43  ;;  %v442_v42 = vld [vmem:[#allocation2 + $0x38] sm:$0xff] }
  0xcf   : > { %v458_v43 = vld [vmem:[#allocation2 + $0xb8] sm:$0xff] }
  0xd1   : > { %698 = vmatmul.mubr.f32.gmra.mrb[28].mxu0 %v495_v44  ;;  %778 = vmatmul.mubr.f32.gmra.mrb[28].mxu1 %v527_v45 }
  0xd2   : > { %702 = vmatprep.mubr.f32.mxu0 %v498_v46  ;;  %782 = vmatprep.mubr.f32.mxu1 %v530_v47 }
  0xd5   : > { %703 = vmatmul.mubr.f32.gmra.mrb[30].mxu0 %v497_v48  ;;  %783 = vmatmul.mubr.f32.gmra.mrb[30].mxu1 %v529_v49 }
 0x16c   : > { %v629_v52 = vpop.f32.mrb[0].mxu0  ;;  %v709_v53 = vpop.f32.mrb[0].mxu1 }
 0x16d   : > { %v788_v54 = vadd.f32 %v629_v52, %v435_v50  ;;  %v804_v55 = vadd.f32 %v709_v53, %v451_v51  ;;  %v631_v56 = vpop.f32.mrb[1].mxu0  ;;  %v711_v57 = vpop.f32.mrb[1].mxu1  ;;  %v443_v50 = vld [vmem:[#allocation2 + $0x40] sm:$0xff] }
 0x16e   : > { %v459_v51 = vld [vmem:[#allocation2 + $0xc0] sm:$0xff] }
 0x16f   : > { %820 = vst [vmem:[#allocation2] sm:$0xff] %v788_v54  ;;  %836 = vst [vmem:[#allocation2 + $0x80] sm:$0xff] %v804_v55 }
 0x170   : > { %v634_v60 = vpop.f32.mrb[2].mxu0  ;;  %v714_v61 = vpop.f32.mrb[2].mxu1 }
 0x171   : > { %v789_v62 = vadd.f32 %v634_v60, %v436_v58  ;;  %v805_v63 = vadd.f32 %v714_v61, %v452_v59  ;;  %v636_v0 = vpop.f32.mrb[3].mxu0  ;;  %v716_v1 = vpop.f32.mrb[3].mxu1  ;;  %v444_v58 = vld [vmem:[#allocation2 + $0x48] sm:$0xff] }
 0x172   : > { %v460_v59 = vld [vmem:[#allocation2 + $0xc8] sm:$0xff] }
 0x173   : > { %821 = vst [vmem:[#allocation2 + $0x8] sm:$0xff] %v789_v62  ;;  %837 = vst [vmem:[#allocation2 + $0x88] sm:$0xff] %v805_v63 }
 0x174   : > { %v639_v4 = vpop.f32.mrb[4].mxu0  ;;  %v719_v5 = vpop.f32.mrb[4].mxu1 }
 0x175   : > { %v790_v6 = vadd.f32 %v639_v4, %v437_v2  ;;  %v806_v7 = vadd.f32 %v719_v5, %v453_v3  ;;  %v641_v8 = vpop.f32.mrb[5].mxu0  ;;  %v721_v9 = vpop.f32.mrb[5].mxu1  ;;  %v445_v2 = vld [vmem:[#allocation2 + $0x50] sm:$0xff] }
 0x176   : > { %v461_v3 = vld [vmem:[#allocation2 + $0xd0] sm:$0xff] }
 0x177   : > { %822 = vst [vmem:[#allocation2 + $0x10] sm:$0xff] %v790_v6  ;;  %838 = vst [vmem:[#allocation2 + $0x90] sm:$0xff] %v806_v7 }
 0x178   : > { %v644_v12 = vpop.f32.mrb[6].mxu0  ;;  %v724_v13 = vpop.f32.mrb[6].mxu1 }
 0x179   : > { %v791_v14 = vadd.f32 %v644_v12, %v438_v10  ;;  %v807_v15 = vadd.f32 %v724_v13, %v454_v11  ;;  %v646_v16 = vpop.f32.mrb[7].mxu0  ;;  %v726_v17 = vpop.f32.mrb[7].mxu1  ;;  %v446_v10 = vld [vmem:[#allocation2 + $0x58] sm:$0xff] }
 0x17a   : > { %v462_v11 = vld [vmem:[#allocation2 + $0xd8] sm:$0xff] }
 0x17b   : > { %823 = vst [vmem:[#allocation2 + $0x18] sm:$0xff] %v791_v14  ;;  %839 = vst [vmem:[#allocation2 + $0x98] sm:$0xff] %v807_v15 }
 0x17c   : > { %v649_v20 = vpop.f32.mrb[8].mxu0  ;;  %v729_v21 = vpop.f32.mrb[8].mxu1 }
 0x17d   : > { %v792_v22 = vadd.f32 %v649_v20, %v439_v18  ;;  %v808_v23 = vadd.f32 %v729_v21, %v455_v19  ;;  %v651_v24 = vpop.f32.mrb[9].mxu0  ;;  %v731_v25 = vpop.f32.mrb[9].mxu1  ;;  %v447_v18 = vld [vmem:[#allocation2 + $0x60] sm:$0xff] }
 0x17e   : > { %v463_v19 = vld [vmem:[#allocation2 + $0xe0] sm:$0xff] }
 0x17f   : > { %824 = vst [vmem:[#allocation2 + $0x20] sm:$0xff] %v792_v22  ;;  %840 = vst [vmem:[#allocation2 + $0xa0] sm:$0xff] %v808_v23 }
 0x180   : > { %v654_v28 = vpop.f32.mrb[10].mxu0  ;;  %v734_v29 = vpop.f32.mrb[10].mxu1 }
 0x181   : > { %v793_v30 = vadd.f32 %v654_v28, %v440_v26  ;;  %v809_v31 = vadd.f32 %v734_v29, %v456_v27  ;;  %v656_v32 = vpop.f32.mrb[11].mxu0  ;;  %v736_v33 = vpop.f32.mrb[11].mxu1  ;;  %v448_v26 = vld [vmem:[#allocation2 + $0x68] sm:$0xff] }
 0x182   : > { %v464_v27 = vld [vmem:[#allocation2 + $0xe8] sm:$0xff] }
 0x183   : > { %825 = vst [vmem:[#allocation2 + $0x28] sm:$0xff] %v793_v30  ;;  %841 = vst [vmem:[#allocation2 + $0xa8] sm:$0xff] %v809_v31 }
 0x184   : > { %v659_v36 = vpop.f32.mrb[12].mxu0  ;;  %v739_v37 = vpop.f32.mrb[12].mxu1 }
 0x185   : > { %v794_v38 = vadd.f32 %v659_v36, %v441_v34  ;;  %v810_v39 = vadd.f32 %v739_v37, %v457_v35  ;;  %v661_v40 = vpop.f32.mrb[13].mxu0  ;;  %v741_v41 = vpop.f32.mrb[13].mxu1  ;;  %v449_v34 = vld [vmem:[#allocation2 + $0x70] sm:$0xff] }
 0x186   : > { %v465_v35 = vld [vmem:[#allocation2 + $0xf0] sm:$0xff] }
 0x187   : > { %826 = vst [vmem:[#allocation2 + $0x30] sm:$0xff] %v794_v38  ;;  %842 = vst [vmem:[#allocation2 + $0xb0] sm:$0xff] %v810_v39 }
 0x188   : > { %v664_v44 = vpop.f32.mrb[14].mxu0  ;;  %v744_v45 = vpop.f32.mrb[14].mxu1 }
 0x189   : > { %v795_v46 = vadd.f32 %v664_v44, %v442_v42  ;;  %v811_v47 = vadd.f32 %v744_v45, %v458_v43  ;;  %v666_v48 = vpop.f32.mrb[15].mxu0  ;;  %v746_v49 = vpop.f32.mrb[15].mxu1  ;;  %v450_v42 = vld [vmem:[#allocation2 + $0x78] sm:$0xff] }
 0x18a   : > { %v466_v43 = vld [vmem:[#allocation2 + $0xf8] sm:$0xff] }
 0x18b   : > { %827 = vst [vmem:[#allocation2 + $0x38] sm:$0xff] %v795_v46  ;;  %843 = vst [vmem:[#allocation2 + $0xb8] sm:$0xff] %v811_v47 }
 0x18c   : > { %v669_v52 = vpop.f32.mrb[16].mxu0  ;;  %v749_v53 = vpop.f32.mrb[16].mxu1 }
 0x18d   : > { %v796_v54 = vadd.f32 %v669_v52, %v443_v50  ;;  %v812_v55 = vadd.f32 %v749_v53, %v459_v51  ;;  %v671_v56 = vpop.f32.mrb[17].mxu0  ;;  %v751_v57 = vpop.f32.mrb[17].mxu1  ;;  %v856_v50 = vld [vmem:[#allocation2] sm:$0xff] (!%p1125_p13)  ;;  %v857_v52 = vld [vmem:[#allocation2 + $0x8] sm:$0xff] (!%p1125_p13) }
 0x18e   : > { %v1688_v51 = vld [vmem:[%s1777_s2] ss:$0 sm:$0xff] (!%p1125_p13)  ;;  %v859_v56 = vld [vmem:[#allocation2 + $0x18] sm:$0xff] (!%p1125_p13) }
 0x18f   : > { %828 = vst [vmem:[#allocation2 + $0x40] sm:$0xff] %v796_v54  ;;  %844 = vst [vmem:[#allocation2 + $0xc0] sm:$0xff] %v812_v55  ;;  %v895_v53 = vadd.f32 (!%p1125_p13), %v1688_v51, %v856_v50  ;;  %v896_v54 = vadd.f32 (!%p1125_p13), %v1688_v51, %v857_v52  ;;  %v858_v55 = vld [vmem:[#allocation2 + $0x10] sm:$0xff] (!%p1125_p13)  ;;  %v860_v57 = vld [vmem:[#allocation2 + $0x20] sm:$0xff] (!%p1125_p13) }
 0x190   : > { %v674_v60 = vpop.f32.mrb[18].mxu0  ;;  %v754_v61 = vpop.f32.mrb[18].mxu1 }
 0x191   : > { %v797_v62 = vadd.f32 %v674_v60, %v444_v58  ;;  %v813_v63 = vadd.f32 %v754_v61, %v460_v59  ;;  %v676_v0 = vpop.f32.mrb[19].mxu0  ;;  %v756_v1 = vpop.f32.mrb[19].mxu1  ;;  %v897_v58 = vadd.f32 (!%p1125_p13), %v1688_v51, %v858_v55  ;;  %v898_v59 = vadd.f32 (!%p1125_p13), %v1688_v51, %v859_v56  ;;  %v861_v61 = vld [vmem:[#allocation2 + $0x28] sm:$0xff] (!%p1125_p13) }
 0x192   : > { %v899_v60 = vadd.f32 (!%p1125_p13), %v1688_v51, %v860_v57  ;;  %v927_v0 = vmax.f32 (!%p1125_p13), %v895_v53, 0.0  ;;  %v928_v1 = vmax.f32 (!%p1125_p13), %v896_v54, 0.0 }
 0x193   : > { %829 = vst [vmem:[#allocation2 + $0x48] sm:$0xff] %v797_v62  ;;  %845 = vst [vmem:[#allocation2 + $0xc8] sm:$0xff] %v813_v63  ;;  %v862_v62 = vld [vmem:[#allocation2 + $0x30] sm:$0xff] (!%p1125_p13)  ;;  %v863_v63 = vld [vmem:[#allocation2 + $0x38] sm:$0xff] (!%p1125_p13) }
 0x194   : > { %v679_v4 = vpop.f32.mrb[20].mxu0  ;;  %v759_v5 = vpop.f32.mrb[20].mxu1  ;;  %959 = vst [vmem:[%s1551_s30] sm:$0xff] (!%p1125_p13), %v927_v0  ;;  %960 = vst [vmem:[%s1551_s30 + $0x8] sm:$0xff] (!%p1125_p13), %v928_v1 }
 0x195   : > { %v798_v6 = vadd.f32 %v679_v4, %v445_v2  ;;  %v814_v7 = vadd.f32 %v759_v5, %v461_v3  ;;  %v681_v8 = vpop.f32.mrb[21].mxu0  ;;  %v761_v9 = vpop.f32.mrb[21].mxu1  ;;  %v900_v2 = vadd.f32 (!%p1125_p13), %v1688_v51, %v861_v61  ;;  %v901_v3 = vadd.f32 (!%p1125_p13), %v1688_v51, %v862_v62 }
 0x196   : > { %v864_v4 = vld [vmem:[#allocation2 + $0x40] sm:$0xff] (!%p1125_p13)  ;;  %v930_v8 = vmax.f32 (!%p1125_p13), %v898_v59, 0.0  ;;  %v931_v9 = vmax.f32 (!%p1125_p13), %v899_v60, 0.0 }
 0x197   : > { %830 = vst [vmem:[#allocation2 + $0x50] sm:$0xff] %v798_v6  ;;  %846 = vst [vmem:[#allocation2 + $0xd0] sm:$0xff] %v814_v7  ;;  %v929_v7 = vmax.f32 (!%p1125_p13), %v897_v58, 0.0 }
 0x198   : > { %v684_v12 = vpop.f32.mrb[22].mxu0  ;;  %v764_v13 = vpop.f32.mrb[22].mxu1  ;;  %962 = vst [vmem:[%s1551_s30 + $0x18] sm:$0xff] (!%p1125_p13), %v930_v8  ;;  %963 = vst [vmem:[%s1551_s30 + $0x20] sm:$0xff] (!%p1125_p13), %v931_v9 }
 0x199   : > { %v799_v14 = vadd.f32 %v684_v12, %v446_v10  ;;  %v815_v15 = vadd.f32 %v764_v13, %v462_v11  ;;  %v686_v16 = vpop.f32.mrb[23].mxu0  ;;  %v766_v17 = vpop.f32.mrb[23].mxu1  ;;  %v902_v10 = vadd.f32 (!%p1125_p13), %v1688_v51, %v863_v63  ;;  %961 = vst [vmem:[%s1551_s30 + $0x10] sm:$0xff] (!%p1125_p13), %v929_v7 }
 0x19a   : > { %v865_v5 = vld [vmem:[#allocation2 + $0x48] sm:$0xff] (!%p1125_p13)  ;;  %v903_v16 = vadd.f32 (!%p1125_p13), %v1688_v51, %v864_v4 }
 0x19b   : > { %831 = vst [vmem:[#allocation2 + $0x58] sm:$0xff] %v799_v14  ;;  %847 = vst [vmem:[#allocation2 + $0xd8] sm:$0xff] %v815_v15  ;;  %v932_v14 = vmax.f32 (!%p1125_p13), %v900_v2, 0.0  ;;  %v933_v15 = vmax.f32 (!%p1125_p13), %v901_v3, 0.0  ;;  %v904_v17 = vadd.f32 (!%p1125_p13), %v1688_v51, %v865_v5 }
 0x19c   : > { %v689_v20 = vpop.f32.mrb[24].mxu0  ;;  %v769_v21 = vpop.f32.mrb[24].mxu1 }
 0x19d   : > { %v800_v22 = vadd.f32 %v689_v20, %v447_v18  ;;  %v816_v23 = vadd.f32 %v769_v21, %v463_v19  ;;  %v691_v24 = vpop.f32.mrb[25].mxu0  ;;  %v771_v25 = vpop.f32.mrb[25].mxu1  ;;  %v934_v20 = vmax.f32 (!%p1125_p13), %v902_v10, 0.0  ;;  %964 = vst [vmem:[%s1551_s30 + $0x28] sm:$0xff] (!%p1125_p13), %v932_v14  ;;  %965 = vst [vmem:[%s1551_s30 + $0x30] sm:$0xff] (!%p1125_p13), %v933_v15 }
 0x19e   : > { %v866_v6 = vld [vmem:[#allocation2 + $0x50] sm:$0xff] (!%p1125_p13)  ;;  %v872_v24 = vld [vmem:[#allocation2 + $0x80] sm:$0xff] (!%p1125_p13)  ;;  %v873_v25 = vld [vmem:[#allocation2 + $0x88] sm:$0xff] (!%p1125_p13) }
 0x19f   : > { %832 = vst [vmem:[#allocation2 + $0x60] sm:$0xff] %v800_v22  ;;  %848 = vst [vmem:[#allocation2 + $0xe0] sm:$0xff] %v816_v23  ;;  %v905_v21 = vadd.f32 (!%p1125_p13), %v1688_v51, %v866_v6  ;;  %v882_v55 = vld [vmem:[#allocation2 + $0xd0] sm:$0xff] (!%p1125_p13) }
 0x1a0   : > { %v694_v28 = vpop.f32.mrb[26].mxu0  ;;  %v774_v29 = vpop.f32.mrb[26].mxu1  ;;  %966 = vst [vmem:[%s1551_s30 + $0x38] sm:$0xff] (!%p1125_p13), %v934_v20  ;;  %v921_v6 = vadd.f32 (!%p1125_p13), %v1688_v51, %v882_v55 }
 0x1a1   : > { %v801_v30 = vadd.f32 %v694_v28, %v448_v26  ;;  %v817_v31 = vadd.f32 %v774_v29, %v464_v27  ;;  %v696_v32 = vpop.f32.mrb[27].mxu0  ;;  %v776_v33 = vpop.f32.mrb[27].mxu1  ;;  %v935_v26 = vmax.f32 (!%p1125_p13), %v903_v16, 0.0  ;;  %v936_v27 = vmax.f32 (!%p1125_p13), %v904_v17, 0.0 }
 0x1a2   : > { %v867_v11 = vld [vmem:[#allocation2 + $0x58] sm:$0xff] (!%p1125_p13)  ;;  %v876_v32 = vld [vmem:[#allocation2 + $0xa0] sm:$0xff] (!%p1125_p13)  ;;  %v937_v33 = vmax.f32 (!%p1125_p13), %v905_v21, 0.0 }
 0x1a3   : > { %833 = vst [vmem:[#allocation2 + $0x68] sm:$0xff] %v801_v30  ;;  %849 = vst [vmem:[#allocation2 + $0xe8] sm:$0xff] %v817_v31  ;;  %v906_v22 = vadd.f32 (!%p1125_p13), %v1688_v51, %v867_v11  ;;  %v874_v30 = vld [vmem:[#allocation2 + $0x90] sm:$0xff] (!%p1125_p13)  ;;  %v875_v31 = vld [vmem:[#allocation2 + $0x98] sm:$0xff] (!%p1125_p13) }
 0x1a4   : > { %v699_v36 = vpop.f32.mrb[28].mxu0  ;;  %v779_v37 = vpop.f32.mrb[28].mxu1  ;;  %967 = vst [vmem:[%s1551_s30 + $0x40] sm:$0xff] (!%p1125_p13), %v935_v26  ;;  %968 = vst [vmem:[%s1551_s30 + $0x48] sm:$0xff] (!%p1125_p13), %v936_v27  ;;  %v883_v56 = vld [vmem:[#allocation2 + $0xd8] sm:$0xff] (!%p1125_p13) }
 0x1a5   : > { %v802_v38 = vadd.f32 %v699_v36, %v449_v34  ;;  %v818_v39 = vadd.f32 %v779_v37, %v465_v35  ;;  %v701_v40 = vpop.f32.mrb[29].mxu0  ;;  %v781_v41 = vpop.f32.mrb[29].mxu1  ;;  %855 = sbr.rel (%p1125_p13) target bundleno = 441 (0x1b9), region = 63  ;;  %v938_v34 = vmax.f32 (!%p1125_p13), %v906_v22, 0.0  ;;  %v877_v37 = vld [vmem:[#allocation2 + $0xa8] sm:$0xff] (!%p1125_p13)  ;;  %969 = vst [vmem:[%s1551_s30 + $0x50] sm:$0xff] (!%p1125_p13), %v937_v33  ;;  %v922_v7 = vadd.f32 (!%p1125_p13), %v1688_v51, %v883_v56 }
 0x1a6   : > { %v868_v12 = vld [vmem:[#allocation2 + $0x60] sm:$0xff] (!%p1125_p13)  ;;  %v911_v41 = vadd.f32 (!%p1125_p13), %v1688_v51, %v872_v24  ;;  %v916_v53 = vadd.f32 (!%p1125_p13), %v1688_v51, %v877_v37 }
 0x1a7   : > { %834 = vst [vmem:[#allocation2 + $0x70] sm:$0xff] %v802_v38  ;;  %850 = vst [vmem:[#allocation2 + $0xf0] sm:$0xff] %v818_v39  ;;  %v907_v23 = vadd.f32 (!%p1125_p13), %v1688_v51, %v868_v12  ;;  %v878_v38 = vld [vmem:[#allocation2 + $0xb0] sm:$0xff] (!%p1125_p13)  ;;  %v884_v57 = vld [vmem:[#allocation2 + $0xe0] sm:$0xff] (!%p1125_p13)  ;;  %v954_v14 = vmax.f32 (!%p1125_p13), %v922_v7, 0.0 }
 0x1a8   : > { %v704_v44 = vpop.f32.mrb[30].mxu0  ;;  %v784_v45 = vpop.f32.mrb[30].mxu1  ;;  %970 = vst [vmem:[%s1551_s30 + $0x58] sm:$0xff] (!%p1125_p13), %v938_v34  ;;  %v943_v50 = vmax.f32 (!%p1125_p13), %v911_v41, 0.0  ;;  %v917_v54 = vadd.f32 (!%p1125_p13), %v1688_v51, %v878_v38  ;;  %v948_v0 = vmax.f32 (!%p1125_p13), %v916_v53, 0.0  ;;  %v923_v8 = vadd.f32 (!%p1125_p13), %v1688_v51, %v884_v57 }
 0x1a9   : > { %v803_v46 = vadd.f32 %v704_v44, %v450_v42  ;;  %v819_v47 = vadd.f32 %v784_v45, %v466_v43  ;;  %v706_v48 = vpop.f32.mrb[31].mxu0  ;;  %v786_v49 = vpop.f32.mrb[31].mxu1  ;;  %v939_v35 = vmax.f32 (!%p1125_p13), %v907_v23, 0.0  ;;  %v912_v42 = vadd.f32 (!%p1125_p13), %v1688_v51, %v873_v25  ;;  %v879_v43 = vld [vmem:[#allocation2 + $0xb8] sm:$0xff] (!%p1125_p13)  ;;  %986 = vst [vmem:[%s1551_s30 + $0xd8] sm:$0xff] (!%p1125_p13), %v954_v14 }
 0x1aa   : > { %v869_v13 = vld [vmem:[#allocation2 + $0x68] sm:$0xff] (!%p1125_p13)  ;;  %v913_v45 = vadd.f32 (!%p1125_p13), %v1688_v51, %v874_v30  ;;  %v880_v48 = vld [vmem:[#allocation2 + $0xc0] sm:$0xff] (!%p1125_p13)  ;;  %v918_v61 = vadd.f32 (!%p1125_p13), %v1688_v51, %v879_v43  ;;  %975 = vst [vmem:[%s1551_s30 + $0x80] sm:$0xff] (!%p1125_p13), %v943_v50  ;;  %v949_v1 = vmax.f32 (!%p1125_p13), %v917_v54, 0.0  ;;  %980 = vst [vmem:[%s1551_s30 + $0xa8] sm:$0xff] (!%p1125_p13), %v948_v0  ;;  %v955_v15 = vmax.f32 (!%p1125_p13), %v923_v8, 0.0 }
 0x1ab   : > { %835 = vst [vmem:[#allocation2 + $0x78] sm:$0xff] %v803_v46  ;;  %851 = vst [vmem:[#allocation2 + $0xf8] sm:$0xff] %v819_v47  ;;  %v908_v28 = vadd.f32 (!%p1125_p13), %v1688_v51, %v869_v13  ;;  %v914_v46 = vadd.f32 (!%p1125_p13), %v1688_v51, %v875_v31  ;;  %v915_v47 = vadd.f32 (!%p1125_p13), %v1688_v51, %v876_v32  ;;  %v881_v49 = vld [vmem:[#allocation2 + $0xc8] sm:$0xff] (!%p1125_p13)  ;;  %v944_v52 = vmax.f32 (!%p1125_p13), %v912_v42, 0.0 }
 0x1ac   : > { %971 = vst [vmem:[%s1551_s30 + $0x60] sm:$0xff] %v939_v35  ;;  %v945_v58 = vmax.f32 %v913_v45, 0.0  ;;  %v885_v62 = vld [vmem:[#allocation2 + $0xe8] sm:$0xff]  ;;  %v919_v2 = vadd.f32 %v1688_v51, %v880_v48  ;;  %v920_v3 = vadd.f32 %v1688_v51, %v881_v49  ;;  %v950_v5 = vmax.f32 %v918_v61, 0.0  ;;  %981 = vst [vmem:[%s1551_s30 + $0xb0] sm:$0xff] %v949_v1 }
 0x1ad   : > { %v940_v39 = vmax.f32 %v908_v28, 0.0  ;;  %v946_v59 = vmax.f32 %v914_v46, 0.0  ;;  %v947_v60 = vmax.f32 %v915_v47, 0.0  ;;  %976 = vst [vmem:[%s1551_s30 + $0x88] sm:$0xff] %v944_v52  ;;  %v924_v11 = vadd.f32 %v1688_v51, %v885_v62  ;;  %987 = vst [vmem:[%s1551_s30 + $0xe0] sm:$0xff] %v955_v15 }
 0x1ae   : > { %v870_v18 = vld [vmem:[#allocation2 + $0x70] sm:$0xff]  ;;  %977 = vst [vmem:[%s1551_s30 + $0x90] sm:$0xff] %v945_v58  ;;  %v951_v9 = vmax.f32 %v919_v2, 0.0  ;;  %v952_v10 = vmax.f32 %v920_v3, 0.0  ;;  %982 = vst [vmem:[%s1551_s30 + $0xb8] sm:$0xff] %v950_v5  ;;  %v953_v13 = vmax.f32 %v921_v6, 0.0 }
 0x1af   : > { %v909_v29 = vadd.f32 %v1688_v51, %v870_v18  ;;  %972 = vst [vmem:[%s1551_s30 + $0x68] sm:$0xff] %v940_v39  ;;  %v886_v63 = vld [vmem:[#allocation2 + $0xf0] sm:$0xff]  ;;  %978 = vst [vmem:[%s1551_s30 + $0x98] sm:$0xff] %v946_v59  ;;  %v956_v17 = vmax.f32 %v924_v11, 0.0 }
 0x1b0   : > { %979 = vst [vmem:[%s1551_s30 + $0xa0] sm:$0xff] %v947_v60  ;;  %v925_v12 = vadd.f32 %v1688_v51, %v886_v63  ;;  %983 = vst [vmem:[%s1551_s30 + $0xc0] sm:$0xff] %v951_v9 }
 0x1b1   : > { %v941_v40 = vmax.f32 %v909_v29, 0.0  ;;  %984 = vst [vmem:[%s1551_s30 + $0xc8] sm:$0xff] %v952_v10  ;;  %985 = vst [vmem:[%s1551_s30 + $0xd0] sm:$0xff] %v953_v13 }
 0x1b2   : > { %v871_v19 = vld [vmem:[#allocation2 + $0x78] sm:$0xff]  ;;  %v957_v18 = vmax.f32 %v925_v12, 0.0  ;;  %988 = vst [vmem:[%s1551_s30 + $0xe8] sm:$0xff] %v956_v17 }
 0x1b3   : > { %v910_v36 = vadd.f32 %v1688_v51, %v871_v19  ;;  %973 = vst [vmem:[%s1551_s30 + $0x70] sm:$0xff] %v941_v40  ;;  %v887_v4 = vld [vmem:[#allocation2 + $0xf8] sm:$0xff] }
 0x1b4   : > { %v926_v16 = vadd.f32 %v1688_v51, %v887_v4  ;;  %989 = vst [vmem:[%s1551_s30 + $0xf0] sm:$0xff] %v957_v18 }
 0x1b5   : > { %v942_v44 = vmax.f32 %v910_v36, 0.0 }
 0x1b6   : > { %v958_v19 = vmax.f32 %v926_v16, 0.0 }
 0x1b7   : > { %974 = vst [vmem:[%s1551_s30 + $0x78] sm:$0xff] %v942_v44 }
 0x1b8   : > { %990 = vst [vmem:[%s1551_s30 + $0xf8] sm:$0xff] %v958_v19 }
 0x1b9 PF: > { %s13_s18 = sadd.s32 1, %s1322_s18   ;;  %s1779_s12 = smov %s1302_s13 }
 0x1ba   : > { %p10_p0 = scmp.ge.s32.totalorder %s13_s18, 26   ;;  %s1780_s13 = smov %s1397_s25 }
 0x1bb   : > { %s1781_s14 = smov %s1314_s16  ;;  %s1782_s15 = smov %s1318_s17 }
 0x1bc   : > { %s1783_s16 = smov %s1786_s19  ;;  %s1784_s17 = smov %s1790_s20 }
 0x1bd   :  { %12 = sbr.rel (!%p10_p0) target bundleno = 4 (0x4), region = 104 }

// kernel: _pallas_forward.24
= control target key start
LH: loop header
LB: loop body
LE: loop exit
PB: predicated region body
PF: predicated region fallthrough
CT: control target
= control target key end

     0   :  { %s782_s0 = inlined_call_operand.vmem [shape: f32[32,1024], index: 0, kind: input, shape index: {}]   ;;  %s783_s1 = inlined_call_operand.vmem [shape: f32[32,1024], index: 1, kind: input, shape index: {}]   ;;  %s784_s2 = inlined_call_operand.vmem [shape: f32[32,1024], index: 2, kind: input, shape index: {}]   ;;  %s785_s3 = inlined_call_operand.vmem [shape: f32[32,1024], index: 3, kind: input, shape index: {}]   ;;  %s786_s4 = inlined_call_operand.vmem [shape: f32[32,1024], index: 4, kind: output, shape index: {}]  }
   0x1   :  { %v17_v0 = vld [vmem:[%s782_s0] sm:$0xff]  ;;  %v18_v5 = vld [vmem:[%s782_s0 + $0x8] sm:$0xff]  ;;  %v19_v11 = vld [vmem:[%s782_s0 + $0x10] sm:$0xff] }
   0x2   :  { %v49_v1 = vld [vmem:[%s783_s1] sm:$0xff]  ;;  %v50_v6 = vld [vmem:[%s783_s1 + $0x8] sm:$0xff]  ;;  %v51_v13 = vld [vmem:[%s783_s1 + $0x10] sm:$0xff] }
   0x3   :  { %v113_v2 = vld [vmem:[%s784_s2] sm:$0xff]  ;;  %v81_v3 = vmax.f32 %v17_v0, %v49_v1  ;;  %v82_v8 = vmax.f32 %v18_v5, %v50_v6  ;;  %v114_v9 = vld [vmem:[%s784_s2 + $0x8] sm:$0xff]  ;;  %v115_v14 = vld [vmem:[%s784_s2 + $0x10] sm:$0xff]  ;;  %v83_v17 = vmax.f32 %v19_v11, %v51_v13 }
   0x4   :  { %v145_v4 = vld [vmem:[%s785_s3] sm:$0xff]  ;;  %v146_v10 = vld [vmem:[%s785_s3 + $0x8] sm:$0xff]  ;;  %v147_v15 = vld [vmem:[%s785_s3 + $0x10] sm:$0xff] }
   0x5   :  { %v177_v7 = vmax.f32 %v113_v2, %v145_v4  ;;  %v178_v12 = vmax.f32 %v114_v9, %v146_v10  ;;  %v179_v18 = vmax.f32 %v115_v14, %v147_v15  ;;  %v20_v19 = vld [vmem:[%s782_s0 + $0x18] sm:$0xff]  ;;  %v21_v25 = vld [vmem:[%s782_s0 + $0x20] sm:$0xff]  ;;  %v22_v32 = vld [vmem:[%s782_s0 + $0x28] sm:$0xff] }
   0x6   :  { %v52_v20 = vld [vmem:[%s783_s1 + $0x18] sm:$0xff]  ;;  %v53_v26 = vld [vmem:[%s783_s1 + $0x20] sm:$0xff]  ;;  %v54_v34 = vld [vmem:[%s783_s1 + $0x28] sm:$0xff] }
   0x7   :  { %v209_v16 = vmax.f32 %v81_v3, %v177_v7  ;;  %v116_v21 = vld [vmem:[%s784_s2 + $0x18] sm:$0xff]  ;;  %v210_v22 = vmax.f32 %v82_v8, %v178_v12  ;;  %v84_v23 = vmax.f32 %v20_v19, %v52_v20  ;;  %v211_v27 = vmax.f32 %v83_v17, %v179_v18  ;;  %v117_v30 = vld [vmem:[%s784_s2 + $0x20] sm:$0xff]  ;;  %v118_v35 = vld [vmem:[%s784_s2 + $0x28] sm:$0xff] }
   0x8   :  { %v148_v24 = vld [vmem:[%s785_s3 + $0x18] sm:$0xff]  ;;  %v85_v29 = vmax.f32 %v21_v25, %v53_v26  ;;  %v149_v31 = vld [vmem:[%s785_s3 + $0x20] sm:$0xff]  ;;  %v150_v36 = vld [vmem:[%s785_s3 + $0x28] sm:$0xff]  ;;  %v86_v38 = vmax.f32 %v22_v32, %v54_v34 }
   0x9   :  { %241 = vst [vmem:[%s786_s4] sm:$0xff] %v209_v16  ;;  %v180_v28 = vmax.f32 %v116_v21, %v148_v24  ;;  %242 = vst [vmem:[%s786_s4 + $0x8] sm:$0xff] %v210_v22  ;;  %v181_v33 = vmax.f32 %v117_v30, %v149_v31  ;;  %v182_v39 = vmax.f32 %v118_v35, %v150_v36  ;;  %v23_v40 = vld [vmem:[%s782_s0 + $0x30] sm:$0xff]  ;;  %v24_v46 = vld [vmem:[%s782_s0 + $0x38] sm:$0xff] }
   0xa   :  { %243 = vst [vmem:[%s786_s4 + $0x10] sm:$0xff] %v211_v27  ;;  %v55_v41 = vld [vmem:[%s783_s1 + $0x30] sm:$0xff]  ;;  %v56_v47 = vld [vmem:[%s783_s1 + $0x38] sm:$0xff]  ;;  %v25_v53 = vld [vmem:[%s782_s0 + $0x40] sm:$0xff] }
   0xb   :  { %v212_v37 = vmax.f32 %v84_v23, %v180_v28  ;;  %v119_v42 = vld [vmem:[%s784_s2 + $0x30] sm:$0xff]  ;;  %v213_v43 = vmax.f32 %v85_v29, %v181_v33  ;;  %v87_v44 = vmax.f32 %v23_v40, %v55_v41  ;;  %v214_v48 = vmax.f32 %v86_v38, %v182_v39  ;;  %v120_v51 = vld [vmem:[%s784_s2 + $0x38] sm:$0xff]  ;;  %v57_v55 = vld [vmem:[%s783_s1 + $0x40] sm:$0xff] }
   0xc   :  { %v151_v45 = vld [vmem:[%s785_s3 + $0x30] sm:$0xff]  ;;  %v88_v50 = vmax.f32 %v24_v46, %v56_v47  ;;  %v152_v52 = vld [vmem:[%s785_s3 + $0x38] sm:$0xff]  ;;  %v121_v56 = vld [vmem:[%s784_s2 + $0x40] sm:$0xff]  ;;  %v89_v59 = vmax.f32 %v25_v53, %v57_v55 }
   0xd   :  { %244 = vst [vmem:[%s786_s4 + $0x18] sm:$0xff] %v212_v37  ;;  %v183_v49 = vmax.f32 %v119_v42, %v151_v45  ;;  %245 = vst [vmem:[%s786_s4 + $0x20] sm:$0xff] %v213_v43  ;;  %v184_v54 = vmax.f32 %v120_v51, %v152_v52  ;;  %v153_v57 = vld [vmem:[%s785_s3 + $0x40] sm:$0xff]  ;;  %v26_v61 = vld [vmem:[%s782_s0 + $0x48] sm:$0xff] }
   0xe   :  { %246 = vst [vmem:[%s786_s4 + $0x28] sm:$0xff] %v214_v48  ;;  %v185_v60 = vmax.f32 %v121_v56, %v153_v57  ;;  %v58_v62 = vld [vmem:[%s783_s1 + $0x48] sm:$0xff]  ;;  %v27_v3 = vld [vmem:[%s782_s0 + $0x50] sm:$0xff]  ;;  %v28_v10 = vld [vmem:[%s782_s0 + $0x58] sm:$0xff] }
   0xf   :  { %v215_v58 = vmax.f32 %v87_v44, %v183_v49  ;;  %v122_v63 = vld [vmem:[%s784_s2 + $0x48] sm:$0xff]  ;;  %v216_v0 = vmax.f32 %v88_v50, %v184_v54  ;;  %v90_v1 = vmax.f32 %v26_v61, %v58_v62  ;;  %v59_v4 = vld [vmem:[%s783_s1 + $0x50] sm:$0xff]  ;;  %v60_v12 = vld [vmem:[%s783_s1 + $0x58] sm:$0xff] }
  0x10   :  { %v154_v2 = vld [vmem:[%s785_s3 + $0x48] sm:$0xff]  ;;  %v217_v5 = vmax.f32 %v89_v59, %v185_v60  ;;  %v91_v7 = vmax.f32 %v27_v3, %v59_v4  ;;  %v123_v8 = vld [vmem:[%s784_s2 + $0x50] sm:$0xff]  ;;  %v124_v13 = vld [vmem:[%s784_s2 + $0x58] sm:$0xff]  ;;  %v92_v16 = vmax.f32 %v28_v10, %v60_v12 }
  0x11   :  { %247 = vst [vmem:[%s786_s4 + $0x30] sm:$0xff] %v215_v58  ;;  %v186_v6 = vmax.f32 %v122_v63, %v154_v2  ;;  %v155_v9 = vld [vmem:[%s785_s3 + $0x50] sm:$0xff]  ;;  %248 = vst [vmem:[%s786_s4 + $0x38] sm:$0xff] %v216_v0  ;;  %v156_v14 = vld [vmem:[%s785_s3 + $0x58] sm:$0xff] }
  0x12   :  { %v187_v11 = vmax.f32 %v123_v8, %v155_v9  ;;  %249 = vst [vmem:[%s786_s4 + $0x40] sm:$0xff] %v217_v5  ;;  %v188_v17 = vmax.f32 %v124_v13, %v156_v14  ;;  %v29_v18 = vld [vmem:[%s782_s0 + $0x60] sm:$0xff]  ;;  %v30_v24 = vld [vmem:[%s782_s0 + $0x68] sm:$0xff]  ;;  %v31_v31 = vld [vmem:[%s782_s0 + $0x70] sm:$0xff] }
  0x13   :  { %v218_v15 = vmax.f32 %v90_v1, %v186_v6  ;;  %v61_v19 = vld [vmem:[%s783_s1 + $0x60] sm:$0xff]  ;;  %v62_v25 = vld [vmem:[%s783_s1 + $0x68] sm:$0xff]  ;;  %v63_v33 = vld [vmem:[%s783_s1 + $0x70] sm:$0xff] }
  0x14   :  { %v125_v20 = vld [vmem:[%s784_s2 + $0x60] sm:$0xff]  ;;  %v219_v21 = vmax.f32 %v91_v7, %v187_v11  ;;  %v93_v22 = vmax.f32 %v29_v18, %v61_v19  ;;  %v220_v26 = vmax.f32 %v92_v16, %v188_v17  ;;  %v94_v28 = vmax.f32 %v30_v24, %v62_v25  ;;  %v126_v29 = vld [vmem:[%s784_s2 + $0x68] sm:$0xff]  ;;  %v127_v34 = vld [vmem:[%s784_s2 + $0x70] sm:$0xff] }
  0x15   :  { %v157_v23 = vld [vmem:[%s785_s3 + $0x60] sm:$0xff]  ;;  %250 = vst [vmem:[%s786_s4 + $0x48] sm:$0xff] %v218_v15  ;;  %v158_v30 = vld [vmem:[%s785_s3 + $0x68] sm:$0xff]  ;;  %v159_v35 = vld [vmem:[%s785_s3 + $0x70] sm:$0xff]  ;;  %v95_v37 = vmax.f32 %v31_v31, %v63_v33 }
  0x16   :  { %v189_v27 = vmax.f32 %v125_v20, %v157_v23  ;;  %251 = vst [vmem:[%s786_s4 + $0x50] sm:$0xff] %v219_v21  ;;  %v190_v32 = vmax.f32 %v126_v29, %v158_v30  ;;  %252 = vst [vmem:[%s786_s4 + $0x58] sm:$0xff] %v220_v26  ;;  %v191_v38 = vmax.f32 %v127_v34, %v159_v35  ;;  %v32_v39 = vld [vmem:[%s782_s0 + $0x78] sm:$0xff]  ;;  %v33_v45 = vld [vmem:[%s782_s0 + $0x80] sm:$0xff] }
  0x17   :  { %v64_v40 = vld [vmem:[%s783_s1 + $0x78] sm:$0xff]  ;;  %v65_v46 = vld [vmem:[%s783_s1 + $0x80] sm:$0xff]  ;;  %v34_v52 = vld [vmem:[%s782_s0 + $0x88] sm:$0xff] }
  0x18   :  { %v221_v36 = vmax.f32 %v93_v22, %v189_v27  ;;  %v128_v41 = vld [vmem:[%s784_s2 + $0x78] sm:$0xff]  ;;  %v222_v42 = vmax.f32 %v94_v28, %v190_v32  ;;  %v96_v43 = vmax.f32 %v32_v39, %v64_v40  ;;  %v223_v47 = vmax.f32 %v95_v37, %v191_v38  ;;  %v129_v50 = vld [vmem:[%s784_s2 + $0x80] sm:$0xff]  ;;  %v66_v54 = vld [vmem:[%s783_s1 + $0x88] sm:$0xff] }
  0x19   :  { %v160_v44 = vld [vmem:[%s785_s3 + $0x78] sm:$0xff]  ;;  %v97_v49 = vmax.f32 %v33_v45, %v65_v46  ;;  %v161_v51 = vld [vmem:[%s785_s3 + $0x80] sm:$0xff]  ;;  %v130_v55 = vld [vmem:[%s784_s2 + $0x88] sm:$0xff]  ;;  %v98_v58 = vmax.f32 %v34_v52, %v66_v54 }
  0x1a   :  { %253 = vst [vmem:[%s786_s4 + $0x60] sm:$0xff] %v221_v36  ;;  %v192_v48 = vmax.f32 %v128_v41, %v160_v44  ;;  %254 = vst [vmem:[%s786_s4 + $0x68] sm:$0xff] %v222_v42  ;;  %v193_v53 = vmax.f32 %v129_v50, %v161_v51  ;;  %v162_v56 = vld [vmem:[%s785_s3 + $0x88] sm:$0xff]  ;;  %v35_v60 = vld [vmem:[%s782_s0 + $0x90] sm:$0xff] }
  0x1b   :  { %255 = vst [vmem:[%s786_s4 + $0x70] sm:$0xff] %v223_v47  ;;  %v194_v59 = vmax.f32 %v130_v55, %v162_v56  ;;  %v67_v61 = vld [vmem:[%s783_s1 + $0x90] sm:$0xff]  ;;  %v36_v2 = vld [vmem:[%s782_s0 + $0x98] sm:$0xff]  ;;  %v37_v9 = vld [vmem:[%s782_s0 + $0xa0] sm:$0xff] }
  0x1c   :  { %v224_v57 = vmax.f32 %v96_v43, %v192_v48  ;;  %v131_v62 = vld [vmem:[%s784_s2 + $0x90] sm:$0xff]  ;;  %v225_v63 = vmax.f32 %v97_v49, %v193_v53  ;;  %v99_v0 = vmax.f32 %v35_v60, %v67_v61  ;;  %v68_v3 = vld [vmem:[%s783_s1 + $0x98] sm:$0xff]  ;;  %v69_v11 = vld [vmem:[%s783_s1 + $0xa0] sm:$0xff] }
  0x1d   :  { %v163_v1 = vld [vmem:[%s785_s3 + $0x90] sm:$0xff]  ;;  %v226_v4 = vmax.f32 %v98_v58, %v194_v59  ;;  %v100_v6 = vmax.f32 %v36_v2, %v68_v3  ;;  %v132_v7 = vld [vmem:[%s784_s2 + $0x98] sm:$0xff]  ;;  %v133_v12 = vld [vmem:[%s784_s2 + $0xa0] sm:$0xff]  ;;  %v101_v15 = vmax.f32 %v37_v9, %v69_v11 }
  0x1e   :  { %256 = vst [vmem:[%s786_s4 + $0x78] sm:$0xff] %v224_v57  ;;  %v195_v5 = vmax.f32 %v131_v62, %v163_v1  ;;  %v164_v8 = vld [vmem:[%s785_s3 + $0x98] sm:$0xff]  ;;  %257 = vst [vmem:[%s786_s4 + $0x80] sm:$0xff] %v225_v63  ;;  %v165_v13 = vld [vmem:[%s785_s3 + $0xa0] sm:$0xff] }
  0x1f   :  { %v196_v10 = vmax.f32 %v132_v7, %v164_v8  ;;  %258 = vst [vmem:[%s786_s4 + $0x88] sm:$0xff] %v226_v4  ;;  %v197_v16 = vmax.f32 %v133_v12, %v165_v13  ;;  %v38_v17 = vld [vmem:[%s782_s0 + $0xa8] sm:$0xff]  ;;  %v39_v23 = vld [vmem:[%s782_s0 + $0xb0] sm:$0xff]  ;;  %v40_v30 = vld [vmem:[%s782_s0 + $0xb8] sm:$0xff] }
  0x20   :  { %v227_v14 = vmax.f32 %v99_v0, %v195_v5  ;;  %v70_v18 = vld [vmem:[%s783_s1 + $0xa8] sm:$0xff]  ;;  %v71_v24 = vld [vmem:[%s783_s1 + $0xb0] sm:$0xff]  ;;  %v72_v32 = vld [vmem:[%s783_s1 + $0xb8] sm:$0xff] }
  0x21   :  { %v134_v19 = vld [vmem:[%s784_s2 + $0xa8] sm:$0xff]  ;;  %v228_v20 = vmax.f32 %v100_v6, %v196_v10  ;;  %v102_v21 = vmax.f32 %v38_v17, %v70_v18  ;;  %v229_v25 = vmax.f32 %v101_v15, %v197_v16  ;;  %v103_v27 = vmax.f32 %v39_v23, %v71_v24  ;;  %v135_v28 = vld [vmem:[%s784_s2 + $0xb0] sm:$0xff]  ;;  %v136_v33 = vld [vmem:[%s784_s2 + $0xb8] sm:$0xff] }
  0x22   :  { %v166_v22 = vld [vmem:[%s785_s3 + $0xa8] sm:$0xff]  ;;  %259 = vst [vmem:[%s786_s4 + $0x90] sm:$0xff] %v227_v14  ;;  %v167_v29 = vld [vmem:[%s785_s3 + $0xb0] sm:$0xff]  ;;  %v168_v34 = vld [vmem:[%s785_s3 + $0xb8] sm:$0xff]  ;;  %v104_v36 = vmax.f32 %v40_v30, %v72_v32 }
  0x23   :  { %v198_v26 = vmax.f32 %v134_v19, %v166_v22  ;;  %260 = vst [vmem:[%s786_s4 + $0x98] sm:$0xff] %v228_v20  ;;  %v199_v31 = vmax.f32 %v135_v28, %v167_v29  ;;  %261 = vst [vmem:[%s786_s4 + $0xa0] sm:$0xff] %v229_v25  ;;  %v200_v37 = vmax.f32 %v136_v33, %v168_v34  ;;  %v41_v38 = vld [vmem:[%s782_s0 + $0xc0] sm:$0xff]  ;;  %v42_v44 = vld [vmem:[%s782_s0 + $0xc8] sm:$0xff] }
  0x24   :  { %v73_v39 = vld [vmem:[%s783_s1 + $0xc0] sm:$0xff]  ;;  %v74_v45 = vld [vmem:[%s783_s1 + $0xc8] sm:$0xff]  ;;  %v43_v51 = vld [vmem:[%s782_s0 + $0xd0] sm:$0xff] }
  0x25   :  { %v230_v35 = vmax.f32 %v102_v21, %v198_v26  ;;  %v137_v40 = vld [vmem:[%s784_s2 + $0xc0] sm:$0xff]  ;;  %v231_v41 = vmax.f32 %v103_v27, %v199_v31  ;;  %v105_v42 = vmax.f32 %v41_v38, %v73_v39  ;;  %v232_v46 = vmax.f32 %v104_v36, %v200_v37  ;;  %v138_v49 = vld [vmem:[%s784_s2 + $0xc8] sm:$0xff]  ;;  %v75_v53 = vld [vmem:[%s783_s1 + $0xd0] sm:$0xff] }
  0x26   :  { %v169_v43 = vld [vmem:[%s785_s3 + $0xc0] sm:$0xff]  ;;  %v106_v48 = vmax.f32 %v42_v44, %v74_v45  ;;  %v170_v50 = vld [vmem:[%s785_s3 + $0xc8] sm:$0xff]  ;;  %v139_v54 = vld [vmem:[%s784_s2 + $0xd0] sm:$0xff]  ;;  %v107_v57 = vmax.f32 %v43_v51, %v75_v53 }
  0x27   :  { %262 = vst [vmem:[%s786_s4 + $0xa8] sm:$0xff] %v230_v35  ;;  %v201_v47 = vmax.f32 %v137_v40, %v169_v43  ;;  %263 = vst [vmem:[%s786_s4 + $0xb0] sm:$0xff] %v231_v41  ;;  %v202_v52 = vmax.f32 %v138_v49, %v170_v50  ;;  %v171_v55 = vld [vmem:[%s785_s3 + $0xd0] sm:$0xff]  ;;  %v44_v59 = vld [vmem:[%s782_s0 + $0xd8] sm:$0xff] }
  0x28   :  { %264 = vst [vmem:[%s786_s4 + $0xb8] sm:$0xff] %v232_v46  ;;  %v203_v58 = vmax.f32 %v139_v54, %v171_v55  ;;  %v76_v60 = vld [vmem:[%s783_s1 + $0xd8] sm:$0xff]  ;;  %v45_v1 = vld [vmem:[%s782_s0 + $0xe0] sm:$0xff]  ;;  %v46_v8 = vld [vmem:[%s782_s0 + $0xe8] sm:$0xff] }
  0x29   :  { %v233_v56 = vmax.f32 %v105_v42, %v201_v47  ;;  %v140_v61 = vld [vmem:[%s784_s2 + $0xd8] sm:$0xff]  ;;  %v234_v62 = vmax.f32 %v106_v48, %v202_v52  ;;  %v108_v63 = vmax.f32 %v44_v59, %v76_v60  ;;  %v77_v2 = vld [vmem:[%s783_s1 + $0xe0] sm:$0xff]  ;;  %v78_v10 = vld [vmem:[%s783_s1 + $0xe8] sm:$0xff] }
  0x2a   :  { %v172_v0 = vld [vmem:[%s785_s3 + $0xd8] sm:$0xff]  ;;  %v235_v3 = vmax.f32 %v107_v57, %v203_v58  ;;  %v109_v5 = vmax.f32 %v45_v1, %v77_v2  ;;  %v141_v6 = vld [vmem:[%s784_s2 + $0xe0] sm:$0xff]  ;;  %v142_v11 = vld [vmem:[%s784_s2 + $0xe8] sm:$0xff]  ;;  %v110_v14 = vmax.f32 %v46_v8, %v78_v10 }
  0x2b   :  { %265 = vst [vmem:[%s786_s4 + $0xc0] sm:$0xff] %v233_v56  ;;  %v204_v4 = vmax.f32 %v140_v61, %v172_v0  ;;  %v173_v7 = vld [vmem:[%s785_s3 + $0xe0] sm:$0xff]  ;;  %266 = vst [vmem:[%s786_s4 + $0xc8] sm:$0xff] %v234_v62  ;;  %v174_v12 = vld [vmem:[%s785_s3 + $0xe8] sm:$0xff] }
  0x2c   :  { %v205_v9 = vmax.f32 %v141_v6, %v173_v7  ;;  %267 = vst [vmem:[%s786_s4 + $0xd0] sm:$0xff] %v235_v3  ;;  %v206_v15 = vmax.f32 %v142_v11, %v174_v12  ;;  %v47_v16 = vld [vmem:[%s782_s0 + $0xf0] sm:$0xff]  ;;  %v48_v22 = vld [vmem:[%s782_s0 + $0xf8] sm:$0xff] }
  0x2d   :  { %v236_v13 = vmax.f32 %v108_v63, %v204_v4  ;;  %v79_v17 = vld [vmem:[%s783_s1 + $0xf0] sm:$0xff]  ;;  %v80_v23 = vld [vmem:[%s783_s1 + $0xf8] sm:$0xff] }
  0x2e   :  { %v143_v18 = vld [vmem:[%s784_s2 + $0xf0] sm:$0xff]  ;;  %v237_v19 = vmax.f32 %v109_v5, %v205_v9  ;;  %v111_v20 = vmax.f32 %v47_v16, %v79_v17  ;;  %v238_v24 = vmax.f32 %v110_v14, %v206_v15  ;;  %v112_v26 = vmax.f32 %v48_v22, %v80_v23  ;;  %v144_v27 = vld [vmem:[%s784_s2 + $0xf8] sm:$0xff] }
  0x2f   :  { %v175_v21 = vld [vmem:[%s785_s3 + $0xf0] sm:$0xff]  ;;  %268 = vst [vmem:[%s786_s4 + $0xd8] sm:$0xff] %v236_v13  ;;  %v176_v28 = vld [vmem:[%s785_s3 + $0xf8] sm:$0xff] }
  0x30   :  { %v207_v25 = vmax.f32 %v143_v18, %v175_v21  ;;  %269 = vst [vmem:[%s786_s4 + $0xe0] sm:$0xff] %v237_v19  ;;  %v208_v29 = vmax.f32 %v144_v27, %v176_v28  ;;  %270 = vst [vmem:[%s786_s4 + $0xe8] sm:$0xff] %v238_v24 }
  0x32   :  { %v239_v30 = vmax.f32 %v111_v20, %v207_v25  ;;  %v240_v31 = vmax.f32 %v112_v26, %v208_v29 }
  0x34   :  { %271 = vst [vmem:[%s786_s4 + $0xf0] sm:$0xff] %v239_v30  ;;  %272 = vst [vmem:[%s786_s4 + $0xf8] sm:$0xff] %v240_v31 }

// kernel: _pallas_forward.25
= control target key start
LH: loop header
LB: loop body
LE: loop exit
PB: predicated region body
PF: predicated region fallthrough
CT: control target
= control target key end

     0   :  { %s1346_s12 = smov 0   ;;  %s1348_s13 = smov 0   ;;  %s1775_s0 = inlined_call_operand.vmem [shape: f32[512,768], index: 0, kind: input, shape index: {}]   ;;  %s1776_s1 = inlined_call_operand.vmem [shape: f32[768,128], index: 1, kind: input, shape index: {}]   ;;  %s1777_s2 = inlined_call_operand.vmem [shape: f32[1,128], index: 2, kind: input, shape index: {}]   ;;  %s1778_s3 = inlined_call_operand.vmem [shape: f32[512,128], index: 3, kind: output, shape index: {}]  }
   0x1   :  { %s1350_s14 = smov 0   ;;  %s1352_s15 = smov 0  }
   0x2   :  { %s1354_s16 = smov 0   ;;  %s1356_s17 = smov 0  }
   0x3   :  { %s1358_s18 = smov 0  }
   0x4 LB: > { %s25_s19 = sadd.s32 1, %s1314_s16  ;;  %s32_s20 = sadd.s32 1, %s1318_s17  ;;  %s1322_s18 = sphi %s1358_s18, %s13_s18   ;;  %s1318_s17 = sphi %s1356_s17, %s1784_s17   ;;  %s1314_s16 = sphi %s1354_s16, %s1783_s16   ;;  %s1310_s15 = sphi %s1352_s15, %s1782_s15   ;;  %s1306_s14 = sphi %s1350_s14, %s1781_s14   ;;  %s1302_s13 = sphi %s1348_s13, %s1780_s13   ;;  %s1298_s12 = sphi %s1346_s12, %s1779_s12  }
   0x5   : > { %p26_p0 = scmp.ge.s32.totalorder %s25_s19, 3  ;;  %p48_p1 = scmp.ne.s32.totalorder %s1302_s13, %s1298_s12 }
   0x6   : > { %p49_p2 = scmp.eq.s32.totalorder %s1322_s18, 0  ;;  %s41_s24 = sadd.s32 1, %s1302_s13 }
   0x7   : > { %s1786_s19 = smov (%p26_p0, %s25_s19), 0  ;;  %s1788_s20 = smov (!%p26_p0, %s32_s20), %s1318_s17 }
   0x8   : > { %p50_p3 = por %p49_p2, %p48_p1  ;;  %p34_p4 = scmp.ge.s32.totalorder %s1788_s20, 2 }
   0x9   : > { %s37_s21 = ssub.s32 %s1314_s16, %s1786_s19  ;;  %p1112_p6 = scmp.ge.s32.totalorder %s1322_s18, 6 }
   0xa   : > { %s1790_s20 = smov (%p34_p4, %s1788_s20), 0 }
   0xb   : > { %s36_s22 = ssub.s32 %s1318_s17, %s1790_s20  ;;  %162 = sbr.rel (%p1112_p6) target bundleno = 58 (0x3a), region = 20 }
   0xc   : > { %s38_s23 = sor.u32 %s37_s21, %s36_s22 }
   0xd   : > { %p39_p5 = scmp.eq.s32.totalorder %s38_s23, 0 }
   0xf   : > { %s1397_s25 = scalar_select %p39_p5, %s1302_s13, %s41_s24  }
  0x12   : > { %165 = sbr.rel (!%p50_p3) target bundleno = 58 (0x3a), region = 24  ;;  %s167_s26 = sand.u32 (%p50_p3), 1, %s1302_s13  }
  0x13   : > { %s1115_s27 = sshll.u32 (%p50_p3), %s1314_s16, 1  ;;  %s1113_s28 = sshll.u32 (%p50_p3), %s167_s26, 9 }
  0x14   : > { %s1209_s29 = smul.u32 (%p50_p3), 192, %s1318_s17  ;;  %s1411_s8 = scalar_lea.vmem (%p50_p3), [#allocation3], %s1113_s28 }
  0x16   : > { %s173_s30 = sadd.s32 (%p50_p3), %s1209_s29, %s1115_s27 }
  0x17   : > { %s1117_s4 = sshll.u32 (%p50_p3), %s173_s30, 3 }
  0x18   : > { %s1406_s7 = scalar_lea.vmem (%p50_p3), %s1775_s0, %s1117_s4 }
  0x19   : > { %v188_v0 = vld [vmem:[%s1406_s7] sm:$0xff]  ;;  %v190_v1 = vld [vmem:[%s1406_s7 + $0x8] sm:$0xff]  ;;  %v192_v2 = vld [vmem:[%s1406_s7 + $0x30] sm:$0xff] }
  0x1a   : > { %189 = vst [vmem:[%s1411_s8] sm:$0xff] %v188_v0  ;;  %191 = vst [vmem:[%s1411_s8 + $0x8] sm:$0xff] %v190_v1  ;;  %v194_v3 = vld [vmem:[%s1406_s7 + $0x38] sm:$0xff]  ;;  %v196_v4 = vld [vmem:[%s1406_s7 + $0x60] sm:$0xff] }
  0x1b   : > { %193 = vst [vmem:[%s1411_s8 + $0x10] sm:$0xff] %v192_v2  ;;  %v198_v5 = vld [vmem:[%s1406_s7 + $0x68] sm:$0xff]  ;;  %195 = vst [vmem:[%s1411_s8 + $0x18] sm:$0xff] %v194_v3  ;;  %v200_v6 = vld [vmem:[%s1406_s7 + $0x90] sm:$0xff] }
  0x1c   : > { %197 = vst [vmem:[%s1411_s8 + $0x20] sm:$0xff] %v196_v4  ;;  %199 = vst [vmem:[%s1411_s8 + $0x28] sm:$0xff] %v198_v5  ;;  %v202_v7 = vld [vmem:[%s1406_s7 + $0x98] sm:$0xff]  ;;  %v204_v8 = vld [vmem:[%s1406_s7 + $0xc0] sm:$0xff] }
  0x1d   : > { %201 = vst [vmem:[%s1411_s8 + $0x30] sm:$0xff] %v200_v6  ;;  %203 = vst [vmem:[%s1411_s8 + $0x38] sm:$0xff] %v202_v7  ;;  %v206_v9 = vld [vmem:[%s1406_s7 + $0xc8] sm:$0xff]  ;;  %v208_v10 = vld [vmem:[%s1406_s7 + $0xf0] sm:$0xff] }
  0x1e   : > { %205 = vst [vmem:[%s1411_s8 + $0x40] sm:$0xff] %v204_v8  ;;  %v210_v11 = vld [vmem:[%s1406_s7 + $0xf8] sm:$0xff]  ;;  %207 = vst [vmem:[%s1411_s8 + $0x48] sm:$0xff] %v206_v9  ;;  %v212_v12 = vld [vmem:[%s1406_s7 + $0x120] sm:$0xff] }
  0x1f   : > { %209 = vst [vmem:[%s1411_s8 + $0x50] sm:$0xff] %v208_v10  ;;  %211 = vst [vmem:[%s1411_s8 + $0x58] sm:$0xff] %v210_v11  ;;  %v214_v13 = vld [vmem:[%s1406_s7 + $0x128] sm:$0xff]  ;;  %v216_v14 = vld [vmem:[%s1406_s7 + $0x150] sm:$0xff] }
  0x20   : > { %213 = vst [vmem:[%s1411_s8 + $0x60] sm:$0xff] %v212_v12  ;;  %215 = vst [vmem:[%s1411_s8 + $0x68] sm:$0xff] %v214_v13  ;;  %v218_v15 = vld [vmem:[%s1406_s7 + $0x158] sm:$0xff]  ;;  %v220_v16 = vld [vmem:[%s1406_s7 + $0x180] sm:$0xff] }
  0x21   : > { %217 = vst [vmem:[%s1411_s8 + $0x70] sm:$0xff] %v216_v14  ;;  %v222_v17 = vld [vmem:[%s1406_s7 + $0x188] sm:$0xff]  ;;  %219 = vst [vmem:[%s1411_s8 + $0x78] sm:$0xff] %v218_v15  ;;  %v224_v18 = vld [vmem:[%s1406_s7 + $0x1b0] sm:$0xff] }
  0x22   : > { %221 = vst [vmem:[%s1411_s8 + $0x80] sm:$0xff] %v220_v16  ;;  %223 = vst [vmem:[%s1411_s8 + $0x88] sm:$0xff] %v222_v17  ;;  %v226_v19 = vld [vmem:[%s1406_s7 + $0x1b8] sm:$0xff]  ;;  %v228_v20 = vld [vmem:[%s1406_s7 + $0x1e0] sm:$0xff] }
  0x23   : > { %225 = vst [vmem:[%s1411_s8 + $0x90] sm:$0xff] %v224_v18  ;;  %227 = vst [vmem:[%s1411_s8 + $0x98] sm:$0xff] %v226_v19  ;;  %v230_v21 = vld [vmem:[%s1406_s7 + $0x1e8] sm:$0xff]  ;;  %v232_v22 = vld [vmem:[%s1406_s7 + $0x210] sm:$0xff] }
  0x24   : > { %229 = vst [vmem:[%s1411_s8 + $0xa0] sm:$0xff] %v228_v20  ;;  %v234_v23 = vld [vmem:[%s1406_s7 + $0x218] sm:$0xff]  ;;  %231 = vst [vmem:[%s1411_s8 + $0xa8] sm:$0xff] %v230_v21  ;;  %v236_v24 = vld [vmem:[%s1406_s7 + $0x240] sm:$0xff] }
  0x25   : > { %233 = vst [vmem:[%s1411_s8 + $0xb0] sm:$0xff] %v232_v22  ;;  %235 = vst [vmem:[%s1411_s8 + $0xb8] sm:$0xff] %v234_v23  ;;  %v238_v25 = vld [vmem:[%s1406_s7 + $0x248] sm:$0xff]  ;;  %v240_v26 = vld [vmem:[%s1406_s7 + $0x270] sm:$0xff] }
  0x26   : > { %237 = vst [vmem:[%s1411_s8 + $0xc0] sm:$0xff] %v236_v24  ;;  %239 = vst [vmem:[%s1411_s8 + $0xc8] sm:$0xff] %v238_v25  ;;  %v242_v27 = vld [vmem:[%s1406_s7 + $0x278] sm:$0xff]  ;;  %v244_v28 = vld [vmem:[%s1406_s7 + $0x2a0] sm:$0xff] }
  0x27   : > { %241 = vst [vmem:[%s1411_s8 + $0xd0] sm:$0xff] %v240_v26  ;;  %v246_v29 = vld [vmem:[%s1406_s7 + $0x2a8] sm:$0xff]  ;;  %243 = vst [vmem:[%s1411_s8 + $0xd8] sm:$0xff] %v242_v27  ;;  %v248_v30 = vld [vmem:[%s1406_s7 + $0x2d0] sm:$0xff] }
  0x28   : > { %245 = vst [vmem:[%s1411_s8 + $0xe0] sm:$0xff] %v244_v28  ;;  %247 = vst [vmem:[%s1411_s8 + $0xe8] sm:$0xff] %v246_v29  ;;  %v250_v31 = vld [vmem:[%s1406_s7 + $0x2d8] sm:$0xff]  ;;  %v252_v32 = vld [vmem:[%s1406_s7 + $0x300] sm:$0xff] }
  0x29   : > { %249 = vst [vmem:[%s1411_s8 + $0xf0] sm:$0xff] %v248_v30  ;;  %251 = vst [vmem:[%s1411_s8 + $0xf8] sm:$0xff] %v250_v31  ;;  %v254_v33 = vld [vmem:[%s1406_s7 + $0x308] sm:$0xff]  ;;  %v256_v34 = vld [vmem:[%s1406_s7 + $0x330] sm:$0xff] }
  0x2a   : > { %253 = vst [vmem:[%s1411_s8 + $0x100] sm:$0xff] %v252_v32  ;;  %v258_v35 = vld [vmem:[%s1406_s7 + $0x338] sm:$0xff]  ;;  %255 = vst [vmem:[%s1411_s8 + $0x108] sm:$0xff] %v254_v33  ;;  %v260_v36 = vld [vmem:[%s1406_s7 + $0x360] sm:$0xff] }
  0x2b   : > { %257 = vst [vmem:[%s1411_s8 + $0x110] sm:$0xff] %v256_v34  ;;  %259 = vst [vmem:[%s1411_s8 + $0x118] sm:$0xff] %v258_v35  ;;  %v262_v37 = vld [vmem:[%s1406_s7 + $0x368] sm:$0xff]  ;;  %v264_v38 = vld [vmem:[%s1406_s7 + $0x390] sm:$0xff] }
  0x2c   : > { %261 = vst [vmem:[%s1411_s8 + $0x120] sm:$0xff] %v260_v36  ;;  %263 = vst [vmem:[%s1411_s8 + $0x128] sm:$0xff] %v262_v37  ;;  %v266_v39 = vld [vmem:[%s1406_s7 + $0x398] sm:$0xff]  ;;  %v268_v40 = vld [vmem:[%s1406_s7 + $0x3c0] sm:$0xff] }
  0x2d   : > { %265 = vst [vmem:[%s1411_s8 + $0x130] sm:$0xff] %v264_v38  ;;  %v270_v41 = vld [vmem:[%s1406_s7 + $0x3c8] sm:$0xff]  ;;  %267 = vst [vmem:[%s1411_s8 + $0x138] sm:$0xff] %v266_v39  ;;  %v272_v42 = vld [vmem:[%s1406_s7 + $0x3f0] sm:$0xff] }
  0x2e   : > { %269 = vst [vmem:[%s1411_s8 + $0x140] sm:$0xff] %v268_v40  ;;  %271 = vst [vmem:[%s1411_s8 + $0x148] sm:$0xff] %v270_v41  ;;  %v274_v43 = vld [vmem:[%s1406_s7 + $0x3f8] sm:$0xff]  ;;  %v276_v44 = vld [vmem:[%s1406_s7 + $0x420] sm:$0xff] }
  0x2f   : > { %273 = vst [vmem:[%s1411_s8 + $0x150] sm:$0xff] %v272_v42  ;;  %275 = vst [vmem:[%s1411_s8 + $0x158] sm:$0xff] %v274_v43  ;;  %v278_v45 = vld [vmem:[%s1406_s7 + $0x428] sm:$0xff]  ;;  %v280_v46 = vld [vmem:[%s1406_s7 + $0x450] sm:$0xff] }
  0x30   : > { %277 = vst [vmem:[%s1411_s8 + $0x160] sm:$0xff] %v276_v44  ;;  %v282_v47 = vld [vmem:[%s1406_s7 + $0x458] sm:$0xff]  ;;  %279 = vst [vmem:[%s1411_s8 + $0x168] sm:$0xff] %v278_v45  ;;  %v284_v48 = vld [vmem:[%s1406_s7 + $0x480] sm:$0xff] }
  0x31   : > { %281 = vst [vmem:[%s1411_s8 + $0x170] sm:$0xff] %v280_v46  ;;  %283 = vst [vmem:[%s1411_s8 + $0x178] sm:$0xff] %v282_v47  ;;  %v286_v49 = vld [vmem:[%s1406_s7 + $0x488] sm:$0xff]  ;;  %v288_v50 = vld [vmem:[%s1406_s7 + $0x4b0] sm:$0xff] }
  0x32   : > { %285 = vst [vmem:[%s1411_s8 + $0x180] sm:$0xff] %v284_v48  ;;  %287 = vst [vmem:[%s1411_s8 + $0x188] sm:$0xff] %v286_v49  ;;  %v290_v51 = vld [vmem:[%s1406_s7 + $0x4b8] sm:$0xff]  ;;  %v292_v52 = vld [vmem:[%s1406_s7 + $0x4e0] sm:$0xff] }
  0x33   : > { %289 = vst [vmem:[%s1411_s8 + $0x190] sm:$0xff] %v288_v50  ;;  %v294_v53 = vld [vmem:[%s1406_s7 + $0x4e8] sm:$0xff]  ;;  %291 = vst [vmem:[%s1411_s8 + $0x198] sm:$0xff] %v290_v51  ;;  %v296_v54 = vld [vmem:[%s1406_s7 + $0x510] sm:$0xff] }
  0x34   : > { %293 = vst [vmem:[%s1411_s8 + $0x1a0] sm:$0xff] %v292_v52  ;;  %295 = vst [vmem:[%s1411_s8 + $0x1a8] sm:$0xff] %v294_v53  ;;  %v298_v55 = vld [vmem:[%s1406_s7 + $0x518] sm:$0xff]  ;;  %v300_v56 = vld [vmem:[%s1406_s7 + $0x540] sm:$0xff] }
  0x35   : > { %297 = vst [vmem:[%s1411_s8 + $0x1b0] sm:$0xff] %v296_v54  ;;  %299 = vst [vmem:[%s1411_s8 + $0x1b8] sm:$0xff] %v298_v55  ;;  %v302_v57 = vld [vmem:[%s1406_s7 + $0x548] sm:$0xff]  ;;  %v304_v58 = vld [vmem:[%s1406_s7 + $0x570] sm:$0xff] }
  0x36   : > { %301 = vst [vmem:[%s1411_s8 + $0x1c0] sm:$0xff] %v300_v56  ;;  %v306_v59 = vld [vmem:[%s1406_s7 + $0x578] sm:$0xff]  ;;  %303 = vst [vmem:[%s1411_s8 + $0x1c8] sm:$0xff] %v302_v57  ;;  %v308_v60 = vld [vmem:[%s1406_s7 + $0x5a0] sm:$0xff] }
  0x37   : > { %305 = vst [vmem:[%s1411_s8 + $0x1d0] sm:$0xff] %v304_v58  ;;  %307 = vst [vmem:[%s1411_s8 + $0x1d8] sm:$0xff] %v306_v59  ;;  %v310_v61 = vld [vmem:[%s1406_s7 + $0x5a8] sm:$0xff]  ;;  %v312_v62 = vld [vmem:[%s1406_s7 + $0x5d0] sm:$0xff] }
  0x38   : > { %309 = vst [vmem:[%s1411_s8 + $0x1e0] sm:$0xff] %v308_v60  ;;  %311 = vst [vmem:[%s1411_s8 + $0x1e8] sm:$0xff] %v310_v61  ;;  %v314_v63 = vld [vmem:[%s1406_s7 + $0x5d8] sm:$0xff] }
  0x39   : > { %313 = vst [vmem:[%s1411_s8 + $0x1f0] sm:$0xff] %v312_v62  ;;  %315 = vst [vmem:[%s1411_s8 + $0x1f8] sm:$0xff] %v314_v63 }
  0x3a PF: > { %p1118_p7 = scmp.ge.s32.totalorder %s1322_s18, 1  ;;  %p332_p8 = scmp.lt.s32.totalorder %s1322_s18, 7 }
  0x3c   : > { %p333_p9 = pnand %p1118_p7, %p332_p8 }
  0x3d   : > { %s339_s9 = sand.u32 (!%p333_p9), 1, %s1298_s12   ;;  %s1120_s10 = sshll.u32 (!%p333_p9), %s1306_s14, 5 }
  0x3e   : > { %336 = sbr.rel (%p333_p9) target bundleno = 441 (0x1b9), region = 51  ;;  %s1119_s11 = sshll.u32 (!%p333_p9), %s339_s9, 9 }
  0x3f   : > { %p379_p10 = scmp.lt.s32.totalorder (!%p333_p9), %s1120_s10, 95  ;;  %s1122_s21 = sshll.u32 (!%p333_p9), %s1310_s15, 5 }
  0x40   : > { %p391_p11 = scmp.lt.s32.totalorder (!%p333_p9), %s1122_s21, 63  ;;  %s1553_s12 = scalar_lea.vmem (!%p333_p9), [#allocation3], %s1119_s11 }
  0x41   : > { %p1124_p12 = scmp.ne.s32.totalorder (!%p333_p9), %s1306_s14, 0 }
  0x45   : > { %s1792_s10 = smov (!%p379_p10, %s1120_s10), 95  ;;  %s1794_s21 = smov (!%p391_p11, %s1122_s21), 63 }
  0x46   : > { %s1121_s22 = sshll.u32 %s1792_s10, 3  ;;  %s1123_s27 = sshll.u32 %s1794_s21, 3  ;;  %v1324_v0 = vmov (!%p1124_p12), 0.0  }
  0x47   : > { %s1546_s26 = scalar_lea.vmem %s1776_s1, %s1121_s22  ;;  %s1551_s30 = scalar_lea.vmem %s1778_s3, %s1123_s27  ;;  %403 = vst [vmem:[#allocation2] sm:$0xff] (!%p1124_p12), %v1324_v0  ;;  %404 = vst [vmem:[#allocation2 + $0x8] sm:$0xff] (!%p1124_p12), %v1324_v0 }
  0x48   : > { %402 = sbr.rel (%p1124_p12) target bundleno = 87 (0x57), region = 59  ;;  %405 = vst [vmem:[#allocation2 + $0x10] sm:$0xff] (!%p1124_p12), %v1324_v0  ;;  %406 = vst [vmem:[#allocation2 + $0x18] sm:$0xff] (!%p1124_p12), %v1324_v0 }
  0x49   : > { %407 = vst [vmem:[#allocation2 + $0x20] sm:$0xff] (!%p1124_p12), %v1324_v0  ;;  %408 = vst [vmem:[#allocation2 + $0x28] sm:$0xff] (!%p1124_p12), %v1324_v0 }
  0x4a   : > { %409 = vst [vmem:[#allocation2 + $0x30] sm:$0xff] (!%p1124_p12), %v1324_v0  ;;  %410 = vst [vmem:[#allocation2 + $0x38] sm:$0xff] (!%p1124_p12), %v1324_v0 }
  0x4b   : > { %411 = vst [vmem:[#allocation2 + $0x40] sm:$0xff] (!%p1124_p12), %v1324_v0  ;;  %412 = vst [vmem:[#allocation2 + $0x48] sm:$0xff] (!%p1124_p12), %v1324_v0 }
  0x4c   : > { %413 = vst [vmem:[#allocation2 + $0x50] sm:$0xff] (!%p1124_p12), %v1324_v0  ;;  %414 = vst [vmem:[#allocation2 + $0x58] sm:$0xff] (!%p1124_p12), %v1324_v0 }
  0x4d   : > { %415 = vst [vmem:[#allocation2 + $0x60] sm:$0xff] (!%p1124_p12), %v1324_v0  ;;  %416 = vst [vmem:[#allocation2 + $0x68] sm:$0xff] (!%p1124_p12), %v1324_v0 }
  0x4e   : > { %417 = vst [vmem:[#allocation2 + $0x70] sm:$0xff] (!%p1124_p12), %v1324_v0  ;;  %418 = vst [vmem:[#allocation2 + $0x78] sm:$0xff] (!%p1124_p12), %v1324_v0 }
  0x4f   : > { %419 = vst [vmem:[#allocation2 + $0x80] sm:$0xff] %v1324_v0  ;;  %420 = vst [vmem:[#allocation2 + $0x88] sm:$0xff] %v1324_v0 }
  0x50   : > { %421 = vst [vmem:[#allocation2 + $0x90] sm:$0xff] %v1324_v0  ;;  %422 = vst [vmem:[#allocation2 + $0x98] sm:$0xff] %v1324_v0 }
  0x51   : > { %423 = vst [vmem:[#allocation2 + $0xa0] sm:$0xff] %v1324_v0  ;;  %424 = vst [vmem:[#allocation2 + $0xa8] sm:$0xff] %v1324_v0 }
  0x52   : > { %425 = vst [vmem:[#allocation2 + $0xb0] sm:$0xff] %v1324_v0  ;;  %426 = vst [vmem:[#allocation2 + $0xb8] sm:$0xff] %v1324_v0 }
  0x53   : > { %427 = vst [vmem:[#allocation2 + $0xc0] sm:$0xff] %v1324_v0  ;;  %428 = vst [vmem:[#allocation2 + $0xc8] sm:$0xff] %v1324_v0 }
  0x54   : > { %429 = vst [vmem:[#allocation2 + $0xd0] sm:$0xff] %v1324_v0  ;;  %430 = vst [vmem:[#allocation2 + $0xd8] sm:$0xff] %v1324_v0 }
  0x55   : > { %431 = vst [vmem:[#allocation2 + $0xe0] sm:$0xff] %v1324_v0  ;;  %432 = vst [vmem:[#allocation2 + $0xe8] sm:$0xff] %v1324_v0 }
  0x56   : > { %433 = vst [vmem:[#allocation2 + $0xf0] sm:$0xff] %v1324_v0  ;;  %434 = vst [vmem:[#allocation2 + $0xf8] sm:$0xff] %v1324_v0 }
  0x57 PF: > { %v531_v1 = vld [vmem:[%s1546_s26] sm:$0xff]  ;;  %v532_v2 = vld [vmem:[%s1546_s26 + $0x8] sm:$0xff]  ;;  %v533_v3 = vld [vmem:[%s1546_s26 + $0x10] sm:$0xff]  ;;  %v1325_v4 = vmov 0.0|0.0   ;;  %p1125_p13 = scmp.ne.s32.totalorder %s1306_s14, 2 }
  0x58   : > { %1129 = vmatprep.subr.bf16.mxu0 %v1325_v4  ;;  %1177 = vmatprep.subr.bf16.mxu1 %v1325_v4  ;;  %v1130_v5 = vpack.c.bf16 %v532_v2, %v531_v1  ;;  %v534_v6 = vld [vmem:[%s1546_s26 + $0x18] sm:$0xff]  ;;  %v535_v8 = vld [vmem:[%s1546_s26 + $0x20] sm:$0xff]  ;;  %v536_v9 = vld [vmem:[%s1546_s26 + $0x28] sm:$0xff] }
  0x59   : > { %v1133_v7 = vpack.c.bf16 %v534_v6, %v533_v3  ;;  %v1136_v10 = vpack.c.bf16 %v536_v9, %v535_v8  ;;  %v537_v11 = vld [vmem:[%s1546_s26 + $0x30] sm:$0xff]  ;;  %v538_v12 = vld [vmem:[%s1546_s26 + $0x38] sm:$0xff]  ;;  %v468_v13 = vld [vmem:[%s1553_s12 + $0x8] sm:$0xff] }
  0x5a   : > { %1131 = vmatpush1.bf16.msra.mxu0 %v1130_v5  ;;  %1193 = vmatpush1.bf16.msra.mxu1 %v1130_v5  ;;  %v1139_v14 = vpack.c.bf16 %v538_v12, %v537_v11  ;;  %v500_v15 = vld [vmem:[%s1553_s12 + $0x108] sm:$0xff]  ;;  %v539_v16 = vld [vmem:[%s1546_s26 + $0x40] sm:$0xff]  ;;  %v541_v19 = vld [vmem:[%s1546_s26 + $0x50] sm:$0xff] }
  0x5b   : > { %1132 = vmatprep.subr.bf16.mxu0 %v1325_v4  ;;  %1178 = vmatprep.subr.bf16.mxu1 %v1325_v4  ;;  %v540_v17 = vld [vmem:[%s1546_s26 + $0x48] sm:$0xff]  ;;  %v542_v20 = vld [vmem:[%s1546_s26 + $0x58] sm:$0xff]  ;;  %v543_v22 = vld [vmem:[%s1546_s26 + $0x60] sm:$0xff] }
  0x5c   : > { %627 = vmatprep.mubr.f32.mxu0 %v468_v13  ;;  %707 = vmatprep.mubr.f32.mxu1 %v500_v15  ;;  %v1142_v18 = vpack.c.bf16 %v540_v17, %v539_v16  ;;  %v1145_v21 = vpack.c.bf16 %v542_v20, %v541_v19  ;;  %v544_v23 = vld [vmem:[%s1546_s26 + $0x68] sm:$0xff]  ;;  %v545_v25 = vld [vmem:[%s1546_s26 + $0x70] sm:$0xff]  ;;  %v546_v26 = vld [vmem:[%s1546_s26 + $0x78] sm:$0xff] }
  0x5d   : > { %v1148_v24 = vpack.c.bf16 %v544_v23, %v543_v22  ;;  %v1151_v27 = vpack.c.bf16 %v546_v26, %v545_v25  ;;  %v547_v28 = vld [vmem:[%s1546_s26 + $0x80] sm:$0xff]  ;;  %v548_v29 = vld [vmem:[%s1546_s26 + $0x88] sm:$0xff]  ;;  %v549_v31 = vld [vmem:[%s1546_s26 + $0x90] sm:$0xff] }
  0x5e   : > { %1134 = vmatpush1.bf16.msra.mxu0 %v1133_v7  ;;  %1194 = vmatpush1.bf16.msra.mxu1 %v1133_v7  ;;  %v1154_v30 = vpack.c.bf16 %v548_v29, %v547_v28  ;;  %v550_v32 = vld [vmem:[%s1546_s26 + $0x98] sm:$0xff]  ;;  %v551_v34 = vld [vmem:[%s1546_s26 + $0xa0] sm:$0xff]  ;;  %v552_v35 = vld [vmem:[%s1546_s26 + $0xa8] sm:$0xff] }
  0x5f   : > { %1135 = vmatprep.subr.bf16.mxu0 %v1325_v4  ;;  %1179 = vmatprep.subr.bf16.mxu1 %v1325_v4  ;;  %v1157_v33 = vpack.c.bf16 %v550_v32, %v549_v31  ;;  %v1160_v36 = vpack.c.bf16 %v552_v35, %v551_v34  ;;  %v553_v37 = vld [vmem:[%s1546_s26 + $0xb0] sm:$0xff]  ;;  %v554_v38 = vld [vmem:[%s1546_s26 + $0xb8] sm:$0xff]  ;;  %v555_v40 = vld [vmem:[%s1546_s26 + $0xc0] sm:$0xff] }
  0x60   : > { %v1163_v39 = vpack.c.bf16 %v554_v38, %v553_v37  ;;  %v556_v41 = vld [vmem:[%s1546_s26 + $0xc8] sm:$0xff]  ;;  %v557_v43 = vld [vmem:[%s1546_s26 + $0xd0] sm:$0xff]  ;;  %v558_v44 = vld [vmem:[%s1546_s26 + $0xd8] sm:$0xff] }
  0x61   : > { %v1166_v42 = vpack.c.bf16 %v556_v41, %v555_v40  ;;  %v1169_v45 = vpack.c.bf16 %v558_v44, %v557_v43  ;;  %v559_v46 = vld [vmem:[%s1546_s26 + $0xe0] sm:$0xff]  ;;  %v560_v47 = vld [vmem:[%s1546_s26 + $0xe8] sm:$0xff]  ;;  %v561_v49 = vld [vmem:[%s1546_s26 + $0xf0] sm:$0xff] }
  0x62   : > { %1137 = vmatpush1.bf16.msra.mxu0 %v1136_v10  ;;  %1195 = vmatpush1.bf16.msra.mxu1 %v1136_v10  ;;  %v1172_v48 = vpack.c.bf16 %v560_v47, %v559_v46  ;;  %v562_v50 = vld [vmem:[%s1546_s26 + $0xf8] sm:$0xff]  ;;  %v467_v52 = vld [vmem:[%s1553_s12] sm:$0xff]  ;;  %v469_v56 = vld [vmem:[%s1553_s12 + $0x10] sm:$0xff] }
  0x63   : > { %1138 = vmatprep.subr.bf16.mxu0 %v1325_v4  ;;  %1180 = vmatprep.subr.bf16.mxu1 %v1325_v4  ;;  %v1175_v51 = vpack.c.bf16 %v562_v50, %v561_v49  ;;  %v499_v53 = vld [vmem:[%s1553_s12 + $0x100] sm:$0xff]  ;;  %v470_v54 = vld [vmem:[%s1553_s12 + $0x18] sm:$0xff]  ;;  %v501_v57 = vld [vmem:[%s1553_s12 + $0x110] sm:$0xff] }
  0x64   : > { %v502_v55 = vld [vmem:[%s1553_s12 + $0x118] sm:$0xff]  ;;  %v472_v58 = vld [vmem:[%s1553_s12 + $0x28] sm:$0xff]  ;;  %v471_v60 = vld [vmem:[%s1553_s12 + $0x20] sm:$0xff] }
  0x65   : > { %v504_v59 = vld [vmem:[%s1553_s12 + $0x128] sm:$0xff]  ;;  %v503_v61 = vld [vmem:[%s1553_s12 + $0x120] sm:$0xff]  ;;  %v474_v62 = vld [vmem:[%s1553_s12 + $0x38] sm:$0xff] }
  0x66   : > { %1140 = vmatpush1.bf16.msra.mxu0 %v1139_v14  ;;  %1196 = vmatpush1.bf16.msra.mxu1 %v1139_v14  ;;  %v506_v63 = vld [vmem:[%s1553_s12 + $0x138] sm:$0xff]  ;;  %v473_v0 = vld [vmem:[%s1553_s12 + $0x30] sm:$0xff]  ;;  %v476_v2 = vld [vmem:[%s1553_s12 + $0x48] sm:$0xff] }
  0x67   : > { %1141 = vmatprep.subr.bf16.mxu0 %v1325_v4  ;;  %1181 = vmatprep.subr.bf16.mxu1 %v1325_v4  ;;  %v505_v1 = vld [vmem:[%s1553_s12 + $0x130] sm:$0xff]  ;;  %v508_v3 = vld [vmem:[%s1553_s12 + $0x148] sm:$0xff]  ;;  %v507_v5 = vld [vmem:[%s1553_s12 + $0x140] sm:$0xff] }
  0x68   : > { %v478_v6 = vld [vmem:[%s1553_s12 + $0x58] sm:$0xff]  ;;  %v477_v8 = vld [vmem:[%s1553_s12 + $0x50] sm:$0xff]  ;;  %v480_v10 = vld [vmem:[%s1553_s12 + $0x68] sm:$0xff] }
  0x69   : > { %v510_v7 = vld [vmem:[%s1553_s12 + $0x158] sm:$0xff]  ;;  %v509_v9 = vld [vmem:[%s1553_s12 + $0x150] sm:$0xff]  ;;  %v512_v11 = vld [vmem:[%s1553_s12 + $0x168] sm:$0xff] }
  0x6a   : > { %1143 = vmatpush1.bf16.msra.mxu0 %v1142_v18  ;;  %1197 = vmatpush1.bf16.msra.mxu1 %v1142_v18  ;;  %v479_v12 = vld [vmem:[%s1553_s12 + $0x60] sm:$0xff]  ;;  %v482_v14 = vld [vmem:[%s1553_s12 + $0x78] sm:$0xff]  ;;  %v481_v16 = vld [vmem:[%s1553_s12 + $0x70] sm:$0xff] }
  0x6b   : > { %1144 = vmatprep.subr.bf16.mxu0 %v1325_v4  ;;  %1182 = vmatprep.subr.bf16.mxu1 %v1325_v4  ;;  %v511_v13 = vld [vmem:[%s1553_s12 + $0x160] sm:$0xff]  ;;  %v514_v15 = vld [vmem:[%s1553_s12 + $0x178] sm:$0xff]  ;;  %v513_v17 = vld [vmem:[%s1553_s12 + $0x170] sm:$0xff] }
  0x6c   : > { %v484_v18 = vld [vmem:[%s1553_s12 + $0x88] sm:$0xff]  ;;  %v483_v20 = vld [vmem:[%s1553_s12 + $0x80] sm:$0xff]  ;;  %v486_v22 = vld [vmem:[%s1553_s12 + $0x98] sm:$0xff] }
  0x6d   : > { %v516_v19 = vld [vmem:[%s1553_s12 + $0x188] sm:$0xff]  ;;  %v518_v23 = vld [vmem:[%s1553_s12 + $0x198] sm:$0xff]  ;;  %v517_v25 = vld [vmem:[%s1553_s12 + $0x190] sm:$0xff] }
  0x6e   : > { %1146 = vmatpush1.bf16.msra.mxu0 %v1145_v21  ;;  %1198 = vmatpush1.bf16.msra.mxu1 %v1145_v21  ;;  %v515_v21 = vld [vmem:[%s1553_s12 + $0x180] sm:$0xff]  ;;  %v488_v26 = vld [vmem:[%s1553_s12 + $0xa8] sm:$0xff]  ;;  %v522_v31 = vld [vmem:[%s1553_s12 + $0x1b8] sm:$0xff] }
  0x6f   : > { %1147 = vmatprep.subr.bf16.mxu0 %v1325_v4  ;;  %1183 = vmatprep.subr.bf16.mxu1 %v1325_v4  ;;  %v487_v28 = vld [vmem:[%s1553_s12 + $0xa0] sm:$0xff]  ;;  %v489_v32 = vld [vmem:[%s1553_s12 + $0xb0] sm:$0xff]  ;;  %v492_v34 = vld [vmem:[%s1553_s12 + $0xc8] sm:$0xff] }
  0x70   : > { %v519_v29 = vld [vmem:[%s1553_s12 + $0x1a0] sm:$0xff]  ;;  %v524_v35 = vld [vmem:[%s1553_s12 + $0x1c8] sm:$0xff]  ;;  %v494_v38 = vld [vmem:[%s1553_s12 + $0xd8] sm:$0xff] }
  0x71   : > { %v523_v37 = vld [vmem:[%s1553_s12 + $0x1c0] sm:$0xff]  ;;  %v493_v40 = vld [vmem:[%s1553_s12 + $0xd0] sm:$0xff]  ;;  %v528_v43 = vld [vmem:[%s1553_s12 + $0x1e8] sm:$0xff] }
  0x72   : > { %1149 = vmatpush1.bf16.msra.mxu0 %v1148_v24  ;;  %1199 = vmatpush1.bf16.msra.mxu1 %v1148_v24  ;;  %v485_v24 = vld [vmem:[%s1553_s12 + $0x90] sm:$0xff]  ;;  %v495_v44 = vld [vmem:[%s1553_s12 + $0xe0] sm:$0xff]  ;;  %v498_v46 = vld [vmem:[%s1553_s12 + $0xf8] sm:$0xff] }
  0x73   : > { %1150 = vmatprep.subr.bf16.mxu0 %v1325_v4  ;;  %1184 = vmatprep.subr.bf16.mxu1 %v1325_v4  ;;  %v525_v41 = vld [vmem:[%s1553_s12 + $0x1d0] sm:$0xff]  ;;  %v530_v47 = vld [vmem:[%s1553_s12 + $0x1f8] sm:$0xff]  ;;  %v435_v50 = vld [vmem:[#allocation2] sm:$0xff] }
  0x74   : > { %v529_v49 = vld [vmem:[%s1553_s12 + $0x1f0] sm:$0xff] }
  0x76   : > { %1152 = vmatpush1.bf16.msra.mxu0 %v1151_v27  ;;  %1200 = vmatpush1.bf16.msra.mxu1 %v1151_v27  ;;  %v520_v27 = vld [vmem:[%s1553_s12 + $0x1a8] sm:$0xff] }
  0x77   : > { %1153 = vmatprep.subr.bf16.mxu0 %v1325_v4  ;;  %1185 = vmatprep.subr.bf16.mxu1 %v1325_v4 }
  0x7a   : > { %1155 = vmatpush1.bf16.msra.mxu0 %v1154_v30  ;;  %1201 = vmatpush1.bf16.msra.mxu1 %v1154_v30  ;;  %v490_v30 = vld [vmem:[%s1553_s12 + $0xb8] sm:$0xff] }
  0x7b   : > { %1156 = vmatprep.subr.bf16.mxu0 %v1325_v4  ;;  %1186 = vmatprep.subr.bf16.mxu1 %v1325_v4 }
  0x7e   : > { %1158 = vmatpush1.bf16.msra.mxu0 %v1157_v33  ;;  %1202 = vmatpush1.bf16.msra.mxu1 %v1157_v33  ;;  %v521_v33 = vld [vmem:[%s1553_s12 + $0x1b0] sm:$0xff] }
  0x7f   : > { %1159 = vmatprep.subr.bf16.mxu0 %v1325_v4  ;;  %1187 = vmatprep.subr.bf16.mxu1 %v1325_v4 }
  0x82   : > { %1161 = vmatpush1.bf16.msra.mxu0 %v1160_v36  ;;  %1203 = vmatpush1.bf16.msra.mxu1 %v1160_v36  ;;  %v491_v36 = vld [vmem:[%s1553_s12 + $0xc0] sm:$0xff] }
  0x83   : > { %1162 = vmatprep.subr.bf16.mxu0 %v1325_v4  ;;  %1188 = vmatprep.subr.bf16.mxu1 %v1325_v4 }
  0x86   : > { %1164 = vmatpush1.bf16.msra.mxu0 %v1163_v39  ;;  %1204 = vmatpush1.bf16.msra.mxu1 %v1163_v39  ;;  %v526_v39 = vld [vmem:[%s1553_s12 + $0x1d8] sm:$0xff] }
  0x87   : > { %1165 = vmatprep.subr.bf16.mxu0 %v1325_v4  ;;  %1189 = vmatprep.subr.bf16.mxu1 %v1325_v4 }
  0x8a   : > { %1167 = vmatpush1.bf16.msra.mxu0 %v1166_v42  ;;  %1205 = vmatpush1.bf16.msra.mxu1 %v1166_v42  ;;  %v496_v42 = vld [vmem:[%s1553_s12 + $0xe8] sm:$0xff] }
  0x8b   : > { %1168 = vmatprep.subr.bf16.mxu0 %v1325_v4  ;;  %1190 = vmatprep.subr.bf16.mxu1 %v1325_v4 }
  0x8e   : > { %1170 = vmatpush1.bf16.msra.mxu0 %v1169_v45  ;;  %1206 = vmatpush1.bf16.msra.mxu1 %v1169_v45  ;;  %v527_v45 = vld [vmem:[%s1553_s12 + $0x1e0] sm:$0xff] }
  0x8f   : > { %1171 = vmatprep.subr.bf16.mxu0 %v1325_v4  ;;  %1191 = vmatprep.subr.bf16.mxu1 %v1325_v4 }
  0x92   : > { %1173 = vmatpush1.bf16.msra.mxu0 %v1172_v48  ;;  %1207 = vmatpush1.bf16.msra.mxu1 %v1172_v48  ;;  %v497_v48 = vld [vmem:[%s1553_s12 + $0xf0] sm:$0xff] }
  0x93   : > { %1174 = vmatprep.subr.bf16.mxu0 %v1325_v4  ;;  %1192 = vmatprep.subr.bf16.mxu1 %v1325_v4  ;;  %v475_v4 = vld [vmem:[%s1553_s12 + $0x40] sm:$0xff] }
  0x96   : > { %1176 = vmatpush1.bf16.msra.mxu0 %v1175_v51  ;;  %1208 = vmatpush1.bf16.msra.mxu1 %v1175_v51  ;;  %v451_v51 = vld [vmem:[#allocation2 + $0x80] sm:$0xff] }
  0x99   : > { %628 = vmatmul.mubr.f32.vlgmr.msra.gmra.mrb[0].mxu0 %v467_v52  ;;  %708 = vmatmul.mubr.f32.vlgmr.msra.gmra.mrb[0].mxu1 %v499_v53 }
  0x9a   : > { %632 = vmatprep.mubr.f32.mxu0 %v470_v54  ;;  %712 = vmatprep.mubr.f32.mxu1 %v502_v55 }
  0x9d   : > { %633 = vmatmul.mubr.f32.gmra.mrb[2].mxu0 %v469_v56  ;;  %713 = vmatmul.mubr.f32.gmra.mrb[2].mxu1 %v501_v57 }
  0x9e   : > { %637 = vmatprep.mubr.f32.mxu0 %v472_v58  ;;  %717 = vmatprep.mubr.f32.mxu1 %v504_v59  ;;  %v436_v58 = vld [vmem:[#allocation2 + $0x8] sm:$0xff] }
  0x9f   : > { %v452_v59 = vld [vmem:[#allocation2 + $0x88] sm:$0xff] }
  0xa1   : > { %638 = vmatmul.mubr.f32.gmra.mrb[4].mxu0 %v471_v60  ;;  %718 = vmatmul.mubr.f32.gmra.mrb[4].mxu1 %v503_v61 }
  0xa2   : > { %642 = vmatprep.mubr.f32.mxu0 %v474_v62  ;;  %722 = vmatprep.mubr.f32.mxu1 %v506_v63 }
  0xa5   : > { %643 = vmatmul.mubr.f32.gmra.mrb[6].mxu0 %v473_v0  ;;  %723 = vmatmul.mubr.f32.gmra.mrb[6].mxu1 %v505_v1 }
  0xa6   : > { %647 = vmatprep.mubr.f32.mxu0 %v476_v2  ;;  %727 = vmatprep.mubr.f32.mxu1 %v508_v3  ;;  %v437_v2 = vld [vmem:[#allocation2 + $0x10] sm:$0xff] }
  0xa7   : > { %v453_v3 = vld [vmem:[#allocation2 + $0x90] sm:$0xff] }
  0xa9   : > { %648 = vmatmul.mubr.f32.gmra.mrb[8].mxu0 %v475_v4  ;;  %728 = vmatmul.mubr.f32.gmra.mrb[8].mxu1 %v507_v5 }
  0xaa   : > { %652 = vmatprep.mubr.f32.mxu0 %v478_v6  ;;  %732 = vmatprep.mubr.f32.mxu1 %v510_v7 }
  0xad   : > { %653 = vmatmul.mubr.f32.gmra.mrb[10].mxu0 %v477_v8  ;;  %733 = vmatmul.mubr.f32.gmra.mrb[10].mxu1 %v509_v9 }
  0xae   : > { %657 = vmatprep.mubr.f32.mxu0 %v480_v10  ;;  %737 = vmatprep.mubr.f32.mxu1 %v512_v11  ;;  %v438_v10 = vld [vmem:[#allocation2 + $0x18] sm:$0xff] }
  0xaf   : > { %v454_v11 = vld [vmem:[#allocation2 + $0x98] sm:$0xff] }
  0xb1   : > { %658 = vmatmul.mubr.f32.gmra.mrb[12].mxu0 %v479_v12  ;;  %738 = vmatmul.mubr.f32.gmra.mrb[12].mxu1 %v511_v13 }
  0xb2   : > { %662 = vmatprep.mubr.f32.mxu0 %v482_v14  ;;  %742 = vmatprep.mubr.f32.mxu1 %v514_v15 }
  0xb5   : > { %663 = vmatmul.mubr.f32.gmra.mrb[14].mxu0 %v481_v16  ;;  %743 = vmatmul.mubr.f32.gmra.mrb[14].mxu1 %v513_v17 }
  0xb6   : > { %667 = vmatprep.mubr.f32.mxu0 %v484_v18  ;;  %747 = vmatprep.mubr.f32.mxu1 %v516_v19  ;;  %v439_v18 = vld [vmem:[#allocation2 + $0x20] sm:$0xff] }
  0xb7   : > { %v455_v19 = vld [vmem:[#allocation2 + $0xa0] sm:$0xff] }
  0xb9   : > { %668 = vmatmul.mubr.f32.gmra.mrb[16].mxu0 %v483_v20  ;;  %748 = vmatmul.mubr.f32.gmra.mrb[16].mxu1 %v515_v21 }
  0xba   : > { %672 = vmatprep.mubr.f32.mxu0 %v486_v22  ;;  %752 = vmatprep.mubr.f32.mxu1 %v518_v23 }
  0xbd   : > { %673 = vmatmul.mubr.f32.gmra.mrb[18].mxu0 %v485_v24  ;;  %753 = vmatmul.mubr.f32.gmra.mrb[18].mxu1 %v517_v25 }
  0xbe   : > { %677 = vmatprep.mubr.f32.mxu0 %v488_v26  ;;  %757 = vmatprep.mubr.f32.mxu1 %v520_v27  ;;  %v440_v26 = vld [vmem:[#allocation2 + $0x28] sm:$0xff] }
  0xbf   : > { %v456_v27 = vld [vmem:[#allocation2 + $0xa8] sm:$0xff] }
  0xc1   : > { %678 = vmatmul.mubr.f32.gmra.mrb[20].mxu0 %v487_v28  ;;  %758 = vmatmul.mubr.f32.gmra.mrb[20].mxu1 %v519_v29 }
  0xc2   : > { %682 = vmatprep.mubr.f32.mxu0 %v490_v30  ;;  %762 = vmatprep.mubr.f32.mxu1 %v522_v31 }
  0xc5   : > { %683 = vmatmul.mubr.f32.gmra.mrb[22].mxu0 %v489_v32  ;;  %763 = vmatmul.mubr.f32.gmra.mrb[22].mxu1 %v521_v33 }
  0xc6   : > { %687 = vmatprep.mubr.f32.mxu0 %v492_v34  ;;  %767 = vmatprep.mubr.f32.mxu1 %v524_v35  ;;  %v441_v34 = vld [vmem:[#allocation2 + $0x30] sm:$0xff] }
  0xc7   : > { %v457_v35 = vld [vmem:[#allocation2 + $0xb0] sm:$0xff] }
  0xc9   : > { %688 = vmatmul.mubr.f32.gmra.mrb[24].mxu0 %v491_v36  ;;  %768 = vmatmul.mubr.f32.gmra.mrb[24].mxu1 %v523_v37 }
  0xca   : > { %692 = vmatprep.mubr.f32.mxu0 %v494_v38  ;;  %772 = vmatprep.mubr.f32.mxu1 %v526_v39 }
  0xcd   : > { %693 = vmatmul.mubr.f32.gmra.mrb[26].mxu0 %v493_v40  ;;  %773 = vmatmul.mubr.f32.gmra.mrb[26].mxu1 %v525_v41 }
  0xce   : > { %697 = vmatprep.mubr.f32.mxu0 %v496_v42  ;;  %777 = vmatprep.mubr.f32.mxu1 %v528_v43  ;;  %v442_v42 = vld [vmem:[#allocation2 + $0x38] sm:$0xff] }
  0xcf   : > { %v458_v43 = vld [vmem:[#allocation2 + $0xb8] sm:$0xff] }
  0xd1   : > { %698 = vmatmul.mubr.f32.gmra.mrb[28].mxu0 %v495_v44  ;;  %778 = vmatmul.mubr.f32.gmra.mrb[28].mxu1 %v527_v45 }
  0xd2   : > { %702 = vmatprep.mubr.f32.mxu0 %v498_v46  ;;  %782 = vmatprep.mubr.f32.mxu1 %v530_v47 }
  0xd5   : > { %703 = vmatmul.mubr.f32.gmra.mrb[30].mxu0 %v497_v48  ;;  %783 = vmatmul.mubr.f32.gmra.mrb[30].mxu1 %v529_v49 }
 0x16c   : > { %v629_v52 = vpop.f32.mrb[0].mxu0  ;;  %v709_v53 = vpop.f32.mrb[0].mxu1 }
 0x16d   : > { %v788_v54 = vadd.f32 %v629_v52, %v435_v50  ;;  %v804_v55 = vadd.f32 %v709_v53, %v451_v51  ;;  %v631_v56 = vpop.f32.mrb[1].mxu0  ;;  %v711_v57 = vpop.f32.mrb[1].mxu1  ;;  %v443_v50 = vld [vmem:[#allocation2 + $0x40] sm:$0xff] }
 0x16e   : > { %v459_v51 = vld [vmem:[#allocation2 + $0xc0] sm:$0xff] }
 0x16f   : > { %820 = vst [vmem:[#allocation2] sm:$0xff] %v788_v54  ;;  %836 = vst [vmem:[#allocation2 + $0x80] sm:$0xff] %v804_v55 }
 0x170   : > { %v634_v60 = vpop.f32.mrb[2].mxu0  ;;  %v714_v61 = vpop.f32.mrb[2].mxu1 }
 0x171   : > { %v789_v62 = vadd.f32 %v634_v60, %v436_v58  ;;  %v805_v63 = vadd.f32 %v714_v61, %v452_v59  ;;  %v636_v0 = vpop.f32.mrb[3].mxu0  ;;  %v716_v1 = vpop.f32.mrb[3].mxu1  ;;  %v444_v58 = vld [vmem:[#allocation2 + $0x48] sm:$0xff] }
 0x172   : > { %v460_v59 = vld [vmem:[#allocation2 + $0xc8] sm:$0xff] }
 0x173   : > { %821 = vst [vmem:[#allocation2 + $0x8] sm:$0xff] %v789_v62  ;;  %837 = vst [vmem:[#allocation2 + $0x88] sm:$0xff] %v805_v63 }
 0x174   : > { %v639_v4 = vpop.f32.mrb[4].mxu0  ;;  %v719_v5 = vpop.f32.mrb[4].mxu1 }
 0x175   : > { %v790_v6 = vadd.f32 %v639_v4, %v437_v2  ;;  %v806_v7 = vadd.f32 %v719_v5, %v453_v3  ;;  %v641_v8 = vpop.f32.mrb[5].mxu0  ;;  %v721_v9 = vpop.f32.mrb[5].mxu1  ;;  %v445_v2 = vld [vmem:[#allocation2 + $0x50] sm:$0xff] }
 0x176   : > { %v461_v3 = vld [vmem:[#allocation2 + $0xd0] sm:$0xff] }
 0x177   : > { %822 = vst [vmem:[#allocation2 + $0x10] sm:$0xff] %v790_v6  ;;  %838 = vst [vmem:[#allocation2 + $0x90] sm:$0xff] %v806_v7 }
 0x178   : > { %v644_v12 = vpop.f32.mrb[6].mxu0  ;;  %v724_v13 = vpop.f32.mrb[6].mxu1 }
 0x179   : > { %v791_v14 = vadd.f32 %v644_v12, %v438_v10  ;;  %v807_v15 = vadd.f32 %v724_v13, %v454_v11  ;;  %v646_v16 = vpop.f32.mrb[7].mxu0  ;;  %v726_v17 = vpop.f32.mrb[7].mxu1  ;;  %v446_v10 = vld [vmem:[#allocation2 + $0x58] sm:$0xff] }
 0x17a   : > { %v462_v11 = vld [vmem:[#allocation2 + $0xd8] sm:$0xff] }
 0x17b   : > { %823 = vst [vmem:[#allocation2 + $0x18] sm:$0xff] %v791_v14  ;;  %839 = vst [vmem:[#allocation2 + $0x98] sm:$0xff] %v807_v15 }
 0x17c   : > { %v649_v20 = vpop.f32.mrb[8].mxu0  ;;  %v729_v21 = vpop.f32.mrb[8].mxu1 }
 0x17d   : > { %v792_v22 = vadd.f32 %v649_v20, %v439_v18  ;;  %v808_v23 = vadd.f32 %v729_v21, %v455_v19  ;;  %v651_v24 = vpop.f32.mrb[9].mxu0  ;;  %v731_v25 = vpop.f32.mrb[9].mxu1  ;;  %v447_v18 = vld [vmem:[#allocation2 + $0x60] sm:$0xff] }
 0x17e   : > { %v463_v19 = vld [vmem:[#allocation2 + $0xe0] sm:$0xff] }
 0x17f   : > { %824 = vst [vmem:[#allocation2 + $0x20] sm:$0xff] %v792_v22  ;;  %840 = vst [vmem:[#allocation2 + $0xa0] sm:$0xff] %v808_v23 }
 0x180   : > { %v654_v28 = vpop.f32.mrb[10].mxu0  ;;  %v734_v29 = vpop.f32.mrb[10].mxu1 }
 0x181   : > { %v793_v30 = vadd.f32 %v654_v28, %v440_v26  ;;  %v809_v31 = vadd.f32 %v734_v29, %v456_v27  ;;  %v656_v32 = vpop.f32.mrb[11].mxu0  ;;  %v736_v33 = vpop.f32.mrb[11].mxu1  ;;  %v448_v26 = vld [vmem:[#allocation2 + $0x68] sm:$0xff] }
 0x182   : > { %v464_v27 = vld [vmem:[#allocation2 + $0xe8] sm:$0xff] }
 0x183   : > { %825 = vst [vmem:[#allocation2 + $0x28] sm:$0xff] %v793_v30  ;;  %841 = vst [vmem:[#allocation2 + $0xa8] sm:$0xff] %v809_v31 }
 0x184   : > { %v659_v36 = vpop.f32.mrb[12].mxu0  ;;  %v739_v37 = vpop.f32.mrb[12].mxu1 }
 0x185   : > { %v794_v38 = vadd.f32 %v659_v36, %v441_v34  ;;  %v810_v39 = vadd.f32 %v739_v37, %v457_v35  ;;  %v661_v40 = vpop.f32.mrb[13].mxu0  ;;  %v741_v41 = vpop.f32.mrb[13].mxu1  ;;  %v449_v34 = vld [vmem:[#allocation2 + $0x70] sm:$0xff] }
 0x186   : > { %v465_v35 = vld [vmem:[#allocation2 + $0xf0] sm:$0xff] }
 0x187   : > { %826 = vst [vmem:[#allocation2 + $0x30] sm:$0xff] %v794_v38  ;;  %842 = vst [vmem:[#allocation2 + $0xb0] sm:$0xff] %v810_v39 }
 0x188   : > { %v664_v44 = vpop.f32.mrb[14].mxu0  ;;  %v744_v45 = vpop.f32.mrb[14].mxu1 }
 0x189   : > { %v795_v46 = vadd.f32 %v664_v44, %v442_v42  ;;  %v811_v47 = vadd.f32 %v744_v45, %v458_v43  ;;  %v666_v48 = vpop.f32.mrb[15].mxu0  ;;  %v746_v49 = vpop.f32.mrb[15].mxu1  ;;  %v450_v42 = vld [vmem:[#allocation2 + $0x78] sm:$0xff] }
 0x18a   : > { %v466_v43 = vld [vmem:[#allocation2 + $0xf8] sm:$0xff] }
 0x18b   : > { %827 = vst [vmem:[#allocation2 + $0x38] sm:$0xff] %v795_v46  ;;  %843 = vst [vmem:[#allocation2 + $0xb8] sm:$0xff] %v811_v47 }
 0x18c   : > { %v669_v52 = vpop.f32.mrb[16].mxu0  ;;  %v749_v53 = vpop.f32.mrb[16].mxu1 }
 0x18d   : > { %v796_v54 = vadd.f32 %v669_v52, %v443_v50  ;;  %v812_v55 = vadd.f32 %v749_v53, %v459_v51  ;;  %v671_v56 = vpop.f32.mrb[17].mxu0  ;;  %v751_v57 = vpop.f32.mrb[17].mxu1  ;;  %v856_v50 = vld [vmem:[#allocation2] sm:$0xff] (!%p1125_p13)  ;;  %v857_v52 = vld [vmem:[#allocation2 + $0x8] sm:$0xff] (!%p1125_p13) }
 0x18e   : > { %v1688_v51 = vld [vmem:[%s1777_s2] ss:$0 sm:$0xff] (!%p1125_p13)  ;;  %v859_v56 = vld [vmem:[#allocation2 + $0x18] sm:$0xff] (!%p1125_p13) }
 0x18f   : > { %828 = vst [vmem:[#allocation2 + $0x40] sm:$0xff] %v796_v54  ;;  %844 = vst [vmem:[#allocation2 + $0xc0] sm:$0xff] %v812_v55  ;;  %v895_v53 = vadd.f32 (!%p1125_p13), %v1688_v51, %v856_v50  ;;  %v896_v54 = vadd.f32 (!%p1125_p13), %v1688_v51, %v857_v52  ;;  %v858_v55 = vld [vmem:[#allocation2 + $0x10] sm:$0xff] (!%p1125_p13)  ;;  %v860_v57 = vld [vmem:[#allocation2 + $0x20] sm:$0xff] (!%p1125_p13) }
 0x190   : > { %v674_v60 = vpop.f32.mrb[18].mxu0  ;;  %v754_v61 = vpop.f32.mrb[18].mxu1 }
 0x191   : > { %v797_v62 = vadd.f32 %v674_v60, %v444_v58  ;;  %v813_v63 = vadd.f32 %v754_v61, %v460_v59  ;;  %v676_v0 = vpop.f32.mrb[19].mxu0  ;;  %v756_v1 = vpop.f32.mrb[19].mxu1  ;;  %v897_v58 = vadd.f32 (!%p1125_p13), %v1688_v51, %v858_v55  ;;  %v898_v59 = vadd.f32 (!%p1125_p13), %v1688_v51, %v859_v56  ;;  %v861_v61 = vld [vmem:[#allocation2 + $0x28] sm:$0xff] (!%p1125_p13) }
 0x192   : > { %v899_v60 = vadd.f32 (!%p1125_p13), %v1688_v51, %v860_v57  ;;  %v927_v0 = vmax.f32 (!%p1125_p13), %v895_v53, 0.0  ;;  %v928_v1 = vmax.f32 (!%p1125_p13), %v896_v54, 0.0 }
 0x193   : > { %829 = vst [vmem:[#allocation2 + $0x48] sm:$0xff] %v797_v62  ;;  %845 = vst [vmem:[#allocation2 + $0xc8] sm:$0xff] %v813_v63  ;;  %v862_v62 = vld [vmem:[#allocation2 + $0x30] sm:$0xff] (!%p1125_p13)  ;;  %v863_v63 = vld [vmem:[#allocation2 + $0x38] sm:$0xff] (!%p1125_p13) }
 0x194   : > { %v679_v4 = vpop.f32.mrb[20].mxu0  ;;  %v759_v5 = vpop.f32.mrb[20].mxu1  ;;  %959 = vst [vmem:[%s1551_s30] sm:$0xff] (!%p1125_p13), %v927_v0  ;;  %960 = vst [vmem:[%s1551_s30 + $0x8] sm:$0xff] (!%p1125_p13), %v928_v1 }
 0x195   : > { %v798_v6 = vadd.f32 %v679_v4, %v445_v2  ;;  %v814_v7 = vadd.f32 %v759_v5, %v461_v3  ;;  %v681_v8 = vpop.f32.mrb[21].mxu0  ;;  %v761_v9 = vpop.f32.mrb[21].mxu1  ;;  %v900_v2 = vadd.f32 (!%p1125_p13), %v1688_v51, %v861_v61  ;;  %v901_v3 = vadd.f32 (!%p1125_p13), %v1688_v51, %v862_v62 }
 0x196   : > { %v864_v4 = vld [vmem:[#allocation2 + $0x40] sm:$0xff] (!%p1125_p13)  ;;  %v930_v8 = vmax.f32 (!%p1125_p13), %v898_v59, 0.0  ;;  %v931_v9 = vmax.f32 (!%p1125_p13), %v899_v60, 0.0 }
 0x197   : > { %830 = vst [vmem:[#allocation2 + $0x50] sm:$0xff] %v798_v6  ;;  %846 = vst [vmem:[#allocation2 + $0xd0] sm:$0xff] %v814_v7  ;;  %v929_v7 = vmax.f32 (!%p1125_p13), %v897_v58, 0.0 }
 0x198   : > { %v684_v12 = vpop.f32.mrb[22].mxu0  ;;  %v764_v13 = vpop.f32.mrb[22].mxu1  ;;  %962 = vst [vmem:[%s1551_s30 + $0x18] sm:$0xff] (!%p1125_p13), %v930_v8  ;;  %963 = vst [vmem:[%s1551_s30 + $0x20] sm:$0xff] (!%p1125_p13), %v931_v9 }
 0x199   : > { %v799_v14 = vadd.f32 %v684_v12, %v446_v10  ;;  %v815_v15 = vadd.f32 %v764_v13, %v462_v11  ;;  %v686_v16 = vpop.f32.mrb[23].mxu0  ;;  %v766_v17 = vpop.f32.mrb[23].mxu1  ;;  %v902_v10 = vadd.f32 (!%p1125_p13), %v1688_v51, %v863_v63  ;;  %961 = vst [vmem:[%s1551_s30 + $0x10] sm:$0xff] (!%p1125_p13), %v929_v7 }
 0x19a   : > { %v865_v5 = vld [vmem:[#allocation2 + $0x48] sm:$0xff] (!%p1125_p13)  ;;  %v903_v16 = vadd.f32 (!%p1125_p13), %v1688_v51, %v864_v4 }
 0x19b   : > { %831 = vst [vmem:[#allocation2 + $0x58] sm:$0xff] %v799_v14  ;;  %847 = vst [vmem:[#allocation2 + $0xd8] sm:$0xff] %v815_v15  ;;  %v932_v14 = vmax.f32 (!%p1125_p13), %v900_v2, 0.0  ;;  %v933_v15 = vmax.f32 (!%p1125_p13), %v901_v3, 0.0  ;;  %v904_v17 = vadd.f32 (!%p1125_p13), %v1688_v51, %v865_v5 }
 0x19c   : > { %v689_v20 = vpop.f32.mrb[24].mxu0  ;;  %v769_v21 = vpop.f32.mrb[24].mxu1 }
 0x19d   : > { %v800_v22 = vadd.f32 %v689_v20, %v447_v18  ;;  %v816_v23 = vadd.f32 %v769_v21, %v463_v19  ;;  %v691_v24 = vpop.f32.mrb[25].mxu0  ;;  %v771_v25 = vpop.f32.mrb[25].mxu1  ;;  %v934_v20 = vmax.f32 (!%p1125_p13), %v902_v10, 0.0  ;;  %964 = vst [vmem:[%s1551_s30 + $0x28] sm:$0xff] (!%p1125_p13), %v932_v14  ;;  %965 = vst [vmem:[%s1551_s30 + $0x30] sm:$0xff] (!%p1125_p13), %v933_v15 }
 0x19e   : > { %v866_v6 = vld [vmem:[#allocation2 + $0x50] sm:$0xff] (!%p1125_p13)  ;;  %v872_v24 = vld [vmem:[#allocation2 + $0x80] sm:$0xff] (!%p1125_p13)  ;;  %v873_v25 = vld [vmem:[#allocation2 + $0x88] sm:$0xff] (!%p1125_p13) }
 0x19f   : > { %832 = vst [vmem:[#allocation2 + $0x60] sm:$0xff] %v800_v22  ;;  %848 = vst [vmem:[#allocation2 + $0xe0] sm:$0xff] %v816_v23  ;;  %v905_v21 = vadd.f32 (!%p1125_p13), %v1688_v51, %v866_v6  ;;  %v882_v55 = vld [vmem:[#allocation2 + $0xd0] sm:$0xff] (!%p1125_p13) }
 0x1a0   : > { %v694_v28 = vpop.f32.mrb[26].mxu0  ;;  %v774_v29 = vpop.f32.mrb[26].mxu1  ;;  %966 = vst [vmem:[%s1551_s30 + $0x38] sm:$0xff] (!%p1125_p13), %v934_v20  ;;  %v921_v6 = vadd.f32 (!%p1125_p13), %v1688_v51, %v882_v55 }
 0x1a1   : > { %v801_v30 = vadd.f32 %v694_v28, %v448_v26  ;;  %v817_v31 = vadd.f32 %v774_v29, %v464_v27  ;;  %v696_v32 = vpop.f32.mrb[27].mxu0  ;;  %v776_v33 = vpop.f32.mrb[27].mxu1  ;;  %v935_v26 = vmax.f32 (!%p1125_p13), %v903_v16, 0.0  ;;  %v936_v27 = vmax.f32 (!%p1125_p13), %v904_v17, 0.0 }
 0x1a2   : > { %v867_v11 = vld [vmem:[#allocation2 + $0x58] sm:$0xff] (!%p1125_p13)  ;;  %v876_v32 = vld [vmem:[#allocation2 + $0xa0] sm:$0xff] (!%p1125_p13)  ;;  %v937_v33 = vmax.f32 (!%p1125_p13), %v905_v21, 0.0 }
 0x1a3   : > { %833 = vst [vmem:[#allocation2 + $0x68] sm:$0xff] %v801_v30  ;;  %849 = vst [vmem:[#allocation2 + $0xe8] sm:$0xff] %v817_v31  ;;  %v906_v22 = vadd.f32 (!%p1125_p13), %v1688_v51, %v867_v11  ;;  %v874_v30 = vld [vmem:[#allocation2 + $0x90] sm:$0xff] (!%p1125_p13)  ;;  %v875_v31 = vld [vmem:[#allocation2 + $0x98] sm:$0xff] (!%p1125_p13) }
 0x1a4   : > { %v699_v36 = vpop.f32.mrb[28].mxu0  ;;  %v779_v37 = vpop.f32.mrb[28].mxu1  ;;  %967 = vst [vmem:[%s1551_s30 + $0x40] sm:$0xff] (!%p1125_p13), %v935_v26  ;;  %968 = vst [vmem:[%s1551_s30 + $0x48] sm:$0xff] (!%p1125_p13), %v936_v27  ;;  %v883_v56 = vld [vmem:[#allocation2 + $0xd8] sm:$0xff] (!%p1125_p13) }
 0x1a5   : > { %v802_v38 = vadd.f32 %v699_v36, %v449_v34  ;;  %v818_v39 = vadd.f32 %v779_v37, %v465_v35  ;;  %v701_v40 = vpop.f32.mrb[29].mxu0  ;;  %v781_v41 = vpop.f32.mrb[29].mxu1  ;;  %855 = sbr.rel (%p1125_p13) target bundleno = 441 (0x1b9), region = 63  ;;  %v938_v34 = vmax.f32 (!%p1125_p13), %v906_v22, 0.0  ;;  %v877_v37 = vld [vmem:[#allocation2 + $0xa8] sm:$0xff] (!%p1125_p13)  ;;  %969 = vst [vmem:[%s1551_s30 + $0x50] sm:$0xff] (!%p1125_p13), %v937_v33  ;;  %v922_v7 = vadd.f32 (!%p1125_p13), %v1688_v51, %v883_v56 }
 0x1a6   : > { %v868_v12 = vld [vmem:[#allocation2 + $0x60] sm:$0xff] (!%p1125_p13)  ;;  %v911_v41 = vadd.f32 (!%p1125_p13), %v1688_v51, %v872_v24  ;;  %v916_v53 = vadd.f32 (!%p1125_p13), %v1688_v51, %v877_v37 }
 0x1a7   : > { %834 = vst [vmem:[#allocation2 + $0x70] sm:$0xff] %v802_v38  ;;  %850 = vst [vmem:[#allocation2 + $0xf0] sm:$0xff] %v818_v39  ;;  %v907_v23 = vadd.f32 (!%p1125_p13), %v1688_v51, %v868_v12  ;;  %v878_v38 = vld [vmem:[#allocation2 + $0xb0] sm:$0xff] (!%p1125_p13)  ;;  %v884_v57 = vld [vmem:[#allocation2 + $0xe0] sm:$0xff] (!%p1125_p13)  ;;  %v954_v14 = vmax.f32 (!%p1125_p13), %v922_v7, 0.0 }
 0x1a8   : > { %v704_v44 = vpop.f32.mrb[30].mxu0  ;;  %v784_v45 = vpop.f32.mrb[30].mxu1  ;;  %970 = vst [vmem:[%s1551_s30 + $0x58] sm:$0xff] (!%p1125_p13), %v938_v34  ;;  %v943_v50 = vmax.f32 (!%p1125_p13), %v911_v41, 0.0  ;;  %v917_v54 = vadd.f32 (!%p1125_p13), %v1688_v51, %v878_v38  ;;  %v948_v0 = vmax.f32 (!%p1125_p13), %v916_v53, 0.0  ;;  %v923_v8 = vadd.f32 (!%p1125_p13), %v1688_v51, %v884_v57 }
 0x1a9   : > { %v803_v46 = vadd.f32 %v704_v44, %v450_v42  ;;  %v819_v47 = vadd.f32 %v784_v45, %v466_v43  ;;  %v706_v48 = vpop.f32.mrb[31].mxu0  ;;  %v786_v49 = vpop.f32.mrb[31].mxu1  ;;  %v939_v35 = vmax.f32 (!%p1125_p13), %v907_v23, 0.0  ;;  %v912_v42 = vadd.f32 (!%p1125_p13), %v1688_v51, %v873_v25  ;;  %v879_v43 = vld [vmem:[#allocation2 + $0xb8] sm:$0xff] (!%p1125_p13)  ;;  %986 = vst [vmem:[%s1551_s30 + $0xd8] sm:$0xff] (!%p1125_p13), %v954_v14 }
 0x1aa   : > { %v869_v13 = vld [vmem:[#allocation2 + $0x68] sm:$0xff] (!%p1125_p13)  ;;  %v913_v45 = vadd.f32 (!%p1125_p13), %v1688_v51, %v874_v30  ;;  %v880_v48 = vld [vmem:[#allocation2 + $0xc0] sm:$0xff] (!%p1125_p13)  ;;  %v918_v61 = vadd.f32 (!%p1125_p13), %v1688_v51, %v879_v43  ;;  %975 = vst [vmem:[%s1551_s30 + $0x80] sm:$0xff] (!%p1125_p13), %v943_v50  ;;  %v949_v1 = vmax.f32 (!%p1125_p13), %v917_v54, 0.0  ;;  %980 = vst [vmem:[%s1551_s30 + $0xa8] sm:$0xff] (!%p1125_p13), %v948_v0  ;;  %v955_v15 = vmax.f32 (!%p1125_p13), %v923_v8, 0.0 }
 0x1ab   : > { %835 = vst [vmem:[#allocation2 + $0x78] sm:$0xff] %v803_v46  ;;  %851 = vst [vmem:[#allocation2 + $0xf8] sm:$0xff] %v819_v47  ;;  %v908_v28 = vadd.f32 (!%p1125_p13), %v1688_v51, %v869_v13  ;;  %v914_v46 = vadd.f32 (!%p1125_p13), %v1688_v51, %v875_v31  ;;  %v915_v47 = vadd.f32 (!%p1125_p13), %v1688_v51, %v876_v32  ;;  %v881_v49 = vld [vmem:[#allocation2 + $0xc8] sm:$0xff] (!%p1125_p13)  ;;  %v944_v52 = vmax.f32 (!%p1125_p13), %v912_v42, 0.0 }
 0x1ac   : > { %971 = vst [vmem:[%s1551_s30 + $0x60] sm:$0xff] %v939_v35  ;;  %v945_v58 = vmax.f32 %v913_v45, 0.0  ;;  %v885_v62 = vld [vmem:[#allocation2 + $0xe8] sm:$0xff]  ;;  %v919_v2 = vadd.f32 %v1688_v51, %v880_v48  ;;  %v920_v3 = vadd.f32 %v1688_v51, %v881_v49  ;;  %v950_v5 = vmax.f32 %v918_v61, 0.0  ;;  %981 = vst [vmem:[%s1551_s30 + $0xb0] sm:$0xff] %v949_v1 }
 0x1ad   : > { %v940_v39 = vmax.f32 %v908_v28, 0.0  ;;  %v946_v59 = vmax.f32 %v914_v46, 0.0  ;;  %v947_v60 = vmax.f32 %v915_v47, 0.0  ;;  %976 = vst [vmem:[%s1551_s30 + $0x88] sm:$0xff] %v944_v52  ;;  %v924_v11 = vadd.f32 %v1688_v51, %v885_v62  ;;  %987 = vst [vmem:[%s1551_s30 + $0xe0] sm:$0xff] %v955_v15 }
 0x1ae   : > { %v870_v18 = vld [vmem:[#allocation2 + $0x70] sm:$0xff]  ;;  %977 = vst [vmem:[%s1551_s30 + $0x90] sm:$0xff] %v945_v58  ;;  %v951_v9 = vmax.f32 %v919_v2, 0.0  ;;  %v952_v10 = vmax.f32 %v920_v3, 0.0  ;;  %982 = vst [vmem:[%s1551_s30 + $0xb8] sm:$0xff] %v950_v5  ;;  %v953_v13 = vmax.f32 %v921_v6, 0.0 }
 0x1af   : > { %v909_v29 = vadd.f32 %v1688_v51, %v870_v18  ;;  %972 = vst [vmem:[%s1551_s30 + $0x68] sm:$0xff] %v940_v39  ;;  %v886_v63 = vld [vmem:[#allocation2 + $0xf0] sm:$0xff]  ;;  %978 = vst [vmem:[%s1551_s30 + $0x98] sm:$0xff] %v946_v59  ;;  %v956_v17 = vmax.f32 %v924_v11, 0.0 }
 0x1b0   : > { %979 = vst [vmem:[%s1551_s30 + $0xa0] sm:$0xff] %v947_v60  ;;  %v925_v12 = vadd.f32 %v1688_v51, %v886_v63  ;;  %983 = vst [vmem:[%s1551_s30 + $0xc0] sm:$0xff] %v951_v9 }
 0x1b1   : > { %v941_v40 = vmax.f32 %v909_v29, 0.0  ;;  %984 = vst [vmem:[%s1551_s30 + $0xc8] sm:$0xff] %v952_v10  ;;  %985 = vst [vmem:[%s1551_s30 + $0xd0] sm:$0xff] %v953_v13 }
 0x1b2   : > { %v871_v19 = vld [vmem:[#allocation2 + $0x78] sm:$0xff]  ;;  %v957_v18 = vmax.f32 %v925_v12, 0.0  ;;  %988 = vst [vmem:[%s1551_s30 + $0xe8] sm:$0xff] %v956_v17 }
 0x1b3   : > { %v910_v36 = vadd.f32 %v1688_v51, %v871_v19  ;;  %973 = vst [vmem:[%s1551_s30 + $0x70] sm:$0xff] %v941_v40  ;;  %v887_v4 = vld [vmem:[#allocation2 + $0xf8] sm:$0xff] }
 0x1b4   : > { %v926_v16 = vadd.f32 %v1688_v51, %v887_v4  ;;  %989 = vst [vmem:[%s1551_s30 + $0xf0] sm:$0xff] %v957_v18 }
 0x1b5   : > { %v942_v44 = vmax.f32 %v910_v36, 0.0 }
 0x1b6   : > { %v958_v19 = vmax.f32 %v926_v16, 0.0 }
 0x1b7   : > { %974 = vst [vmem:[%s1551_s30 + $0x78] sm:$0xff] %v942_v44 }
 0x1b8   : > { %990 = vst [vmem:[%s1551_s30 + $0xf8] sm:$0xff] %v958_v19 }
 0x1b9 PF: > { %s13_s18 = sadd.s32 1, %s1322_s18   ;;  %s1779_s12 = smov %s1302_s13 }
 0x1ba   : > { %p10_p0 = scmp.ge.s32.totalorder %s13_s18, 8   ;;  %s1780_s13 = smov %s1397_s25 }
 0x1bb   : > { %s1781_s14 = smov %s1314_s16  ;;  %s1782_s15 = smov %s1318_s17 }
 0x1bc   : > { %s1783_s16 = smov %s1786_s19  ;;  %s1784_s17 = smov %s1790_s20 }
 0x1bd   :  { %12 = sbr.rel (!%p10_p0) target bundleno = 4 (0x4), region = 104 }

// kernel: _pallas_forward.26
= control target key start
LH: loop header
LB: loop body
LE: loop exit
PB: predicated region body
PF: predicated region fallthrough
CT: control target
= control target key end

     0   :  { %s1346_s12 = smov 0   ;;  %s1348_s13 = smov 0   ;;  %s1775_s0 = inlined_call_operand.vmem [shape: f32[512,1280], index: 0, kind: input, shape index: {}]   ;;  %s1776_s1 = inlined_call_operand.vmem [shape: f32[1280,128], index: 1, kind: input, shape index: {}]   ;;  %s1777_s2 = inlined_call_operand.vmem [shape: f32[1,128], index: 2, kind: input, shape index: {}]   ;;  %s1778_s3 = inlined_call_operand.vmem [shape: f32[512,128], index: 3, kind: output, shape index: {}]  }
   0x1   :  { %s1350_s14 = smov 0   ;;  %s1352_s15 = smov 0  }
   0x2   :  { %s1354_s16 = smov 0   ;;  %s1356_s17 = smov 0  }
   0x3   :  { %s1358_s18 = smov 0  }
   0x4 LB: > { %s25_s19 = sadd.s32 1, %s1314_s16  ;;  %s32_s20 = sadd.s32 1, %s1318_s17  ;;  %s1322_s18 = sphi %s1358_s18, %s13_s18   ;;  %s1318_s17 = sphi %s1356_s17, %s1784_s17   ;;  %s1314_s16 = sphi %s1354_s16, %s1783_s16   ;;  %s1310_s15 = sphi %s1352_s15, %s1782_s15   ;;  %s1306_s14 = sphi %s1350_s14, %s1781_s14   ;;  %s1302_s13 = sphi %s1348_s13, %s1780_s13   ;;  %s1298_s12 = sphi %s1346_s12, %s1779_s12  }
   0x5   : > { %p26_p0 = scmp.ge.s32.totalorder %s25_s19, 5  ;;  %p48_p1 = scmp.ne.s32.totalorder %s1302_s13, %s1298_s12 }
   0x6   : > { %p49_p2 = scmp.eq.s32.totalorder %s1322_s18, 0  ;;  %s41_s24 = sadd.s32 1, %s1302_s13 }
   0x7   : > { %s1786_s19 = smov (%p26_p0, %s25_s19), 0  ;;  %s1788_s20 = smov (!%p26_p0, %s32_s20), %s1318_s17 }
   0x8   : > { %p50_p3 = por %p49_p2, %p48_p1  ;;  %p34_p4 = scmp.ge.s32.totalorder %s1788_s20, 2 }
   0x9   : > { %s37_s21 = ssub.s32 %s1314_s16, %s1786_s19  ;;  %p1112_p6 = scmp.ge.s32.totalorder %s1322_s18, 10 }
   0xa   : > { %s1790_s20 = smov (%p34_p4, %s1788_s20), 0 }
   0xb   : > { %s36_s22 = ssub.s32 %s1318_s17, %s1790_s20  ;;  %162 = sbr.rel (%p1112_p6) target bundleno = 58 (0x3a), region = 20 }
   0xc   : > { %s38_s23 = sor.u32 %s37_s21, %s36_s22 }
   0xd   : > { %p39_p5 = scmp.eq.s32.totalorder %s38_s23, 0 }
   0xf   : > { %s1397_s25 = scalar_select %p39_p5, %s1302_s13, %s41_s24  }
  0x12   : > { %165 = sbr.rel (!%p50_p3) target bundleno = 58 (0x3a), region = 24  ;;  %s167_s26 = sand.u32 (%p50_p3), 1, %s1302_s13  }
  0x13   : > { %s1115_s27 = sshll.u32 (%p50_p3), %s1314_s16, 1  ;;  %s1113_s28 = sshll.u32 (%p50_p3), %s167_s26, 9 }
  0x14   : > { %s1209_s29 = smul.u32 (%p50_p3), 320, %s1318_s17  ;;  %s1411_s8 = scalar_lea.vmem (%p50_p3), [#allocation3], %s1113_s28 }
  0x16   : > { %s173_s30 = sadd.s32 (%p50_p3), %s1209_s29, %s1115_s27 }
  0x17   : > { %s1117_s4 = sshll.u32 (%p50_p3), %s173_s30, 3 }
  0x18   : > { %s1406_s7 = scalar_lea.vmem (%p50_p3), %s1775_s0, %s1117_s4 }
  0x19   : > { %v188_v0 = vld [vmem:[%s1406_s7] sm:$0xff]  ;;  %v190_v1 = vld [vmem:[%s1406_s7 + $0x8] sm:$0xff]  ;;  %v192_v2 = vld [vmem:[%s1406_s7 + $0x50] sm:$0xff] }
  0x1a   : > { %189 = vst [vmem:[%s1411_s8] sm:$0xff] %v188_v0  ;;  %191 = vst [vmem:[%s1411_s8 + $0x8] sm:$0xff] %v190_v1  ;;  %v194_v3 = vld [vmem:[%s1406_s7 + $0x58] sm:$0xff]  ;;  %v196_v4 = vld [vmem:[%s1406_s7 + $0xa0] sm:$0xff] }
  0x1b   : > { %193 = vst [vmem:[%s1411_s8 + $0x10] sm:$0xff] %v192_v2  ;;  %v198_v5 = vld [vmem:[%s1406_s7 + $0xa8] sm:$0xff]  ;;  %195 = vst [vmem:[%s1411_s8 + $0x18] sm:$0xff] %v194_v3  ;;  %v200_v6 = vld [vmem:[%s1406_s7 + $0xf0] sm:$0xff] }
  0x1c   : > { %197 = vst [vmem:[%s1411_s8 + $0x20] sm:$0xff] %v196_v4  ;;  %199 = vst [vmem:[%s1411_s8 + $0x28] sm:$0xff] %v198_v5  ;;  %v202_v7 = vld [vmem:[%s1406_s7 + $0xf8] sm:$0xff]  ;;  %v204_v8 = vld [vmem:[%s1406_s7 + $0x140] sm:$0xff] }
  0x1d   : > { %201 = vst [vmem:[%s1411_s8 + $0x30] sm:$0xff] %v200_v6  ;;  %203 = vst [vmem:[%s1411_s8 + $0x38] sm:$0xff] %v202_v7  ;;  %v206_v9 = vld [vmem:[%s1406_s7 + $0x148] sm:$0xff]  ;;  %v208_v10 = vld [vmem:[%s1406_s7 + $0x190] sm:$0xff] }
  0x1e   : > { %205 = vst [vmem:[%s1411_s8 + $0x40] sm:$0xff] %v204_v8  ;;  %v210_v11 = vld [vmem:[%s1406_s7 + $0x198] sm:$0xff]  ;;  %207 = vst [vmem:[%s1411_s8 + $0x48] sm:$0xff] %v206_v9  ;;  %v212_v12 = vld [vmem:[%s1406_s7 + $0x1e0] sm:$0xff] }
  0x1f   : > { %209 = vst [vmem:[%s1411_s8 + $0x50] sm:$0xff] %v208_v10  ;;  %211 = vst [vmem:[%s1411_s8 + $0x58] sm:$0xff] %v210_v11  ;;  %v214_v13 = vld [vmem:[%s1406_s7 + $0x1e8] sm:$0xff]  ;;  %v216_v14 = vld [vmem:[%s1406_s7 + $0x230] sm:$0xff] }
  0x20   : > { %213 = vst [vmem:[%s1411_s8 + $0x60] sm:$0xff] %v212_v12  ;;  %215 = vst [vmem:[%s1411_s8 + $0x68] sm:$0xff] %v214_v13  ;;  %v218_v15 = vld [vmem:[%s1406_s7 + $0x238] sm:$0xff]  ;;  %v220_v16 = vld [vmem:[%s1406_s7 + $0x280] sm:$0xff] }
  0x21   : > { %217 = vst [vmem:[%s1411_s8 + $0x70] sm:$0xff] %v216_v14  ;;  %v222_v17 = vld [vmem:[%s1406_s7 + $0x288] sm:$0xff]  ;;  %219 = vst [vmem:[%s1411_s8 + $0x78] sm:$0xff] %v218_v15  ;;  %v224_v18 = vld [vmem:[%s1406_s7 + $0x2d0] sm:$0xff] }
  0x22   : > { %221 = vst [vmem:[%s1411_s8 + $0x80] sm:$0xff] %v220_v16  ;;  %223 = vst [vmem:[%s1411_s8 + $0x88] sm:$0xff] %v222_v17  ;;  %v226_v19 = vld [vmem:[%s1406_s7 + $0x2d8] sm:$0xff]  ;;  %v228_v20 = vld [vmem:[%s1406_s7 + $0x320] sm:$0xff] }
  0x23   : > { %225 = vst [vmem:[%s1411_s8 + $0x90] sm:$0xff] %v224_v18  ;;  %227 = vst [vmem:[%s1411_s8 + $0x98] sm:$0xff] %v226_v19  ;;  %v230_v21 = vld [vmem:[%s1406_s7 + $0x328] sm:$0xff]  ;;  %v232_v22 = vld [vmem:[%s1406_s7 + $0x370] sm:$0xff] }
  0x24   : > { %229 = vst [vmem:[%s1411_s8 + $0xa0] sm:$0xff] %v228_v20  ;;  %v234_v23 = vld [vmem:[%s1406_s7 + $0x378] sm:$0xff]  ;;  %231 = vst [vmem:[%s1411_s8 + $0xa8] sm:$0xff] %v230_v21  ;;  %v236_v24 = vld [vmem:[%s1406_s7 + $0x3c0] sm:$0xff] }
  0x25   : > { %233 = vst [vmem:[%s1411_s8 + $0xb0] sm:$0xff] %v232_v22  ;;  %235 = vst [vmem:[%s1411_s8 + $0xb8] sm:$0xff] %v234_v23  ;;  %v238_v25 = vld [vmem:[%s1406_s7 + $0x3c8] sm:$0xff]  ;;  %v240_v26 = vld [vmem:[%s1406_s7 + $0x410] sm:$0xff] }
  0x26   : > { %237 = vst [vmem:[%s1411_s8 + $0xc0] sm:$0xff] %v236_v24  ;;  %239 = vst [vmem:[%s1411_s8 + $0xc8] sm:$0xff] %v238_v25  ;;  %v242_v27 = vld [vmem:[%s1406_s7 + $0x418] sm:$0xff]  ;;  %v244_v28 = vld [vmem:[%s1406_s7 + $0x460] sm:$0xff] }
  0x27   : > { %241 = vst [vmem:[%s1411_s8 + $0xd0] sm:$0xff] %v240_v26  ;;  %v246_v29 = vld [vmem:[%s1406_s7 + $0x468] sm:$0xff]  ;;  %243 = vst [vmem:[%s1411_s8 + $0xd8] sm:$0xff] %v242_v27  ;;  %v248_v30 = vld [vmem:[%s1406_s7 + $0x4b0] sm:$0xff] }
  0x28   : > { %245 = vst [vmem:[%s1411_s8 + $0xe0] sm:$0xff] %v244_v28  ;;  %247 = vst [vmem:[%s1411_s8 + $0xe8] sm:$0xff] %v246_v29  ;;  %v250_v31 = vld [vmem:[%s1406_s7 + $0x4b8] sm:$0xff]  ;;  %v252_v32 = vld [vmem:[%s1406_s7 + $0x500] sm:$0xff] }
  0x29   : > { %249 = vst [vmem:[%s1411_s8 + $0xf0] sm:$0xff] %v248_v30  ;;  %251 = vst [vmem:[%s1411_s8 + $0xf8] sm:$0xff] %v250_v31  ;;  %v254_v33 = vld [vmem:[%s1406_s7 + $0x508] sm:$0xff]  ;;  %v256_v34 = vld [vmem:[%s1406_s7 + $0x550] sm:$0xff] }
  0x2a   : > { %253 = vst [vmem:[%s1411_s8 + $0x100] sm:$0xff] %v252_v32  ;;  %v258_v35 = vld [vmem:[%s1406_s7 + $0x558] sm:$0xff]  ;;  %255 = vst [vmem:[%s1411_s8 + $0x108] sm:$0xff] %v254_v33  ;;  %v260_v36 = vld [vmem:[%s1406_s7 + $0x5a0] sm:$0xff] }
  0x2b   : > { %257 = vst [vmem:[%s1411_s8 + $0x110] sm:$0xff] %v256_v34  ;;  %259 = vst [vmem:[%s1411_s8 + $0x118] sm:$0xff] %v258_v35  ;;  %v262_v37 = vld [vmem:[%s1406_s7 + $0x5a8] sm:$0xff]  ;;  %v264_v38 = vld [vmem:[%s1406_s7 + $0x5f0] sm:$0xff] }
  0x2c   : > { %261 = vst [vmem:[%s1411_s8 + $0x120] sm:$0xff] %v260_v36  ;;  %263 = vst [vmem:[%s1411_s8 + $0x128] sm:$0xff] %v262_v37  ;;  %v266_v39 = vld [vmem:[%s1406_s7 + $0x5f8] sm:$0xff]  ;;  %v268_v40 = vld [vmem:[%s1406_s7 + $0x640] sm:$0xff] }
  0x2d   : > { %265 = vst [vmem:[%s1411_s8 + $0x130] sm:$0xff] %v264_v38  ;;  %v270_v41 = vld [vmem:[%s1406_s7 + $0x648] sm:$0xff]  ;;  %267 = vst [vmem:[%s1411_s8 + $0x138] sm:$0xff] %v266_v39  ;;  %v272_v42 = vld [vmem:[%s1406_s7 + $0x690] sm:$0xff] }
  0x2e   : > { %269 = vst [vmem:[%s1411_s8 + $0x140] sm:$0xff] %v268_v40  ;;  %271 = vst [vmem:[%s1411_s8 + $0x148] sm:$0xff] %v270_v41  ;;  %v274_v43 = vld [vmem:[%s1406_s7 + $0x698] sm:$0xff]  ;;  %v276_v44 = vld [vmem:[%s1406_s7 + $0x6e0] sm:$0xff] }
  0x2f   : > { %273 = vst [vmem:[%s1411_s8 + $0x150] sm:$0xff] %v272_v42  ;;  %275 = vst [vmem:[%s1411_s8 + $0x158] sm:$0xff] %v274_v43  ;;  %v278_v45 = vld [vmem:[%s1406_s7 + $0x6e8] sm:$0xff]  ;;  %v280_v46 = vld [vmem:[%s1406_s7 + $0x730] sm:$0xff] }
  0x30   : > { %277 = vst [vmem:[%s1411_s8 + $0x160] sm:$0xff] %v276_v44  ;;  %v282_v47 = vld [vmem:[%s1406_s7 + $0x738] sm:$0xff]  ;;  %279 = vst [vmem:[%s1411_s8 + $0x168] sm:$0xff] %v278_v45  ;;  %v284_v48 = vld [vmem:[%s1406_s7 + $0x780] sm:$0xff] }
  0x31   : > { %281 = vst [vmem:[%s1411_s8 + $0x170] sm:$0xff] %v280_v46  ;;  %283 = vst [vmem:[%s1411_s8 + $0x178] sm:$0xff] %v282_v47  ;;  %v286_v49 = vld [vmem:[%s1406_s7 + $0x788] sm:$0xff]  ;;  %v288_v50 = vld [vmem:[%s1406_s7 + $0x7d0] sm:$0xff] }
  0x32   : > { %285 = vst [vmem:[%s1411_s8 + $0x180] sm:$0xff] %v284_v48  ;;  %287 = vst [vmem:[%s1411_s8 + $0x188] sm:$0xff] %v286_v49  ;;  %v290_v51 = vld [vmem:[%s1406_s7 + $0x7d8] sm:$0xff]  ;;  %v292_v52 = vld [vmem:[%s1406_s7 + $0x820] sm:$0xff] }
  0x33   : > { %289 = vst [vmem:[%s1411_s8 + $0x190] sm:$0xff] %v288_v50  ;;  %v294_v53 = vld [vmem:[%s1406_s7 + $0x828] sm:$0xff]  ;;  %291 = vst [vmem:[%s1411_s8 + $0x198] sm:$0xff] %v290_v51  ;;  %v296_v54 = vld [vmem:[%s1406_s7 + $0x870] sm:$0xff] }
  0x34   : > { %293 = vst [vmem:[%s1411_s8 + $0x1a0] sm:$0xff] %v292_v52  ;;  %295 = vst [vmem:[%s1411_s8 + $0x1a8] sm:$0xff] %v294_v53  ;;  %v298_v55 = vld [vmem:[%s1406_s7 + $0x878] sm:$0xff]  ;;  %v300_v56 = vld [vmem:[%s1406_s7 + $0x8c0] sm:$0xff] }
  0x35   : > { %297 = vst [vmem:[%s1411_s8 + $0x1b0] sm:$0xff] %v296_v54  ;;  %299 = vst [vmem:[%s1411_s8 + $0x1b8] sm:$0xff] %v298_v55  ;;  %v302_v57 = vld [vmem:[%s1406_s7 + $0x8c8] sm:$0xff]  ;;  %v304_v58 = vld [vmem:[%s1406_s7 + $0x910] sm:$0xff] }
  0x36   : > { %301 = vst [vmem:[%s1411_s8 + $0x1c0] sm:$0xff] %v300_v56  ;;  %v306_v59 = vld [vmem:[%s1406_s7 + $0x918] sm:$0xff]  ;;  %303 = vst [vmem:[%s1411_s8 + $0x1c8] sm:$0xff] %v302_v57  ;;  %v308_v60 = vld [vmem:[%s1406_s7 + $0x960] sm:$0xff] }
  0x37   : > { %305 = vst [vmem:[%s1411_s8 + $0x1d0] sm:$0xff] %v304_v58  ;;  %307 = vst [vmem:[%s1411_s8 + $0x1d8] sm:$0xff] %v306_v59  ;;  %v310_v61 = vld [vmem:[%s1406_s7 + $0x968] sm:$0xff]  ;;  %v312_v62 = vld [vmem:[%s1406_s7 + $0x9b0] sm:$0xff] }
  0x38   : > { %309 = vst [vmem:[%s1411_s8 + $0x1e0] sm:$0xff] %v308_v60  ;;  %311 = vst [vmem:[%s1411_s8 + $0x1e8] sm:$0xff] %v310_v61  ;;  %v314_v63 = vld [vmem:[%s1406_s7 + $0x9b8] sm:$0xff] }
  0x39   : > { %313 = vst [vmem:[%s1411_s8 + $0x1f0] sm:$0xff] %v312_v62  ;;  %315 = vst [vmem:[%s1411_s8 + $0x1f8] sm:$0xff] %v314_v63 }
  0x3a PF: > { %p1118_p7 = scmp.ge.s32.totalorder %s1322_s18, 1  ;;  %p332_p8 = scmp.lt.s32.totalorder %s1322_s18, 11 }
  0x3c   : > { %p333_p9 = pnand %p1118_p7, %p332_p8 }
  0x3d   : > { %s339_s9 = sand.u32 (!%p333_p9), 1, %s1298_s12   ;;  %s1120_s10 = sshll.u32 (!%p333_p9), %s1306_s14, 5 }
  0x3e   : > { %336 = sbr.rel (%p333_p9) target bundleno = 441 (0x1b9), region = 51  ;;  %s1119_s11 = sshll.u32 (!%p333_p9), %s339_s9, 9 }
  0x3f   : > { %p379_p10 = scmp.lt.s32.totalorder (!%p333_p9), %s1120_s10, 159  ;;  %s1122_s21 = sshll.u32 (!%p333_p9), %s1310_s15, 5 }
  0x40   : > { %p391_p11 = scmp.lt.s32.totalorder (!%p333_p9), %s1122_s21, 63  ;;  %s1553_s12 = scalar_lea.vmem (!%p333_p9), [#allocation3], %s1119_s11 }
  0x41   : > { %p1124_p12 = scmp.ne.s32.totalorder (!%p333_p9), %s1306_s14, 0 }
  0x45   : > { %s1792_s10 = smov (!%p379_p10, %s1120_s10), 159  ;;  %s1794_s21 = smov (!%p391_p11, %s1122_s21), 63 }
  0x46   : > { %s1121_s22 = sshll.u32 %s1792_s10, 3  ;;  %s1123_s27 = sshll.u32 %s1794_s21, 3  ;;  %v1324_v0 = vmov (!%p1124_p12), 0.0  }
  0x47   : > { %s1546_s26 = scalar_lea.vmem %s1776_s1, %s1121_s22  ;;  %s1551_s30 = scalar_lea.vmem %s1778_s3, %s1123_s27  ;;  %403 = vst [vmem:[#allocation2] sm:$0xff] (!%p1124_p12), %v1324_v0  ;;  %404 = vst [vmem:[#allocation2 + $0x8] sm:$0xff] (!%p1124_p12), %v1324_v0 }
  0x48   : > { %402 = sbr.rel (%p1124_p12) target bundleno = 87 (0x57), region = 59  ;;  %405 = vst [vmem:[#allocation2 + $0x10] sm:$0xff] (!%p1124_p12), %v1324_v0  ;;  %406 = vst [vmem:[#allocation2 + $0x18] sm:$0xff] (!%p1124_p12), %v1324_v0 }
  0x49   : > { %407 = vst [vmem:[#allocation2 + $0x20] sm:$0xff] (!%p1124_p12), %v1324_v0  ;;  %408 = vst [vmem:[#allocation2 + $0x28] sm:$0xff] (!%p1124_p12), %v1324_v0 }
  0x4a   : > { %409 = vst [vmem:[#allocation2 + $0x30] sm:$0xff] (!%p1124_p12), %v1324_v0  ;;  %410 = vst [vmem:[#allocation2 + $0x38] sm:$0xff] (!%p1124_p12), %v1324_v0 }
  0x4b   : > { %411 = vst [vmem:[#allocation2 + $0x40] sm:$0xff] (!%p1124_p12), %v1324_v0  ;;  %412 = vst [vmem:[#allocation2 + $0x48] sm:$0xff] (!%p1124_p12), %v1324_v0 }
  0x4c   : > { %413 = vst [vmem:[#allocation2 + $0x50] sm:$0xff] (!%p1124_p12), %v1324_v0  ;;  %414 = vst [vmem:[#allocation2 + $0x58] sm:$0xff] (!%p1124_p12), %v1324_v0 }
  0x4d   : > { %415 = vst [vmem:[#allocation2 + $0x60] sm:$0xff] (!%p1124_p12), %v1324_v0  ;;  %416 = vst [vmem:[#allocation2 + $0x68] sm:$0xff] (!%p1124_p12), %v1324_v0 }
  0x4e   : > { %417 = vst [vmem:[#allocation2 + $0x70] sm:$0xff] (!%p1124_p12), %v1324_v0  ;;  %418 = vst [vmem:[#allocation2 + $0x78] sm:$0xff] (!%p1124_p12), %v1324_v0 }
  0x4f   : > { %419 = vst [vmem:[#allocation2 + $0x80] sm:$0xff] %v1324_v0  ;;  %420 = vst [vmem:[#allocation2 + $0x88] sm:$0xff] %v1324_v0 }
  0x50   : > { %421 = vst [vmem:[#allocation2 + $0x90] sm:$0xff] %v1324_v0  ;;  %422 = vst [vmem:[#allocation2 + $0x98] sm:$0xff] %v1324_v0 }
  0x51   : > { %423 = vst [vmem:[#allocation2 + $0xa0] sm:$0xff] %v1324_v0  ;;  %424 = vst [vmem:[#allocation2 + $0xa8] sm:$0xff] %v1324_v0 }
  0x52   : > { %425 = vst [vmem:[#allocation2 + $0xb0] sm:$0xff] %v1324_v0  ;;  %426 = vst [vmem:[#allocation2 + $0xb8] sm:$0xff] %v1324_v0 }
  0x53   : > { %427 = vst [vmem:[#allocation2 + $0xc0] sm:$0xff] %v1324_v0  ;;  %428 = vst [vmem:[#allocation2 + $0xc8] sm:$0xff] %v1324_v0 }
  0x54   : > { %429 = vst [vmem:[#allocation2 + $0xd0] sm:$0xff] %v1324_v0  ;;  %430 = vst [vmem:[#allocation2 + $0xd8] sm:$0xff] %v1324_v0 }
  0x55   : > { %431 = vst [vmem:[#allocation2 + $0xe0] sm:$0xff] %v1324_v0  ;;  %432 = vst [vmem:[#allocation2 + $0xe8] sm:$0xff] %v1324_v0 }
  0x56   : > { %433 = vst [vmem:[#allocation2 + $0xf0] sm:$0xff] %v1324_v0  ;;  %434 = vst [vmem:[#allocation2 + $0xf8] sm:$0xff] %v1324_v0 }
  0x57 PF: > { %v531_v1 = vld [vmem:[%s1546_s26] sm:$0xff]  ;;  %v532_v2 = vld [vmem:[%s1546_s26 + $0x8] sm:$0xff]  ;;  %v533_v3 = vld [vmem:[%s1546_s26 + $0x10] sm:$0xff]  ;;  %v1325_v4 = vmov 0.0|0.0   ;;  %p1125_p13 = scmp.ne.s32.totalorder %s1306_s14, 4 }
  0x58   : > { %1129 = vmatprep.subr.bf16.mxu0 %v1325_v4  ;;  %1177 = vmatprep.subr.bf16.mxu1 %v1325_v4  ;;  %v1130_v5 = vpack.c.bf16 %v532_v2, %v531_v1  ;;  %v534_v6 = vld [vmem:[%s1546_s26 + $0x18] sm:$0xff]  ;;  %v535_v8 = vld [vmem:[%s1546_s26 + $0x20] sm:$0xff]  ;;  %v536_v9 = vld [vmem:[%s1546_s26 + $0x28] sm:$0xff] }
  0x59   : > { %v1133_v7 = vpack.c.bf16 %v534_v6, %v533_v3  ;;  %v1136_v10 = vpack.c.bf16 %v536_v9, %v535_v8  ;;  %v537_v11 = vld [vmem:[%s1546_s26 + $0x30] sm:$0xff]  ;;  %v538_v12 = vld [vmem:[%s1546_s26 + $0x38] sm:$0xff]  ;;  %v468_v13 = vld [vmem:[%s1553_s12 + $0x8] sm:$0xff] }
  0x5a   : > { %1131 = vmatpush1.bf16.msra.mxu0 %v1130_v5  ;;  %1193 = vmatpush1.bf16.msra.mxu1 %v1130_v5  ;;  %v1139_v14 = vpack.c.bf16 %v538_v12, %v537_v11  ;;  %v500_v15 = vld [vmem:[%s1553_s12 + $0x108] sm:$0xff]  ;;  %v539_v16 = vld [vmem:[%s1546_s26 + $0x40] sm:$0xff]  ;;  %v541_v19 = vld [vmem:[%s1546_s26 + $0x50] sm:$0xff] }
  0x5b   : > { %1132 = vmatprep.subr.bf16.mxu0 %v1325_v4  ;;  %1178 = vmatprep.subr.bf16.mxu1 %v1325_v4  ;;  %v540_v17 = vld [vmem:[%s1546_s26 + $0x48] sm:$0xff]  ;;  %v542_v20 = vld [vmem:[%s1546_s26 + $0x58] sm:$0xff]  ;;  %v543_v22 = vld [vmem:[%s1546_s26 + $0x60] sm:$0xff] }
  0x5c   : > { %627 = vmatprep.mubr.f32.mxu0 %v468_v13  ;;  %707 = vmatprep.mubr.f32.mxu1 %v500_v15  ;;  %v1142_v18 = vpack.c.bf16 %v540_v17, %v539_v16  ;;  %v1145_v21 = vpack.c.bf16 %v542_v20, %v541_v19  ;;  %v544_v23 = vld [vmem:[%s1546_s26 + $0x68] sm:$0xff]  ;;  %v545_v25 = vld [vmem:[%s1546_s26 + $0x70] sm:$0xff]  ;;  %v546_v26 = vld [vmem:[%s1546_s26 + $0x78] sm:$0xff] }
  0x5d   : > { %v1148_v24 = vpack.c.bf16 %v544_v23, %v543_v22  ;;  %v1151_v27 = vpack.c.bf16 %v546_v26, %v545_v25  ;;  %v547_v28 = vld [vmem:[%s1546_s26 + $0x80] sm:$0xff]  ;;  %v548_v29 = vld [vmem:[%s1546_s26 + $0x88] sm:$0xff]  ;;  %v549_v31 = vld [vmem:[%s1546_s26 + $0x90] sm:$0xff] }
  0x5e   : > { %1134 = vmatpush1.bf16.msra.mxu0 %v1133_v7  ;;  %1194 = vmatpush1.bf16.msra.mxu1 %v1133_v7  ;;  %v1154_v30 = vpack.c.bf16 %v548_v29, %v547_v28  ;;  %v550_v32 = vld [vmem:[%s1546_s26 + $0x98] sm:$0xff]  ;;  %v551_v34 = vld [vmem:[%s1546_s26 + $0xa0] sm:$0xff]  ;;  %v552_v35 = vld [vmem:[%s1546_s26 + $0xa8] sm:$0xff] }
  0x5f   : > { %1135 = vmatprep.subr.bf16.mxu0 %v1325_v4  ;;  %1179 = vmatprep.subr.bf16.mxu1 %v1325_v4  ;;  %v1157_v33 = vpack.c.bf16 %v550_v32, %v549_v31  ;;  %v1160_v36 = vpack.c.bf16 %v552_v35, %v551_v34  ;;  %v553_v37 = vld [vmem:[%s1546_s26 + $0xb0] sm:$0xff]  ;;  %v554_v38 = vld [vmem:[%s1546_s26 + $0xb8] sm:$0xff]  ;;  %v555_v40 = vld [vmem:[%s1546_s26 + $0xc0] sm:$0xff] }
  0x60   : > { %v1163_v39 = vpack.c.bf16 %v554_v38, %v553_v37  ;;  %v556_v41 = vld [vmem:[%s1546_s26 + $0xc8] sm:$0xff]  ;;  %v557_v43 = vld [vmem:[%s1546_s26 + $0xd0] sm:$0xff]  ;;  %v558_v44 = vld [vmem:[%s1546_s26 + $0xd8] sm:$0xff] }
  0x61   : > { %v1166_v42 = vpack.c.bf16 %v556_v41, %v555_v40  ;;  %v1169_v45 = vpack.c.bf16 %v558_v44, %v557_v43  ;;  %v559_v46 = vld [vmem:[%s1546_s26 + $0xe0] sm:$0xff]  ;;  %v560_v47 = vld [vmem:[%s1546_s26 + $0xe8] sm:$0xff]  ;;  %v561_v49 = vld [vmem:[%s1546_s26 + $0xf0] sm:$0xff] }
  0x62   : > { %1137 = vmatpush1.bf16.msra.mxu0 %v1136_v10  ;;  %1195 = vmatpush1.bf16.msra.mxu1 %v1136_v10  ;;  %v1172_v48 = vpack.c.bf16 %v560_v47, %v559_v46  ;;  %v562_v50 = vld [vmem:[%s1546_s26 + $0xf8] sm:$0xff]  ;;  %v467_v52 = vld [vmem:[%s1553_s12] sm:$0xff]  ;;  %v469_v56 = vld [vmem:[%s1553_s12 + $0x10] sm:$0xff] }
  0x63   : > { %1138 = vmatprep.subr.bf16.mxu0 %v1325_v4  ;;  %1180 = vmatprep.subr.bf16.mxu1 %v1325_v4  ;;  %v1175_v51 = vpack.c.bf16 %v562_v50, %v561_v49  ;;  %v499_v53 = vld [vmem:[%s1553_s12 + $0x100] sm:$0xff]  ;;  %v470_v54 = vld [vmem:[%s1553_s12 + $0x18] sm:$0xff]  ;;  %v501_v57 = vld [vmem:[%s1553_s12 + $0x110] sm:$0xff] }
  0x64   : > { %v502_v55 = vld [vmem:[%s1553_s12 + $0x118] sm:$0xff]  ;;  %v472_v58 = vld [vmem:[%s1553_s12 + $0x28] sm:$0xff]  ;;  %v471_v60 = vld [vmem:[%s1553_s12 + $0x20] sm:$0xff] }
  0x65   : > { %v504_v59 = vld [vmem:[%s1553_s12 + $0x128] sm:$0xff]  ;;  %v503_v61 = vld [vmem:[%s1553_s12 + $0x120] sm:$0xff]  ;;  %v474_v62 = vld [vmem:[%s1553_s12 + $0x38] sm:$0xff] }
  0x66   : > { %1140 = vmatpush1.bf16.msra.mxu0 %v1139_v14  ;;  %1196 = vmatpush1.bf16.msra.mxu1 %v1139_v14  ;;  %v506_v63 = vld [vmem:[%s1553_s12 + $0x138] sm:$0xff]  ;;  %v473_v0 = vld [vmem:[%s1553_s12 + $0x30] sm:$0xff]  ;;  %v476_v2 = vld [vmem:[%s1553_s12 + $0x48] sm:$0xff] }
  0x67   : > { %1141 = vmatprep.subr.bf16.mxu0 %v1325_v4  ;;  %1181 = vmatprep.subr.bf16.mxu1 %v1325_v4  ;;  %v505_v1 = vld [vmem:[%s1553_s12 + $0x130] sm:$0xff]  ;;  %v508_v3 = vld [vmem:[%s1553_s12 + $0x148] sm:$0xff]  ;;  %v507_v5 = vld [vmem:[%s1553_s12 + $0x140] sm:$0xff] }
  0x68   : > { %v478_v6 = vld [vmem:[%s1553_s12 + $0x58] sm:$0xff]  ;;  %v477_v8 = vld [vmem:[%s1553_s12 + $0x50] sm:$0xff]  ;;  %v480_v10 = vld [vmem:[%s1553_s12 + $0x68] sm:$0xff] }
  0x69   : > { %v510_v7 = vld [vmem:[%s1553_s12 + $0x158] sm:$0xff]  ;;  %v509_v9 = vld [vmem:[%s1553_s12 + $0x150] sm:$0xff]  ;;  %v512_v11 = vld [vmem:[%s1553_s12 + $0x168] sm:$0xff] }
  0x6a   : > { %1143 = vmatpush1.bf16.msra.mxu0 %v1142_v18  ;;  %1197 = vmatpush1.bf16.msra.mxu1 %v1142_v18  ;;  %v479_v12 = vld [vmem:[%s1553_s12 + $0x60] sm:$0xff]  ;;  %v482_v14 = vld [vmem:[%s1553_s12 + $0x78] sm:$0xff]  ;;  %v481_v16 = vld [vmem:[%s1553_s12 + $0x70] sm:$0xff] }
  0x6b   : > { %1144 = vmatprep.subr.bf16.mxu0 %v1325_v4  ;;  %1182 = vmatprep.subr.bf16.mxu1 %v1325_v4  ;;  %v511_v13 = vld [vmem:[%s1553_s12 + $0x160] sm:$0xff]  ;;  %v514_v15 = vld [vmem:[%s1553_s12 + $0x178] sm:$0xff]  ;;  %v513_v17 = vld [vmem:[%s1553_s12 + $0x170] sm:$0xff] }
  0x6c   : > { %v484_v18 = vld [vmem:[%s1553_s12 + $0x88] sm:$0xff]  ;;  %v483_v20 = vld [vmem:[%s1553_s12 + $0x80] sm:$0xff]  ;;  %v486_v22 = vld [vmem:[%s1553_s12 + $0x98] sm:$0xff] }
  0x6d   : > { %v516_v19 = vld [vmem:[%s1553_s12 + $0x188] sm:$0xff]  ;;  %v518_v23 = vld [vmem:[%s1553_s12 + $0x198] sm:$0xff]  ;;  %v517_v25 = vld [vmem:[%s1553_s12 + $0x190] sm:$0xff] }
  0x6e   : > { %1146 = vmatpush1.bf16.msra.mxu0 %v1145_v21  ;;  %1198 = vmatpush1.bf16.msra.mxu1 %v1145_v21  ;;  %v515_v21 = vld [vmem:[%s1553_s12 + $0x180] sm:$0xff]  ;;  %v488_v26 = vld [vmem:[%s1553_s12 + $0xa8] sm:$0xff]  ;;  %v522_v31 = vld [vmem:[%s1553_s12 + $0x1b8] sm:$0xff] }
  0x6f   : > { %1147 = vmatprep.subr.bf16.mxu0 %v1325_v4  ;;  %1183 = vmatprep.subr.bf16.mxu1 %v1325_v4  ;;  %v487_v28 = vld [vmem:[%s1553_s12 + $0xa0] sm:$0xff]  ;;  %v489_v32 = vld [vmem:[%s1553_s12 + $0xb0] sm:$0xff]  ;;  %v492_v34 = vld [vmem:[%s1553_s12 + $0xc8] sm:$0xff] }
  0x70   : > { %v519_v29 = vld [vmem:[%s1553_s12 + $0x1a0] sm:$0xff]  ;;  %v524_v35 = vld [vmem:[%s1553_s12 + $0x1c8] sm:$0xff]  ;;  %v494_v38 = vld [vmem:[%s1553_s12 + $0xd8] sm:$0xff] }
  0x71   : > { %v523_v37 = vld [vmem:[%s1553_s12 + $0x1c0] sm:$0xff]  ;;  %v493_v40 = vld [vmem:[%s1553_s12 + $0xd0] sm:$0xff]  ;;  %v528_v43 = vld [vmem:[%s1553_s12 + $0x1e8] sm:$0xff] }
  0x72   : > { %1149 = vmatpush1.bf16.msra.mxu0 %v1148_v24  ;;  %1199 = vmatpush1.bf16.msra.mxu1 %v1148_v24  ;;  %v485_v24 = vld [vmem:[%s1553_s12 + $0x90] sm:$0xff]  ;;  %v495_v44 = vld [vmem:[%s1553_s12 + $0xe0] sm:$0xff]  ;;  %v498_v46 = vld [vmem:[%s1553_s12 + $0xf8] sm:$0xff] }
  0x73   : > { %1150 = vmatprep.subr.bf16.mxu0 %v1325_v4  ;;  %1184 = vmatprep.subr.bf16.mxu1 %v1325_v4  ;;  %v525_v41 = vld [vmem:[%s1553_s12 + $0x1d0] sm:$0xff]  ;;  %v530_v47 = vld [vmem:[%s1553_s12 + $0x1f8] sm:$0xff]  ;;  %v435_v50 = vld [vmem:[#allocation2] sm:$0xff] }
  0x74   : > { %v529_v49 = vld [vmem:[%s1553_s12 + $0x1f0] sm:$0xff] }
  0x76   : > { %1152 = vmatpush1.bf16.msra.mxu0 %v1151_v27  ;;  %1200 = vmatpush1.bf16.msra.mxu1 %v1151_v27  ;;  %v520_v27 = vld [vmem:[%s1553_s12 + $0x1a8] sm:$0xff] }
  0x77   : > { %1153 = vmatprep.subr.bf16.mxu0 %v1325_v4  ;;  %1185 = vmatprep.subr.bf16.mxu1 %v1325_v4 }
  0x7a   : > { %1155 = vmatpush1.bf16.msra.mxu0 %v1154_v30  ;;  %1201 = vmatpush1.bf16.msra.mxu1 %v1154_v30  ;;  %v490_v30 = vld [vmem:[%s1553_s12 + $0xb8] sm:$0xff] }
  0x7b   : > { %1156 = vmatprep.subr.bf16.mxu0 %v1325_v4  ;;  %1186 = vmatprep.subr.bf16.mxu1 %v1325_v4 }
  0x7e   : > { %1158 = vmatpush1.bf16.msra.mxu0 %v1157_v33  ;;  %1202 = vmatpush1.bf16.msra.mxu1 %v1157_v33  ;;  %v521_v33 = vld [vmem:[%s1553_s12 + $0x1b0] sm:$0xff] }
  0x7f   : > { %1159 = vmatprep.subr.bf16.mxu0 %v1325_v4  ;;  %1187 = vmatprep.subr.bf16.mxu1 %v1325_v4 }
  0x82   : > { %1161 = vmatpush1.bf16.msra.mxu0 %v1160_v36  ;;  %1203 = vmatpush1.bf16.msra.mxu1 %v1160_v36  ;;  %v491_v36 = vld [vmem:[%s1553_s12 + $0xc0] sm:$0xff] }
  0x83   : > { %1162 = vmatprep.subr.bf16.mxu0 %v1325_v4  ;;  %1188 = vmatprep.subr.bf16.mxu1 %v1325_v4 }
  0x86   : > { %1164 = vmatpush1.bf16.msra.mxu0 %v1163_v39  ;;  %1204 = vmatpush1.bf16.msra.mxu1 %v1163_v39  ;;  %v526_v39 = vld [vmem:[%s1553_s12 + $0x1d8] sm:$0xff] }
  0x87   : > { %1165 = vmatprep.subr.bf16.mxu0 %v1325_v4  ;;  %1189 = vmatprep.subr.bf16.mxu1 %v1325_v4 }
  0x8a   : > { %1167 = vmatpush1.bf16.msra.mxu0 %v1166_v42  ;;  %1205 = vmatpush1.bf16.msra.mxu1 %v1166_v42  ;;  %v496_v42 = vld [vmem:[%s1553_s12 + $0xe8] sm:$0xff] }
  0x8b   : > { %1168 = vmatprep.subr.bf16.mxu0 %v1325_v4  ;;  %1190 = vmatprep.subr.bf16.mxu1 %v1325_v4 }
  0x8e   : > { %1170 = vmatpush1.bf16.msra.mxu0 %v1169_v45  ;;  %1206 = vmatpush1.bf16.msra.mxu1 %v1169_v45  ;;  %v527_v45 = vld [vmem:[%s1553_s12 + $0x1e0] sm:$0xff] }
  0x8f   : > { %1171 = vmatprep.subr.bf16.mxu0 %v1325_v4  ;;  %1191 = vmatprep.subr.bf16.mxu1 %v1325_v4 }
  0x92   : > { %1173 = vmatpush1.bf16.msra.mxu0 %v1172_v48  ;;  %1207 = vmatpush1.bf16.msra.mxu1 %v1172_v48  ;;  %v497_v48 = vld [vmem:[%s1553_s12 + $0xf0] sm:$0xff] }
  0x93   : > { %1174 = vmatprep.subr.bf16.mxu0 %v1325_v4  ;;  %1192 = vmatprep.subr.bf16.mxu1 %v1325_v4  ;;  %v475_v4 = vld [vmem:[%s1553_s12 + $0x40] sm:$0xff] }
  0x96   : > { %1176 = vmatpush1.bf16.msra.mxu0 %v1175_v51  ;;  %1208 = vmatpush1.bf16.msra.mxu1 %v1175_v51  ;;  %v451_v51 = vld [vmem:[#allocation2 + $0x80] sm:$0xff] }
  0x99   : > { %628 = vmatmul.mubr.f32.vlgmr.msra.gmra.mrb[0].mxu0 %v467_v52  ;;  %708 = vmatmul.mubr.f32.vlgmr.msra.gmra.mrb[0].mxu1 %v499_v53 }
  0x9a   : > { %632 = vmatprep.mubr.f32.mxu0 %v470_v54  ;;  %712 = vmatprep.mubr.f32.mxu1 %v502_v55 }
  0x9d   : > { %633 = vmatmul.mubr.f32.gmra.mrb[2].mxu0 %v469_v56  ;;  %713 = vmatmul.mubr.f32.gmra.mrb[2].mxu1 %v501_v57 }
  0x9e   : > { %637 = vmatprep.mubr.f32.mxu0 %v472_v58  ;;  %717 = vmatprep.mubr.f32.mxu1 %v504_v59  ;;  %v436_v58 = vld [vmem:[#allocation2 + $0x8] sm:$0xff] }
  0x9f   : > { %v452_v59 = vld [vmem:[#allocation2 + $0x88] sm:$0xff] }
  0xa1   : > { %638 = vmatmul.mubr.f32.gmra.mrb[4].mxu0 %v471_v60  ;;  %718 = vmatmul.mubr.f32.gmra.mrb[4].mxu1 %v503_v61 }
  0xa2   : > { %642 = vmatprep.mubr.f32.mxu0 %v474_v62  ;;  %722 = vmatprep.mubr.f32.mxu1 %v506_v63 }
  0xa5   : > { %643 = vmatmul.mubr.f32.gmra.mrb[6].mxu0 %v473_v0  ;;  %723 = vmatmul.mubr.f32.gmra.mrb[6].mxu1 %v505_v1 }
  0xa6   : > { %647 = vmatprep.mubr.f32.mxu0 %v476_v2  ;;  %727 = vmatprep.mubr.f32.mxu1 %v508_v3  ;;  %v437_v2 = vld [vmem:[#allocation2 + $0x10] sm:$0xff] }
  0xa7   : > { %v453_v3 = vld [vmem:[#allocation2 + $0x90] sm:$0xff] }
  0xa9   : > { %648 = vmatmul.mubr.f32.gmra.mrb[8].mxu0 %v475_v4  ;;  %728 = vmatmul.mubr.f32.gmra.mrb[8].mxu1 %v507_v5 }
  0xaa   : > { %652 = vmatprep.mubr.f32.mxu0 %v478_v6  ;;  %732 = vmatprep.mubr.f32.mxu1 %v510_v7 }
  0xad   : > { %653 = vmatmul.mubr.f32.gmra.mrb[10].mxu0 %v477_v8  ;;  %733 = vmatmul.mubr.f32.gmra.mrb[10].mxu1 %v509_v9 }
  0xae   : > { %657 = vmatprep.mubr.f32.mxu0 %v480_v10  ;;  %737 = vmatprep.mubr.f32.mxu1 %v512_v11  ;;  %v438_v10 = vld [vmem:[#allocation2 + $0x18] sm:$0xff] }
  0xaf   : > { %v454_v11 = vld [vmem:[#allocation2 + $0x98] sm:$0xff] }
  0xb1   : > { %658 = vmatmul.mubr.f32.gmra.mrb[12].mxu0 %v479_v12  ;;  %738 = vmatmul.mubr.f32.gmra.mrb[12].mxu1 %v511_v13 }
  0xb2   : > { %662 = vmatprep.mubr.f32.mxu0 %v482_v14  ;;  %742 = vmatprep.mubr.f32.mxu1 %v514_v15 }
  0xb5   : > { %663 = vmatmul.mubr.f32.gmra.mrb[14].mxu0 %v481_v16  ;;  %743 = vmatmul.mubr.f32.gmra.mrb[14].mxu1 %v513_v17 }
  0xb6   : > { %667 = vmatprep.mubr.f32.mxu0 %v484_v18  ;;  %747 = vmatprep.mubr.f32.mxu1 %v516_v19  ;;  %v439_v18 = vld [vmem:[#allocation2 + $0x20] sm:$0xff] }
  0xb7   : > { %v455_v19 = vld [vmem:[#allocation2 + $0xa0] sm:$0xff] }
  0xb9   : > { %668 = vmatmul.mubr.f32.gmra.mrb[16].mxu0 %v483_v20  ;;  %748 = vmatmul.mubr.f32.gmra.mrb[16].mxu1 %v515_v21 }
  0xba   : > { %672 = vmatprep.mubr.f32.mxu0 %v486_v22  ;;  %752 = vmatprep.mubr.f32.mxu1 %v518_v23 }
  0xbd   : > { %673 = vmatmul.mubr.f32.gmra.mrb[18].mxu0 %v485_v24  ;;  %753 = vmatmul.mubr.f32.gmra.mrb[18].mxu1 %v517_v25 }
  0xbe   : > { %677 = vmatprep.mubr.f32.mxu0 %v488_v26  ;;  %757 = vmatprep.mubr.f32.mxu1 %v520_v27  ;;  %v440_v26 = vld [vmem:[#allocation2 + $0x28] sm:$0xff] }
  0xbf   : > { %v456_v27 = vld [vmem:[#allocation2 + $0xa8] sm:$0xff] }
  0xc1   : > { %678 = vmatmul.mubr.f32.gmra.mrb[20].mxu0 %v487_v28  ;;  %758 = vmatmul.mubr.f32.gmra.mrb[20].mxu1 %v519_v29 }
  0xc2   : > { %682 = vmatprep.mubr.f32.mxu0 %v490_v30  ;;  %762 = vmatprep.mubr.f32.mxu1 %v522_v31 }
  0xc5   : > { %683 = vmatmul.mubr.f32.gmra.mrb[22].mxu0 %v489_v32  ;;  %763 = vmatmul.mubr.f32.gmra.mrb[22].mxu1 %v521_v33 }
  0xc6   : > { %687 = vmatprep.mubr.f32.mxu0 %v492_v34  ;;  %767 = vmatprep.mubr.f32.mxu1 %v524_v35  ;;  %v441_v34 = vld [vmem:[#allocation2 + $0x30] sm:$0xff] }
  0xc7   : > { %v457_v35 = vld [vmem:[#allocation2 + $0xb0] sm:$0xff] }
  0xc9   : > { %688 = vmatmul.mubr.f32.gmra.mrb[24].mxu0 %v491_v36  ;;  %768 = vmatmul.mubr.f32.gmra.mrb[24].mxu1 %v523_v37 }
  0xca   : > { %692 = vmatprep.mubr.f32.mxu0 %v494_v38  ;;  %772 = vmatprep.mubr.f32.mxu1 %v526_v39 }
  0xcd   : > { %693 = vmatmul.mubr.f32.gmra.mrb[26].mxu0 %v493_v40  ;;  %773 = vmatmul.mubr.f32.gmra.mrb[26].mxu1 %v525_v41 }
  0xce   : > { %697 = vmatprep.mubr.f32.mxu0 %v496_v42  ;;  %777 = vmatprep.mubr.f32.mxu1 %v528_v43  ;;  %v442_v42 = vld [vmem:[#allocation2 + $0x38] sm:$0xff] }
  0xcf   : > { %v458_v43 = vld [vmem:[#allocation2 + $0xb8] sm:$0xff] }
  0xd1   : > { %698 = vmatmul.mubr.f32.gmra.mrb[28].mxu0 %v495_v44  ;;  %778 = vmatmul.mubr.f32.gmra.mrb[28].mxu1 %v527_v45 }
  0xd2   : > { %702 = vmatprep.mubr.f32.mxu0 %v498_v46  ;;  %782 = vmatprep.mubr.f32.mxu1 %v530_v47 }
  0xd5   : > { %703 = vmatmul.mubr.f32.gmra.mrb[30].mxu0 %v497_v48  ;;  %783 = vmatmul.mubr.f32.gmra.mrb[30].mxu1 %v529_v49 }
 0x16c   : > { %v629_v52 = vpop.f32.mrb[0].mxu0  ;;  %v709_v53 = vpop.f32.mrb[0].mxu1 }
 0x16d   : > { %v788_v54 = vadd.f32 %v629_v52, %v435_v50  ;;  %v804_v55 = vadd.f32 %v709_v53, %v451_v51  ;;  %v631_v56 = vpop.f32.mrb[1].mxu0  ;;  %v711_v57 = vpop.f32.mrb[1].mxu1  ;;  %v443_v50 = vld [vmem:[#allocation2 + $0x40] sm:$0xff] }
 0x16e   : > { %v459_v51 = vld [vmem:[#allocation2 + $0xc0] sm:$0xff] }
 0x16f   : > { %820 = vst [vmem:[#allocation2] sm:$0xff] %v788_v54  ;;  %836 = vst [vmem:[#allocation2 + $0x80] sm:$0xff] %v804_v55 }
 0x170   : > { %v634_v60 = vpop.f32.mrb[2].mxu0  ;;  %v714_v61 = vpop.f32.mrb[2].mxu1 }
 0x171   : > { %v789_v62 = vadd.f32 %v634_v60, %v436_v58  ;;  %v805_v63 = vadd.f32 %v714_v61, %v452_v59  ;;  %v636_v0 = vpop.f32.mrb[3].mxu0  ;;  %v716_v1 = vpop.f32.mrb[3].mxu1  ;;  %v444_v58 = vld [vmem:[#allocation2 + $0x48] sm:$0xff] }
 0x172   : > { %v460_v59 = vld [vmem:[#allocation2 + $0xc8] sm:$0xff] }
 0x173   : > { %821 = vst [vmem:[#allocation2 + $0x8] sm:$0xff] %v789_v62  ;;  %837 = vst [vmem:[#allocation2 + $0x88] sm:$0xff] %v805_v63 }
 0x174   : > { %v639_v4 = vpop.f32.mrb[4].mxu0  ;;  %v719_v5 = vpop.f32.mrb[4].mxu1 }
 0x175   : > { %v790_v6 = vadd.f32 %v639_v4, %v437_v2  ;;  %v806_v7 = vadd.f32 %v719_v5, %v453_v3  ;;  %v641_v8 = vpop.f32.mrb[5].mxu0  ;;  %v721_v9 = vpop.f32.mrb[5].mxu1  ;;  %v445_v2 = vld [vmem:[#allocation2 + $0x50] sm:$0xff] }
 0x176   : > { %v461_v3 = vld [vmem:[#allocation2 + $0xd0] sm:$0xff] }
 0x177   : > { %822 = vst [vmem:[#allocation2 + $0x10] sm:$0xff] %v790_v6  ;;  %838 = vst [vmem:[#allocation2 + $0x90] sm:$0xff] %v806_v7 }
 0x178   : > { %v644_v12 = vpop.f32.mrb[6].mxu0  ;;  %v724_v13 = vpop.f32.mrb[6].mxu1 }
 0x179   : > { %v791_v14 = vadd.f32 %v644_v12, %v438_v10  ;;  %v807_v15 = vadd.f32 %v724_v13, %v454_v11  ;;  %v646_v16 = vpop.f32.mrb[7].mxu0  ;;  %v726_v17 = vpop.f32.mrb[7].mxu1  ;;  %v446_v10 = vld [vmem:[#allocation2 + $0x58] sm:$0xff] }
 0x17a   : > { %v462_v11 = vld [vmem:[#allocation2 + $0xd8] sm:$0xff] }
 0x17b   : > { %823 = vst [vmem:[#allocation2 + $0x18] sm:$0xff] %v791_v14  ;;  %839 = vst [vmem:[#allocation2 + $0x98] sm:$0xff] %v807_v15 }
 0x17c   : > { %v649_v20 = vpop.f32.mrb[8].mxu0  ;;  %v729_v21 = vpop.f32.mrb[8].mxu1 }
 0x17d   : > { %v792_v22 = vadd.f32 %v649_v20, %v439_v18  ;;  %v808_v23 = vadd.f32 %v729_v21, %v455_v19  ;;  %v651_v24 = vpop.f32.mrb[9].mxu0  ;;  %v731_v25 = vpop.f32.mrb[9].mxu1  ;;  %v447_v18 = vld [vmem:[#allocation2 + $0x60] sm:$0xff] }
 0x17e   : > { %v463_v19 = vld [vmem:[#allocation2 + $0xe0] sm:$0xff] }
 0x17f   : > { %824 = vst [vmem:[#allocation2 + $0x20] sm:$0xff] %v792_v22  ;;  %840 = vst [vmem:[#allocation2 + $0xa0] sm:$0xff] %v808_v23 }
 0x180   : > { %v654_v28 = vpop.f32.mrb[10].mxu0  ;;  %v734_v29 = vpop.f32.mrb[10].mxu1 }
 0x181   : > { %v793_v30 = vadd.f32 %v654_v28, %v440_v26  ;;  %v809_v31 = vadd.f32 %v734_v29, %v456_v27  ;;  %v656_v32 = vpop.f32.mrb[11].mxu0  ;;  %v736_v33 = vpop.f32.mrb[11].mxu1  ;;  %v448_v26 = vld [vmem:[#allocation2 + $0x68] sm:$0xff] }
 0x182   : > { %v464_v27 = vld [vmem:[#allocation2 + $0xe8] sm:$0xff] }
 0x183   : > { %825 = vst [vmem:[#allocation2 + $0x28] sm:$0xff] %v793_v30  ;;  %841 = vst [vmem:[#allocation2 + $0xa8] sm:$0xff] %v809_v31 }
 0x184   : > { %v659_v36 = vpop.f32.mrb[12].mxu0  ;;  %v739_v37 = vpop.f32.mrb[12].mxu1 }
 0x185   : > { %v794_v38 = vadd.f32 %v659_v36, %v441_v34  ;;  %v810_v39 = vadd.f32 %v739_v37, %v457_v35  ;;  %v661_v40 = vpop.f32.mrb[13].mxu0  ;;  %v741_v41 = vpop.f32.mrb[13].mxu1  ;;  %v449_v34 = vld [vmem:[#allocation2 + $0x70] sm:$0xff] }
 0x186   : > { %v465_v35 = vld [vmem:[#allocation2 + $0xf0] sm:$0xff] }
 0x187   : > { %826 = vst [vmem:[#allocation2 + $0x30] sm:$0xff] %v794_v38  ;;  %842 = vst [vmem:[#allocation2 + $0xb0] sm:$0xff] %v810_v39 }
 0x188   : > { %v664_v44 = vpop.f32.mrb[14].mxu0  ;;  %v744_v45 = vpop.f32.mrb[14].mxu1 }
 0x189   : > { %v795_v46 = vadd.f32 %v664_v44, %v442_v42  ;;  %v811_v47 = vadd.f32 %v744_v45, %v458_v43  ;;  %v666_v48 = vpop.f32.mrb[15].mxu0  ;;  %v746_v49 = vpop.f32.mrb[15].mxu1  ;;  %v450_v42 = vld [vmem:[#allocation2 + $0x78] sm:$0xff] }
 0x18a   : > { %v466_v43 = vld [vmem:[#allocation2 + $0xf8] sm:$0xff] }
 0x18b   : > { %827 = vst [vmem:[#allocation2 + $0x38] sm:$0xff] %v795_v46  ;;  %843 = vst [vmem:[#allocation2 + $0xb8] sm:$0xff] %v811_v47 }
 0x18c   : > { %v669_v52 = vpop.f32.mrb[16].mxu0  ;;  %v749_v53 = vpop.f32.mrb[16].mxu1 }
 0x18d   : > { %v796_v54 = vadd.f32 %v669_v52, %v443_v50  ;;  %v812_v55 = vadd.f32 %v749_v53, %v459_v51  ;;  %v671_v56 = vpop.f32.mrb[17].mxu0  ;;  %v751_v57 = vpop.f32.mrb[17].mxu1  ;;  %v856_v50 = vld [vmem:[#allocation2] sm:$0xff] (!%p1125_p13)  ;;  %v857_v52 = vld [vmem:[#allocation2 + $0x8] sm:$0xff] (!%p1125_p13) }
 0x18e   : > { %v1688_v51 = vld [vmem:[%s1777_s2] ss:$0 sm:$0xff] (!%p1125_p13)  ;;  %v859_v56 = vld [vmem:[#allocation2 + $0x18] sm:$0xff] (!%p1125_p13) }
 0x18f   : > { %828 = vst [vmem:[#allocation2 + $0x40] sm:$0xff] %v796_v54  ;;  %844 = vst [vmem:[#allocation2 + $0xc0] sm:$0xff] %v812_v55  ;;  %v895_v53 = vadd.f32 (!%p1125_p13), %v1688_v51, %v856_v50  ;;  %v896_v54 = vadd.f32 (!%p1125_p13), %v1688_v51, %v857_v52  ;;  %v858_v55 = vld [vmem:[#allocation2 + $0x10] sm:$0xff] (!%p1125_p13)  ;;  %v860_v57 = vld [vmem:[#allocation2 + $0x20] sm:$0xff] (!%p1125_p13) }
 0x190   : > { %v674_v60 = vpop.f32.mrb[18].mxu0  ;;  %v754_v61 = vpop.f32.mrb[18].mxu1 }
 0x191   : > { %v797_v62 = vadd.f32 %v674_v60, %v444_v58  ;;  %v813_v63 = vadd.f32 %v754_v61, %v460_v59  ;;  %v676_v0 = vpop.f32.mrb[19].mxu0  ;;  %v756_v1 = vpop.f32.mrb[19].mxu1  ;;  %v897_v58 = vadd.f32 (!%p1125_p13), %v1688_v51, %v858_v55  ;;  %v898_v59 = vadd.f32 (!%p1125_p13), %v1688_v51, %v859_v56  ;;  %v861_v61 = vld [vmem:[#allocation2 + $0x28] sm:$0xff] (!%p1125_p13) }
 0x192   : > { %v899_v60 = vadd.f32 (!%p1125_p13), %v1688_v51, %v860_v57  ;;  %v927_v0 = vmax.f32 (!%p1125_p13), %v895_v53, 0.0  ;;  %v928_v1 = vmax.f32 (!%p1125_p13), %v896_v54, 0.0 }
 0x193   : > { %829 = vst [vmem:[#allocation2 + $0x48] sm:$0xff] %v797_v62  ;;  %845 = vst [vmem:[#allocation2 + $0xc8] sm:$0xff] %v813_v63  ;;  %v862_v62 = vld [vmem:[#allocation2 + $0x30] sm:$0xff] (!%p1125_p13)  ;;  %v863_v63 = vld [vmem:[#allocation2 + $0x38] sm:$0xff] (!%p1125_p13) }
 0x194   : > { %v679_v4 = vpop.f32.mrb[20].mxu0  ;;  %v759_v5 = vpop.f32.mrb[20].mxu1  ;;  %959 = vst [vmem:[%s1551_s30] sm:$0xff] (!%p1125_p13), %v927_v0  ;;  %960 = vst [vmem:[%s1551_s30 + $0x8] sm:$0xff] (!%p1125_p13), %v928_v1 }
 0x195   : > { %v798_v6 = vadd.f32 %v679_v4, %v445_v2  ;;  %v814_v7 = vadd.f32 %v759_v5, %v461_v3  ;;  %v681_v8 = vpop.f32.mrb[21].mxu0  ;;  %v761_v9 = vpop.f32.mrb[21].mxu1  ;;  %v900_v2 = vadd.f32 (!%p1125_p13), %v1688_v51, %v861_v61  ;;  %v901_v3 = vadd.f32 (!%p1125_p13), %v1688_v51, %v862_v62 }
 0x196   : > { %v864_v4 = vld [vmem:[#allocation2 + $0x40] sm:$0xff] (!%p1125_p13)  ;;  %v930_v8 = vmax.f32 (!%p1125_p13), %v898_v59, 0.0  ;;  %v931_v9 = vmax.f32 (!%p1125_p13), %v899_v60, 0.0 }
 0x197   : > { %830 = vst [vmem:[#allocation2 + $0x50] sm:$0xff] %v798_v6  ;;  %846 = vst [vmem:[#allocation2 + $0xd0] sm:$0xff] %v814_v7  ;;  %v929_v7 = vmax.f32 (!%p1125_p13), %v897_v58, 0.0 }
 0x198   : > { %v684_v12 = vpop.f32.mrb[22].mxu0  ;;  %v764_v13 = vpop.f32.mrb[22].mxu1  ;;  %962 = vst [vmem:[%s1551_s30 + $0x18] sm:$0xff] (!%p1125_p13), %v930_v8  ;;  %963 = vst [vmem:[%s1551_s30 + $0x20] sm:$0xff] (!%p1125_p13), %v931_v9 }
 0x199   : > { %v799_v14 = vadd.f32 %v684_v12, %v446_v10  ;;  %v815_v15 = vadd.f32 %v764_v13, %v462_v11  ;;  %v686_v16 = vpop.f32.mrb[23].mxu0  ;;  %v766_v17 = vpop.f32.mrb[23].mxu1  ;;  %v902_v10 = vadd.f32 (!%p1125_p13), %v1688_v51, %v863_v63  ;;  %961 = vst [vmem:[%s1551_s30 + $0x10] sm:$0xff] (!%p1125_p13), %v929_v7 }
 0x19a   : > { %v865_v5 = vld [vmem:[#allocation2 + $0x48] sm:$0xff] (!%p1125_p13)  ;;  %v903_v16 = vadd.f32 (!%p1125_p13), %v1688_v51, %v864_v4 }
 0x19b   : > { %831 = vst [vmem:[#allocation2 + $0x58] sm:$0xff] %v799_v14  ;;  %847 = vst [vmem:[#allocation2 + $0xd8] sm:$0xff] %v815_v15  ;;  %v932_v14 = vmax.f32 (!%p1125_p13), %v900_v2, 0.0  ;;  %v933_v15 = vmax.f32 (!%p1125_p13), %v901_v3, 0.0  ;;  %v904_v17 = vadd.f32 (!%p1125_p13), %v1688_v51, %v865_v5 }
 0x19c   : > { %v689_v20 = vpop.f32.mrb[24].mxu0  ;;  %v769_v21 = vpop.f32.mrb[24].mxu1 }
 0x19d   : > { %v800_v22 = vadd.f32 %v689_v20, %v447_v18  ;;  %v816_v23 = vadd.f32 %v769_v21, %v463_v19  ;;  %v691_v24 = vpop.f32.mrb[25].mxu0  ;;  %v771_v25 = vpop.f32.mrb[25].mxu1  ;;  %v934_v20 = vmax.f32 (!%p1125_p13), %v902_v10, 0.0  ;;  %964 = vst [vmem:[%s1551_s30 + $0x28] sm:$0xff] (!%p1125_p13), %v932_v14  ;;  %965 = vst [vmem:[%s1551_s30 + $0x30] sm:$0xff] (!%p1125_p13), %v933_v15 }
 0x19e   : > { %v866_v6 = vld [vmem:[#allocation2 + $0x50] sm:$0xff] (!%p1125_p13)  ;;  %v872_v24 = vld [vmem:[#allocation2 + $0x80] sm:$0xff] (!%p1125_p13)  ;;  %v873_v25 = vld [vmem:[#allocation2 + $0x88] sm:$0xff] (!%p1125_p13) }
 0x19f   : > { %832 = vst [vmem:[#allocation2 + $0x60] sm:$0xff] %v800_v22  ;;  %848 = vst [vmem:[#allocation2 + $0xe0] sm:$0xff] %v816_v23  ;;  %v905_v21 = vadd.f32 (!%p1125_p13), %v1688_v51, %v866_v6  ;;  %v882_v55 = vld [vmem:[#allocation2 + $0xd0] sm:$0xff] (!%p1125_p13) }
 0x1a0   : > { %v694_v28 = vpop.f32.mrb[26].mxu0  ;;  %v774_v29 = vpop.f32.mrb[26].mxu1  ;;  %966 = vst [vmem:[%s1551_s30 + $0x38] sm:$0xff] (!%p1125_p13), %v934_v20  ;;  %v921_v6 = vadd.f32 (!%p1125_p13), %v1688_v51, %v882_v55 }
 0x1a1   : > { %v801_v30 = vadd.f32 %v694_v28, %v448_v26  ;;  %v817_v31 = vadd.f32 %v774_v29, %v464_v27  ;;  %v696_v32 = vpop.f32.mrb[27].mxu0  ;;  %v776_v33 = vpop.f32.mrb[27].mxu1  ;;  %v935_v26 = vmax.f32 (!%p1125_p13), %v903_v16, 0.0  ;;  %v936_v27 = vmax.f32 (!%p1125_p13), %v904_v17, 0.0 }
 0x1a2   : > { %v867_v11 = vld [vmem:[#allocation2 + $0x58] sm:$0xff] (!%p1125_p13)  ;;  %v876_v32 = vld [vmem:[#allocation2 + $0xa0] sm:$0xff] (!%p1125_p13)  ;;  %v937_v33 = vmax.f32 (!%p1125_p13), %v905_v21, 0.0 }
 0x1a3   : > { %833 = vst [vmem:[#allocation2 + $0x68] sm:$0xff] %v801_v30  ;;  %849 = vst [vmem:[#allocation2 + $0xe8] sm:$0xff] %v817_v31  ;;  %v906_v22 = vadd.f32 (!%p1125_p13), %v1688_v51, %v867_v11  ;;  %v874_v30 = vld [vmem:[#allocation2 + $0x90] sm:$0xff] (!%p1125_p13)  ;;  %v875_v31 = vld [vmem:[#allocation2 + $0x98] sm:$0xff] (!%p1125_p13) }
 0x1a4   : > { %v699_v36 = vpop.f32.mrb[28].mxu0  ;;  %v779_v37 = vpop.f32.mrb[28].mxu1  ;;  %967 = vst [vmem:[%s1551_s30 + $0x40] sm:$0xff] (!%p1125_p13), %v935_v26  ;;  %968 = vst [vmem:[%s1551_s30 + $0x48] sm:$0xff] (!%p1125_p13), %v936_v27  ;;  %v883_v56 = vld [vmem:[#allocation2 + $0xd8] sm:$0xff] (!%p1125_p13) }
 0x1a5   : > { %v802_v38 = vadd.f32 %v699_v36, %v449_v34  ;;  %v818_v39 = vadd.f32 %v779_v37, %v465_v35  ;;  %v701_v40 = vpop.f32.mrb[29].mxu0  ;;  %v781_v41 = vpop.f32.mrb[29].mxu1  ;;  %855 = sbr.rel (%p1125_p13) target bundleno = 441 (0x1b9), region = 63  ;;  %v938_v34 = vmax.f32 (!%p1125_p13), %v906_v22, 0.0  ;;  %v877_v37 = vld [vmem:[#allocation2 + $0xa8] sm:$0xff] (!%p1125_p13)  ;;  %969 = vst [vmem:[%s1551_s30 + $0x50] sm:$0xff] (!%p1125_p13), %v937_v33  ;;  %v922_v7 = vadd.f32 (!%p1125_p13), %v1688_v51, %v883_v56 }
 0x1a6   : > { %v868_v12 = vld [vmem:[#allocation2 + $0x60] sm:$0xff] (!%p1125_p13)  ;;  %v911_v41 = vadd.f32 (!%p1125_p13), %v1688_v51, %v872_v24  ;;  %v916_v53 = vadd.f32 (!%p1125_p13), %v1688_v51, %v877_v37 }
 0x1a7   : > { %834 = vst [vmem:[#allocation2 + $0x70] sm:$0xff] %v802_v38  ;;  %850 = vst [vmem:[#allocation2 + $0xf0] sm:$0xff] %v818_v39  ;;  %v907_v23 = vadd.f32 (!%p1125_p13), %v1688_v51, %v868_v12  ;;  %v878_v38 = vld [vmem:[#allocation2 + $0xb0] sm:$0xff] (!%p1125_p13)  ;;  %v884_v57 = vld [vmem:[#allocation2 + $0xe0] sm:$0xff] (!%p1125_p13)  ;;  %v954_v14 = vmax.f32 (!%p1125_p13), %v922_v7, 0.0 }
 0x1a8   : > { %v704_v44 = vpop.f32.mrb[30].mxu0  ;;  %v784_v45 = vpop.f32.mrb[30].mxu1  ;;  %970 = vst [vmem:[%s1551_s30 + $0x58] sm:$0xff] (!%p1125_p13), %v938_v34  ;;  %v943_v50 = vmax.f32 (!%p1125_p13), %v911_v41, 0.0  ;;  %v917_v54 = vadd.f32 (!%p1125_p13), %v1688_v51, %v878_v38  ;;  %v948_v0 = vmax.f32 (!%p1125_p13), %v916_v53, 0.0  ;;  %v923_v8 = vadd.f32 (!%p1125_p13), %v1688_v51, %v884_v57 }
 0x1a9   : > { %v803_v46 = vadd.f32 %v704_v44, %v450_v42  ;;  %v819_v47 = vadd.f32 %v784_v45, %v466_v43  ;;  %v706_v48 = vpop.f32.mrb[31].mxu0  ;;  %v786_v49 = vpop.f32.mrb[31].mxu1  ;;  %v939_v35 = vmax.f32 (!%p1125_p13), %v907_v23, 0.0  ;;  %v912_v42 = vadd.f32 (!%p1125_p13), %v1688_v51, %v873_v25  ;;  %v879_v43 = vld [vmem:[#allocation2 + $0xb8] sm:$0xff] (!%p1125_p13)  ;;  %986 = vst [vmem:[%s1551_s30 + $0xd8] sm:$0xff] (!%p1125_p13), %v954_v14 }
 0x1aa   : > { %v869_v13 = vld [vmem:[#allocation2 + $0x68] sm:$0xff] (!%p1125_p13)  ;;  %v913_v45 = vadd.f32 (!%p1125_p13), %v1688_v51, %v874_v30  ;;  %v880_v48 = vld [vmem:[#allocation2 + $0xc0] sm:$0xff] (!%p1125_p13)  ;;  %v918_v61 = vadd.f32 (!%p1125_p13), %v1688_v51, %v879_v43  ;;  %975 = vst [vmem:[%s1551_s30 + $0x80] sm:$0xff] (!%p1125_p13), %v943_v50  ;;  %v949_v1 = vmax.f32 (!%p1125_p13), %v917_v54, 0.0  ;;  %980 = vst [vmem:[%s1551_s30 + $0xa8] sm:$0xff] (!%p1125_p13), %v948_v0  ;;  %v955_v15 = vmax.f32 (!%p1125_p13), %v923_v8, 0.0 }
 0x1ab   : > { %835 = vst [vmem:[#allocation2 + $0x78] sm:$0xff] %v803_v46  ;;  %851 = vst [vmem:[#allocation2 + $0xf8] sm:$0xff] %v819_v47  ;;  %v908_v28 = vadd.f32 (!%p1125_p13), %v1688_v51, %v869_v13  ;;  %v914_v46 = vadd.f32 (!%p1125_p13), %v1688_v51, %v875_v31  ;;  %v915_v47 = vadd.f32 (!%p1125_p13), %v1688_v51, %v876_v32  ;;  %v881_v49 = vld [vmem:[#allocation2 + $0xc8] sm:$0xff] (!%p1125_p13)  ;;  %v944_v52 = vmax.f32 (!%p1125_p13), %v912_v42, 0.0 }
 0x1ac   : > { %971 = vst [vmem:[%s1551_s30 + $0x60] sm:$0xff] %v939_v35  ;;  %v945_v58 = vmax.f32 %v913_v45, 0.0  ;;  %v885_v62 = vld [vmem:[#allocation2 + $0xe8] sm:$0xff]  ;;  %v919_v2 = vadd.f32 %v1688_v51, %v880_v48  ;;  %v920_v3 = vadd.f32 %v1688_v51, %v881_v49  ;;  %v950_v5 = vmax.f32 %v918_v61, 0.0  ;;  %981 = vst [vmem:[%s1551_s30 + $0xb0] sm:$0xff] %v949_v1 }
 0x1ad   : > { %v940_v39 = vmax.f32 %v908_v28, 0.0  ;;  %v946_v59 = vmax.f32 %v914_v46, 0.0  ;;  %v947_v60 = vmax.f32 %v915_v47, 0.0  ;;  %976 = vst [vmem:[%s1551_s30 + $0x88] sm:$0xff] %v944_v52  ;;  %v924_v11 = vadd.f32 %v1688_v51, %v885_v62  ;;  %987 = vst [vmem:[%s1551_s30 + $0xe0] sm:$0xff] %v955_v15 }
 0x1ae   : > { %v870_v18 = vld [vmem:[#allocation2 + $0x70] sm:$0xff]  ;;  %977 = vst [vmem:[%s1551_s30 + $0x90] sm:$0xff] %v945_v58  ;;  %v951_v9 = vmax.f32 %v919_v2, 0.0  ;;  %v952_v10 = vmax.f32 %v920_v3, 0.0  ;;  %982 = vst [vmem:[%s1551_s30 + $0xb8] sm:$0xff] %v950_v5  ;;  %v953_v13 = vmax.f32 %v921_v6, 0.0 }
 0x1af   : > { %v909_v29 = vadd.f32 %v1688_v51, %v870_v18  ;;  %972 = vst [vmem:[%s1551_s30 + $0x68] sm:$0xff] %v940_v39  ;;  %v886_v63 = vld [vmem:[#allocation2 + $0xf0] sm:$0xff]  ;;  %978 = vst [vmem:[%s1551_s30 + $0x98] sm:$0xff] %v946_v59  ;;  %v956_v17 = vmax.f32 %v924_v11, 0.0 }
 0x1b0   : > { %979 = vst [vmem:[%s1551_s30 + $0xa0] sm:$0xff] %v947_v60  ;;  %v925_v12 = vadd.f32 %v1688_v51, %v886_v63  ;;  %983 = vst [vmem:[%s1551_s30 + $0xc0] sm:$0xff] %v951_v9 }
 0x1b1   : > { %v941_v40 = vmax.f32 %v909_v29, 0.0  ;;  %984 = vst [vmem:[%s1551_s30 + $0xc8] sm:$0xff] %v952_v10  ;;  %985 = vst [vmem:[%s1551_s30 + $0xd0] sm:$0xff] %v953_v13 }
 0x1b2   : > { %v871_v19 = vld [vmem:[#allocation2 + $0x78] sm:$0xff]  ;;  %v957_v18 = vmax.f32 %v925_v12, 0.0  ;;  %988 = vst [vmem:[%s1551_s30 + $0xe8] sm:$0xff] %v956_v17 }
 0x1b3   : > { %v910_v36 = vadd.f32 %v1688_v51, %v871_v19  ;;  %973 = vst [vmem:[%s1551_s30 + $0x70] sm:$0xff] %v941_v40  ;;  %v887_v4 = vld [vmem:[#allocation2 + $0xf8] sm:$0xff] }
 0x1b4   : > { %v926_v16 = vadd.f32 %v1688_v51, %v887_v4  ;;  %989 = vst [vmem:[%s1551_s30 + $0xf0] sm:$0xff] %v957_v18 }
 0x1b5   : > { %v942_v44 = vmax.f32 %v910_v36, 0.0 }
 0x1b6   : > { %v958_v19 = vmax.f32 %v926_v16, 0.0 }
 0x1b7   : > { %974 = vst [vmem:[%s1551_s30 + $0x78] sm:$0xff] %v942_v44 }
 0x1b8   : > { %990 = vst [vmem:[%s1551_s30 + $0xf8] sm:$0xff] %v958_v19 }
 0x1b9 PF: > { %s13_s18 = sadd.s32 1, %s1322_s18   ;;  %s1779_s12 = smov %s1302_s13 }
 0x1ba   : > { %p10_p0 = scmp.ge.s32.totalorder %s13_s18, 12   ;;  %s1780_s13 = smov %s1397_s25 }
 0x1bb   : > { %s1781_s14 = smov %s1314_s16  ;;  %s1782_s15 = smov %s1318_s17 }
 0x1bc   : > { %s1783_s16 = smov %s1786_s19  ;;  %s1784_s17 = smov %s1790_s20 }
 0x1bd   :  { %12 = sbr.rel (!%p10_p0) target bundleno = 4 (0x4), region = 104 }

// kernel: _pallas_forward.27
= control target key start
LH: loop header
LB: loop body
LE: loop exit
PB: predicated region body
PF: predicated region fallthrough
CT: control target
= control target key end

     0   :  { %s414_s0 = inlined_call_operand.vmem [shape: f32[16,1024], index: 0, kind: input, shape index: {}]   ;;  %s415_s1 = inlined_call_operand.vmem [shape: f32[16,1024], index: 1, kind: input, shape index: {}]   ;;  %s416_s2 = inlined_call_operand.vmem [shape: f32[16,1024], index: 2, kind: input, shape index: {}]   ;;  %s417_s3 = inlined_call_operand.vmem [shape: f32[16,1024], index: 3, kind: input, shape index: {}]   ;;  %s418_s4 = inlined_call_operand.vmem [shape: f32[16,1024], index: 4, kind: output, shape index: {}]  }
   0x1   :  { %v17_v0 = vld [vmem:[%s414_s0] sm:$0xff]  ;;  %v18_v5 = vld [vmem:[%s414_s0 + $0x8] sm:$0xff]  ;;  %v19_v11 = vld [vmem:[%s414_s0 + $0x10] sm:$0xff] }
   0x2   :  { %v33_v1 = vld [vmem:[%s415_s1] sm:$0xff]  ;;  %v34_v6 = vld [vmem:[%s415_s1 + $0x8] sm:$0xff]  ;;  %v35_v13 = vld [vmem:[%s415_s1 + $0x10] sm:$0xff] }
   0x3   :  { %v65_v2 = vld [vmem:[%s416_s2] sm:$0xff]  ;;  %v49_v3 = vmax.f32 %v17_v0, %v33_v1  ;;  %v50_v8 = vmax.f32 %v18_v5, %v34_v6  ;;  %v66_v9 = vld [vmem:[%s416_s2 + $0x8] sm:$0xff]  ;;  %v67_v14 = vld [vmem:[%s416_s2 + $0x10] sm:$0xff]  ;;  %v51_v17 = vmax.f32 %v19_v11, %v35_v13 }
   0x4   :  { %v81_v4 = vld [vmem:[%s417_s3] sm:$0xff]  ;;  %v82_v10 = vld [vmem:[%s417_s3 + $0x8] sm:$0xff]  ;;  %v83_v15 = vld [vmem:[%s417_s3 + $0x10] sm:$0xff] }
   0x5   :  { %v97_v7 = vmax.f32 %v65_v2, %v81_v4  ;;  %v98_v12 = vmax.f32 %v66_v9, %v82_v10  ;;  %v99_v18 = vmax.f32 %v67_v14, %v83_v15  ;;  %v20_v19 = vld [vmem:[%s414_s0 + $0x18] sm:$0xff]  ;;  %v21_v25 = vld [vmem:[%s414_s0 + $0x20] sm:$0xff]  ;;  %v22_v32 = vld [vmem:[%s414_s0 + $0x28] sm:$0xff] }
   0x6   :  { %v36_v20 = vld [vmem:[%s415_s1 + $0x18] sm:$0xff]  ;;  %v37_v26 = vld [vmem:[%s415_s1 + $0x20] sm:$0xff]  ;;  %v38_v34 = vld [vmem:[%s415_s1 + $0x28] sm:$0xff] }
   0x7   :  { %v113_v16 = vmax.f32 %v49_v3, %v97_v7  ;;  %v68_v21 = vld [vmem:[%s416_s2 + $0x18] sm:$0xff]  ;;  %v114_v22 = vmax.f32 %v50_v8, %v98_v12  ;;  %v52_v23 = vmax.f32 %v20_v19, %v36_v20  ;;  %v115_v27 = vmax.f32 %v51_v17, %v99_v18  ;;  %v69_v30 = vld [vmem:[%s416_s2 + $0x20] sm:$0xff]  ;;  %v70_v35 = vld [vmem:[%s416_s2 + $0x28] sm:$0xff] }
   0x8   :  { %v84_v24 = vld [vmem:[%s417_s3 + $0x18] sm:$0xff]  ;;  %v53_v29 = vmax.f32 %v21_v25, %v37_v26  ;;  %v85_v31 = vld [vmem:[%s417_s3 + $0x20] sm:$0xff]  ;;  %v86_v36 = vld [vmem:[%s417_s3 + $0x28] sm:$0xff]  ;;  %v54_v38 = vmax.f32 %v22_v32, %v38_v34 }
   0x9   :  { %129 = vst [vmem:[%s418_s4] sm:$0xff] %v113_v16  ;;  %v100_v28 = vmax.f32 %v68_v21, %v84_v24  ;;  %130 = vst [vmem:[%s418_s4 + $0x8] sm:$0xff] %v114_v22  ;;  %v101_v33 = vmax.f32 %v69_v30, %v85_v31  ;;  %v102_v39 = vmax.f32 %v70_v35, %v86_v36  ;;  %v23_v40 = vld [vmem:[%s414_s0 + $0x30] sm:$0xff]  ;;  %v24_v46 = vld [vmem:[%s414_s0 + $0x38] sm:$0xff] }
   0xa   :  { %131 = vst [vmem:[%s418_s4 + $0x10] sm:$0xff] %v115_v27  ;;  %v39_v41 = vld [vmem:[%s415_s1 + $0x30] sm:$0xff]  ;;  %v40_v47 = vld [vmem:[%s415_s1 + $0x38] sm:$0xff]  ;;  %v25_v53 = vld [vmem:[%s414_s0 + $0x40] sm:$0xff] }
   0xb   :  { %v116_v37 = vmax.f32 %v52_v23, %v100_v28  ;;  %v71_v42 = vld [vmem:[%s416_s2 + $0x30] sm:$0xff]  ;;  %v117_v43 = vmax.f32 %v53_v29, %v101_v33  ;;  %v55_v44 = vmax.f32 %v23_v40, %v39_v41  ;;  %v118_v48 = vmax.f32 %v54_v38, %v102_v39  ;;  %v72_v51 = vld [vmem:[%s416_s2 + $0x38] sm:$0xff]  ;;  %v41_v55 = vld [vmem:[%s415_s1 + $0x40] sm:$0xff] }
   0xc   :  { %v87_v45 = vld [vmem:[%s417_s3 + $0x30] sm:$0xff]  ;;  %v56_v50 = vmax.f32 %v24_v46, %v40_v47  ;;  %v88_v52 = vld [vmem:[%s417_s3 + $0x38] sm:$0xff]  ;;  %v73_v56 = vld [vmem:[%s416_s2 + $0x40] sm:$0xff]  ;;  %v57_v59 = vmax.f32 %v25_v53, %v41_v55 }
   0xd   :  { %132 = vst [vmem:[%s418_s4 + $0x18] sm:$0xff] %v116_v37  ;;  %v103_v49 = vmax.f32 %v71_v42, %v87_v45  ;;  %133 = vst [vmem:[%s418_s4 + $0x20] sm:$0xff] %v117_v43  ;;  %v104_v54 = vmax.f32 %v72_v51, %v88_v52  ;;  %v89_v57 = vld [vmem:[%s417_s3 + $0x40] sm:$0xff]  ;;  %v26_v61 = vld [vmem:[%s414_s0 + $0x48] sm:$0xff] }
   0xe   :  { %134 = vst [vmem:[%s418_s4 + $0x28] sm:$0xff] %v118_v48  ;;  %v105_v60 = vmax.f32 %v73_v56, %v89_v57  ;;  %v42_v62 = vld [vmem:[%s415_s1 + $0x48] sm:$0xff]  ;;  %v27_v3 = vld [vmem:[%s414_s0 + $0x50] sm:$0xff]  ;;  %v28_v10 = vld [vmem:[%s414_s0 + $0x58] sm:$0xff] }
   0xf   :  { %v119_v58 = vmax.f32 %v55_v44, %v103_v49  ;;  %v74_v63 = vld [vmem:[%s416_s2 + $0x48] sm:$0xff]  ;;  %v120_v0 = vmax.f32 %v56_v50, %v104_v54  ;;  %v58_v1 = vmax.f32 %v26_v61, %v42_v62  ;;  %v43_v4 = vld [vmem:[%s415_s1 + $0x50] sm:$0xff]  ;;  %v44_v12 = vld [vmem:[%s415_s1 + $0x58] sm:$0xff] }
  0x10   :  { %v90_v2 = vld [vmem:[%s417_s3 + $0x48] sm:$0xff]  ;;  %v121_v5 = vmax.f32 %v57_v59, %v105_v60  ;;  %v59_v7 = vmax.f32 %v27_v3, %v43_v4  ;;  %v75_v8 = vld [vmem:[%s416_s2 + $0x50] sm:$0xff]  ;;  %v76_v13 = vld [vmem:[%s416_s2 + $0x58] sm:$0xff]  ;;  %v60_v16 = vmax.f32 %v28_v10, %v44_v12 }
  0x11   :  { %135 = vst [vmem:[%s418_s4 + $0x30] sm:$0xff] %v119_v58  ;;  %v106_v6 = vmax.f32 %v74_v63, %v90_v2  ;;  %v91_v9 = vld [vmem:[%s417_s3 + $0x50] sm:$0xff]  ;;  %136 = vst [vmem:[%s418_s4 + $0x38] sm:$0xff] %v120_v0  ;;  %v92_v14 = vld [vmem:[%s417_s3 + $0x58] sm:$0xff] }
  0x12   :  { %v107_v11 = vmax.f32 %v75_v8, %v91_v9  ;;  %137 = vst [vmem:[%s418_s4 + $0x40] sm:$0xff] %v121_v5  ;;  %v108_v17 = vmax.f32 %v76_v13, %v92_v14  ;;  %v29_v18 = vld [vmem:[%s414_s0 + $0x60] sm:$0xff]  ;;  %v30_v24 = vld [vmem:[%s414_s0 + $0x68] sm:$0xff]  ;;  %v31_v31 = vld [vmem:[%s414_s0 + $0x70] sm:$0xff] }
  0x13   :  { %v122_v15 = vmax.f32 %v58_v1, %v106_v6  ;;  %v45_v19 = vld [vmem:[%s415_s1 + $0x60] sm:$0xff]  ;;  %v46_v25 = vld [vmem:[%s415_s1 + $0x68] sm:$0xff]  ;;  %v47_v33 = vld [vmem:[%s415_s1 + $0x70] sm:$0xff] }
  0x14   :  { %v77_v20 = vld [vmem:[%s416_s2 + $0x60] sm:$0xff]  ;;  %v123_v21 = vmax.f32 %v59_v7, %v107_v11  ;;  %v61_v22 = vmax.f32 %v29_v18, %v45_v19  ;;  %v124_v26 = vmax.f32 %v60_v16, %v108_v17  ;;  %v62_v28 = vmax.f32 %v30_v24, %v46_v25  ;;  %v78_v29 = vld [vmem:[%s416_s2 + $0x68] sm:$0xff]  ;;  %v79_v34 = vld [vmem:[%s416_s2 + $0x70] sm:$0xff] }
  0x15   :  { %v93_v23 = vld [vmem:[%s417_s3 + $0x60] sm:$0xff]  ;;  %138 = vst [vmem:[%s418_s4 + $0x48] sm:$0xff] %v122_v15  ;;  %v94_v30 = vld [vmem:[%s417_s3 + $0x68] sm:$0xff]  ;;  %v95_v35 = vld [vmem:[%s417_s3 + $0x70] sm:$0xff]  ;;  %v63_v37 = vmax.f32 %v31_v31, %v47_v33 }
  0x16   :  { %v109_v27 = vmax.f32 %v77_v20, %v93_v23  ;;  %139 = vst [vmem:[%s418_s4 + $0x50] sm:$0xff] %v123_v21  ;;  %v110_v32 = vmax.f32 %v78_v29, %v94_v30  ;;  %140 = vst [vmem:[%s418_s4 + $0x58] sm:$0xff] %v124_v26  ;;  %v111_v38 = vmax.f32 %v79_v34, %v95_v35  ;;  %v32_v39 = vld [vmem:[%s414_s0 + $0x78] sm:$0xff] }
  0x17   :  { %v48_v40 = vld [vmem:[%s415_s1 + $0x78] sm:$0xff] }
  0x18   :  { %v125_v36 = vmax.f32 %v61_v22, %v109_v27  ;;  %v80_v41 = vld [vmem:[%s416_s2 + $0x78] sm:$0xff]  ;;  %v126_v42 = vmax.f32 %v62_v28, %v110_v32  ;;  %v64_v43 = vmax.f32 %v32_v39, %v48_v40  ;;  %v127_v45 = vmax.f32 %v63_v37, %v111_v38 }
  0x19   :  { %v96_v44 = vld [vmem:[%s417_s3 + $0x78] sm:$0xff] }
  0x1a   :  { %141 = vst [vmem:[%s418_s4 + $0x60] sm:$0xff] %v125_v36  ;;  %v112_v46 = vmax.f32 %v80_v41, %v96_v44  ;;  %142 = vst [vmem:[%s418_s4 + $0x68] sm:$0xff] %v126_v42 }
  0x1b   :  { %143 = vst [vmem:[%s418_s4 + $0x70] sm:$0xff] %v127_v45 }
  0x1c   :  { %v128_v47 = vmax.f32 %v64_v43, %v112_v46 }
  0x1e   :  { %144 = vst [vmem:[%s418_s4 + $0x78] sm:$0xff] %v128_v47 }

// kernel: _pallas_forward.28
= control target key start
LH: loop header
LB: loop body
LE: loop exit
PB: predicated region body
PF: predicated region fallthrough
CT: control target
= control target key end

     0   :  { %s1227_s12 = smov 0   ;;  %s1229_s13 = smov 0   ;;  %s1597_s0 = inlined_call_operand.vmem [shape: f32[128,1280], index: 0, kind: input, shape index: {}]   ;;  %s1598_s1 = inlined_call_operand.vmem [shape: f32[1280,256], index: 1, kind: input, shape index: {}]   ;;  %s1599_s2 = inlined_call_operand.vmem [shape: f32[1,256], index: 2, kind: input, shape index: {}]   ;;  %s1600_s3 = inlined_call_operand.vmem [shape: f32[128,256], index: 3, kind: output, shape index: {}]  }
   0x1   :  { %s1231_s14 = smov 0   ;;  %s1233_s15 = smov 0  }
   0x2   :  { %s1235_s16 = smov 0  }
   0x3 LB: > { %s25_s17 = sadd.s32 1, %s1200_s15  ;;  %p48_p1 = scmp.ne.s32.totalorder %s1192_s13, %s1188_s12  ;;  %s1204_s16 = sphi %s1235_s16, %s13_s16   ;;  %s1200_s15 = sphi %s1233_s15, %s1604_s15   ;;  %s1196_s14 = sphi %s1231_s14, %s1603_s14   ;;  %s1192_s13 = sphi %s1229_s13, %s1602_s13   ;;  %s1188_s12 = sphi %s1227_s12, %s1601_s12  }
   0x4   : > { %p26_p0 = scmp.ge.s32.totalorder %s25_s17, 5  ;;  %p49_p2 = scmp.eq.s32.totalorder %s1204_s16, 0 }
   0x5   : > { %s41_s19 = sadd.s32 1, %s1192_s13  ;;  %p1012_p5 = scmp.ge.s32.totalorder %s1204_s16, 5 }
   0x6   : > { %s1606_s17 = smov (%p26_p0, %s25_s17), 0  ;;  %p50_p3 = por %p49_p2, %p48_p1 }
   0x7   : > { %s37_s18 = ssub.s32 %s1200_s15, %s1606_s17  ;;  %164 = sbr.rel (%p1012_p5) target bundleno = 34 (0x22), region = 20 }
   0x8   : > { %p39_p4 = scmp.eq.s32.totalorder %s37_s18, 0 }
   0xa   : > { %s1262_s20 = scalar_select %p39_p4, %s1192_s13, %s41_s19  }
   0xe   : > { %167 = sbr.rel (!%p50_p3) target bundleno = 34 (0x22), region = 24  ;;  %s169_s21 = sand.u32 (%p50_p3), 1, %s1192_s13  }
   0xf   : > { %s1027_s22 = sshll.u32 (%p50_p3), %s1200_s15, 4  ;;  %s1013_s23 = sshll.u32 (%p50_p3), %s169_s21, 8 }
  0x10   : > { %s1270_s26 = scalar_lea.vmem (%p50_p3), %s1597_s0, %s1027_s22  ;;  %s1275_s27 = scalar_lea.vmem (%p50_p3), [#allocation3], %s1013_s23 }
  0x11   : > { %v190_v0 = vld [vmem:[%s1270_s26] sm:$0xff] (%p50_p3)  ;;  %v192_v1 = vld [vmem:[%s1270_s26 + $0x8] sm:$0xff] (%p50_p3)  ;;  %v194_v2 = vld [vmem:[%s1270_s26 + $0x50] sm:$0xff] (%p50_p3) }
  0x12   : > { %191 = vst [vmem:[%s1275_s27] sm:$0xff] (%p50_p3), %v190_v0  ;;  %193 = vst [vmem:[%s1275_s27 + $0x8] sm:$0xff] (%p50_p3), %v192_v1  ;;  %v196_v3 = vld [vmem:[%s1270_s26 + $0x58] sm:$0xff] (%p50_p3)  ;;  %v198_v4 = vld [vmem:[%s1270_s26 + $0xa0] sm:$0xff] (%p50_p3) }
  0x13   : > { %195 = vst [vmem:[%s1275_s27 + $0x10] sm:$0xff] (%p50_p3), %v194_v2  ;;  %v200_v5 = vld [vmem:[%s1270_s26 + $0xa8] sm:$0xff] (%p50_p3)  ;;  %197 = vst [vmem:[%s1275_s27 + $0x18] sm:$0xff] (%p50_p3), %v196_v3  ;;  %v202_v6 = vld [vmem:[%s1270_s26 + $0xf0] sm:$0xff] (%p50_p3) }
  0x14   : > { %199 = vst [vmem:[%s1275_s27 + $0x20] sm:$0xff] (%p50_p3), %v198_v4  ;;  %201 = vst [vmem:[%s1275_s27 + $0x28] sm:$0xff] (%p50_p3), %v200_v5  ;;  %v204_v7 = vld [vmem:[%s1270_s26 + $0xf8] sm:$0xff] (%p50_p3)  ;;  %v206_v8 = vld [vmem:[%s1270_s26 + $0x140] sm:$0xff] (%p50_p3) }
  0x15   : > { %203 = vst [vmem:[%s1275_s27 + $0x30] sm:$0xff] %v202_v6  ;;  %205 = vst [vmem:[%s1275_s27 + $0x38] sm:$0xff] %v204_v7  ;;  %v208_v9 = vld [vmem:[%s1270_s26 + $0x148] sm:$0xff]  ;;  %v210_v10 = vld [vmem:[%s1270_s26 + $0x190] sm:$0xff] }
  0x16   : > { %207 = vst [vmem:[%s1275_s27 + $0x40] sm:$0xff] %v206_v8  ;;  %v212_v11 = vld [vmem:[%s1270_s26 + $0x198] sm:$0xff]  ;;  %209 = vst [vmem:[%s1275_s27 + $0x48] sm:$0xff] %v208_v9  ;;  %v214_v12 = vld [vmem:[%s1270_s26 + $0x1e0] sm:$0xff] }
  0x17   : > { %211 = vst [vmem:[%s1275_s27 + $0x50] sm:$0xff] %v210_v10  ;;  %213 = vst [vmem:[%s1275_s27 + $0x58] sm:$0xff] %v212_v11  ;;  %v216_v13 = vld [vmem:[%s1270_s26 + $0x1e8] sm:$0xff]  ;;  %v218_v14 = vld [vmem:[%s1270_s26 + $0x230] sm:$0xff] }
  0x18   : > { %215 = vst [vmem:[%s1275_s27 + $0x60] sm:$0xff] %v214_v12  ;;  %217 = vst [vmem:[%s1275_s27 + $0x68] sm:$0xff] %v216_v13  ;;  %v220_v15 = vld [vmem:[%s1270_s26 + $0x238] sm:$0xff]  ;;  %v222_v16 = vld [vmem:[%s1270_s26 + $0x280] sm:$0xff] }
  0x19   : > { %219 = vst [vmem:[%s1275_s27 + $0x70] sm:$0xff] %v218_v14  ;;  %v224_v17 = vld [vmem:[%s1270_s26 + $0x288] sm:$0xff]  ;;  %221 = vst [vmem:[%s1275_s27 + $0x78] sm:$0xff] %v220_v15  ;;  %v226_v18 = vld [vmem:[%s1270_s26 + $0x2d0] sm:$0xff] }
  0x1a   : > { %223 = vst [vmem:[%s1275_s27 + $0x80] sm:$0xff] %v222_v16  ;;  %225 = vst [vmem:[%s1275_s27 + $0x88] sm:$0xff] %v224_v17  ;;  %v228_v19 = vld [vmem:[%s1270_s26 + $0x2d8] sm:$0xff]  ;;  %v230_v20 = vld [vmem:[%s1270_s26 + $0x320] sm:$0xff] }
  0x1b   : > { %227 = vst [vmem:[%s1275_s27 + $0x90] sm:$0xff] %v226_v18  ;;  %229 = vst [vmem:[%s1275_s27 + $0x98] sm:$0xff] %v228_v19  ;;  %v232_v21 = vld [vmem:[%s1270_s26 + $0x328] sm:$0xff]  ;;  %v234_v22 = vld [vmem:[%s1270_s26 + $0x370] sm:$0xff] }
  0x1c   : > { %231 = vst [vmem:[%s1275_s27 + $0xa0] sm:$0xff] %v230_v20  ;;  %v236_v23 = vld [vmem:[%s1270_s26 + $0x378] sm:$0xff]  ;;  %233 = vst [vmem:[%s1275_s27 + $0xa8] sm:$0xff] %v232_v21  ;;  %v238_v24 = vld [vmem:[%s1270_s26 + $0x3c0] sm:$0xff] }
  0x1d   : > { %235 = vst [vmem:[%s1275_s27 + $0xb0] sm:$0xff] %v234_v22  ;;  %237 = vst [vmem:[%s1275_s27 + $0xb8] sm:$0xff] %v236_v23  ;;  %v240_v25 = vld [vmem:[%s1270_s26 + $0x3c8] sm:$0xff]  ;;  %v242_v26 = vld [vmem:[%s1270_s26 + $0x410] sm:$0xff] }
  0x1e   : > { %239 = vst [vmem:[%s1275_s27 + $0xc0] sm:$0xff] %v238_v24  ;;  %241 = vst [vmem:[%s1275_s27 + $0xc8] sm:$0xff] %v240_v25  ;;  %v244_v27 = vld [vmem:[%s1270_s26 + $0x418] sm:$0xff]  ;;  %v246_v28 = vld [vmem:[%s1270_s26 + $0x460] sm:$0xff] }
  0x1f   : > { %243 = vst [vmem:[%s1275_s27 + $0xd0] sm:$0xff] %v242_v26  ;;  %v248_v29 = vld [vmem:[%s1270_s26 + $0x468] sm:$0xff]  ;;  %245 = vst [vmem:[%s1275_s27 + $0xd8] sm:$0xff] %v244_v27  ;;  %v250_v30 = vld [vmem:[%s1270_s26 + $0x4b0] sm:$0xff] }
  0x20   : > { %247 = vst [vmem:[%s1275_s27 + $0xe0] sm:$0xff] %v246_v28  ;;  %249 = vst [vmem:[%s1275_s27 + $0xe8] sm:$0xff] %v248_v29  ;;  %v252_v31 = vld [vmem:[%s1270_s26 + $0x4b8] sm:$0xff] }
  0x21   : > { %251 = vst [vmem:[%s1275_s27 + $0xf0] sm:$0xff] %v250_v30  ;;  %253 = vst [vmem:[%s1275_s27 + $0xf8] sm:$0xff] %v252_v31 }
  0x22 PF: > { %p1016_p6 = scmp.ge.s32.totalorder %s1204_s16, 1  ;;  %p273_p7 = scmp.lt.s32.totalorder %s1204_s16, 6 }
  0x24   : > { %p274_p8 = pnand %p1016_p6, %p273_p7 }
  0x25   : > { %s280_s28 = sand.u32 (!%p274_p8), 1, %s1188_s12   ;;  %s1018_s29 = sshll.u32 (!%p274_p8), %s1196_s14, 5 }
  0x26   : > { %277 = sbr.rel (%p274_p8) target bundleno = 387 (0x183), region = 51  ;;  %s1017_s30 = sshll.u32 (!%p274_p8), %s280_s28, 8 }
  0x27   : > { %p326_p9 = scmp.lt.s32.totalorder (!%p274_p8), %s1018_s29, 159  ;;  %s1347_s8 = scalar_lea.vmem (!%p274_p8), [#allocation3], %s1017_s30 }
  0x28   : > { %p1021_p10 = scmp.ne.s32.totalorder (!%p274_p8), %s1196_s14, 0 }
  0x2d   : > { %s1608_s29 = smov (!%p326_p9, %s1018_s29), 159  ;;  %356 = sbr.rel (%p1021_p10) target bundleno = 63 (0x3f), region = 59 }
  0x2e   : > { %s1028_s4 = sshll.u32 %s1608_s29, 4  ;;  %v1206_v32 = vmov (!%p1021_p10), 0.0  }
  0x2f   : > { %s1345_s7 = scalar_lea.vmem %s1598_s1, %s1028_s4  ;;  %357 = vst [vmem:[#allocation2] sm:$0xff] (!%p1021_p10), %v1206_v32  ;;  %358 = vst [vmem:[#allocation2 + $0x8] sm:$0xff] (!%p1021_p10), %v1206_v32 }
  0x30   : > { %359 = vst [vmem:[#allocation2 + $0x10] sm:$0xff] (!%p1021_p10), %v1206_v32  ;;  %360 = vst [vmem:[#allocation2 + $0x18] sm:$0xff] (!%p1021_p10), %v1206_v32 }
  0x31   : > { %361 = vst [vmem:[#allocation2 + $0x20] sm:$0xff] (!%p1021_p10), %v1206_v32  ;;  %362 = vst [vmem:[#allocation2 + $0x28] sm:$0xff] (!%p1021_p10), %v1206_v32 }
  0x32   : > { %363 = vst [vmem:[#allocation2 + $0x30] sm:$0xff] (!%p1021_p10), %v1206_v32  ;;  %364 = vst [vmem:[#allocation2 + $0x38] sm:$0xff] (!%p1021_p10), %v1206_v32 }
  0x33   : > { %365 = vst [vmem:[#allocation2 + $0x40] sm:$0xff] (!%p1021_p10), %v1206_v32  ;;  %366 = vst [vmem:[#allocation2 + $0x48] sm:$0xff] (!%p1021_p10), %v1206_v32 }
  0x34   : > { %367 = vst [vmem:[#allocation2 + $0x50] sm:$0xff] %v1206_v32  ;;  %368 = vst [vmem:[#allocation2 + $0x58] sm:$0xff] %v1206_v32 }
  0x35   : > { %369 = vst [vmem:[#allocation2 + $0x60] sm:$0xff] %v1206_v32  ;;  %370 = vst [vmem:[#allocation2 + $0x68] sm:$0xff] %v1206_v32 }
  0x36   : > { %371 = vst [vmem:[#allocation2 + $0x70] sm:$0xff] %v1206_v32  ;;  %372 = vst [vmem:[#allocation2 + $0x78] sm:$0xff] %v1206_v32 }
  0x37   : > { %373 = vst [vmem:[#allocation2 + $0x80] sm:$0xff] %v1206_v32  ;;  %374 = vst [vmem:[#allocation2 + $0x88] sm:$0xff] %v1206_v32 }
  0x38   : > { %375 = vst [vmem:[#allocation2 + $0x90] sm:$0xff] %v1206_v32  ;;  %376 = vst [vmem:[#allocation2 + $0x98] sm:$0xff] %v1206_v32 }
  0x39   : > { %377 = vst [vmem:[#allocation2 + $0xa0] sm:$0xff] %v1206_v32  ;;  %378 = vst [vmem:[#allocation2 + $0xa8] sm:$0xff] %v1206_v32 }
  0x3a   : > { %379 = vst [vmem:[#allocation2 + $0xb0] sm:$0xff] %v1206_v32  ;;  %380 = vst [vmem:[#allocation2 + $0xb8] sm:$0xff] %v1206_v32 }
  0x3b   : > { %381 = vst [vmem:[#allocation2 + $0xc0] sm:$0xff] %v1206_v32  ;;  %382 = vst [vmem:[#allocation2 + $0xc8] sm:$0xff] %v1206_v32 }
  0x3c   : > { %383 = vst [vmem:[#allocation2 + $0xd0] sm:$0xff] %v1206_v32  ;;  %384 = vst [vmem:[#allocation2 + $0xd8] sm:$0xff] %v1206_v32 }
  0x3d   : > { %385 = vst [vmem:[#allocation2 + $0xe0] sm:$0xff] %v1206_v32  ;;  %386 = vst [vmem:[#allocation2 + $0xe8] sm:$0xff] %v1206_v32 }
  0x3e   : > { %387 = vst [vmem:[#allocation2 + $0xf0] sm:$0xff] %v1206_v32  ;;  %388 = vst [vmem:[#allocation2 + $0xf8] sm:$0xff] %v1206_v32 }
  0x3f PF: > { %v454_v33 = vld [vmem:[%s1345_s7 + $0x8] sm:$0xff]  ;;  %v456_v34 = vld [vmem:[%s1345_s7 + $0x18] sm:$0xff]  ;;  %v453_v35 = vld [vmem:[%s1345_s7] sm:$0xff]  ;;  %p1022_p11 = scmp.ne.s32.totalorder %s1196_s14, 4 }
  0x40   : > { %v1029_v36 = vpack.c.bf16 %v456_v34, %v454_v33  ;;  %v455_v37 = vld [vmem:[%s1345_s7 + $0x10] sm:$0xff]  ;;  %v458_v38 = vld [vmem:[%s1345_s7 + $0x28] sm:$0xff]  ;;  %v460_v39 = vld [vmem:[%s1345_s7 + $0x38] sm:$0xff] }
  0x41   : > { %v1031_v40 = vpack.c.bf16 %v455_v37, %v453_v35  ;;  %v1033_v41 = vpack.c.bf16 %v460_v39, %v458_v38  ;;  %v457_v42 = vld [vmem:[%s1345_s7 + $0x20] sm:$0xff]  ;;  %v459_v43 = vld [vmem:[%s1345_s7 + $0x30] sm:$0xff]  ;;  %v462_v44 = vld [vmem:[%s1345_s7 + $0x48] sm:$0xff] }
  0x42   : > { %1030 = vmatprep.subr.bf16.mxu0 %v1029_v36  ;;  %1093 = vmatprep.subr.bf16.mxu1 %v1029_v36  ;;  %v464_v45 = vld [vmem:[%s1345_s7 + $0x58] sm:$0xff]  ;;  %v1035_v46 = vpack.c.bf16 %v459_v43, %v457_v42  ;;  %v461_v48 = vld [vmem:[%s1345_s7 + $0x40] sm:$0xff]  ;;  %v463_v49 = vld [vmem:[%s1345_s7 + $0x50] sm:$0xff] }
  0x43   : > { %1032 = vmatpush1.bf16.msra.mxu0 %v1031_v40  ;;  %1109 = vmatpush1.bf16.msra.mxu1 %v1031_v40  ;;  %v1037_v47 = vpack.c.bf16 %v464_v45, %v462_v44  ;;  %v466_v50 = vld [vmem:[%s1345_s7 + $0x68] sm:$0xff]  ;;  %v468_v51 = vld [vmem:[%s1345_s7 + $0x78] sm:$0xff]  ;;  %v1039_v52 = vpack.c.bf16 %v463_v49, %v461_v48  ;;  %v465_v54 = vld [vmem:[%s1345_s7 + $0x60] sm:$0xff] }
  0x44   : > { %1034 = vmatprep.subr.bf16.mxu0 %v1033_v41  ;;  %1094 = vmatprep.subr.bf16.mxu1 %v1033_v41  ;;  %v1041_v53 = vpack.c.bf16 %v468_v51, %v466_v50  ;;  %v467_v55 = vld [vmem:[%s1345_s7 + $0x70] sm:$0xff]  ;;  %v470_v56 = vld [vmem:[%s1345_s7 + $0x88] sm:$0xff]  ;;  %v472_v57 = vld [vmem:[%s1345_s7 + $0x98] sm:$0xff] }
  0x45   : > { %v1043_v58 = vpack.c.bf16 %v467_v55, %v465_v54  ;;  %v1045_v59 = vpack.c.bf16 %v472_v57, %v470_v56  ;;  %v469_v60 = vld [vmem:[%s1345_s7 + $0x80] sm:$0xff]  ;;  %v471_v61 = vld [vmem:[%s1345_s7 + $0x90] sm:$0xff]  ;;  %v474_v62 = vld [vmem:[%s1345_s7 + $0xa8] sm:$0xff] }
  0x46   : > { %v476_v63 = vld [vmem:[%s1345_s7 + $0xb8] sm:$0xff]  ;;  %v1047_v0 = vpack.c.bf16 %v471_v61, %v469_v60  ;;  %v473_v2 = vld [vmem:[%s1345_s7 + $0xa0] sm:$0xff]  ;;  %v475_v3 = vld [vmem:[%s1345_s7 + $0xb0] sm:$0xff] }
  0x47   : > { %1036 = vmatpush1.bf16.msra.mxu0 %v1035_v46  ;;  %1110 = vmatpush1.bf16.msra.mxu1 %v1035_v46  ;;  %v1049_v1 = vpack.c.bf16 %v476_v63, %v474_v62  ;;  %v478_v4 = vld [vmem:[%s1345_s7 + $0xc8] sm:$0xff]  ;;  %v480_v5 = vld [vmem:[%s1345_s7 + $0xd8] sm:$0xff]  ;;  %v1051_v6 = vpack.c.bf16 %v475_v3, %v473_v2  ;;  %v477_v7 = vld [vmem:[%s1345_s7 + $0xc0] sm:$0xff] }
  0x48   : > { %1038 = vmatprep.subr.bf16.mxu0 %v1037_v47  ;;  %1095 = vmatprep.subr.bf16.mxu1 %v1037_v47  ;;  %v1053_v8 = vpack.c.bf16 %v480_v5, %v478_v4  ;;  %v479_v9 = vld [vmem:[%s1345_s7 + $0xd0] sm:$0xff]  ;;  %v422_v10 = vld [vmem:[%s1347_s8 + $0x8] sm:$0xff]  ;;  %v484_v13 = vld [vmem:[%s1345_s7 + $0xf8] sm:$0xff] }
  0x49   : > { %v438_v11 = vld [vmem:[%s1347_s8 + $0x88] sm:$0xff]  ;;  %581 = vmatprep.mubr.f32.mxu0 %v422_v10  ;;  %v1055_v14 = vpack.c.bf16 %v479_v9, %v477_v7  ;;  %v481_v16 = vld [vmem:[%s1345_s7 + $0xe0] sm:$0xff]  ;;  %v483_v17 = vld [vmem:[%s1345_s7 + $0xf0] sm:$0xff] }
  0x4a   : > { %v482_v12 = vld [vmem:[%s1345_s7 + $0xe8] sm:$0xff]  ;;  %629 = vmatprep.mubr.f32.mxu1 %v438_v11  ;;  %v488_v19 = vld [vmem:[%s1345_s7 + $0x118] sm:$0xff]  ;;  %v1059_v20 = vpack.c.bf16 %v483_v17, %v481_v16  ;;  %v485_v22 = vld [vmem:[%s1345_s7 + $0x100] sm:$0xff] }
  0x4b   : > { %1040 = vmatpush1.bf16.msra.mxu0 %v1039_v52  ;;  %1111 = vmatpush1.bf16.msra.mxu1 %v1039_v52  ;;  %v1057_v15 = vpack.c.bf16 %v484_v13, %v482_v12  ;;  %v486_v18 = vld [vmem:[%s1345_s7 + $0x108] sm:$0xff]  ;;  %v487_v23 = vld [vmem:[%s1345_s7 + $0x110] sm:$0xff]  ;;  %v492_v25 = vld [vmem:[%s1345_s7 + $0x138] sm:$0xff] }
  0x4c   : > { %1042 = vmatprep.subr.bf16.mxu0 %v1041_v53  ;;  %1096 = vmatprep.subr.bf16.mxu1 %v1041_v53  ;;  %v1061_v21 = vpack.c.bf16 %v488_v19, %v486_v18  ;;  %v490_v24 = vld [vmem:[%s1345_s7 + $0x128] sm:$0xff]  ;;  %v1063_v26 = vpack.c.bf16 %v487_v23, %v485_v22  ;;  %v489_v28 = vld [vmem:[%s1345_s7 + $0x120] sm:$0xff]  ;;  %v491_v29 = vld [vmem:[%s1345_s7 + $0x130] sm:$0xff] }
  0x4d   : > { %v1065_v27 = vpack.c.bf16 %v492_v25, %v490_v24  ;;  %v494_v30 = vld [vmem:[%s1345_s7 + $0x148] sm:$0xff]  ;;  %v496_v31 = vld [vmem:[%s1345_s7 + $0x158] sm:$0xff]  ;;  %v1067_v32 = vpack.c.bf16 %v491_v29, %v489_v28  ;;  %v493_v34 = vld [vmem:[%s1345_s7 + $0x140] sm:$0xff] }
  0x4e   : > { %v1069_v33 = vpack.c.bf16 %v496_v31, %v494_v30  ;;  %v495_v35 = vld [vmem:[%s1345_s7 + $0x150] sm:$0xff]  ;;  %v498_v36 = vld [vmem:[%s1345_s7 + $0x168] sm:$0xff]  ;;  %v500_v37 = vld [vmem:[%s1345_s7 + $0x178] sm:$0xff] }
  0x4f   : > { %1044 = vmatpush1.bf16.msra.mxu0 %v1043_v58  ;;  %1112 = vmatpush1.bf16.msra.mxu1 %v1043_v58  ;;  %v1071_v38 = vpack.c.bf16 %v495_v35, %v493_v34  ;;  %v1073_v39 = vpack.c.bf16 %v500_v37, %v498_v36  ;;  %v497_v40 = vld [vmem:[%s1345_s7 + $0x160] sm:$0xff]  ;;  %v499_v41 = vld [vmem:[%s1345_s7 + $0x170] sm:$0xff]  ;;  %v502_v42 = vld [vmem:[%s1345_s7 + $0x188] sm:$0xff] }
  0x50   : > { %1046 = vmatprep.subr.bf16.mxu0 %v1045_v59  ;;  %1097 = vmatprep.subr.bf16.mxu1 %v1045_v59  ;;  %v504_v43 = vld [vmem:[%s1345_s7 + $0x198] sm:$0xff]  ;;  %v1075_v44 = vpack.c.bf16 %v499_v41, %v497_v40  ;;  %v501_v46 = vld [vmem:[%s1345_s7 + $0x180] sm:$0xff]  ;;  %v503_v47 = vld [vmem:[%s1345_s7 + $0x190] sm:$0xff] }
  0x51   : > { %v1077_v45 = vpack.c.bf16 %v504_v43, %v502_v42  ;;  %v506_v48 = vld [vmem:[%s1345_s7 + $0x1a8] sm:$0xff]  ;;  %v508_v49 = vld [vmem:[%s1345_s7 + $0x1b8] sm:$0xff]  ;;  %v1079_v50 = vpack.c.bf16 %v503_v47, %v501_v46  ;;  %v505_v52 = vld [vmem:[%s1345_s7 + $0x1a0] sm:$0xff] }
  0x52   : > { %v1081_v51 = vpack.c.bf16 %v508_v49, %v506_v48  ;;  %v507_v53 = vld [vmem:[%s1345_s7 + $0x1b0] sm:$0xff]  ;;  %v510_v54 = vld [vmem:[%s1345_s7 + $0x1c8] sm:$0xff]  ;;  %v512_v55 = vld [vmem:[%s1345_s7 + $0x1d8] sm:$0xff] }
  0x53   : > { %1048 = vmatpush1.bf16.msra.mxu0 %v1047_v0  ;;  %1113 = vmatpush1.bf16.msra.mxu1 %v1047_v0  ;;  %v1083_v56 = vpack.c.bf16 %v507_v53, %v505_v52  ;;  %v1085_v57 = vpack.c.bf16 %v512_v55, %v510_v54  ;;  %v509_v58 = vld [vmem:[%s1345_s7 + $0x1c0] sm:$0xff]  ;;  %v511_v59 = vld [vmem:[%s1345_s7 + $0x1d0] sm:$0xff]  ;;  %v514_v60 = vld [vmem:[%s1345_s7 + $0x1e8] sm:$0xff] }
  0x54   : > { %1050 = vmatprep.subr.bf16.mxu0 %v1049_v1  ;;  %1098 = vmatprep.subr.bf16.mxu1 %v1049_v1  ;;  %v516_v61 = vld [vmem:[%s1345_s7 + $0x1f8] sm:$0xff]  ;;  %v1087_v62 = vpack.c.bf16 %v511_v59, %v509_v58  ;;  %v513_v0 = vld [vmem:[%s1345_s7 + $0x1e0] sm:$0xff]  ;;  %v515_v1 = vld [vmem:[%s1345_s7 + $0x1f0] sm:$0xff] }
  0x55   : > { %v1089_v63 = vpack.c.bf16 %v516_v61, %v514_v60  ;;  %v1091_v2 = vpack.c.bf16 %v515_v1, %v513_v0  ;;  %v421_v3 = vld [vmem:[%s1347_s8] sm:$0xff]  ;;  %v424_v5 = vld [vmem:[%s1347_s8 + $0x18] sm:$0xff]  ;;  %v423_v7 = vld [vmem:[%s1347_s8 + $0x10] sm:$0xff] }
  0x56   : > { %v437_v4 = vld [vmem:[%s1347_s8 + $0x80] sm:$0xff]  ;;  %v426_v9 = vld [vmem:[%s1347_s8 + $0x28] sm:$0xff]  ;;  %v428_v13 = vld [vmem:[%s1347_s8 + $0x38] sm:$0xff] }
  0x57   : > { %1052 = vmatpush1.bf16.msra.mxu0 %v1051_v6  ;;  %1114 = vmatpush1.bf16.msra.mxu1 %v1051_v6  ;;  %v440_v6 = vld [vmem:[%s1347_s8 + $0x98] sm:$0xff]  ;;  %v442_v10 = vld [vmem:[%s1347_s8 + $0xa8] sm:$0xff]  ;;  %v425_v11 = vld [vmem:[%s1347_s8 + $0x20] sm:$0xff] }
  0x58   : > { %1054 = vmatprep.subr.bf16.mxu0 %v1053_v8  ;;  %1099 = vmatprep.subr.bf16.mxu1 %v1053_v8  ;;  %v439_v8 = vld [vmem:[%s1347_s8 + $0x90] sm:$0xff]  ;;  %v441_v12 = vld [vmem:[%s1347_s8 + $0xa0] sm:$0xff]  ;;  %v430_v17 = vld [vmem:[%s1347_s8 + $0x48] sm:$0xff] }
  0x59   : > { %v443_v16 = vld [vmem:[%s1347_s8 + $0xb0] sm:$0xff]  ;;  %v446_v18 = vld [vmem:[%s1347_s8 + $0xc8] sm:$0xff]  ;;  %v429_v19 = vld [vmem:[%s1347_s8 + $0x40] sm:$0xff] }
  0x5a   : > { %v448_v22 = vld [vmem:[%s1347_s8 + $0xd8] sm:$0xff]  ;;  %v431_v23 = vld [vmem:[%s1347_s8 + $0x50] sm:$0xff]  ;;  %v434_v25 = vld [vmem:[%s1347_s8 + $0x68] sm:$0xff] }
  0x5b   : > { %1056 = vmatpush1.bf16.msra.mxu0 %v1055_v14  ;;  %1115 = vmatpush1.bf16.msra.mxu1 %v1055_v14  ;;  %v444_v14 = vld [vmem:[%s1347_s8 + $0xb8] sm:$0xff]  ;;  %v447_v24 = vld [vmem:[%s1347_s8 + $0xd0] sm:$0xff]  ;;  %v449_v28 = vld [vmem:[%s1347_s8 + $0xe0] sm:$0xff] }
  0x5c   : > { %1058 = vmatprep.subr.bf16.mxu0 %v1057_v15  ;;  %1100 = vmatprep.subr.bf16.mxu1 %v1057_v15  ;;  %v427_v15 = vld [vmem:[%s1347_s8 + $0x30] sm:$0xff]  ;;  %v436_v29 = vld [vmem:[%s1347_s8 + $0x78] sm:$0xff]  ;;  %v405_v34 = vld [vmem:[#allocation2 + $0x80] sm:$0xff] }
  0x5d   : > { %v452_v30 = vld [vmem:[%s1347_s8 + $0xf8] sm:$0xff]  ;;  %v435_v31 = vld [vmem:[%s1347_s8 + $0x70] sm:$0xff]  ;;  %v390_v35 = vld [vmem:[#allocation2 + $0x8] sm:$0xff] }
  0x5e   : > { %v406_v36 = vld [vmem:[#allocation2 + $0x88] sm:$0xff]  ;;  %v407_v46 = vld [vmem:[#allocation2 + $0x90] sm:$0xff]  ;;  %v392_v47 = vld [vmem:[#allocation2 + $0x18] sm:$0xff] }
  0x5f   : > { %1060 = vmatpush1.bf16.msra.mxu0 %v1059_v20  ;;  %1116 = vmatpush1.bf16.msra.mxu1 %v1059_v20  ;;  %v445_v20 = vld [vmem:[%s1347_s8 + $0xc0] sm:$0xff]  ;;  %v408_v48 = vld [vmem:[#allocation2 + $0x98] sm:$0xff]  ;;  %v394_v59 = vld [vmem:[#allocation2 + $0x28] sm:$0xff] }
  0x60   : > { %1062 = vmatprep.subr.bf16.mxu0 %v1061_v21  ;;  %1101 = vmatprep.subr.bf16.mxu1 %v1061_v21  ;;  %v432_v21 = vld [vmem:[%s1347_s8 + $0x58] sm:$0xff]  ;;  %v409_v58 = vld [vmem:[#allocation2 + $0xa0] sm:$0xff]  ;;  %v410_v60 = vld [vmem:[#allocation2 + $0xa8] sm:$0xff] }
  0x63   : > { %1064 = vmatpush1.bf16.msra.mxu0 %v1063_v26  ;;  %1117 = vmatpush1.bf16.msra.mxu1 %v1063_v26  ;;  %v450_v26 = vld [vmem:[%s1347_s8 + $0xe8] sm:$0xff] }
  0x64   : > { %1066 = vmatprep.subr.bf16.mxu0 %v1065_v27  ;;  %1102 = vmatprep.subr.bf16.mxu1 %v1065_v27  ;;  %v433_v27 = vld [vmem:[%s1347_s8 + $0x60] sm:$0xff] }
  0x67   : > { %1068 = vmatpush1.bf16.msra.mxu0 %v1067_v32  ;;  %1118 = vmatpush1.bf16.msra.mxu1 %v1067_v32  ;;  %v451_v32 = vld [vmem:[%s1347_s8 + $0xf0] sm:$0xff] }
  0x68   : > { %1070 = vmatprep.subr.bf16.mxu0 %v1069_v33  ;;  %1103 = vmatprep.subr.bf16.mxu1 %v1069_v33  ;;  %v389_v33 = vld [vmem:[#allocation2] sm:$0xff] }
  0x6b   : > { %1072 = vmatpush1.bf16.msra.mxu0 %v1071_v38  ;;  %1119 = vmatpush1.bf16.msra.mxu1 %v1071_v38 }
  0x6c   : > { %1074 = vmatprep.subr.bf16.mxu0 %v1073_v39  ;;  %1104 = vmatprep.subr.bf16.mxu1 %v1073_v39 }
  0x6f   : > { %1076 = vmatpush1.bf16.msra.mxu0 %v1075_v44  ;;  %1120 = vmatpush1.bf16.msra.mxu1 %v1075_v44 }
  0x70   : > { %1078 = vmatprep.subr.bf16.mxu0 %v1077_v45  ;;  %1105 = vmatprep.subr.bf16.mxu1 %v1077_v45  ;;  %v391_v45 = vld [vmem:[#allocation2 + $0x10] sm:$0xff] }
  0x73   : > { %1080 = vmatpush1.bf16.msra.mxu0 %v1079_v50  ;;  %1121 = vmatpush1.bf16.msra.mxu1 %v1079_v50 }
  0x74   : > { %1082 = vmatprep.subr.bf16.mxu0 %v1081_v51  ;;  %1106 = vmatprep.subr.bf16.mxu1 %v1081_v51 }
  0x77   : > { %1084 = vmatpush1.bf16.msra.mxu0 %v1083_v56  ;;  %1122 = vmatpush1.bf16.msra.mxu1 %v1083_v56 }
  0x78   : > { %1086 = vmatprep.subr.bf16.mxu0 %v1085_v57  ;;  %1107 = vmatprep.subr.bf16.mxu1 %v1085_v57  ;;  %v393_v57 = vld [vmem:[#allocation2 + $0x20] sm:$0xff] }
  0x7b   : > { %1088 = vmatpush1.bf16.msra.mxu0 %v1087_v62  ;;  %1123 = vmatpush1.bf16.msra.mxu1 %v1087_v62 }
  0x7c   : > { %1090 = vmatprep.subr.bf16.mxu0 %v1089_v63  ;;  %1108 = vmatprep.subr.bf16.mxu1 %v1089_v63 }
  0x7f   : > { %1092 = vmatpush1.bf16.msra.mxu0 %v1091_v2  ;;  %1124 = vmatpush1.bf16.msra.mxu1 %v1091_v2 }
  0x82   : > { %582 = vmatmul.mubr.f32.vlgmr.msra.gmra.mrb[0].mxu0 %v421_v3  ;;  %630 = vmatmul.mubr.f32.vlgmr.msra.gmra.mrb[0].mxu1 %v437_v4 }
  0x83   : > { %587 = vmatprep.mubr.f32.mxu0 %v424_v5  ;;  %635 = vmatprep.mubr.f32.mxu1 %v440_v6  ;;  %v395_v5 = vld [vmem:[#allocation2 + $0x30] sm:$0xff] }
  0x84   : > { %v411_v6 = vld [vmem:[#allocation2 + $0xb0] sm:$0xff] }
  0x86   : > { %588 = vmatmul.mubr.f32.gmra.mrb[2].mxu0 %v423_v7  ;;  %636 = vmatmul.mubr.f32.gmra.mrb[2].mxu1 %v439_v8  ;;  %v396_v7 = vld [vmem:[#allocation2 + $0x38] sm:$0xff] }
  0x87   : > { %593 = vmatprep.mubr.f32.mxu0 %v426_v9  ;;  %641 = vmatprep.mubr.f32.mxu1 %v442_v10  ;;  %v412_v8 = vld [vmem:[#allocation2 + $0xb8] sm:$0xff] }
  0x8a   : > { %594 = vmatmul.mubr.f32.gmra.mrb[4].mxu0 %v425_v11  ;;  %642 = vmatmul.mubr.f32.gmra.mrb[4].mxu1 %v441_v12 }
  0x8b   : > { %599 = vmatprep.mubr.f32.mxu0 %v428_v13  ;;  %647 = vmatprep.mubr.f32.mxu1 %v444_v14 }
  0x8e   : > { %600 = vmatmul.mubr.f32.gmra.mrb[6].mxu0 %v427_v15  ;;  %648 = vmatmul.mubr.f32.gmra.mrb[6].mxu1 %v443_v16 }
  0x8f   : > { %605 = vmatprep.mubr.f32.mxu0 %v430_v17  ;;  %653 = vmatprep.mubr.f32.mxu1 %v446_v18  ;;  %v397_v17 = vld [vmem:[#allocation2 + $0x40] sm:$0xff] }
  0x90   : > { %v413_v18 = vld [vmem:[#allocation2 + $0xc0] sm:$0xff] }
  0x92   : > { %606 = vmatmul.mubr.f32.gmra.mrb[8].mxu0 %v429_v19  ;;  %654 = vmatmul.mubr.f32.gmra.mrb[8].mxu1 %v445_v20  ;;  %v398_v19 = vld [vmem:[#allocation2 + $0x48] sm:$0xff] }
  0x93   : > { %611 = vmatprep.mubr.f32.mxu0 %v432_v21  ;;  %659 = vmatprep.mubr.f32.mxu1 %v448_v22  ;;  %v414_v20 = vld [vmem:[#allocation2 + $0xc8] sm:$0xff] }
  0x96   : > { %612 = vmatmul.mubr.f32.gmra.mrb[10].mxu0 %v431_v23  ;;  %660 = vmatmul.mubr.f32.gmra.mrb[10].mxu1 %v447_v24 }
  0x97   : > { %617 = vmatprep.mubr.f32.mxu0 %v434_v25  ;;  %665 = vmatprep.mubr.f32.mxu1 %v450_v26 }
  0x9a   : > { %618 = vmatmul.mubr.f32.gmra.mrb[12].mxu0 %v433_v27  ;;  %666 = vmatmul.mubr.f32.gmra.mrb[12].mxu1 %v449_v28 }
  0x9b   : > { %623 = vmatprep.mubr.f32.mxu0 %v436_v29  ;;  %671 = vmatprep.mubr.f32.mxu1 %v452_v30  ;;  %v399_v29 = vld [vmem:[#allocation2 + $0x50] sm:$0xff] }
  0x9c   : > { %v415_v30 = vld [vmem:[#allocation2 + $0xd0] sm:$0xff] }
  0x9e   : > { %624 = vmatmul.mubr.f32.gmra.mrb[14].mxu0 %v435_v31  ;;  %672 = vmatmul.mubr.f32.gmra.mrb[14].mxu1 %v451_v32  ;;  %v400_v31 = vld [vmem:[#allocation2 + $0x58] sm:$0xff] }
  0x9f   : > { %v416_v32 = vld [vmem:[#allocation2 + $0xd8] sm:$0xff] }
 0x155   : > { %v583_v37 = vpop.f32.mrb[0].mxu0  ;;  %v631_v38 = vpop.f32.mrb[0].mxu1 }
 0x156   : > { %v678_v39 = vadd.f32 %v583_v37, %v389_v33  ;;  %v694_v40 = vadd.f32 %v631_v38, %v405_v34  ;;  %v585_v41 = vpop.f32.mrb[1].mxu0  ;;  %v633_v42 = vpop.f32.mrb[1].mxu1 }
 0x157   : > { %v679_v43 = vadd.f32 %v585_v41, %v390_v35  ;;  %v695_v44 = vadd.f32 %v633_v42, %v406_v36  ;;  %v401_v41 = vld [vmem:[#allocation2 + $0x60] sm:$0xff] }
 0x158   : > { %710 = vst [vmem:[#allocation2] sm:$0xff] %v678_v39  ;;  %726 = vst [vmem:[#allocation2 + $0x80] sm:$0xff] %v694_v40  ;;  %v417_v42 = vld [vmem:[#allocation2 + $0xe0] sm:$0xff] }
 0x159   : > { %711 = vst [vmem:[#allocation2 + $0x8] sm:$0xff] %v679_v43  ;;  %727 = vst [vmem:[#allocation2 + $0x88] sm:$0xff] %v695_v44  ;;  %v589_v49 = vpop.f32.mrb[2].mxu0  ;;  %v637_v50 = vpop.f32.mrb[2].mxu1  ;;  %v402_v43 = vld [vmem:[#allocation2 + $0x68] sm:$0xff] }
 0x15a   : > { %v680_v51 = vadd.f32 %v589_v49, %v391_v45  ;;  %v696_v52 = vadd.f32 %v637_v50, %v407_v46  ;;  %v591_v53 = vpop.f32.mrb[3].mxu0  ;;  %v639_v54 = vpop.f32.mrb[3].mxu1  ;;  %v418_v44 = vld [vmem:[#allocation2 + $0xe8] sm:$0xff] }
 0x15b   : > { %v681_v55 = vadd.f32 %v591_v53, %v392_v47  ;;  %v697_v56 = vadd.f32 %v639_v54, %v408_v48  ;;  %v403_v53 = vld [vmem:[#allocation2 + $0x70] sm:$0xff] }
 0x15c   : > { %712 = vst [vmem:[#allocation2 + $0x10] sm:$0xff] %v680_v51  ;;  %728 = vst [vmem:[#allocation2 + $0x90] sm:$0xff] %v696_v52  ;;  %v419_v54 = vld [vmem:[#allocation2 + $0xf0] sm:$0xff] }
 0x15d   : > { %713 = vst [vmem:[#allocation2 + $0x18] sm:$0xff] %v681_v55  ;;  %729 = vst [vmem:[#allocation2 + $0x98] sm:$0xff] %v697_v56  ;;  %v595_v61 = vpop.f32.mrb[4].mxu0  ;;  %v643_v62 = vpop.f32.mrb[4].mxu1  ;;  %v404_v55 = vld [vmem:[#allocation2 + $0x78] sm:$0xff] }
 0x15e   : > { %v682_v63 = vadd.f32 %v595_v61, %v393_v57  ;;  %v698_v0 = vadd.f32 %v643_v62, %v409_v58  ;;  %v597_v1 = vpop.f32.mrb[5].mxu0  ;;  %v645_v2 = vpop.f32.mrb[5].mxu1  ;;  %v420_v56 = vld [vmem:[#allocation2 + $0xf8] sm:$0xff] }
 0x15f   : > { %v683_v3 = vadd.f32 %v597_v1, %v394_v59  ;;  %v699_v4 = vadd.f32 %v645_v2, %v410_v60  ;;  %v780_v1 = vlaneseq (!%p1022_p11) }
 0x160   : > { %714 = vst [vmem:[#allocation2 + $0x20] sm:$0xff] %v682_v63  ;;  %730 = vst [vmem:[#allocation2 + $0xa0] sm:$0xff] %v698_v0 }
 0x161   : > { %715 = vst [vmem:[#allocation2 + $0x28] sm:$0xff] %v683_v3  ;;  %731 = vst [vmem:[#allocation2 + $0xa8] sm:$0xff] %v699_v4  ;;  %v601_v9 = vpop.f32.mrb[6].mxu0  ;;  %v649_v10 = vpop.f32.mrb[6].mxu1  ;;  %v781_v2 = vshrl.u32 (!%p1022_p11), %v780_v1, 7  ;;  %v746_v4 = vld [vmem:[#allocation2] sm:$0xff] (!%p1022_p11) }
 0x162   : > { %v684_v11 = vadd.f32 %v601_v9, %v395_v5  ;;  %v700_v12 = vadd.f32 %v649_v10, %v411_v6  ;;  %v603_v13 = vpop.f32.mrb[7].mxu0  ;;  %v651_v14 = vpop.f32.mrb[7].mxu1  ;;  %v778_v3 = vld [vmem:[%s1599_s2] sm:$0x3] (!%p1022_p11)  ;;  %v747_v6 = vld [vmem:[#allocation2 + $0x8] sm:$0xff] (!%p1022_p11) }
 0x163   : > { %v685_v15 = vadd.f32 %v603_v13, %v396_v7  ;;  %v701_v16 = vadd.f32 %v651_v14, %v412_v8  ;;  %v782_v5 = vsub.s32 (!%p1022_p11), 0, %v781_v2  ;;  %v786_v7 = vsub.s32 (!%p1022_p11), 1, %v781_v2  ;;  %v748_v8 = vld [vmem:[#allocation2 + $0x10] sm:$0xff] (!%p1022_p11) }
 0x164   : > { %716 = vst [vmem:[#allocation2 + $0x30] sm:$0xff] %v684_v11  ;;  %732 = vst [vmem:[#allocation2 + $0xb0] sm:$0xff] %v700_v12  ;;  %v749_v9 = vld [vmem:[#allocation2 + $0x18] sm:$0xff] (!%p1022_p11) }
 0x165   : > { %717 = vst [vmem:[#allocation2 + $0x38] sm:$0xff] %v685_v15  ;;  %733 = vst [vmem:[#allocation2 + $0xb8] sm:$0xff] %v701_v16  ;;  %v607_v21 = vpop.f32.mrb[8].mxu0  ;;  %v655_v22 = vpop.f32.mrb[8].mxu1  ;;  %v1450_v11 = vrot.slane (!%p1022_p11), %v778_v3, %v782_v5  ;;  %v1452_v12 = vrot.slane (!%p1022_p11), %v778_v3, %v786_v7 }
 0x166   : > { %v686_v23 = vadd.f32 %v607_v21, %v397_v17  ;;  %v702_v24 = vadd.f32 %v655_v22, %v413_v18  ;;  %v609_v25 = vpop.f32.mrb[9].mxu0  ;;  %v657_v26 = vpop.f32.mrb[9].mxu1 }
 0x167   : > { %v687_v27 = vadd.f32 %v609_v25, %v398_v19  ;;  %v703_v28 = vadd.f32 %v657_v26, %v414_v20  ;;  %v750_v10 = vld [vmem:[#allocation2 + $0x20] sm:$0xff] (!%p1022_p11)  ;;  %v790_v16 = vadd.f32 (!%p1022_p11), %v1450_v11, %v746_v4  ;;  %v791_v17 = vadd.f32 (!%p1022_p11), %v1452_v12, %v747_v6 }
 0x168   : > { %718 = vst [vmem:[#allocation2 + $0x40] sm:$0xff] %v686_v23  ;;  %734 = vst [vmem:[#allocation2 + $0xc0] sm:$0xff] %v702_v24  ;;  %v751_v13 = vld [vmem:[#allocation2 + $0x28] sm:$0xff] (!%p1022_p11)  ;;  %v792_v18 = vadd.f32 (!%p1022_p11), %v1450_v11, %v748_v8  ;;  %v793_v19 = vadd.f32 (!%p1022_p11), %v1452_v12, %v749_v9  ;;  %v794_v23 = vadd.f32 (!%p1022_p11), %v1450_v11, %v750_v10 }
 0x169   : > { %719 = vst [vmem:[#allocation2 + $0x48] sm:$0xff] %v687_v27  ;;  %735 = vst [vmem:[#allocation2 + $0xc8] sm:$0xff] %v703_v28  ;;  %v613_v33 = vpop.f32.mrb[10].mxu0  ;;  %v661_v34 = vpop.f32.mrb[10].mxu1  ;;  %v795_v24 = vadd.f32 (!%p1022_p11), %v1452_v12, %v751_v13 }
 0x16a   : > { %v688_v35 = vadd.f32 %v613_v33, %v399_v29  ;;  %v704_v36 = vadd.f32 %v661_v34, %v415_v30  ;;  %v615_v37 = vpop.f32.mrb[11].mxu0  ;;  %v663_v38 = vpop.f32.mrb[11].mxu1  ;;  %v822_v30 = vmax.f32 (!%p1022_p11), %v790_v16, 0.0  ;;  %v825_v33 = vmax.f32 (!%p1022_p11), %v793_v19, 0.0 }
 0x16b   : > { %v689_v39 = vadd.f32 %v615_v37, %v400_v31  ;;  %v705_v40 = vadd.f32 %v663_v38, %v416_v32  ;;  %v752_v14 = vld [vmem:[#allocation2 + $0x30] sm:$0xff] (!%p1022_p11)  ;;  %v823_v31 = vmax.f32 (!%p1022_p11), %v791_v17, 0.0  ;;  %v824_v32 = vmax.f32 (!%p1022_p11), %v792_v18, 0.0 }
 0x16c   : > { %720 = vst [vmem:[#allocation2 + $0x50] sm:$0xff] %v688_v35  ;;  %736 = vst [vmem:[#allocation2 + $0xd0] sm:$0xff] %v704_v36  ;;  %v753_v15 = vld [vmem:[#allocation2 + $0x38] sm:$0xff] (!%p1022_p11)  ;;  %v796_v25 = vadd.f32 (!%p1022_p11), %v1450_v11, %v752_v14  ;;  %v826_v36 = vmax.f32 (!%p1022_p11), %v794_v23, 0.0  ;;  %v827_v37 = vmax.f32 (!%p1022_p11), %v795_v24, 0.0 }
 0x16d   : > { %721 = vst [vmem:[#allocation2 + $0x58] sm:$0xff] %v689_v39  ;;  %737 = vst [vmem:[#allocation2 + $0xd8] sm:$0xff] %v705_v40  ;;  %v619_v45 = vpop.f32.mrb[12].mxu0  ;;  %v667_v46 = vpop.f32.mrb[12].mxu1  ;;  %v797_v26 = vadd.f32 (!%p1022_p11), %v1452_v12, %v753_v15 }
 0x16e   : > { %v690_v47 = vadd.f32 %v619_v45, %v401_v41  ;;  %v706_v48 = vadd.f32 %v667_v46, %v417_v42  ;;  %v621_v49 = vpop.f32.mrb[13].mxu0  ;;  %v669_v50 = vpop.f32.mrb[13].mxu1  ;;  %v828_v38 = vmax.f32 (!%p1022_p11), %v796_v25, 0.0  ;;  %854 = vst [vmem:[%s1600_s3] sm:$0xff] (!%p1022_p11), %v822_v30  ;;  %855 = vst [vmem:[%s1600_s3 + $0x8] sm:$0xff] (!%p1022_p11), %v823_v31  ;;  %v763_v45 = vld [vmem:[#allocation2 + $0x88] sm:$0xff] (!%p1022_p11)  ;;  %v764_v46 = vld [vmem:[#allocation2 + $0x90] sm:$0xff] (!%p1022_p11) }
 0x16f   : > { %v691_v51 = vadd.f32 %v621_v49, %v402_v43  ;;  %v707_v52 = vadd.f32 %v669_v50, %v418_v44  ;;  %745 = sbr.rel (%p1022_p11) target bundleno = 387 (0x183), region = 63  ;;  %v754_v20 = vld [vmem:[#allocation2 + $0x40] sm:$0xff] (!%p1022_p11)  ;;  %v829_v39 = vmax.f32 (!%p1022_p11), %v797_v26, 0.0  ;;  %856 = vst [vmem:[%s1600_s3 + $0x10] sm:$0xff] (!%p1022_p11), %v824_v32  ;;  %857 = vst [vmem:[%s1600_s3 + $0x18] sm:$0xff] (!%p1022_p11), %v825_v33  ;;  %v807_v1 = vadd.f32 (!%p1022_p11), %v1452_v12, %v763_v45 }
 0x170   : > { %722 = vst [vmem:[#allocation2 + $0x60] sm:$0xff] %v690_v47  ;;  %738 = vst [vmem:[#allocation2 + $0xe0] sm:$0xff] %v706_v48  ;;  %v755_v21 = vld [vmem:[#allocation2 + $0x48] sm:$0xff] (!%p1022_p11)  ;;  %v798_v40 = vadd.f32 (!%p1022_p11), %v1450_v11, %v754_v20  ;;  %v762_v44 = vld [vmem:[#allocation2 + $0x80] sm:$0xff] (!%p1022_p11)  ;;  %v808_v2 = vadd.f32 (!%p1022_p11), %v1450_v11, %v764_v46 }
 0x171   : > { %723 = vst [vmem:[#allocation2 + $0x68] sm:$0xff] %v691_v51  ;;  %739 = vst [vmem:[#allocation2 + $0xe8] sm:$0xff] %v707_v52  ;;  %v625_v57 = vpop.f32.mrb[14].mxu0  ;;  %v673_v58 = vpop.f32.mrb[14].mxu1  ;;  %v799_v41 = vadd.f32 (!%p1022_p11), %v1452_v12, %v755_v21  ;;  %v765_v51 = vld [vmem:[#allocation2 + $0x98] sm:$0xff] (!%p1022_p11)  ;;  %v766_v52 = vld [vmem:[#allocation2 + $0xa0] sm:$0xff] (!%p1022_p11) }
 0x172   : > { %v692_v59 = vadd.f32 %v625_v57, %v403_v53  ;;  %v708_v60 = vadd.f32 %v673_v58, %v419_v54  ;;  %v627_v61 = vpop.f32.mrb[15].mxu0  ;;  %v675_v62 = vpop.f32.mrb[15].mxu1  ;;  %858 = vst [vmem:[%s1600_s3 + $0x20] sm:$0xff] (!%p1022_p11), %v826_v36  ;;  %859 = vst [vmem:[%s1600_s3 + $0x28] sm:$0xff] (!%p1022_p11), %v827_v37  ;;  %v767_v53 = vld [vmem:[#allocation2 + $0xa8] sm:$0xff] (!%p1022_p11)  ;;  %v830_v54 = vmax.f32 (!%p1022_p11), %v798_v40, 0.0  ;;  %v809_v3 = vadd.f32 (!%p1022_p11), %v1452_v12, %v765_v51 }
 0x173   : > { %v693_v63 = vadd.f32 %v627_v61, %v404_v55  ;;  %v709_v0 = vadd.f32 %v675_v62, %v420_v56  ;;  %v756_v22 = vld [vmem:[#allocation2 + $0x50] sm:$0xff] (!%p1022_p11)  ;;  %860 = vst [vmem:[%s1600_s3 + $0x30] sm:$0xff] (!%p1022_p11), %v828_v38  ;;  %861 = vst [vmem:[%s1600_s3 + $0x38] sm:$0xff] (!%p1022_p11), %v829_v39  ;;  %v831_v55 = vmax.f32 (!%p1022_p11), %v799_v41, 0.0  ;;  %v770_v4 = vld [vmem:[#allocation2 + $0xc0] sm:$0xff] (!%p1022_p11)  ;;  %v810_v7 = vadd.f32 (!%p1022_p11), %v1450_v11, %v766_v52 }
 0x174   : > { %724 = vst [vmem:[#allocation2 + $0x70] sm:$0xff] %v692_v59  ;;  %740 = vst [vmem:[#allocation2 + $0xf0] sm:$0xff] %v708_v60  ;;  %v757_v27 = vld [vmem:[#allocation2 + $0x58] sm:$0xff] (!%p1022_p11)  ;;  %v800_v42 = vadd.f32 (!%p1022_p11), %v1450_v11, %v756_v22  ;;  %v768_v58 = vld [vmem:[#allocation2 + $0xb0] sm:$0xff] (!%p1022_p11)  ;;  %v811_v8 = vadd.f32 (!%p1022_p11), %v1452_v12, %v767_v53  ;;  %v839_v17 = vmax.f32 (!%p1022_p11), %v807_v1, 0.0  ;;  %v840_v18 = vmax.f32 (!%p1022_p11), %v808_v2, 0.0 }
 0x175   : > { %725 = vst [vmem:[#allocation2 + $0x78] sm:$0xff] %v693_v63  ;;  %741 = vst [vmem:[#allocation2 + $0xf8] sm:$0xff] %v709_v0  ;;  %v801_v43 = vadd.f32 (!%p1022_p11), %v1452_v12, %v757_v27  ;;  %v769_v59 = vld [vmem:[#allocation2 + $0xb8] sm:$0xff] (!%p1022_p11)  ;;  %v806_v0 = vadd.f32 (!%p1022_p11), %v1450_v11, %v762_v44  ;;  %v771_v5 = vld [vmem:[#allocation2 + $0xc8] sm:$0xff] (!%p1022_p11)  ;;  %v812_v9 = vadd.f32 (!%p1022_p11), %v1450_v11, %v768_v58  ;;  %v841_v19 = vmax.f32 (!%p1022_p11), %v809_v3, 0.0 }
 0x176   : > { %v832_v56 = vmax.f32 %v800_v42, 0.0  ;;  %862 = vst [vmem:[%s1600_s3 + $0x40] sm:$0xff] %v830_v54  ;;  %863 = vst [vmem:[%s1600_s3 + $0x48] sm:$0xff] %v831_v55  ;;  %v772_v6 = vld [vmem:[#allocation2 + $0xd0] sm:$0xff]  ;;  %v813_v10 = vadd.f32 %v1452_v12, %v769_v59  ;;  %v773_v13 = vld [vmem:[#allocation2 + $0xd8] sm:$0xff]  ;;  %v842_v22 = vmax.f32 %v810_v7, 0.0  ;;  %v814_v26 = vadd.f32 %v1450_v11, %v770_v4 }
 0x177   : > { %v758_v28 = vld [vmem:[#allocation2 + $0x60] sm:$0xff]  ;;  %v833_v57 = vmax.f32 %v801_v43, 0.0  ;;  %v838_v16 = vmax.f32 %v806_v0, 0.0  ;;  %v843_v23 = vmax.f32 %v811_v8, 0.0  ;;  %v844_v24 = vmax.f32 %v812_v9, 0.0  ;;  %871 = vst [vmem:[%s1600_s3 + $0x88] sm:$0xff] %v839_v17 }
 0x178   : > { %v759_v29 = vld [vmem:[#allocation2 + $0x68] sm:$0xff]  ;;  %v802_v47 = vadd.f32 %v1450_v11, %v758_v28  ;;  %864 = vst [vmem:[%s1600_s3 + $0x50] sm:$0xff] %v832_v56  ;;  %v774_v14 = vld [vmem:[#allocation2 + $0xe0] sm:$0xff]  ;;  %v845_v25 = vmax.f32 %v813_v10, 0.0  ;;  %872 = vst [vmem:[%s1600_s3 + $0x90] sm:$0xff] %v840_v18  ;;  %v815_v27 = vadd.f32 %v1452_v12, %v771_v5  ;;  %v816_v28 = vadd.f32 %v1450_v11, %v772_v6 }
 0x179   : > { %v803_v48 = vadd.f32 %v1452_v12, %v759_v29  ;;  %865 = vst [vmem:[%s1600_s3 + $0x58] sm:$0xff] %v833_v57  ;;  %v775_v15 = vld [vmem:[#allocation2 + $0xe8] sm:$0xff]  ;;  %870 = vst [vmem:[%s1600_s3 + $0x80] sm:$0xff] %v838_v16  ;;  %v817_v29 = vadd.f32 %v1452_v12, %v773_v13  ;;  %v818_v30 = vadd.f32 %v1450_v11, %v774_v14 }
 0x17a   : > { %v834_v60 = vmax.f32 %v802_v47, 0.0  ;;  %873 = vst [vmem:[%s1600_s3 + $0x98] sm:$0xff] %v841_v19  ;;  %874 = vst [vmem:[%s1600_s3 + $0xa0] sm:$0xff] %v842_v22  ;;  %v819_v31 = vadd.f32 %v1452_v12, %v775_v15  ;;  %v848_v36 = vmax.f32 %v816_v28, 0.0 }
 0x17b   : > { %v760_v34 = vld [vmem:[#allocation2 + $0x70] sm:$0xff]  ;;  %v835_v61 = vmax.f32 %v803_v48, 0.0  ;;  %875 = vst [vmem:[%s1600_s3 + $0xa8] sm:$0xff] %v843_v23  ;;  %876 = vst [vmem:[%s1600_s3 + $0xb0] sm:$0xff] %v844_v24  ;;  %v849_v37 = vmax.f32 %v817_v29, 0.0  ;;  %v850_v38 = vmax.f32 %v818_v30, 0.0 }
 0x17c   : > { %v761_v35 = vld [vmem:[#allocation2 + $0x78] sm:$0xff]  ;;  %v804_v49 = vadd.f32 %v1450_v11, %v760_v34  ;;  %866 = vst [vmem:[%s1600_s3 + $0x60] sm:$0xff] %v834_v60  ;;  %v776_v20 = vld [vmem:[#allocation2 + $0xf0] sm:$0xff]  ;;  %877 = vst [vmem:[%s1600_s3 + $0xb8] sm:$0xff] %v845_v25  ;;  %v846_v34 = vmax.f32 %v814_v26, 0.0  ;;  %v851_v39 = vmax.f32 %v819_v31, 0.0 }
 0x17d   : > { %v805_v50 = vadd.f32 %v1452_v12, %v761_v35  ;;  %867 = vst [vmem:[%s1600_s3 + $0x68] sm:$0xff] %v835_v61  ;;  %v777_v21 = vld [vmem:[#allocation2 + $0xf8] sm:$0xff]  ;;  %v820_v32 = vadd.f32 %v1450_v11, %v776_v20  ;;  %v847_v35 = vmax.f32 %v815_v27, 0.0  ;;  %880 = vst [vmem:[%s1600_s3 + $0xd0] sm:$0xff] %v848_v36 }
 0x17e   : > { %v836_v62 = vmax.f32 %v804_v49, 0.0  ;;  %v821_v33 = vadd.f32 %v1452_v12, %v777_v21  ;;  %878 = vst [vmem:[%s1600_s3 + $0xc0] sm:$0xff] %v846_v34  ;;  %881 = vst [vmem:[%s1600_s3 + $0xd8] sm:$0xff] %v849_v37 }
 0x17f   : > { %v837_v63 = vmax.f32 %v805_v50, 0.0  ;;  %v852_v40 = vmax.f32 %v820_v32, 0.0  ;;  %879 = vst [vmem:[%s1600_s3 + $0xc8] sm:$0xff] %v847_v35  ;;  %882 = vst [vmem:[%s1600_s3 + $0xe0] sm:$0xff] %v850_v38 }
 0x180   : > { %868 = vst [vmem:[%s1600_s3 + $0x70] sm:$0xff] %v836_v62  ;;  %v853_v41 = vmax.f32 %v821_v33, 0.0  ;;  %883 = vst [vmem:[%s1600_s3 + $0xe8] sm:$0xff] %v851_v39 }
 0x181   : > { %869 = vst [vmem:[%s1600_s3 + $0x78] sm:$0xff] %v837_v63  ;;  %884 = vst [vmem:[%s1600_s3 + $0xf0] sm:$0xff] %v852_v40 }
 0x182   : > { %885 = vst [vmem:[%s1600_s3 + $0xf8] sm:$0xff] %v853_v41 }
 0x183 PF: > { %s13_s16 = sadd.s32 1, %s1204_s16   ;;  %s1601_s12 = smov %s1192_s13 }
 0x184   : > { %p10_p12 = scmp.ge.s32.totalorder %s13_s16, 7   ;;  %s1602_s13 = smov %s1262_s20 }
 0x185   : > { %s1603_s14 = smov %s1200_s15  ;;  %s1604_s15 = smov %s1606_s17 }
 0x186   :  { %12 = sbr.rel (!%p10_p12) target bundleno = 3 (0x3), region = 104 }

// kernel: _pallas_forward.32
= control target key start
LH: loop header
LB: loop body
LE: loop exit
PB: predicated region body
PF: predicated region fallthrough
CT: control target
= control target key end

     0   :  { %s230_s0 = inlined_call_operand.vmem [shape: f32[8,1024], index: 0, kind: input, shape index: {}]   ;;  %s231_s1 = inlined_call_operand.vmem [shape: f32[8,1024], index: 1, kind: input, shape index: {}]   ;;  %s232_s2 = inlined_call_operand.vmem [shape: f32[8,1024], index: 2, kind: input, shape index: {}]   ;;  %s233_s3 = inlined_call_operand.vmem [shape: f32[8,1024], index: 3, kind: input, shape index: {}]   ;;  %s234_s4 = inlined_call_operand.vmem [shape: f32[8,1024], index: 4, kind: output, shape index: {}]  }
   0x1   :  { %v17_v0 = vld [vmem:[%s230_s0] sm:$0xff]  ;;  %v18_v5 = vld [vmem:[%s230_s0 + $0x8] sm:$0xff]  ;;  %v19_v11 = vld [vmem:[%s230_s0 + $0x10] sm:$0xff] }
   0x2   :  { %v25_v1 = vld [vmem:[%s231_s1] sm:$0xff]  ;;  %v26_v6 = vld [vmem:[%s231_s1 + $0x8] sm:$0xff]  ;;  %v27_v13 = vld [vmem:[%s231_s1 + $0x10] sm:$0xff] }
   0x3   :  { %v41_v2 = vld [vmem:[%s232_s2] sm:$0xff]  ;;  %v33_v3 = vmax.f32 %v17_v0, %v25_v1  ;;  %v34_v8 = vmax.f32 %v18_v5, %v26_v6  ;;  %v42_v9 = vld [vmem:[%s232_s2 + $0x8] sm:$0xff]  ;;  %v43_v14 = vld [vmem:[%s232_s2 + $0x10] sm:$0xff]  ;;  %v35_v17 = vmax.f32 %v19_v11, %v27_v13 }
   0x4   :  { %v49_v4 = vld [vmem:[%s233_s3] sm:$0xff]  ;;  %v50_v10 = vld [vmem:[%s233_s3 + $0x8] sm:$0xff]  ;;  %v51_v15 = vld [vmem:[%s233_s3 + $0x10] sm:$0xff] }
   0x5   :  { %v57_v7 = vmax.f32 %v41_v2, %v49_v4  ;;  %v58_v12 = vmax.f32 %v42_v9, %v50_v10  ;;  %v59_v18 = vmax.f32 %v43_v14, %v51_v15  ;;  %v20_v19 = vld [vmem:[%s230_s0 + $0x18] sm:$0xff]  ;;  %v21_v25 = vld [vmem:[%s230_s0 + $0x20] sm:$0xff]  ;;  %v22_v32 = vld [vmem:[%s230_s0 + $0x28] sm:$0xff] }
   0x6   :  { %v28_v20 = vld [vmem:[%s231_s1 + $0x18] sm:$0xff]  ;;  %v29_v26 = vld [vmem:[%s231_s1 + $0x20] sm:$0xff]  ;;  %v30_v34 = vld [vmem:[%s231_s1 + $0x28] sm:$0xff] }
   0x7   :  { %v65_v16 = vmax.f32 %v33_v3, %v57_v7  ;;  %v44_v21 = vld [vmem:[%s232_s2 + $0x18] sm:$0xff]  ;;  %v66_v22 = vmax.f32 %v34_v8, %v58_v12  ;;  %v36_v23 = vmax.f32 %v20_v19, %v28_v20  ;;  %v67_v27 = vmax.f32 %v35_v17, %v59_v18  ;;  %v45_v30 = vld [vmem:[%s232_s2 + $0x20] sm:$0xff]  ;;  %v46_v35 = vld [vmem:[%s232_s2 + $0x28] sm:$0xff] }
   0x8   :  { %v52_v24 = vld [vmem:[%s233_s3 + $0x18] sm:$0xff]  ;;  %v37_v29 = vmax.f32 %v21_v25, %v29_v26  ;;  %v53_v31 = vld [vmem:[%s233_s3 + $0x20] sm:$0xff]  ;;  %v54_v36 = vld [vmem:[%s233_s3 + $0x28] sm:$0xff]  ;;  %v38_v38 = vmax.f32 %v22_v32, %v30_v34 }
   0x9   :  { %73 = vst [vmem:[%s234_s4] sm:$0xff] %v65_v16  ;;  %v60_v28 = vmax.f32 %v44_v21, %v52_v24  ;;  %74 = vst [vmem:[%s234_s4 + $0x8] sm:$0xff] %v66_v22  ;;  %v61_v33 = vmax.f32 %v45_v30, %v53_v31  ;;  %v62_v39 = vmax.f32 %v46_v35, %v54_v36  ;;  %v23_v40 = vld [vmem:[%s230_s0 + $0x30] sm:$0xff]  ;;  %v24_v46 = vld [vmem:[%s230_s0 + $0x38] sm:$0xff] }
   0xa   :  { %75 = vst [vmem:[%s234_s4 + $0x10] sm:$0xff] %v67_v27  ;;  %v31_v41 = vld [vmem:[%s231_s1 + $0x30] sm:$0xff]  ;;  %v32_v47 = vld [vmem:[%s231_s1 + $0x38] sm:$0xff] }
   0xb   :  { %v68_v37 = vmax.f32 %v36_v23, %v60_v28  ;;  %v47_v42 = vld [vmem:[%s232_s2 + $0x30] sm:$0xff]  ;;  %v69_v43 = vmax.f32 %v37_v29, %v61_v33  ;;  %v39_v44 = vmax.f32 %v23_v40, %v31_v41  ;;  %v70_v48 = vmax.f32 %v38_v38, %v62_v39  ;;  %v48_v51 = vld [vmem:[%s232_s2 + $0x38] sm:$0xff] }
   0xc   :  { %v55_v45 = vld [vmem:[%s233_s3 + $0x30] sm:$0xff]  ;;  %v40_v50 = vmax.f32 %v24_v46, %v32_v47  ;;  %v56_v52 = vld [vmem:[%s233_s3 + $0x38] sm:$0xff] }
   0xd   :  { %76 = vst [vmem:[%s234_s4 + $0x18] sm:$0xff] %v68_v37  ;;  %v63_v49 = vmax.f32 %v47_v42, %v55_v45  ;;  %77 = vst [vmem:[%s234_s4 + $0x20] sm:$0xff] %v69_v43  ;;  %v64_v53 = vmax.f32 %v48_v51, %v56_v52 }
   0xe   :  { %78 = vst [vmem:[%s234_s4 + $0x28] sm:$0xff] %v70_v48 }
   0xf   :  { %v71_v54 = vmax.f32 %v39_v44, %v63_v49  ;;  %v72_v55 = vmax.f32 %v40_v50, %v64_v53 }
  0x11   :  { %79 = vst [vmem:[%s234_s4 + $0x30] sm:$0xff] %v71_v54  ;;  %80 = vst [vmem:[%s234_s4 + $0x38] sm:$0xff] %v72_v55 }

// kernel: _pallas_forward.29
= control target key start
LH: loop header
LB: loop body
LE: loop exit
PB: predicated region body
PF: predicated region fallthrough
CT: control target
= control target key end

     0   :  { %s1227_s12 = smov 0   ;;  %s1229_s13 = smov 0   ;;  %s1597_s0 = inlined_call_operand.vmem [shape: f32[128,2304], index: 0, kind: input, shape index: {}]   ;;  %s1598_s1 = inlined_call_operand.vmem [shape: f32[2304,256], index: 1, kind: input, shape index: {}]   ;;  %s1599_s2 = inlined_call_operand.vmem [shape: f32[1,256], index: 2, kind: input, shape index: {}]   ;;  %s1600_s3 = inlined_call_operand.vmem [shape: f32[128,256], index: 3, kind: output, shape index: {}]  }
   0x1   :  { %s1231_s14 = smov 0   ;;  %s1233_s15 = smov 0  }
   0x2   :  { %s1235_s16 = smov 0  }
   0x3 LB: > { %s25_s17 = sadd.s32 1, %s1200_s15  ;;  %p48_p1 = scmp.ne.s32.totalorder %s1192_s13, %s1188_s12  ;;  %s1204_s16 = sphi %s1235_s16, %s13_s16   ;;  %s1200_s15 = sphi %s1233_s15, %s1604_s15   ;;  %s1196_s14 = sphi %s1231_s14, %s1603_s14   ;;  %s1192_s13 = sphi %s1229_s13, %s1602_s13   ;;  %s1188_s12 = sphi %s1227_s12, %s1601_s12  }
   0x4   : > { %p26_p0 = scmp.ge.s32.totalorder %s25_s17, 9  ;;  %p49_p2 = scmp.eq.s32.totalorder %s1204_s16, 0 }
   0x5   : > { %s41_s19 = sadd.s32 1, %s1192_s13  ;;  %p1012_p5 = scmp.ge.s32.totalorder %s1204_s16, 9 }
   0x6   : > { %s1606_s17 = smov (%p26_p0, %s25_s17), 0  ;;  %p50_p3 = por %p49_p2, %p48_p1 }
   0x7   : > { %s37_s18 = ssub.s32 %s1200_s15, %s1606_s17  ;;  %164 = sbr.rel (%p1012_p5) target bundleno = 34 (0x22), region = 20 }
   0x8   : > { %p39_p4 = scmp.eq.s32.totalorder %s37_s18, 0 }
   0xa   : > { %s1262_s20 = scalar_select %p39_p4, %s1192_s13, %s41_s19  }
   0xe   : > { %167 = sbr.rel (!%p50_p3) target bundleno = 34 (0x22), region = 24  ;;  %s169_s21 = sand.u32 (%p50_p3), 1, %s1192_s13  }
   0xf   : > { %s1027_s22 = sshll.u32 (%p50_p3), %s1200_s15, 4  ;;  %s1013_s23 = sshll.u32 (%p50_p3), %s169_s21, 8 }
  0x10   : > { %s1270_s26 = scalar_lea.vmem (%p50_p3), %s1597_s0, %s1027_s22  ;;  %s1275_s27 = scalar_lea.vmem (%p50_p3), [#allocation3], %s1013_s23 }
  0x11   : > { %v190_v0 = vld [vmem:[%s1270_s26] sm:$0xff] (%p50_p3)  ;;  %v192_v1 = vld [vmem:[%s1270_s26 + $0x8] sm:$0xff] (%p50_p3)  ;;  %v194_v2 = vld [vmem:[%s1270_s26 + $0x90] sm:$0xff] (%p50_p3) }
  0x12   : > { %191 = vst [vmem:[%s1275_s27] sm:$0xff] (%p50_p3), %v190_v0  ;;  %193 = vst [vmem:[%s1275_s27 + $0x8] sm:$0xff] (%p50_p3), %v192_v1  ;;  %v196_v3 = vld [vmem:[%s1270_s26 + $0x98] sm:$0xff] (%p50_p3)  ;;  %v198_v4 = vld [vmem:[%s1270_s26 + $0x120] sm:$0xff] (%p50_p3) }
  0x13   : > { %195 = vst [vmem:[%s1275_s27 + $0x10] sm:$0xff] (%p50_p3), %v194_v2  ;;  %v200_v5 = vld [vmem:[%s1270_s26 + $0x128] sm:$0xff] (%p50_p3)  ;;  %197 = vst [vmem:[%s1275_s27 + $0x18] sm:$0xff] (%p50_p3), %v196_v3  ;;  %v202_v6 = vld [vmem:[%s1270_s26 + $0x1b0] sm:$0xff] (%p50_p3) }
  0x14   : > { %199 = vst [vmem:[%s1275_s27 + $0x20] sm:$0xff] (%p50_p3), %v198_v4  ;;  %201 = vst [vmem:[%s1275_s27 + $0x28] sm:$0xff] (%p50_p3), %v200_v5  ;;  %v204_v7 = vld [vmem:[%s1270_s26 + $0x1b8] sm:$0xff] (%p50_p3)  ;;  %v206_v8 = vld [vmem:[%s1270_s26 + $0x240] sm:$0xff] (%p50_p3) }
  0x15   : > { %203 = vst [vmem:[%s1275_s27 + $0x30] sm:$0xff] %v202_v6  ;;  %205 = vst [vmem:[%s1275_s27 + $0x38] sm:$0xff] %v204_v7  ;;  %v208_v9 = vld [vmem:[%s1270_s26 + $0x248] sm:$0xff]  ;;  %v210_v10 = vld [vmem:[%s1270_s26 + $0x2d0] sm:$0xff] }
  0x16   : > { %207 = vst [vmem:[%s1275_s27 + $0x40] sm:$0xff] %v206_v8  ;;  %v212_v11 = vld [vmem:[%s1270_s26 + $0x2d8] sm:$0xff]  ;;  %209 = vst [vmem:[%s1275_s27 + $0x48] sm:$0xff] %v208_v9  ;;  %v214_v12 = vld [vmem:[%s1270_s26 + $0x360] sm:$0xff] }
  0x17   : > { %211 = vst [vmem:[%s1275_s27 + $0x50] sm:$0xff] %v210_v10  ;;  %213 = vst [vmem:[%s1275_s27 + $0x58] sm:$0xff] %v212_v11  ;;  %v216_v13 = vld [vmem:[%s1270_s26 + $0x368] sm:$0xff]  ;;  %v218_v14 = vld [vmem:[%s1270_s26 + $0x3f0] sm:$0xff] }
  0x18   : > { %215 = vst [vmem:[%s1275_s27 + $0x60] sm:$0xff] %v214_v12  ;;  %217 = vst [vmem:[%s1275_s27 + $0x68] sm:$0xff] %v216_v13  ;;  %v220_v15 = vld [vmem:[%s1270_s26 + $0x3f8] sm:$0xff]  ;;  %v222_v16 = vld [vmem:[%s1270_s26 + $0x480] sm:$0xff] }
  0x19   : > { %219 = vst [vmem:[%s1275_s27 + $0x70] sm:$0xff] %v218_v14  ;;  %v224_v17 = vld [vmem:[%s1270_s26 + $0x488] sm:$0xff]  ;;  %221 = vst [vmem:[%s1275_s27 + $0x78] sm:$0xff] %v220_v15  ;;  %v226_v18 = vld [vmem:[%s1270_s26 + $0x510] sm:$0xff] }
  0x1a   : > { %223 = vst [vmem:[%s1275_s27 + $0x80] sm:$0xff] %v222_v16  ;;  %225 = vst [vmem:[%s1275_s27 + $0x88] sm:$0xff] %v224_v17  ;;  %v228_v19 = vld [vmem:[%s1270_s26 + $0x518] sm:$0xff]  ;;  %v230_v20 = vld [vmem:[%s1270_s26 + $0x5a0] sm:$0xff] }
  0x1b   : > { %227 = vst [vmem:[%s1275_s27 + $0x90] sm:$0xff] %v226_v18  ;;  %229 = vst [vmem:[%s1275_s27 + $0x98] sm:$0xff] %v228_v19  ;;  %v232_v21 = vld [vmem:[%s1270_s26 + $0x5a8] sm:$0xff]  ;;  %v234_v22 = vld [vmem:[%s1270_s26 + $0x630] sm:$0xff] }
  0x1c   : > { %231 = vst [vmem:[%s1275_s27 + $0xa0] sm:$0xff] %v230_v20  ;;  %v236_v23 = vld [vmem:[%s1270_s26 + $0x638] sm:$0xff]  ;;  %233 = vst [vmem:[%s1275_s27 + $0xa8] sm:$0xff] %v232_v21  ;;  %v238_v24 = vld [vmem:[%s1270_s26 + $0x6c0] sm:$0xff] }
  0x1d   : > { %235 = vst [vmem:[%s1275_s27 + $0xb0] sm:$0xff] %v234_v22  ;;  %237 = vst [vmem:[%s1275_s27 + $0xb8] sm:$0xff] %v236_v23  ;;  %v240_v25 = vld [vmem:[%s1270_s26 + $0x6c8] sm:$0xff]  ;;  %v242_v26 = vld [vmem:[%s1270_s26 + $0x750] sm:$0xff] }
  0x1e   : > { %239 = vst [vmem:[%s1275_s27 + $0xc0] sm:$0xff] %v238_v24  ;;  %241 = vst [vmem:[%s1275_s27 + $0xc8] sm:$0xff] %v240_v25  ;;  %v244_v27 = vld [vmem:[%s1270_s26 + $0x758] sm:$0xff]  ;;  %v246_v28 = vld [vmem:[%s1270_s26 + $0x7e0] sm:$0xff] }
  0x1f   : > { %243 = vst [vmem:[%s1275_s27 + $0xd0] sm:$0xff] %v242_v26  ;;  %v248_v29 = vld [vmem:[%s1270_s26 + $0x7e8] sm:$0xff]  ;;  %245 = vst [vmem:[%s1275_s27 + $0xd8] sm:$0xff] %v244_v27  ;;  %v250_v30 = vld [vmem:[%s1270_s26 + $0x870] sm:$0xff] }
  0x20   : > { %247 = vst [vmem:[%s1275_s27 + $0xe0] sm:$0xff] %v246_v28  ;;  %249 = vst [vmem:[%s1275_s27 + $0xe8] sm:$0xff] %v248_v29  ;;  %v252_v31 = vld [vmem:[%s1270_s26 + $0x878] sm:$0xff] }
  0x21   : > { %251 = vst [vmem:[%s1275_s27 + $0xf0] sm:$0xff] %v250_v30  ;;  %253 = vst [vmem:[%s1275_s27 + $0xf8] sm:$0xff] %v252_v31 }
  0x22 PF: > { %p1016_p6 = scmp.ge.s32.totalorder %s1204_s16, 1  ;;  %p273_p7 = scmp.lt.s32.totalorder %s1204_s16, 10 }
  0x24   : > { %p274_p8 = pnand %p1016_p6, %p273_p7 }
  0x25   : > { %s280_s28 = sand.u32 (!%p274_p8), 1, %s1188_s12   ;;  %s1018_s29 = sshll.u32 (!%p274_p8), %s1196_s14, 5 }
  0x26   : > { %277 = sbr.rel (%p274_p8) target bundleno = 387 (0x183), region = 51  ;;  %s1017_s30 = sshll.u32 (!%p274_p8), %s280_s28, 8 }
  0x27   : > { %p326_p9 = scmp.lt.s32.totalorder (!%p274_p8), %s1018_s29, 287  ;;  %s1347_s8 = scalar_lea.vmem (!%p274_p8), [#allocation3], %s1017_s30 }
  0x28   : > { %p1021_p10 = scmp.ne.s32.totalorder (!%p274_p8), %s1196_s14, 0 }
  0x2d   : > { %s1608_s29 = smov (!%p326_p9, %s1018_s29), 287  ;;  %356 = sbr.rel (%p1021_p10) target bundleno = 63 (0x3f), region = 59 }
  0x2e   : > { %s1028_s4 = sshll.u32 %s1608_s29, 4  ;;  %v1206_v32 = vmov (!%p1021_p10), 0.0  }
  0x2f   : > { %s1345_s7 = scalar_lea.vmem %s1598_s1, %s1028_s4  ;;  %357 = vst [vmem:[#allocation2] sm:$0xff] (!%p1021_p10), %v1206_v32  ;;  %358 = vst [vmem:[#allocation2 + $0x8] sm:$0xff] (!%p1021_p10), %v1206_v32 }
  0x30   : > { %359 = vst [vmem:[#allocation2 + $0x10] sm:$0xff] (!%p1021_p10), %v1206_v32  ;;  %360 = vst [vmem:[#allocation2 + $0x18] sm:$0xff] (!%p1021_p10), %v1206_v32 }
  0x31   : > { %361 = vst [vmem:[#allocation2 + $0x20] sm:$0xff] (!%p1021_p10), %v1206_v32  ;;  %362 = vst [vmem:[#allocation2 + $0x28] sm:$0xff] (!%p1021_p10), %v1206_v32 }
  0x32   : > { %363 = vst [vmem:[#allocation2 + $0x30] sm:$0xff] (!%p1021_p10), %v1206_v32  ;;  %364 = vst [vmem:[#allocation2 + $0x38] sm:$0xff] (!%p1021_p10), %v1206_v32 }
  0x33   : > { %365 = vst [vmem:[#allocation2 + $0x40] sm:$0xff] (!%p1021_p10), %v1206_v32  ;;  %366 = vst [vmem:[#allocation2 + $0x48] sm:$0xff] (!%p1021_p10), %v1206_v32 }
  0x34   : > { %367 = vst [vmem:[#allocation2 + $0x50] sm:$0xff] %v1206_v32  ;;  %368 = vst [vmem:[#allocation2 + $0x58] sm:$0xff] %v1206_v32 }
  0x35   : > { %369 = vst [vmem:[#allocation2 + $0x60] sm:$0xff] %v1206_v32  ;;  %370 = vst [vmem:[#allocation2 + $0x68] sm:$0xff] %v1206_v32 }
  0x36   : > { %371 = vst [vmem:[#allocation2 + $0x70] sm:$0xff] %v1206_v32  ;;  %372 = vst [vmem:[#allocation2 + $0x78] sm:$0xff] %v1206_v32 }
  0x37   : > { %373 = vst [vmem:[#allocation2 + $0x80] sm:$0xff] %v1206_v32  ;;  %374 = vst [vmem:[#allocation2 + $0x88] sm:$0xff] %v1206_v32 }
  0x38   : > { %375 = vst [vmem:[#allocation2 + $0x90] sm:$0xff] %v1206_v32  ;;  %376 = vst [vmem:[#allocation2 + $0x98] sm:$0xff] %v1206_v32 }
  0x39   : > { %377 = vst [vmem:[#allocation2 + $0xa0] sm:$0xff] %v1206_v32  ;;  %378 = vst [vmem:[#allocation2 + $0xa8] sm:$0xff] %v1206_v32 }
  0x3a   : > { %379 = vst [vmem:[#allocation2 + $0xb0] sm:$0xff] %v1206_v32  ;;  %380 = vst [vmem:[#allocation2 + $0xb8] sm:$0xff] %v1206_v32 }
  0x3b   : > { %381 = vst [vmem:[#allocation2 + $0xc0] sm:$0xff] %v1206_v32  ;;  %382 = vst [vmem:[#allocation2 + $0xc8] sm:$0xff] %v1206_v32 }
  0x3c   : > { %383 = vst [vmem:[#allocation2 + $0xd0] sm:$0xff] %v1206_v32  ;;  %384 = vst [vmem:[#allocation2 + $0xd8] sm:$0xff] %v1206_v32 }
  0x3d   : > { %385 = vst [vmem:[#allocation2 + $0xe0] sm:$0xff] %v1206_v32  ;;  %386 = vst [vmem:[#allocation2 + $0xe8] sm:$0xff] %v1206_v32 }
  0x3e   : > { %387 = vst [vmem:[#allocation2 + $0xf0] sm:$0xff] %v1206_v32  ;;  %388 = vst [vmem:[#allocation2 + $0xf8] sm:$0xff] %v1206_v32 }
  0x3f PF: > { %v454_v33 = vld [vmem:[%s1345_s7 + $0x8] sm:$0xff]  ;;  %v456_v34 = vld [vmem:[%s1345_s7 + $0x18] sm:$0xff]  ;;  %v453_v35 = vld [vmem:[%s1345_s7] sm:$0xff]  ;;  %p1022_p11 = scmp.ne.s32.totalorder %s1196_s14, 8 }
  0x40   : > { %v1029_v36 = vpack.c.bf16 %v456_v34, %v454_v33  ;;  %v455_v37 = vld [vmem:[%s1345_s7 + $0x10] sm:$0xff]  ;;  %v458_v38 = vld [vmem:[%s1345_s7 + $0x28] sm:$0xff]  ;;  %v460_v39 = vld [vmem:[%s1345_s7 + $0x38] sm:$0xff] }
  0x41   : > { %v1031_v40 = vpack.c.bf16 %v455_v37, %v453_v35  ;;  %v1033_v41 = vpack.c.bf16 %v460_v39, %v458_v38  ;;  %v457_v42 = vld [vmem:[%s1345_s7 + $0x20] sm:$0xff]  ;;  %v459_v43 = vld [vmem:[%s1345_s7 + $0x30] sm:$0xff]  ;;  %v462_v44 = vld [vmem:[%s1345_s7 + $0x48] sm:$0xff] }
  0x42   : > { %1030 = vmatprep.subr.bf16.mxu0 %v1029_v36  ;;  %1093 = vmatprep.subr.bf16.mxu1 %v1029_v36  ;;  %v464_v45 = vld [vmem:[%s1345_s7 + $0x58] sm:$0xff]  ;;  %v1035_v46 = vpack.c.bf16 %v459_v43, %v457_v42  ;;  %v461_v48 = vld [vmem:[%s1345_s7 + $0x40] sm:$0xff]  ;;  %v463_v49 = vld [vmem:[%s1345_s7 + $0x50] sm:$0xff] }
  0x43   : > { %1032 = vmatpush1.bf16.msra.mxu0 %v1031_v40  ;;  %1109 = vmatpush1.bf16.msra.mxu1 %v1031_v40  ;;  %v1037_v47 = vpack.c.bf16 %v464_v45, %v462_v44  ;;  %v466_v50 = vld [vmem:[%s1345_s7 + $0x68] sm:$0xff]  ;;  %v468_v51 = vld [vmem:[%s1345_s7 + $0x78] sm:$0xff]  ;;  %v1039_v52 = vpack.c.bf16 %v463_v49, %v461_v48  ;;  %v465_v54 = vld [vmem:[%s1345_s7 + $0x60] sm:$0xff] }
  0x44   : > { %1034 = vmatprep.subr.bf16.mxu0 %v1033_v41  ;;  %1094 = vmatprep.subr.bf16.mxu1 %v1033_v41  ;;  %v1041_v53 = vpack.c.bf16 %v468_v51, %v466_v50  ;;  %v467_v55 = vld [vmem:[%s1345_s7 + $0x70] sm:$0xff]  ;;  %v470_v56 = vld [vmem:[%s1345_s7 + $0x88] sm:$0xff]  ;;  %v472_v57 = vld [vmem:[%s1345_s7 + $0x98] sm:$0xff] }
  0x45   : > { %v1043_v58 = vpack.c.bf16 %v467_v55, %v465_v54  ;;  %v1045_v59 = vpack.c.bf16 %v472_v57, %v470_v56  ;;  %v469_v60 = vld [vmem:[%s1345_s7 + $0x80] sm:$0xff]  ;;  %v471_v61 = vld [vmem:[%s1345_s7 + $0x90] sm:$0xff]  ;;  %v474_v62 = vld [vmem:[%s1345_s7 + $0xa8] sm:$0xff] }
  0x46   : > { %v476_v63 = vld [vmem:[%s1345_s7 + $0xb8] sm:$0xff]  ;;  %v1047_v0 = vpack.c.bf16 %v471_v61, %v469_v60  ;;  %v473_v2 = vld [vmem:[%s1345_s7 + $0xa0] sm:$0xff]  ;;  %v475_v3 = vld [vmem:[%s1345_s7 + $0xb0] sm:$0xff] }
  0x47   : > { %1036 = vmatpush1.bf16.msra.mxu0 %v1035_v46  ;;  %1110 = vmatpush1.bf16.msra.mxu1 %v1035_v46  ;;  %v1049_v1 = vpack.c.bf16 %v476_v63, %v474_v62  ;;  %v478_v4 = vld [vmem:[%s1345_s7 + $0xc8] sm:$0xff]  ;;  %v480_v5 = vld [vmem:[%s1345_s7 + $0xd8] sm:$0xff]  ;;  %v1051_v6 = vpack.c.bf16 %v475_v3, %v473_v2  ;;  %v477_v7 = vld [vmem:[%s1345_s7 + $0xc0] sm:$0xff] }
  0x48   : > { %1038 = vmatprep.subr.bf16.mxu0 %v1037_v47  ;;  %1095 = vmatprep.subr.bf16.mxu1 %v1037_v47  ;;  %v1053_v8 = vpack.c.bf16 %v480_v5, %v478_v4  ;;  %v479_v9 = vld [vmem:[%s1345_s7 + $0xd0] sm:$0xff]  ;;  %v422_v10 = vld [vmem:[%s1347_s8 + $0x8] sm:$0xff]  ;;  %v484_v13 = vld [vmem:[%s1345_s7 + $0xf8] sm:$0xff] }
  0x49   : > { %v438_v11 = vld [vmem:[%s1347_s8 + $0x88] sm:$0xff]  ;;  %581 = vmatprep.mubr.f32.mxu0 %v422_v10  ;;  %v1055_v14 = vpack.c.bf16 %v479_v9, %v477_v7  ;;  %v481_v16 = vld [vmem:[%s1345_s7 + $0xe0] sm:$0xff]  ;;  %v483_v17 = vld [vmem:[%s1345_s7 + $0xf0] sm:$0xff] }
  0x4a   : > { %v482_v12 = vld [vmem:[%s1345_s7 + $0xe8] sm:$0xff]  ;;  %629 = vmatprep.mubr.f32.mxu1 %v438_v11  ;;  %v488_v19 = vld [vmem:[%s1345_s7 + $0x118] sm:$0xff]  ;;  %v1059_v20 = vpack.c.bf16 %v483_v17, %v481_v16  ;;  %v485_v22 = vld [vmem:[%s1345_s7 + $0x100] sm:$0xff] }
  0x4b   : > { %1040 = vmatpush1.bf16.msra.mxu0 %v1039_v52  ;;  %1111 = vmatpush1.bf16.msra.mxu1 %v1039_v52  ;;  %v1057_v15 = vpack.c.bf16 %v484_v13, %v482_v12  ;;  %v486_v18 = vld [vmem:[%s1345_s7 + $0x108] sm:$0xff]  ;;  %v487_v23 = vld [vmem:[%s1345_s7 + $0x110] sm:$0xff]  ;;  %v492_v25 = vld [vmem:[%s1345_s7 + $0x138] sm:$0xff] }
  0x4c   : > { %1042 = vmatprep.subr.bf16.mxu0 %v1041_v53  ;;  %1096 = vmatprep.subr.bf16.mxu1 %v1041_v53  ;;  %v1061_v21 = vpack.c.bf16 %v488_v19, %v486_v18  ;;  %v490_v24 = vld [vmem:[%s1345_s7 + $0x128] sm:$0xff]  ;;  %v1063_v26 = vpack.c.bf16 %v487_v23, %v485_v22  ;;  %v489_v28 = vld [vmem:[%s1345_s7 + $0x120] sm:$0xff]  ;;  %v491_v29 = vld [vmem:[%s1345_s7 + $0x130] sm:$0xff] }
  0x4d   : > { %v1065_v27 = vpack.c.bf16 %v492_v25, %v490_v24  ;;  %v494_v30 = vld [vmem:[%s1345_s7 + $0x148] sm:$0xff]  ;;  %v496_v31 = vld [vmem:[%s1345_s7 + $0x158] sm:$0xff]  ;;  %v1067_v32 = vpack.c.bf16 %v491_v29, %v489_v28  ;;  %v493_v34 = vld [vmem:[%s1345_s7 + $0x140] sm:$0xff] }
  0x4e   : > { %v1069_v33 = vpack.c.bf16 %v496_v31, %v494_v30  ;;  %v495_v35 = vld [vmem:[%s1345_s7 + $0x150] sm:$0xff]  ;;  %v498_v36 = vld [vmem:[%s1345_s7 + $0x168] sm:$0xff]  ;;  %v500_v37 = vld [vmem:[%s1345_s7 + $0x178] sm:$0xff] }
  0x4f   : > { %1044 = vmatpush1.bf16.msra.mxu0 %v1043_v58  ;;  %1112 = vmatpush1.bf16.msra.mxu1 %v1043_v58  ;;  %v1071_v38 = vpack.c.bf16 %v495_v35, %v493_v34  ;;  %v1073_v39 = vpack.c.bf16 %v500_v37, %v498_v36  ;;  %v497_v40 = vld [vmem:[%s1345_s7 + $0x160] sm:$0xff]  ;;  %v499_v41 = vld [vmem:[%s1345_s7 + $0x170] sm:$0xff]  ;;  %v502_v42 = vld [vmem:[%s1345_s7 + $0x188] sm:$0xff] }
  0x50   : > { %1046 = vmatprep.subr.bf16.mxu0 %v1045_v59  ;;  %1097 = vmatprep.subr.bf16.mxu1 %v1045_v59  ;;  %v504_v43 = vld [vmem:[%s1345_s7 + $0x198] sm:$0xff]  ;;  %v1075_v44 = vpack.c.bf16 %v499_v41, %v497_v40  ;;  %v501_v46 = vld [vmem:[%s1345_s7 + $0x180] sm:$0xff]  ;;  %v503_v47 = vld [vmem:[%s1345_s7 + $0x190] sm:$0xff] }
  0x51   : > { %v1077_v45 = vpack.c.bf16 %v504_v43, %v502_v42  ;;  %v506_v48 = vld [vmem:[%s1345_s7 + $0x1a8] sm:$0xff]  ;;  %v508_v49 = vld [vmem:[%s1345_s7 + $0x1b8] sm:$0xff]  ;;  %v1079_v50 = vpack.c.bf16 %v503_v47, %v501_v46  ;;  %v505_v52 = vld [vmem:[%s1345_s7 + $0x1a0] sm:$0xff] }
  0x52   : > { %v1081_v51 = vpack.c.bf16 %v508_v49, %v506_v48  ;;  %v507_v53 = vld [vmem:[%s1345_s7 + $0x1b0] sm:$0xff]  ;;  %v510_v54 = vld [vmem:[%s1345_s7 + $0x1c8] sm:$0xff]  ;;  %v512_v55 = vld [vmem:[%s1345_s7 + $0x1d8] sm:$0xff] }
  0x53   : > { %1048 = vmatpush1.bf16.msra.mxu0 %v1047_v0  ;;  %1113 = vmatpush1.bf16.msra.mxu1 %v1047_v0  ;;  %v1083_v56 = vpack.c.bf16 %v507_v53, %v505_v52  ;;  %v1085_v57 = vpack.c.bf16 %v512_v55, %v510_v54  ;;  %v509_v58 = vld [vmem:[%s1345_s7 + $0x1c0] sm:$0xff]  ;;  %v511_v59 = vld [vmem:[%s1345_s7 + $0x1d0] sm:$0xff]  ;;  %v514_v60 = vld [vmem:[%s1345_s7 + $0x1e8] sm:$0xff] }
  0x54   : > { %1050 = vmatprep.subr.bf16.mxu0 %v1049_v1  ;;  %1098 = vmatprep.subr.bf16.mxu1 %v1049_v1  ;;  %v516_v61 = vld [vmem:[%s1345_s7 + $0x1f8] sm:$0xff]  ;;  %v1087_v62 = vpack.c.bf16 %v511_v59, %v509_v58  ;;  %v513_v0 = vld [vmem:[%s1345_s7 + $0x1e0] sm:$0xff]  ;;  %v515_v1 = vld [vmem:[%s1345_s7 + $0x1f0] sm:$0xff] }
  0x55   : > { %v1089_v63 = vpack.c.bf16 %v516_v61, %v514_v60  ;;  %v1091_v2 = vpack.c.bf16 %v515_v1, %v513_v0  ;;  %v421_v3 = vld [vmem:[%s1347_s8] sm:$0xff]  ;;  %v424_v5 = vld [vmem:[%s1347_s8 + $0x18] sm:$0xff]  ;;  %v423_v7 = vld [vmem:[%s1347_s8 + $0x10] sm:$0xff] }
  0x56   : > { %v437_v4 = vld [vmem:[%s1347_s8 + $0x80] sm:$0xff]  ;;  %v426_v9 = vld [vmem:[%s1347_s8 + $0x28] sm:$0xff]  ;;  %v428_v13 = vld [vmem:[%s1347_s8 + $0x38] sm:$0xff] }
  0x57   : > { %1052 = vmatpush1.bf16.msra.mxu0 %v1051_v6  ;;  %1114 = vmatpush1.bf16.msra.mxu1 %v1051_v6  ;;  %v440_v6 = vld [vmem:[%s1347_s8 + $0x98] sm:$0xff]  ;;  %v442_v10 = vld [vmem:[%s1347_s8 + $0xa8] sm:$0xff]  ;;  %v425_v11 = vld [vmem:[%s1347_s8 + $0x20] sm:$0xff] }
  0x58   : > { %1054 = vmatprep.subr.bf16.mxu0 %v1053_v8  ;;  %1099 = vmatprep.subr.bf16.mxu1 %v1053_v8  ;;  %v439_v8 = vld [vmem:[%s1347_s8 + $0x90] sm:$0xff]  ;;  %v441_v12 = vld [vmem:[%s1347_s8 + $0xa0] sm:$0xff]  ;;  %v430_v17 = vld [vmem:[%s1347_s8 + $0x48] sm:$0xff] }
  0x59   : > { %v443_v16 = vld [vmem:[%s1347_s8 + $0xb0] sm:$0xff]  ;;  %v446_v18 = vld [vmem:[%s1347_s8 + $0xc8] sm:$0xff]  ;;  %v429_v19 = vld [vmem:[%s1347_s8 + $0x40] sm:$0xff] }
  0x5a   : > { %v448_v22 = vld [vmem:[%s1347_s8 + $0xd8] sm:$0xff]  ;;  %v431_v23 = vld [vmem:[%s1347_s8 + $0x50] sm:$0xff]  ;;  %v434_v25 = vld [vmem:[%s1347_s8 + $0x68] sm:$0xff] }
  0x5b   : > { %1056 = vmatpush1.bf16.msra.mxu0 %v1055_v14  ;;  %1115 = vmatpush1.bf16.msra.mxu1 %v1055_v14  ;;  %v444_v14 = vld [vmem:[%s1347_s8 + $0xb8] sm:$0xff]  ;;  %v447_v24 = vld [vmem:[%s1347_s8 + $0xd0] sm:$0xff]  ;;  %v449_v28 = vld [vmem:[%s1347_s8 + $0xe0] sm:$0xff] }
  0x5c   : > { %1058 = vmatprep.subr.bf16.mxu0 %v1057_v15  ;;  %1100 = vmatprep.subr.bf16.mxu1 %v1057_v15  ;;  %v427_v15 = vld [vmem:[%s1347_s8 + $0x30] sm:$0xff]  ;;  %v436_v29 = vld [vmem:[%s1347_s8 + $0x78] sm:$0xff]  ;;  %v405_v34 = vld [vmem:[#allocation2 + $0x80] sm:$0xff] }
  0x5d   : > { %v452_v30 = vld [vmem:[%s1347_s8 + $0xf8] sm:$0xff]  ;;  %v435_v31 = vld [vmem:[%s1347_s8 + $0x70] sm:$0xff]  ;;  %v390_v35 = vld [vmem:[#allocation2 + $0x8] sm:$0xff] }
  0x5e   : > { %v406_v36 = vld [vmem:[#allocation2 + $0x88] sm:$0xff]  ;;  %v407_v46 = vld [vmem:[#allocation2 + $0x90] sm:$0xff]  ;;  %v392_v47 = vld [vmem:[#allocation2 + $0x18] sm:$0xff] }
  0x5f   : > { %1060 = vmatpush1.bf16.msra.mxu0 %v1059_v20  ;;  %1116 = vmatpush1.bf16.msra.mxu1 %v1059_v20  ;;  %v445_v20 = vld [vmem:[%s1347_s8 + $0xc0] sm:$0xff]  ;;  %v408_v48 = vld [vmem:[#allocation2 + $0x98] sm:$0xff]  ;;  %v394_v59 = vld [vmem:[#allocation2 + $0x28] sm:$0xff] }
  0x60   : > { %1062 = vmatprep.subr.bf16.mxu0 %v1061_v21  ;;  %1101 = vmatprep.subr.bf16.mxu1 %v1061_v21  ;;  %v432_v21 = vld [vmem:[%s1347_s8 + $0x58] sm:$0xff]  ;;  %v409_v58 = vld [vmem:[#allocation2 + $0xa0] sm:$0xff]  ;;  %v410_v60 = vld [vmem:[#allocation2 + $0xa8] sm:$0xff] }
  0x63   : > { %1064 = vmatpush1.bf16.msra.mxu0 %v1063_v26  ;;  %1117 = vmatpush1.bf16.msra.mxu1 %v1063_v26  ;;  %v450_v26 = vld [vmem:[%s1347_s8 + $0xe8] sm:$0xff] }
  0x64   : > { %1066 = vmatprep.subr.bf16.mxu0 %v1065_v27  ;;  %1102 = vmatprep.subr.bf16.mxu1 %v1065_v27  ;;  %v433_v27 = vld [vmem:[%s1347_s8 + $0x60] sm:$0xff] }
  0x67   : > { %1068 = vmatpush1.bf16.msra.mxu0 %v1067_v32  ;;  %1118 = vmatpush1.bf16.msra.mxu1 %v1067_v32  ;;  %v451_v32 = vld [vmem:[%s1347_s8 + $0xf0] sm:$0xff] }
  0x68   : > { %1070 = vmatprep.subr.bf16.mxu0 %v1069_v33  ;;  %1103 = vmatprep.subr.bf16.mxu1 %v1069_v33  ;;  %v389_v33 = vld [vmem:[#allocation2] sm:$0xff] }
  0x6b   : > { %1072 = vmatpush1.bf16.msra.mxu0 %v1071_v38  ;;  %1119 = vmatpush1.bf16.msra.mxu1 %v1071_v38 }
  0x6c   : > { %1074 = vmatprep.subr.bf16.mxu0 %v1073_v39  ;;  %1104 = vmatprep.subr.bf16.mxu1 %v1073_v39 }
  0x6f   : > { %1076 = vmatpush1.bf16.msra.mxu0 %v1075_v44  ;;  %1120 = vmatpush1.bf16.msra.mxu1 %v1075_v44 }
  0x70   : > { %1078 = vmatprep.subr.bf16.mxu0 %v1077_v45  ;;  %1105 = vmatprep.subr.bf16.mxu1 %v1077_v45  ;;  %v391_v45 = vld [vmem:[#allocation2 + $0x10] sm:$0xff] }
  0x73   : > { %1080 = vmatpush1.bf16.msra.mxu0 %v1079_v50  ;;  %1121 = vmatpush1.bf16.msra.mxu1 %v1079_v50 }
  0x74   : > { %1082 = vmatprep.subr.bf16.mxu0 %v1081_v51  ;;  %1106 = vmatprep.subr.bf16.mxu1 %v1081_v51 }
  0x77   : > { %1084 = vmatpush1.bf16.msra.mxu0 %v1083_v56  ;;  %1122 = vmatpush1.bf16.msra.mxu1 %v1083_v56 }
  0x78   : > { %1086 = vmatprep.subr.bf16.mxu0 %v1085_v57  ;;  %1107 = vmatprep.subr.bf16.mxu1 %v1085_v57  ;;  %v393_v57 = vld [vmem:[#allocation2 + $0x20] sm:$0xff] }
  0x7b   : > { %1088 = vmatpush1.bf16.msra.mxu0 %v1087_v62  ;;  %1123 = vmatpush1.bf16.msra.mxu1 %v1087_v62 }
  0x7c   : > { %1090 = vmatprep.subr.bf16.mxu0 %v1089_v63  ;;  %1108 = vmatprep.subr.bf16.mxu1 %v1089_v63 }
  0x7f   : > { %1092 = vmatpush1.bf16.msra.mxu0 %v1091_v2  ;;  %1124 = vmatpush1.bf16.msra.mxu1 %v1091_v2 }
  0x82   : > { %582 = vmatmul.mubr.f32.vlgmr.msra.gmra.mrb[0].mxu0 %v421_v3  ;;  %630 = vmatmul.mubr.f32.vlgmr.msra.gmra.mrb[0].mxu1 %v437_v4 }
  0x83   : > { %587 = vmatprep.mubr.f32.mxu0 %v424_v5  ;;  %635 = vmatprep.mubr.f32.mxu1 %v440_v6  ;;  %v395_v5 = vld [vmem:[#allocation2 + $0x30] sm:$0xff] }
  0x84   : > { %v411_v6 = vld [vmem:[#allocation2 + $0xb0] sm:$0xff] }
  0x86   : > { %588 = vmatmul.mubr.f32.gmra.mrb[2].mxu0 %v423_v7  ;;  %636 = vmatmul.mubr.f32.gmra.mrb[2].mxu1 %v439_v8  ;;  %v396_v7 = vld [vmem:[#allocation2 + $0x38] sm:$0xff] }
  0x87   : > { %593 = vmatprep.mubr.f32.mxu0 %v426_v9  ;;  %641 = vmatprep.mubr.f32.mxu1 %v442_v10  ;;  %v412_v8 = vld [vmem:[#allocation2 + $0xb8] sm:$0xff] }
  0x8a   : > { %594 = vmatmul.mubr.f32.gmra.mrb[4].mxu0 %v425_v11  ;;  %642 = vmatmul.mubr.f32.gmra.mrb[4].mxu1 %v441_v12 }
  0x8b   : > { %599 = vmatprep.mubr.f32.mxu0 %v428_v13  ;;  %647 = vmatprep.mubr.f32.mxu1 %v444_v14 }
  0x8e   : > { %600 = vmatmul.mubr.f32.gmra.mrb[6].mxu0 %v427_v15  ;;  %648 = vmatmul.mubr.f32.gmra.mrb[6].mxu1 %v443_v16 }
  0x8f   : > { %605 = vmatprep.mubr.f32.mxu0 %v430_v17  ;;  %653 = vmatprep.mubr.f32.mxu1 %v446_v18  ;;  %v397_v17 = vld [vmem:[#allocation2 + $0x40] sm:$0xff] }
  0x90   : > { %v413_v18 = vld [vmem:[#allocation2 + $0xc0] sm:$0xff] }
  0x92   : > { %606 = vmatmul.mubr.f32.gmra.mrb[8].mxu0 %v429_v19  ;;  %654 = vmatmul.mubr.f32.gmra.mrb[8].mxu1 %v445_v20  ;;  %v398_v19 = vld [vmem:[#allocation2 + $0x48] sm:$0xff] }
  0x93   : > { %611 = vmatprep.mubr.f32.mxu0 %v432_v21  ;;  %659 = vmatprep.mubr.f32.mxu1 %v448_v22  ;;  %v414_v20 = vld [vmem:[#allocation2 + $0xc8] sm:$0xff] }
  0x96   : > { %612 = vmatmul.mubr.f32.gmra.mrb[10].mxu0 %v431_v23  ;;  %660 = vmatmul.mubr.f32.gmra.mrb[10].mxu1 %v447_v24 }
  0x97   : > { %617 = vmatprep.mubr.f32.mxu0 %v434_v25  ;;  %665 = vmatprep.mubr.f32.mxu1 %v450_v26 }
  0x9a   : > { %618 = vmatmul.mubr.f32.gmra.mrb[12].mxu0 %v433_v27  ;;  %666 = vmatmul.mubr.f32.gmra.mrb[12].mxu1 %v449_v28 }
  0x9b   : > { %623 = vmatprep.mubr.f32.mxu0 %v436_v29  ;;  %671 = vmatprep.mubr.f32.mxu1 %v452_v30  ;;  %v399_v29 = vld [vmem:[#allocation2 + $0x50] sm:$0xff] }
  0x9c   : > { %v415_v30 = vld [vmem:[#allocation2 + $0xd0] sm:$0xff] }
  0x9e   : > { %624 = vmatmul.mubr.f32.gmra.mrb[14].mxu0 %v435_v31  ;;  %672 = vmatmul.mubr.f32.gmra.mrb[14].mxu1 %v451_v32  ;;  %v400_v31 = vld [vmem:[#allocation2 + $0x58] sm:$0xff] }
  0x9f   : > { %v416_v32 = vld [vmem:[#allocation2 + $0xd8] sm:$0xff] }
 0x155   : > { %v583_v37 = vpop.f32.mrb[0].mxu0  ;;  %v631_v38 = vpop.f32.mrb[0].mxu1 }
 0x156   : > { %v678_v39 = vadd.f32 %v583_v37, %v389_v33  ;;  %v694_v40 = vadd.f32 %v631_v38, %v405_v34  ;;  %v585_v41 = vpop.f32.mrb[1].mxu0  ;;  %v633_v42 = vpop.f32.mrb[1].mxu1 }
 0x157   : > { %v679_v43 = vadd.f32 %v585_v41, %v390_v35  ;;  %v695_v44 = vadd.f32 %v633_v42, %v406_v36  ;;  %v401_v41 = vld [vmem:[#allocation2 + $0x60] sm:$0xff] }
 0x158   : > { %710 = vst [vmem:[#allocation2] sm:$0xff] %v678_v39  ;;  %726 = vst [vmem:[#allocation2 + $0x80] sm:$0xff] %v694_v40  ;;  %v417_v42 = vld [vmem:[#allocation2 + $0xe0] sm:$0xff] }
 0x159   : > { %711 = vst [vmem:[#allocation2 + $0x8] sm:$0xff] %v679_v43  ;;  %727 = vst [vmem:[#allocation2 + $0x88] sm:$0xff] %v695_v44  ;;  %v589_v49 = vpop.f32.mrb[2].mxu0  ;;  %v637_v50 = vpop.f32.mrb[2].mxu1  ;;  %v402_v43 = vld [vmem:[#allocation2 + $0x68] sm:$0xff] }
 0x15a   : > { %v680_v51 = vadd.f32 %v589_v49, %v391_v45  ;;  %v696_v52 = vadd.f32 %v637_v50, %v407_v46  ;;  %v591_v53 = vpop.f32.mrb[3].mxu0  ;;  %v639_v54 = vpop.f32.mrb[3].mxu1  ;;  %v418_v44 = vld [vmem:[#allocation2 + $0xe8] sm:$0xff] }
 0x15b   : > { %v681_v55 = vadd.f32 %v591_v53, %v392_v47  ;;  %v697_v56 = vadd.f32 %v639_v54, %v408_v48  ;;  %v403_v53 = vld [vmem:[#allocation2 + $0x70] sm:$0xff] }
 0x15c   : > { %712 = vst [vmem:[#allocation2 + $0x10] sm:$0xff] %v680_v51  ;;  %728 = vst [vmem:[#allocation2 + $0x90] sm:$0xff] %v696_v52  ;;  %v419_v54 = vld [vmem:[#allocation2 + $0xf0] sm:$0xff] }
 0x15d   : > { %713 = vst [vmem:[#allocation2 + $0x18] sm:$0xff] %v681_v55  ;;  %729 = vst [vmem:[#allocation2 + $0x98] sm:$0xff] %v697_v56  ;;  %v595_v61 = vpop.f32.mrb[4].mxu0  ;;  %v643_v62 = vpop.f32.mrb[4].mxu1  ;;  %v404_v55 = vld [vmem:[#allocation2 + $0x78] sm:$0xff] }
 0x15e   : > { %v682_v63 = vadd.f32 %v595_v61, %v393_v57  ;;  %v698_v0 = vadd.f32 %v643_v62, %v409_v58  ;;  %v597_v1 = vpop.f32.mrb[5].mxu0  ;;  %v645_v2 = vpop.f32.mrb[5].mxu1  ;;  %v420_v56 = vld [vmem:[#allocation2 + $0xf8] sm:$0xff] }
 0x15f   : > { %v683_v3 = vadd.f32 %v597_v1, %v394_v59  ;;  %v699_v4 = vadd.f32 %v645_v2, %v410_v60  ;;  %v780_v1 = vlaneseq (!%p1022_p11) }
 0x160   : > { %714 = vst [vmem:[#allocation2 + $0x20] sm:$0xff] %v682_v63  ;;  %730 = vst [vmem:[#allocation2 + $0xa0] sm:$0xff] %v698_v0 }
 0x161   : > { %715 = vst [vmem:[#allocation2 + $0x28] sm:$0xff] %v683_v3  ;;  %731 = vst [vmem:[#allocation2 + $0xa8] sm:$0xff] %v699_v4  ;;  %v601_v9 = vpop.f32.mrb[6].mxu0  ;;  %v649_v10 = vpop.f32.mrb[6].mxu1  ;;  %v781_v2 = vshrl.u32 (!%p1022_p11), %v780_v1, 7  ;;  %v746_v4 = vld [vmem:[#allocation2] sm:$0xff] (!%p1022_p11) }
 0x162   : > { %v684_v11 = vadd.f32 %v601_v9, %v395_v5  ;;  %v700_v12 = vadd.f32 %v649_v10, %v411_v6  ;;  %v603_v13 = vpop.f32.mrb[7].mxu0  ;;  %v651_v14 = vpop.f32.mrb[7].mxu1  ;;  %v778_v3 = vld [vmem:[%s1599_s2] sm:$0x3] (!%p1022_p11)  ;;  %v747_v6 = vld [vmem:[#allocation2 + $0x8] sm:$0xff] (!%p1022_p11) }
 0x163   : > { %v685_v15 = vadd.f32 %v603_v13, %v396_v7  ;;  %v701_v16 = vadd.f32 %v651_v14, %v412_v8  ;;  %v782_v5 = vsub.s32 (!%p1022_p11), 0, %v781_v2  ;;  %v786_v7 = vsub.s32 (!%p1022_p11), 1, %v781_v2  ;;  %v748_v8 = vld [vmem:[#allocation2 + $0x10] sm:$0xff] (!%p1022_p11) }
 0x164   : > { %716 = vst [vmem:[#allocation2 + $0x30] sm:$0xff] %v684_v11  ;;  %732 = vst [vmem:[#allocation2 + $0xb0] sm:$0xff] %v700_v12  ;;  %v749_v9 = vld [vmem:[#allocation2 + $0x18] sm:$0xff] (!%p1022_p11) }
 0x165   : > { %717 = vst [vmem:[#allocation2 + $0x38] sm:$0xff] %v685_v15  ;;  %733 = vst [vmem:[#allocation2 + $0xb8] sm:$0xff] %v701_v16  ;;  %v607_v21 = vpop.f32.mrb[8].mxu0  ;;  %v655_v22 = vpop.f32.mrb[8].mxu1  ;;  %v1450_v11 = vrot.slane (!%p1022_p11), %v778_v3, %v782_v5  ;;  %v1452_v12 = vrot.slane (!%p1022_p11), %v778_v3, %v786_v7 }
 0x166   : > { %v686_v23 = vadd.f32 %v607_v21, %v397_v17  ;;  %v702_v24 = vadd.f32 %v655_v22, %v413_v18  ;;  %v609_v25 = vpop.f32.mrb[9].mxu0  ;;  %v657_v26 = vpop.f32.mrb[9].mxu1 }
 0x167   : > { %v687_v27 = vadd.f32 %v609_v25, %v398_v19  ;;  %v703_v28 = vadd.f32 %v657_v26, %v414_v20  ;;  %v750_v10 = vld [vmem:[#allocation2 + $0x20] sm:$0xff] (!%p1022_p11)  ;;  %v790_v16 = vadd.f32 (!%p1022_p11), %v1450_v11, %v746_v4  ;;  %v791_v17 = vadd.f32 (!%p1022_p11), %v1452_v12, %v747_v6 }
 0x168   : > { %718 = vst [vmem:[#allocation2 + $0x40] sm:$0xff] %v686_v23  ;;  %734 = vst [vmem:[#allocation2 + $0xc0] sm:$0xff] %v702_v24  ;;  %v751_v13 = vld [vmem:[#allocation2 + $0x28] sm:$0xff] (!%p1022_p11)  ;;  %v792_v18 = vadd.f32 (!%p1022_p11), %v1450_v11, %v748_v8  ;;  %v793_v19 = vadd.f32 (!%p1022_p11), %v1452_v12, %v749_v9  ;;  %v794_v23 = vadd.f32 (!%p1022_p11), %v1450_v11, %v750_v10 }
 0x169   : > { %719 = vst [vmem:[#allocation2 + $0x48] sm:$0xff] %v687_v27  ;;  %735 = vst [vmem:[#allocation2 + $0xc8] sm:$0xff] %v703_v28  ;;  %v613_v33 = vpop.f32.mrb[10].mxu0  ;;  %v661_v34 = vpop.f32.mrb[10].mxu1  ;;  %v795_v24 = vadd.f32 (!%p1022_p11), %v1452_v12, %v751_v13 }
 0x16a   : > { %v688_v35 = vadd.f32 %v613_v33, %v399_v29  ;;  %v704_v36 = vadd.f32 %v661_v34, %v415_v30  ;;  %v615_v37 = vpop.f32.mrb[11].mxu0  ;;  %v663_v38 = vpop.f32.mrb[11].mxu1  ;;  %v822_v30 = vmax.f32 (!%p1022_p11), %v790_v16, 0.0  ;;  %v825_v33 = vmax.f32 (!%p1022_p11), %v793_v19, 0.0 }
 0x16b   : > { %v689_v39 = vadd.f32 %v615_v37, %v400_v31  ;;  %v705_v40 = vadd.f32 %v663_v38, %v416_v32  ;;  %v752_v14 = vld [vmem:[#allocation2 + $0x30] sm:$0xff] (!%p1022_p11)  ;;  %v823_v31 = vmax.f32 (!%p1022_p11), %v791_v17, 0.0  ;;  %v824_v32 = vmax.f32 (!%p1022_p11), %v792_v18, 0.0 }
 0x16c   : > { %720 = vst [vmem:[#allocation2 + $0x50] sm:$0xff] %v688_v35  ;;  %736 = vst [vmem:[#allocation2 + $0xd0] sm:$0xff] %v704_v36  ;;  %v753_v15 = vld [vmem:[#allocation2 + $0x38] sm:$0xff] (!%p1022_p11)  ;;  %v796_v25 = vadd.f32 (!%p1022_p11), %v1450_v11, %v752_v14  ;;  %v826_v36 = vmax.f32 (!%p1022_p11), %v794_v23, 0.0  ;;  %v827_v37 = vmax.f32 (!%p1022_p11), %v795_v24, 0.0 }
 0x16d   : > { %721 = vst [vmem:[#allocation2 + $0x58] sm:$0xff] %v689_v39  ;;  %737 = vst [vmem:[#allocation2 + $0xd8] sm:$0xff] %v705_v40  ;;  %v619_v45 = vpop.f32.mrb[12].mxu0  ;;  %v667_v46 = vpop.f32.mrb[12].mxu1  ;;  %v797_v26 = vadd.f32 (!%p1022_p11), %v1452_v12, %v753_v15 }
 0x16e   : > { %v690_v47 = vadd.f32 %v619_v45, %v401_v41  ;;  %v706_v48 = vadd.f32 %v667_v46, %v417_v42  ;;  %v621_v49 = vpop.f32.mrb[13].mxu0  ;;  %v669_v50 = vpop.f32.mrb[13].mxu1  ;;  %v828_v38 = vmax.f32 (!%p1022_p11), %v796_v25, 0.0  ;;  %854 = vst [vmem:[%s1600_s3] sm:$0xff] (!%p1022_p11), %v822_v30  ;;  %855 = vst [vmem:[%s1600_s3 + $0x8] sm:$0xff] (!%p1022_p11), %v823_v31  ;;  %v763_v45 = vld [vmem:[#allocation2 + $0x88] sm:$0xff] (!%p1022_p11)  ;;  %v764_v46 = vld [vmem:[#allocation2 + $0x90] sm:$0xff] (!%p1022_p11) }
 0x16f   : > { %v691_v51 = vadd.f32 %v621_v49, %v402_v43  ;;  %v707_v52 = vadd.f32 %v669_v50, %v418_v44  ;;  %745 = sbr.rel (%p1022_p11) target bundleno = 387 (0x183), region = 63  ;;  %v754_v20 = vld [vmem:[#allocation2 + $0x40] sm:$0xff] (!%p1022_p11)  ;;  %v829_v39 = vmax.f32 (!%p1022_p11), %v797_v26, 0.0  ;;  %856 = vst [vmem:[%s1600_s3 + $0x10] sm:$0xff] (!%p1022_p11), %v824_v32  ;;  %857 = vst [vmem:[%s1600_s3 + $0x18] sm:$0xff] (!%p1022_p11), %v825_v33  ;;  %v807_v1 = vadd.f32 (!%p1022_p11), %v1452_v12, %v763_v45 }
 0x170   : > { %722 = vst [vmem:[#allocation2 + $0x60] sm:$0xff] %v690_v47  ;;  %738 = vst [vmem:[#allocation2 + $0xe0] sm:$0xff] %v706_v48  ;;  %v755_v21 = vld [vmem:[#allocation2 + $0x48] sm:$0xff] (!%p1022_p11)  ;;  %v798_v40 = vadd.f32 (!%p1022_p11), %v1450_v11, %v754_v20  ;;  %v762_v44 = vld [vmem:[#allocation2 + $0x80] sm:$0xff] (!%p1022_p11)  ;;  %v808_v2 = vadd.f32 (!%p1022_p11), %v1450_v11, %v764_v46 }
 0x171   : > { %723 = vst [vmem:[#allocation2 + $0x68] sm:$0xff] %v691_v51  ;;  %739 = vst [vmem:[#allocation2 + $0xe8] sm:$0xff] %v707_v52  ;;  %v625_v57 = vpop.f32.mrb[14].mxu0  ;;  %v673_v58 = vpop.f32.mrb[14].mxu1  ;;  %v799_v41 = vadd.f32 (!%p1022_p11), %v1452_v12, %v755_v21  ;;  %v765_v51 = vld [vmem:[#allocation2 + $0x98] sm:$0xff] (!%p1022_p11)  ;;  %v766_v52 = vld [vmem:[#allocation2 + $0xa0] sm:$0xff] (!%p1022_p11) }
 0x172   : > { %v692_v59 = vadd.f32 %v625_v57, %v403_v53  ;;  %v708_v60 = vadd.f32 %v673_v58, %v419_v54  ;;  %v627_v61 = vpop.f32.mrb[15].mxu0  ;;  %v675_v62 = vpop.f32.mrb[15].mxu1  ;;  %858 = vst [vmem:[%s1600_s3 + $0x20] sm:$0xff] (!%p1022_p11), %v826_v36  ;;  %859 = vst [vmem:[%s1600_s3 + $0x28] sm:$0xff] (!%p1022_p11), %v827_v37  ;;  %v767_v53 = vld [vmem:[#allocation2 + $0xa8] sm:$0xff] (!%p1022_p11)  ;;  %v830_v54 = vmax.f32 (!%p1022_p11), %v798_v40, 0.0  ;;  %v809_v3 = vadd.f32 (!%p1022_p11), %v1452_v12, %v765_v51 }
 0x173   : > { %v693_v63 = vadd.f32 %v627_v61, %v404_v55  ;;  %v709_v0 = vadd.f32 %v675_v62, %v420_v56  ;;  %v756_v22 = vld [vmem:[#allocation2 + $0x50] sm:$0xff] (!%p1022_p11)  ;;  %860 = vst [vmem:[%s1600_s3 + $0x30] sm:$0xff] (!%p1022_p11), %v828_v38  ;;  %861 = vst [vmem:[%s1600_s3 + $0x38] sm:$0xff] (!%p1022_p11), %v829_v39  ;;  %v831_v55 = vmax.f32 (!%p1022_p11), %v799_v41, 0.0  ;;  %v770_v4 = vld [vmem:[#allocation2 + $0xc0] sm:$0xff] (!%p1022_p11)  ;;  %v810_v7 = vadd.f32 (!%p1022_p11), %v1450_v11, %v766_v52 }
 0x174   : > { %724 = vst [vmem:[#allocation2 + $0x70] sm:$0xff] %v692_v59  ;;  %740 = vst [vmem:[#allocation2 + $0xf0] sm:$0xff] %v708_v60  ;;  %v757_v27 = vld [vmem:[#allocation2 + $0x58] sm:$0xff] (!%p1022_p11)  ;;  %v800_v42 = vadd.f32 (!%p1022_p11), %v1450_v11, %v756_v22  ;;  %v768_v58 = vld [vmem:[#allocation2 + $0xb0] sm:$0xff] (!%p1022_p11)  ;;  %v811_v8 = vadd.f32 (!%p1022_p11), %v1452_v12, %v767_v53  ;;  %v839_v17 = vmax.f32 (!%p1022_p11), %v807_v1, 0.0  ;;  %v840_v18 = vmax.f32 (!%p1022_p11), %v808_v2, 0.0 }
 0x175   : > { %725 = vst [vmem:[#allocation2 + $0x78] sm:$0xff] %v693_v63  ;;  %741 = vst [vmem:[#allocation2 + $0xf8] sm:$0xff] %v709_v0  ;;  %v801_v43 = vadd.f32 (!%p1022_p11), %v1452_v12, %v757_v27  ;;  %v769_v59 = vld [vmem:[#allocation2 + $0xb8] sm:$0xff] (!%p1022_p11)  ;;  %v806_v0 = vadd.f32 (!%p1022_p11), %v1450_v11, %v762_v44  ;;  %v771_v5 = vld [vmem:[#allocation2 + $0xc8] sm:$0xff] (!%p1022_p11)  ;;  %v812_v9 = vadd.f32 (!%p1022_p11), %v1450_v11, %v768_v58  ;;  %v841_v19 = vmax.f32 (!%p1022_p11), %v809_v3, 0.0 }
 0x176   : > { %v832_v56 = vmax.f32 %v800_v42, 0.0  ;;  %862 = vst [vmem:[%s1600_s3 + $0x40] sm:$0xff] %v830_v54  ;;  %863 = vst [vmem:[%s1600_s3 + $0x48] sm:$0xff] %v831_v55  ;;  %v772_v6 = vld [vmem:[#allocation2 + $0xd0] sm:$0xff]  ;;  %v813_v10 = vadd.f32 %v1452_v12, %v769_v59  ;;  %v773_v13 = vld [vmem:[#allocation2 + $0xd8] sm:$0xff]  ;;  %v842_v22 = vmax.f32 %v810_v7, 0.0  ;;  %v814_v26 = vadd.f32 %v1450_v11, %v770_v4 }
 0x177   : > { %v758_v28 = vld [vmem:[#allocation2 + $0x60] sm:$0xff]  ;;  %v833_v57 = vmax.f32 %v801_v43, 0.0  ;;  %v838_v16 = vmax.f32 %v806_v0, 0.0  ;;  %v843_v23 = vmax.f32 %v811_v8, 0.0  ;;  %v844_v24 = vmax.f32 %v812_v9, 0.0  ;;  %871 = vst [vmem:[%s1600_s3 + $0x88] sm:$0xff] %v839_v17 }
 0x178   : > { %v759_v29 = vld [vmem:[#allocation2 + $0x68] sm:$0xff]  ;;  %v802_v47 = vadd.f32 %v1450_v11, %v758_v28  ;;  %864 = vst [vmem:[%s1600_s3 + $0x50] sm:$0xff] %v832_v56  ;;  %v774_v14 = vld [vmem:[#allocation2 + $0xe0] sm:$0xff]  ;;  %v845_v25 = vmax.f32 %v813_v10, 0.0  ;;  %872 = vst [vmem:[%s1600_s3 + $0x90] sm:$0xff] %v840_v18  ;;  %v815_v27 = vadd.f32 %v1452_v12, %v771_v5  ;;  %v816_v28 = vadd.f32 %v1450_v11, %v772_v6 }
 0x179   : > { %v803_v48 = vadd.f32 %v1452_v12, %v759_v29  ;;  %865 = vst [vmem:[%s1600_s3 + $0x58] sm:$0xff] %v833_v57  ;;  %v775_v15 = vld [vmem:[#allocation2 + $0xe8] sm:$0xff]  ;;  %870 = vst [vmem:[%s1600_s3 + $0x80] sm:$0xff] %v838_v16  ;;  %v817_v29 = vadd.f32 %v1452_v12, %v773_v13  ;;  %v818_v30 = vadd.f32 %v1450_v11, %v774_v14 }
 0x17a   : > { %v834_v60 = vmax.f32 %v802_v47, 0.0  ;;  %873 = vst [vmem:[%s1600_s3 + $0x98] sm:$0xff] %v841_v19  ;;  %874 = vst [vmem:[%s1600_s3 + $0xa0] sm:$0xff] %v842_v22  ;;  %v819_v31 = vadd.f32 %v1452_v12, %v775_v15  ;;  %v848_v36 = vmax.f32 %v816_v28, 0.0 }
 0x17b   : > { %v760_v34 = vld [vmem:[#allocation2 + $0x70] sm:$0xff]  ;;  %v835_v61 = vmax.f32 %v803_v48, 0.0  ;;  %875 = vst [vmem:[%s1600_s3 + $0xa8] sm:$0xff] %v843_v23  ;;  %876 = vst [vmem:[%s1600_s3 + $0xb0] sm:$0xff] %v844_v24  ;;  %v849_v37 = vmax.f32 %v817_v29, 0.0  ;;  %v850_v38 = vmax.f32 %v818_v30, 0.0 }
 0x17c   : > { %v761_v35 = vld [vmem:[#allocation2 + $0x78] sm:$0xff]  ;;  %v804_v49 = vadd.f32 %v1450_v11, %v760_v34  ;;  %866 = vst [vmem:[%s1600_s3 + $0x60] sm:$0xff] %v834_v60  ;;  %v776_v20 = vld [vmem:[#allocation2 + $0xf0] sm:$0xff]  ;;  %877 = vst [vmem:[%s1600_s3 + $0xb8] sm:$0xff] %v845_v25  ;;  %v846_v34 = vmax.f32 %v814_v26, 0.0  ;;  %v851_v39 = vmax.f32 %v819_v31, 0.0 }
 0x17d   : > { %v805_v50 = vadd.f32 %v1452_v12, %v761_v35  ;;  %867 = vst [vmem:[%s1600_s3 + $0x68] sm:$0xff] %v835_v61  ;;  %v777_v21 = vld [vmem:[#allocation2 + $0xf8] sm:$0xff]  ;;  %v820_v32 = vadd.f32 %v1450_v11, %v776_v20  ;;  %v847_v35 = vmax.f32 %v815_v27, 0.0  ;;  %880 = vst [vmem:[%s1600_s3 + $0xd0] sm:$0xff] %v848_v36 }
 0x17e   : > { %v836_v62 = vmax.f32 %v804_v49, 0.0  ;;  %v821_v33 = vadd.f32 %v1452_v12, %v777_v21  ;;  %878 = vst [vmem:[%s1600_s3 + $0xc0] sm:$0xff] %v846_v34  ;;  %881 = vst [vmem:[%s1600_s3 + $0xd8] sm:$0xff] %v849_v37 }
 0x17f   : > { %v837_v63 = vmax.f32 %v805_v50, 0.0  ;;  %v852_v40 = vmax.f32 %v820_v32, 0.0  ;;  %879 = vst [vmem:[%s1600_s3 + $0xc8] sm:$0xff] %v847_v35  ;;  %882 = vst [vmem:[%s1600_s3 + $0xe0] sm:$0xff] %v850_v38 }
 0x180   : > { %868 = vst [vmem:[%s1600_s3 + $0x70] sm:$0xff] %v836_v62  ;;  %v853_v41 = vmax.f32 %v821_v33, 0.0  ;;  %883 = vst [vmem:[%s1600_s3 + $0xe8] sm:$0xff] %v851_v39 }
 0x181   : > { %869 = vst [vmem:[%s1600_s3 + $0x78] sm:$0xff] %v837_v63  ;;  %884 = vst [vmem:[%s1600_s3 + $0xf0] sm:$0xff] %v852_v40 }
 0x182   : > { %885 = vst [vmem:[%s1600_s3 + $0xf8] sm:$0xff] %v853_v41 }
 0x183 PF: > { %s13_s16 = sadd.s32 1, %s1204_s16   ;;  %s1601_s12 = smov %s1192_s13 }
 0x184   : > { %p10_p12 = scmp.ge.s32.totalorder %s13_s16, 11   ;;  %s1602_s13 = smov %s1262_s20 }
 0x185   : > { %s1603_s14 = smov %s1200_s15  ;;  %s1604_s15 = smov %s1606_s17 }
 0x186   :  { %12 = sbr.rel (!%p10_p12) target bundleno = 3 (0x3), region = 104 }

// kernel: _pallas_forward.33
= control target key start
LH: loop header
LB: loop body
LE: loop exit
PB: predicated region body
PF: predicated region fallthrough
CT: control target
= control target key end

     0   :  { %s2130_s0 = inlined_call_operand.vmem [shape: f32[128,2304], index: 0, kind: input, shape index: {}]   ;;  %s2131_s1 = inlined_call_operand.vmem [shape: f32[2304,512], index: 1, kind: input, shape index: {}]   ;;  %s2132_s2 = inlined_call_operand.vmem [shape: f32[1,512], index: 2, kind: input, shape index: {}]   ;;  %s2133_s3 = inlined_call_operand.vmem [shape: f32[128,512], index: 3, kind: output, shape index: {}]  }
   0x1   :  { %2135 = sst [smem:[#allocation7_spill]] %s2130_s0 }
   0x2   :  { %2136 = sst [smem:[#allocation8_spill]] %s2131_s1 }
   0x3   :  { %s1522_s12 = smov 0   ;;  %s1524_s13 = smov 0  }
   0x4   :  { %s1526_s14 = smov 0   ;;  %s1528_s15 = smov 0  }
   0x5   :  { %s1530_s16 = smov 0   ;;  %s1532_s17 = smov 0  }
   0x6   :  { %s1534_s18 = smov 0   ;;  %s1536_s19 = smov 0  }
   0x7   :  { %s1538_s20 = smov 0   ;;  %s1540_s21 = smov 0  }
   0x8   :  { %s1542_s22 = smov 0  }
   0x9 LB: > { %s1201_s23 = sadd.s32 4294967295, %s1499_s22   ;;  %s25_s24 = sadd.s32 1, %s1491_s20  ;;  %s1499_s22 = sphi %s1542_s22, %s13_s22   ;;  %s1495_s21 = sphi %s1540_s21, %s2153_s21   ;;  %s1491_s20 = sphi %s1538_s20, %s2152_s20   ;;  %s1487_s19 = sphi %s1536_s19, %s2151_s19   ;;  %s1483_s18 = sphi %s1534_s18, %s2150_s18   ;;  %s1479_s17 = sphi %s1532_s17, %s2149_s17   ;;  %s1475_s16 = sphi %s1530_s16, %s2148_s16   ;;  %s1471_s15 = sphi %s1528_s15, %s2147_s15   ;;  %s1467_s14 = sphi %s1526_s14, %s2146_s14   ;;  %s1463_s13 = sphi %s1524_s13, %s2145_s13   ;;  %s1459_s12 = sphi %s1522_s12, %s2144_s12  }
   0xa   : > { %p26_p0 = scmp.ge.s32.totalorder %s25_s24, 9  ;;  %s28_s25 = sadd.s32 1, %s1495_s21 }
   0xb   : > { %s41_s26 = sadd.s32 1, %s1479_s17  ;;  %p48_p1 = scmp.ne.s32.totalorder %s1479_s17, %s1475_s16 }
   0xc   : > { %s2155_s24 = smov (%p26_p0, %s25_s24), 0  ;;  %s2157_s25 = smov (!%p26_p0, %s28_s25), %s1495_s21 }
   0xd   : > { %s37_s27 = ssub.s32 %s1491_s20, %s2155_s24  ;;  %p49_p2 = scmp.eq.s32.totalorder %s1499_s22, 0 }
   0xe   : > { %p30_p3 = scmp.ge.s32.totalorder %s2157_s25, 2  ;;  %p39_p4 = scmp.eq.s32.totalorder %s37_s27, 0 }
   0xf   : > { %p1589_p5 = por %p49_p2, %p48_p1  ;;  %s69_s29 = sadd.s32 1, %s1471_s15 }
  0x10   : > { %s2159_s25 = smov (%p30_p3, %s2157_s25), 0  ;;  %p76_p6 = scmp.ne.s32.totalorder %s1471_s15, %s1467_s14 }
  0x11   : > { %2138 = sst [smem:[#allocation6_spill]] %s2159_s25  ;;  %s65_s4 = ssub.s32 %s1495_s21, %s2159_s25 }
  0x12   : > { %s1597_s30 = scalar_select %p39_p4, %s1479_s17, %s41_s26  }
  0x13   : > { %s66_s5 = sor.u32 %s65_s4, %s37_s27  ;;  %p121_p7 = scmp.eq.s32.totalorder %s65_s4, 0 }
  0x14   : > { %p67_p8 = scmp.eq.s32.totalorder %s66_s5, 0  ;;  %p1603_p9 = por %p76_p6, %p49_p2 }
  0x15   : > { %s123_s7 = sadd.s32 1, %s1463_s13  ;;  %p133_p10 = scmp.ne.s32.totalorder %s1463_s13, %s1459_s12 }
  0x16   : > { %s1611_s8 = scalar_select %p67_p8, %s1471_s15, %s69_s29  }
  0x17   : > { %s1614_s9 = scalar_select %p121_p7, %s1463_s13, %s123_s7  }
  0x18   : > { %p134_p11 = scmp.eq.s32.totalorder %s1201_s23, 17  ;;  %p1204_p13 = scmp.ge.s32.totalorder %s1499_s22, 18 }
  0x1a   : > { %p1616_p12 = por %p134_p11, %p133_p10  ;;  %156 = sbr.rel (%p1204_p13) target bundleno = 101 (0x65), region = 16 }
  0x21   : > { %159 = sbr.rel (!%p1589_p5) target bundleno = 59 (0x3b), region = 20  ;;  %s161_s11 = sand.u32 (%p1589_p5), 1, %s1479_s17  }
  0x22   : > { %s1225_s26 = sshll.u32 (%p1589_p5), %s1491_s20, 4  ;;  %s1205_s27 = sshll.u32 (%p1589_p5), %s161_s11, 8 }
  0x23   : > { %s2141_s0 = sld [smem:[#allocation7_spill]] (%p1589_p5)  ;;  %s1633_s23 = scalar_lea.vmem (%p1589_p5), [#allocation3], %s1205_s27 }
  0x29   : > { %s1628_s5 = scalar_lea.vmem %s2141_s0, %s1225_s26 }
  0x2a   : > { %v182_v0 = vld [vmem:[%s1628_s5] sm:$0xff]  ;;  %v184_v1 = vld [vmem:[%s1628_s5 + $0x8] sm:$0xff]  ;;  %v186_v2 = vld [vmem:[%s1628_s5 + $0x90] sm:$0xff] }
  0x2b   : > { %183 = vst [vmem:[%s1633_s23] sm:$0xff] %v182_v0  ;;  %185 = vst [vmem:[%s1633_s23 + $0x8] sm:$0xff] %v184_v1  ;;  %v188_v3 = vld [vmem:[%s1628_s5 + $0x98] sm:$0xff]  ;;  %v190_v4 = vld [vmem:[%s1628_s5 + $0x120] sm:$0xff] }
  0x2c   : > { %187 = vst [vmem:[%s1633_s23 + $0x10] sm:$0xff] %v186_v2  ;;  %v192_v5 = vld [vmem:[%s1628_s5 + $0x128] sm:$0xff]  ;;  %189 = vst [vmem:[%s1633_s23 + $0x18] sm:$0xff] %v188_v3  ;;  %v194_v6 = vld [vmem:[%s1628_s5 + $0x1b0] sm:$0xff] }
  0x2d   : > { %191 = vst [vmem:[%s1633_s23 + $0x20] sm:$0xff] %v190_v4  ;;  %193 = vst [vmem:[%s1633_s23 + $0x28] sm:$0xff] %v192_v5  ;;  %v196_v7 = vld [vmem:[%s1628_s5 + $0x1b8] sm:$0xff]  ;;  %v198_v8 = vld [vmem:[%s1628_s5 + $0x240] sm:$0xff] }
  0x2e   : > { %195 = vst [vmem:[%s1633_s23 + $0x30] sm:$0xff] %v194_v6  ;;  %197 = vst [vmem:[%s1633_s23 + $0x38] sm:$0xff] %v196_v7  ;;  %v200_v9 = vld [vmem:[%s1628_s5 + $0x248] sm:$0xff]  ;;  %v202_v10 = vld [vmem:[%s1628_s5 + $0x2d0] sm:$0xff] }
  0x2f   : > { %199 = vst [vmem:[%s1633_s23 + $0x40] sm:$0xff] %v198_v8  ;;  %v204_v11 = vld [vmem:[%s1628_s5 + $0x2d8] sm:$0xff]  ;;  %201 = vst [vmem:[%s1633_s23 + $0x48] sm:$0xff] %v200_v9  ;;  %v206_v12 = vld [vmem:[%s1628_s5 + $0x360] sm:$0xff] }
  0x30   : > { %203 = vst [vmem:[%s1633_s23 + $0x50] sm:$0xff] %v202_v10  ;;  %205 = vst [vmem:[%s1633_s23 + $0x58] sm:$0xff] %v204_v11  ;;  %v208_v13 = vld [vmem:[%s1628_s5 + $0x368] sm:$0xff]  ;;  %v210_v14 = vld [vmem:[%s1628_s5 + $0x3f0] sm:$0xff] }
  0x31   : > { %207 = vst [vmem:[%s1633_s23 + $0x60] sm:$0xff] %v206_v12  ;;  %209 = vst [vmem:[%s1633_s23 + $0x68] sm:$0xff] %v208_v13  ;;  %v212_v15 = vld [vmem:[%s1628_s5 + $0x3f8] sm:$0xff]  ;;  %v214_v16 = vld [vmem:[%s1628_s5 + $0x480] sm:$0xff] }
  0x32   : > { %211 = vst [vmem:[%s1633_s23 + $0x70] sm:$0xff] %v210_v14  ;;  %v216_v17 = vld [vmem:[%s1628_s5 + $0x488] sm:$0xff]  ;;  %213 = vst [vmem:[%s1633_s23 + $0x78] sm:$0xff] %v212_v15  ;;  %v218_v18 = vld [vmem:[%s1628_s5 + $0x510] sm:$0xff] }
  0x33   : > { %215 = vst [vmem:[%s1633_s23 + $0x80] sm:$0xff] %v214_v16  ;;  %217 = vst [vmem:[%s1633_s23 + $0x88] sm:$0xff] %v216_v17  ;;  %v220_v19 = vld [vmem:[%s1628_s5 + $0x518] sm:$0xff]  ;;  %v222_v20 = vld [vmem:[%s1628_s5 + $0x5a0] sm:$0xff] }
  0x34   : > { %219 = vst [vmem:[%s1633_s23 + $0x90] sm:$0xff] %v218_v18  ;;  %221 = vst [vmem:[%s1633_s23 + $0x98] sm:$0xff] %v220_v19  ;;  %v224_v21 = vld [vmem:[%s1628_s5 + $0x5a8] sm:$0xff]  ;;  %v226_v22 = vld [vmem:[%s1628_s5 + $0x630] sm:$0xff] }
  0x35   : > { %223 = vst [vmem:[%s1633_s23 + $0xa0] sm:$0xff] %v222_v20  ;;  %v228_v23 = vld [vmem:[%s1628_s5 + $0x638] sm:$0xff]  ;;  %225 = vst [vmem:[%s1633_s23 + $0xa8] sm:$0xff] %v224_v21  ;;  %v230_v24 = vld [vmem:[%s1628_s5 + $0x6c0] sm:$0xff] }
  0x36   : > { %227 = vst [vmem:[%s1633_s23 + $0xb0] sm:$0xff] %v226_v22  ;;  %229 = vst [vmem:[%s1633_s23 + $0xb8] sm:$0xff] %v228_v23  ;;  %v232_v25 = vld [vmem:[%s1628_s5 + $0x6c8] sm:$0xff]  ;;  %v234_v26 = vld [vmem:[%s1628_s5 + $0x750] sm:$0xff] }
  0x37   : > { %231 = vst [vmem:[%s1633_s23 + $0xc0] sm:$0xff] %v230_v24  ;;  %233 = vst [vmem:[%s1633_s23 + $0xc8] sm:$0xff] %v232_v25  ;;  %v236_v27 = vld [vmem:[%s1628_s5 + $0x758] sm:$0xff]  ;;  %v238_v28 = vld [vmem:[%s1628_s5 + $0x7e0] sm:$0xff] }
  0x38   : > { %235 = vst [vmem:[%s1633_s23 + $0xd0] sm:$0xff] %v234_v26  ;;  %v240_v29 = vld [vmem:[%s1628_s5 + $0x7e8] sm:$0xff]  ;;  %237 = vst [vmem:[%s1633_s23 + $0xd8] sm:$0xff] %v236_v27  ;;  %v242_v30 = vld [vmem:[%s1628_s5 + $0x870] sm:$0xff] }
  0x39   : > { %239 = vst [vmem:[%s1633_s23 + $0xe0] sm:$0xff] %v238_v28  ;;  %241 = vst [vmem:[%s1633_s23 + $0xe8] sm:$0xff] %v240_v29  ;;  %v244_v31 = vld [vmem:[%s1628_s5 + $0x878] sm:$0xff] }
  0x3a   : > { %243 = vst [vmem:[%s1633_s23 + $0xf0] sm:$0xff] %v242_v30  ;;  %245 = vst [vmem:[%s1633_s23 + $0xf8] sm:$0xff] %v244_v31 }
  0x3b PF: > { %251 = sbr.rel (!%p1603_p9) target bundleno = 101 (0x65), region = 43  ;;  %s253_s28 = sand.u32 (%p1603_p9), 1, %s1471_s15  }
  0x3c   : > { %s1210_s7 = sshll.u32 (%p1603_p9), %s1495_s21, 1  ;;  %s1208_s11 = sshll.u32 (%p1603_p9), %s253_s28, 9 }
  0x3d   : > { %s1226_s26 = sshll.u32 (%p1603_p9), %s1491_s20, 7  ;;  %s2142_s1 = sld [smem:[#allocation8_spill]] (%p1603_p9) }
  0x3e   : > { %s259_s27 = sadd.s32 (%p1603_p9), %s1226_s26, %s1210_s7  ;;  %s1709_s6 = scalar_lea.vmem (%p1603_p9), [#allocation4], %s1208_s11 }
  0x3f   : > { %s1212_s29 = sshll.u32 (%p1603_p9), %s259_s27, 3 }
  0x43   : > { %s1704_s25 = scalar_lea.vmem %s2142_s1, %s1212_s29 }
  0x44   : > { %v274_v32 = vld [vmem:[%s1704_s25] sm:$0xff]  ;;  %v276_v33 = vld [vmem:[%s1704_s25 + $0x8] sm:$0xff] }
  0x45   : > { %v278_v34 = vld [vmem:[%s1704_s25 + $0x20] sm:$0xff]  ;;  %275 = vst [vmem:[%s1709_s6] sm:$0xff] %v274_v32  ;;  %277 = vst [vmem:[%s1709_s6 + $0x8] sm:$0xff] %v276_v33  ;;  %v280_v35 = vld [vmem:[%s1704_s25 + $0x28] sm:$0xff] }
  0x46   : > { %279 = vst [vmem:[%s1709_s6 + $0x10] sm:$0xff] %v278_v34  ;;  %v282_v36 = vld [vmem:[%s1704_s25 + $0x40] sm:$0xff]  ;;  %v284_v37 = vld [vmem:[%s1704_s25 + $0x48] sm:$0xff]  ;;  %281 = vst [vmem:[%s1709_s6 + $0x18] sm:$0xff] %v280_v35 }
  0x47   : > { %283 = vst [vmem:[%s1709_s6 + $0x20] sm:$0xff] %v282_v36  ;;  %285 = vst [vmem:[%s1709_s6 + $0x28] sm:$0xff] %v284_v37  ;;  %v286_v38 = vld [vmem:[%s1704_s25 + $0x60] sm:$0xff]  ;;  %v288_v39 = vld [vmem:[%s1704_s25 + $0x68] sm:$0xff] }
  0x48   : > { %v290_v40 = vld [vmem:[%s1704_s25 + $0x80] sm:$0xff]  ;;  %287 = vst [vmem:[%s1709_s6 + $0x30] sm:$0xff] %v286_v38  ;;  %289 = vst [vmem:[%s1709_s6 + $0x38] sm:$0xff] %v288_v39  ;;  %v292_v41 = vld [vmem:[%s1704_s25 + $0x88] sm:$0xff] }
  0x49   : > { %291 = vst [vmem:[%s1709_s6 + $0x40] sm:$0xff] %v290_v40  ;;  %v294_v42 = vld [vmem:[%s1704_s25 + $0xa0] sm:$0xff]  ;;  %v296_v43 = vld [vmem:[%s1704_s25 + $0xa8] sm:$0xff]  ;;  %293 = vst [vmem:[%s1709_s6 + $0x48] sm:$0xff] %v292_v41 }
  0x4a   : > { %295 = vst [vmem:[%s1709_s6 + $0x50] sm:$0xff] %v294_v42  ;;  %297 = vst [vmem:[%s1709_s6 + $0x58] sm:$0xff] %v296_v43  ;;  %v298_v44 = vld [vmem:[%s1704_s25 + $0xc0] sm:$0xff]  ;;  %v300_v45 = vld [vmem:[%s1704_s25 + $0xc8] sm:$0xff] }
  0x4b   : > { %v302_v46 = vld [vmem:[%s1704_s25 + $0xe0] sm:$0xff]  ;;  %299 = vst [vmem:[%s1709_s6 + $0x60] sm:$0xff] %v298_v44  ;;  %301 = vst [vmem:[%s1709_s6 + $0x68] sm:$0xff] %v300_v45  ;;  %v304_v47 = vld [vmem:[%s1704_s25 + $0xe8] sm:$0xff] }
  0x4c   : > { %303 = vst [vmem:[%s1709_s6 + $0x70] sm:$0xff] %v302_v46  ;;  %v306_v48 = vld [vmem:[%s1704_s25 + $0x100] sm:$0xff]  ;;  %v308_v49 = vld [vmem:[%s1704_s25 + $0x108] sm:$0xff]  ;;  %305 = vst [vmem:[%s1709_s6 + $0x78] sm:$0xff] %v304_v47 }
  0x4d   : > { %307 = vst [vmem:[%s1709_s6 + $0x80] sm:$0xff] %v306_v48  ;;  %309 = vst [vmem:[%s1709_s6 + $0x88] sm:$0xff] %v308_v49  ;;  %v310_v50 = vld [vmem:[%s1704_s25 + $0x120] sm:$0xff]  ;;  %v312_v51 = vld [vmem:[%s1704_s25 + $0x128] sm:$0xff] }
  0x4e   : > { %v314_v52 = vld [vmem:[%s1704_s25 + $0x140] sm:$0xff]  ;;  %311 = vst [vmem:[%s1709_s6 + $0x90] sm:$0xff] %v310_v50  ;;  %313 = vst [vmem:[%s1709_s6 + $0x98] sm:$0xff] %v312_v51  ;;  %v316_v53 = vld [vmem:[%s1704_s25 + $0x148] sm:$0xff] }
  0x4f   : > { %315 = vst [vmem:[%s1709_s6 + $0xa0] sm:$0xff] %v314_v52  ;;  %v318_v54 = vld [vmem:[%s1704_s25 + $0x160] sm:$0xff]  ;;  %v320_v55 = vld [vmem:[%s1704_s25 + $0x168] sm:$0xff]  ;;  %317 = vst [vmem:[%s1709_s6 + $0xa8] sm:$0xff] %v316_v53 }
  0x50   : > { %319 = vst [vmem:[%s1709_s6 + $0xb0] sm:$0xff] %v318_v54  ;;  %321 = vst [vmem:[%s1709_s6 + $0xb8] sm:$0xff] %v320_v55  ;;  %v322_v56 = vld [vmem:[%s1704_s25 + $0x180] sm:$0xff]  ;;  %v324_v57 = vld [vmem:[%s1704_s25 + $0x188] sm:$0xff] }
  0x51   : > { %v326_v58 = vld [vmem:[%s1704_s25 + $0x1a0] sm:$0xff]  ;;  %323 = vst [vmem:[%s1709_s6 + $0xc0] sm:$0xff] %v322_v56  ;;  %325 = vst [vmem:[%s1709_s6 + $0xc8] sm:$0xff] %v324_v57  ;;  %v328_v59 = vld [vmem:[%s1704_s25 + $0x1a8] sm:$0xff] }
  0x52   : > { %327 = vst [vmem:[%s1709_s6 + $0xd0] sm:$0xff] %v326_v58  ;;  %v330_v60 = vld [vmem:[%s1704_s25 + $0x1c0] sm:$0xff]  ;;  %v332_v61 = vld [vmem:[%s1704_s25 + $0x1c8] sm:$0xff]  ;;  %329 = vst [vmem:[%s1709_s6 + $0xd8] sm:$0xff] %v328_v59 }
  0x53   : > { %331 = vst [vmem:[%s1709_s6 + $0xe0] sm:$0xff] %v330_v60  ;;  %333 = vst [vmem:[%s1709_s6 + $0xe8] sm:$0xff] %v332_v61  ;;  %v334_v62 = vld [vmem:[%s1704_s25 + $0x1e0] sm:$0xff]  ;;  %v336_v63 = vld [vmem:[%s1704_s25 + $0x1e8] sm:$0xff] }
  0x54   : > { %v338_v0 = vld [vmem:[%s1704_s25 + $0x200] sm:$0xff]  ;;  %335 = vst [vmem:[%s1709_s6 + $0xf0] sm:$0xff] %v334_v62  ;;  %337 = vst [vmem:[%s1709_s6 + $0xf8] sm:$0xff] %v336_v63  ;;  %v340_v1 = vld [vmem:[%s1704_s25 + $0x208] sm:$0xff] }
  0x55   : > { %339 = vst [vmem:[%s1709_s6 + $0x100] sm:$0xff] %v338_v0  ;;  %v342_v2 = vld [vmem:[%s1704_s25 + $0x220] sm:$0xff]  ;;  %v344_v3 = vld [vmem:[%s1704_s25 + $0x228] sm:$0xff]  ;;  %341 = vst [vmem:[%s1709_s6 + $0x108] sm:$0xff] %v340_v1 }
  0x56   : > { %343 = vst [vmem:[%s1709_s6 + $0x110] sm:$0xff] %v342_v2  ;;  %345 = vst [vmem:[%s1709_s6 + $0x118] sm:$0xff] %v344_v3  ;;  %v346_v4 = vld [vmem:[%s1704_s25 + $0x240] sm:$0xff]  ;;  %v348_v5 = vld [vmem:[%s1704_s25 + $0x248] sm:$0xff] }
  0x57   : > { %v350_v6 = vld [vmem:[%s1704_s25 + $0x260] sm:$0xff]  ;;  %347 = vst [vmem:[%s1709_s6 + $0x120] sm:$0xff] %v346_v4  ;;  %349 = vst [vmem:[%s1709_s6 + $0x128] sm:$0xff] %v348_v5  ;;  %v352_v7 = vld [vmem:[%s1704_s25 + $0x268] sm:$0xff] }
  0x58   : > { %351 = vst [vmem:[%s1709_s6 + $0x130] sm:$0xff] %v350_v6  ;;  %v354_v8 = vld [vmem:[%s1704_s25 + $0x280] sm:$0xff]  ;;  %v356_v9 = vld [vmem:[%s1704_s25 + $0x288] sm:$0xff]  ;;  %353 = vst [vmem:[%s1709_s6 + $0x138] sm:$0xff] %v352_v7 }
  0x59   : > { %355 = vst [vmem:[%s1709_s6 + $0x140] sm:$0xff] %v354_v8  ;;  %357 = vst [vmem:[%s1709_s6 + $0x148] sm:$0xff] %v356_v9  ;;  %v358_v10 = vld [vmem:[%s1704_s25 + $0x2a0] sm:$0xff]  ;;  %v360_v11 = vld [vmem:[%s1704_s25 + $0x2a8] sm:$0xff] }
  0x5a   : > { %v362_v12 = vld [vmem:[%s1704_s25 + $0x2c0] sm:$0xff]  ;;  %359 = vst [vmem:[%s1709_s6 + $0x150] sm:$0xff] %v358_v10  ;;  %361 = vst [vmem:[%s1709_s6 + $0x158] sm:$0xff] %v360_v11  ;;  %v364_v13 = vld [vmem:[%s1704_s25 + $0x2c8] sm:$0xff] }
  0x5b   : > { %363 = vst [vmem:[%s1709_s6 + $0x160] sm:$0xff] %v362_v12  ;;  %v366_v14 = vld [vmem:[%s1704_s25 + $0x2e0] sm:$0xff]  ;;  %v368_v15 = vld [vmem:[%s1704_s25 + $0x2e8] sm:$0xff]  ;;  %365 = vst [vmem:[%s1709_s6 + $0x168] sm:$0xff] %v364_v13 }
  0x5c   : > { %367 = vst [vmem:[%s1709_s6 + $0x170] sm:$0xff] %v366_v14  ;;  %369 = vst [vmem:[%s1709_s6 + $0x178] sm:$0xff] %v368_v15  ;;  %v370_v16 = vld [vmem:[%s1704_s25 + $0x300] sm:$0xff]  ;;  %v372_v17 = vld [vmem:[%s1704_s25 + $0x308] sm:$0xff] }
  0x5d   : > { %v374_v18 = vld [vmem:[%s1704_s25 + $0x320] sm:$0xff]  ;;  %371 = vst [vmem:[%s1709_s6 + $0x180] sm:$0xff] %v370_v16  ;;  %373 = vst [vmem:[%s1709_s6 + $0x188] sm:$0xff] %v372_v17  ;;  %v376_v19 = vld [vmem:[%s1704_s25 + $0x328] sm:$0xff] }
  0x5e   : > { %375 = vst [vmem:[%s1709_s6 + $0x190] sm:$0xff] %v374_v18  ;;  %v378_v20 = vld [vmem:[%s1704_s25 + $0x340] sm:$0xff]  ;;  %v380_v21 = vld [vmem:[%s1704_s25 + $0x348] sm:$0xff]  ;;  %377 = vst [vmem:[%s1709_s6 + $0x198] sm:$0xff] %v376_v19 }
  0x5f   : > { %379 = vst [vmem:[%s1709_s6 + $0x1a0] sm:$0xff] %v378_v20  ;;  %381 = vst [vmem:[%s1709_s6 + $0x1a8] sm:$0xff] %v380_v21  ;;  %v382_v22 = vld [vmem:[%s1704_s25 + $0x360] sm:$0xff]  ;;  %v384_v23 = vld [vmem:[%s1704_s25 + $0x368] sm:$0xff] }
  0x60   : > { %v386_v24 = vld [vmem:[%s1704_s25 + $0x380] sm:$0xff]  ;;  %383 = vst [vmem:[%s1709_s6 + $0x1b0] sm:$0xff] %v382_v22  ;;  %385 = vst [vmem:[%s1709_s6 + $0x1b8] sm:$0xff] %v384_v23  ;;  %v388_v25 = vld [vmem:[%s1704_s25 + $0x388] sm:$0xff] }
  0x61   : > { %387 = vst [vmem:[%s1709_s6 + $0x1c0] sm:$0xff] %v386_v24  ;;  %v390_v26 = vld [vmem:[%s1704_s25 + $0x3a0] sm:$0xff]  ;;  %v392_v27 = vld [vmem:[%s1704_s25 + $0x3a8] sm:$0xff]  ;;  %389 = vst [vmem:[%s1709_s6 + $0x1c8] sm:$0xff] %v388_v25 }
  0x62   : > { %391 = vst [vmem:[%s1709_s6 + $0x1d0] sm:$0xff] %v390_v26  ;;  %393 = vst [vmem:[%s1709_s6 + $0x1d8] sm:$0xff] %v392_v27  ;;  %v394_v28 = vld [vmem:[%s1704_s25 + $0x3c0] sm:$0xff]  ;;  %v396_v29 = vld [vmem:[%s1704_s25 + $0x3c8] sm:$0xff] }
  0x63   : > { %v398_v30 = vld [vmem:[%s1704_s25 + $0x3e0] sm:$0xff]  ;;  %395 = vst [vmem:[%s1709_s6 + $0x1e0] sm:$0xff] %v394_v28  ;;  %397 = vst [vmem:[%s1709_s6 + $0x1e8] sm:$0xff] %v396_v29  ;;  %v400_v31 = vld [vmem:[%s1704_s25 + $0x3e8] sm:$0xff] }
  0x64   : > { %399 = vst [vmem:[%s1709_s6 + $0x1f0] sm:$0xff] %v398_v30  ;;  %401 = vst [vmem:[%s1709_s6 + $0x1f8] sm:$0xff] %v400_v31 }
  0x65 PF: > { %p1213_p0 = scmp.ge.s32.totalorder %s1499_s22, 1  ;;  %p414_p1 = scmp.lt.s32.totalorder %s1499_s22, 19 }
  0x67   : > { %p415_p2 = pnand %p1213_p0, %p414_p1 }
  0x68   : > { %s421_s0 = sand.u32 (!%p415_p2), 1, %s1475_s16   ;;  %s428_s5 = sand.u32 (!%p415_p2), 1, %s1467_s14  }
  0x69   : > { %418 = sbr.rel (%p415_p2) target bundleno = 472 (0x1d8), region = 70  ;;  %s1214_s23 = sshll.u32 (!%p415_p2), %s421_s0, 8 }
  0x6a   : > { %s1215_s28 = sshll.u32 (!%p415_p2), %s428_s5, 9  ;;  %s455_s7 = sand.u32 (!%p415_p2), 1, %s1459_s12  }
  0x6b   : > { %s1217_s11 = sshll.u32 (!%p415_p2), %s1487_s19, 1  ;;  %s1216_s25 = sshll.u32 (!%p415_p2), %s455_s7, 8 }
  0x6c   : > { %p463_p3 = scmp.lt.s32.totalorder (!%p415_p2), %s1217_s11, 3  ;;  %s1848_s4 = scalar_lea.vmem (!%p415_p2), [#allocation3], %s1214_s23 }
  0x6d   : > { %s1850_s6 = scalar_lea.vmem (!%p415_p2), [#allocation4], %s1215_s28  ;;  %s1852_s1 = scalar_lea.vmem (!%p415_p2), [#allocation5], %s1216_s25 }
  0x6e   : > { %p1218_p4 = scmp.ne.s32.totalorder (!%p415_p2), %s1483_s18, 0 }
  0x70   : > { %s2161_s11 = smov (!%p463_p3, %s1217_s11), 3  ;;  %472 = sbr.rel (%p1218_p4) target bundleno = 130 (0x82), region = 82 }
  0x71   : > { %s465_s29 = scalar_lea.vmem %s2132_s2, %s2161_s11  ;;  %v1501_v32 = vmov (!%p1218_p4), 0.0  }
  0x72   : > { %473 = vst [vmem:[#allocation2] sm:$0xff] (!%p1218_p4), %v1501_v32  ;;  %474 = vst [vmem:[#allocation2 + $0x8] sm:$0xff] (!%p1218_p4), %v1501_v32 }
  0x73   : > { %475 = vst [vmem:[#allocation2 + $0x10] sm:$0xff] (!%p1218_p4), %v1501_v32  ;;  %476 = vst [vmem:[#allocation2 + $0x18] sm:$0xff] (!%p1218_p4), %v1501_v32 }
  0x74   : > { %477 = vst [vmem:[#allocation2 + $0x20] sm:$0xff] (!%p1218_p4), %v1501_v32  ;;  %478 = vst [vmem:[#allocation2 + $0x28] sm:$0xff] (!%p1218_p4), %v1501_v32 }
  0x75   : > { %479 = vst [vmem:[#allocation2 + $0x30] sm:$0xff] (!%p1218_p4), %v1501_v32  ;;  %480 = vst [vmem:[#allocation2 + $0x38] sm:$0xff] (!%p1218_p4), %v1501_v32 }
  0x76   : > { %481 = vst [vmem:[#allocation2 + $0x40] sm:$0xff] (!%p1218_p4), %v1501_v32  ;;  %482 = vst [vmem:[#allocation2 + $0x48] sm:$0xff] (!%p1218_p4), %v1501_v32 }
  0x77   : > { %483 = vst [vmem:[#allocation2 + $0x50] sm:$0xff] %v1501_v32  ;;  %484 = vst [vmem:[#allocation2 + $0x58] sm:$0xff] %v1501_v32 }
  0x78   : > { %485 = vst [vmem:[#allocation2 + $0x60] sm:$0xff] %v1501_v32  ;;  %486 = vst [vmem:[#allocation2 + $0x68] sm:$0xff] %v1501_v32 }
  0x79   : > { %487 = vst [vmem:[#allocation2 + $0x70] sm:$0xff] %v1501_v32  ;;  %488 = vst [vmem:[#allocation2 + $0x78] sm:$0xff] %v1501_v32 }
  0x7a   : > { %489 = vst [vmem:[#allocation2 + $0x80] sm:$0xff] %v1501_v32  ;;  %490 = vst [vmem:[#allocation2 + $0x88] sm:$0xff] %v1501_v32 }
  0x7b   : > { %491 = vst [vmem:[#allocation2 + $0x90] sm:$0xff] %v1501_v32  ;;  %492 = vst [vmem:[#allocation2 + $0x98] sm:$0xff] %v1501_v32 }
  0x7c   : > { %493 = vst [vmem:[#allocation2 + $0xa0] sm:$0xff] %v1501_v32  ;;  %494 = vst [vmem:[#allocation2 + $0xa8] sm:$0xff] %v1501_v32 }
  0x7d   : > { %495 = vst [vmem:[#allocation2 + $0xb0] sm:$0xff] %v1501_v32  ;;  %496 = vst [vmem:[#allocation2 + $0xb8] sm:$0xff] %v1501_v32 }
  0x7e   : > { %497 = vst [vmem:[#allocation2 + $0xc0] sm:$0xff] %v1501_v32  ;;  %498 = vst [vmem:[#allocation2 + $0xc8] sm:$0xff] %v1501_v32 }
  0x7f   : > { %499 = vst [vmem:[#allocation2 + $0xd0] sm:$0xff] %v1501_v32  ;;  %500 = vst [vmem:[#allocation2 + $0xd8] sm:$0xff] %v1501_v32 }
  0x80   : > { %501 = vst [vmem:[#allocation2 + $0xe0] sm:$0xff] %v1501_v32  ;;  %502 = vst [vmem:[#allocation2 + $0xe8] sm:$0xff] %v1501_v32 }
  0x81   : > { %503 = vst [vmem:[#allocation2 + $0xf0] sm:$0xff] %v1501_v32  ;;  %504 = vst [vmem:[#allocation2 + $0xf8] sm:$0xff] %v1501_v32 }
  0x82 PF: > { %v570_v33 = vld [vmem:[%s1850_s6 + $0x8] sm:$0xff]  ;;  %v572_v34 = vld [vmem:[%s1850_s6 + $0x18] sm:$0xff]  ;;  %v569_v35 = vld [vmem:[%s1850_s6] sm:$0xff]  ;;  %p1219_p5 = scmp.ne.s32.totalorder %s1483_s18, 8 }
  0x83   : > { %v1228_v36 = vpack.c.bf16 %v572_v34, %v570_v33  ;;  %v571_v37 = vld [vmem:[%s1850_s6 + $0x10] sm:$0xff]  ;;  %v574_v38 = vld [vmem:[%s1850_s6 + $0x28] sm:$0xff]  ;;  %v576_v39 = vld [vmem:[%s1850_s6 + $0x38] sm:$0xff] }
  0x84   : > { %v1230_v40 = vpack.c.bf16 %v571_v37, %v569_v35  ;;  %v1232_v41 = vpack.c.bf16 %v576_v39, %v574_v38  ;;  %v573_v42 = vld [vmem:[%s1850_s6 + $0x20] sm:$0xff]  ;;  %v575_v43 = vld [vmem:[%s1850_s6 + $0x30] sm:$0xff]  ;;  %v578_v44 = vld [vmem:[%s1850_s6 + $0x48] sm:$0xff] }
  0x85   : > { %1229 = vmatprep.subr.bf16.mxu0 %v1228_v36  ;;  %1292 = vmatprep.subr.bf16.mxu1 %v1228_v36  ;;  %v580_v45 = vld [vmem:[%s1850_s6 + $0x58] sm:$0xff]  ;;  %v1234_v46 = vpack.c.bf16 %v575_v43, %v573_v42  ;;  %v577_v48 = vld [vmem:[%s1850_s6 + $0x40] sm:$0xff]  ;;  %v579_v49 = vld [vmem:[%s1850_s6 + $0x50] sm:$0xff] }
  0x86   : > { %1231 = vmatpush1.bf16.msra.mxu0 %v1230_v40  ;;  %1308 = vmatpush1.bf16.msra.mxu1 %v1230_v40  ;;  %v1236_v47 = vpack.c.bf16 %v580_v45, %v578_v44  ;;  %v582_v50 = vld [vmem:[%s1850_s6 + $0x68] sm:$0xff]  ;;  %v584_v51 = vld [vmem:[%s1850_s6 + $0x78] sm:$0xff]  ;;  %v1238_v52 = vpack.c.bf16 %v579_v49, %v577_v48  ;;  %v581_v54 = vld [vmem:[%s1850_s6 + $0x60] sm:$0xff] }
  0x87   : > { %1233 = vmatprep.subr.bf16.mxu0 %v1232_v41  ;;  %1293 = vmatprep.subr.bf16.mxu1 %v1232_v41  ;;  %v1240_v53 = vpack.c.bf16 %v584_v51, %v582_v50  ;;  %v583_v55 = vld [vmem:[%s1850_s6 + $0x70] sm:$0xff]  ;;  %v586_v56 = vld [vmem:[%s1850_s6 + $0x88] sm:$0xff]  ;;  %v588_v57 = vld [vmem:[%s1850_s6 + $0x98] sm:$0xff] }
  0x88   : > { %v1242_v58 = vpack.c.bf16 %v583_v55, %v581_v54  ;;  %v1244_v59 = vpack.c.bf16 %v588_v57, %v586_v56  ;;  %v585_v60 = vld [vmem:[%s1850_s6 + $0x80] sm:$0xff]  ;;  %v587_v61 = vld [vmem:[%s1850_s6 + $0x90] sm:$0xff]  ;;  %v590_v62 = vld [vmem:[%s1850_s6 + $0xa8] sm:$0xff] }
  0x89   : > { %v592_v63 = vld [vmem:[%s1850_s6 + $0xb8] sm:$0xff]  ;;  %v1246_v0 = vpack.c.bf16 %v587_v61, %v585_v60  ;;  %v589_v2 = vld [vmem:[%s1850_s6 + $0xa0] sm:$0xff]  ;;  %v591_v3 = vld [vmem:[%s1850_s6 + $0xb0] sm:$0xff] }
  0x8a   : > { %1235 = vmatpush1.bf16.msra.mxu0 %v1234_v46  ;;  %1309 = vmatpush1.bf16.msra.mxu1 %v1234_v46  ;;  %v1248_v1 = vpack.c.bf16 %v592_v63, %v590_v62  ;;  %v594_v4 = vld [vmem:[%s1850_s6 + $0xc8] sm:$0xff]  ;;  %v596_v5 = vld [vmem:[%s1850_s6 + $0xd8] sm:$0xff]  ;;  %v1250_v6 = vpack.c.bf16 %v591_v3, %v589_v2  ;;  %v593_v7 = vld [vmem:[%s1850_s6 + $0xc0] sm:$0xff] }
  0x8b   : > { %1237 = vmatprep.subr.bf16.mxu0 %v1236_v47  ;;  %1294 = vmatprep.subr.bf16.mxu1 %v1236_v47  ;;  %v1252_v8 = vpack.c.bf16 %v596_v5, %v594_v4  ;;  %v595_v9 = vld [vmem:[%s1850_s6 + $0xd0] sm:$0xff]  ;;  %v538_v10 = vld [vmem:[%s1848_s4 + $0x8] sm:$0xff]  ;;  %v600_v13 = vld [vmem:[%s1850_s6 + $0xf8] sm:$0xff] }
  0x8c   : > { %v554_v11 = vld [vmem:[%s1848_s4 + $0x88] sm:$0xff]  ;;  %697 = vmatprep.mubr.f32.mxu0 %v538_v10  ;;  %v1254_v14 = vpack.c.bf16 %v595_v9, %v593_v7  ;;  %v597_v16 = vld [vmem:[%s1850_s6 + $0xe0] sm:$0xff]  ;;  %v599_v17 = vld [vmem:[%s1850_s6 + $0xf0] sm:$0xff] }
  0x8d   : > { %v598_v12 = vld [vmem:[%s1850_s6 + $0xe8] sm:$0xff]  ;;  %745 = vmatprep.mubr.f32.mxu1 %v554_v11  ;;  %v604_v19 = vld [vmem:[%s1850_s6 + $0x118] sm:$0xff]  ;;  %v1258_v20 = vpack.c.bf16 %v599_v17, %v597_v16  ;;  %v601_v22 = vld [vmem:[%s1850_s6 + $0x100] sm:$0xff] }
  0x8e   : > { %1239 = vmatpush1.bf16.msra.mxu0 %v1238_v52  ;;  %1310 = vmatpush1.bf16.msra.mxu1 %v1238_v52  ;;  %v1256_v15 = vpack.c.bf16 %v600_v13, %v598_v12  ;;  %v602_v18 = vld [vmem:[%s1850_s6 + $0x108] sm:$0xff]  ;;  %v603_v23 = vld [vmem:[%s1850_s6 + $0x110] sm:$0xff]  ;;  %v608_v25 = vld [vmem:[%s1850_s6 + $0x138] sm:$0xff] }
  0x8f   : > { %1241 = vmatprep.subr.bf16.mxu0 %v1240_v53  ;;  %1295 = vmatprep.subr.bf16.mxu1 %v1240_v53  ;;  %v1260_v21 = vpack.c.bf16 %v604_v19, %v602_v18  ;;  %v606_v24 = vld [vmem:[%s1850_s6 + $0x128] sm:$0xff]  ;;  %v1262_v26 = vpack.c.bf16 %v603_v23, %v601_v22  ;;  %v605_v28 = vld [vmem:[%s1850_s6 + $0x120] sm:$0xff]  ;;  %v607_v29 = vld [vmem:[%s1850_s6 + $0x130] sm:$0xff] }
  0x90   : > { %v1264_v27 = vpack.c.bf16 %v608_v25, %v606_v24  ;;  %v610_v30 = vld [vmem:[%s1850_s6 + $0x148] sm:$0xff]  ;;  %v612_v31 = vld [vmem:[%s1850_s6 + $0x158] sm:$0xff]  ;;  %v1266_v32 = vpack.c.bf16 %v607_v29, %v605_v28  ;;  %v609_v34 = vld [vmem:[%s1850_s6 + $0x140] sm:$0xff] }
  0x91   : > { %v1268_v33 = vpack.c.bf16 %v612_v31, %v610_v30  ;;  %v611_v35 = vld [vmem:[%s1850_s6 + $0x150] sm:$0xff]  ;;  %v614_v36 = vld [vmem:[%s1850_s6 + $0x168] sm:$0xff]  ;;  %v616_v37 = vld [vmem:[%s1850_s6 + $0x178] sm:$0xff] }
  0x92   : > { %1243 = vmatpush1.bf16.msra.mxu0 %v1242_v58  ;;  %1311 = vmatpush1.bf16.msra.mxu1 %v1242_v58  ;;  %v1270_v38 = vpack.c.bf16 %v611_v35, %v609_v34  ;;  %v1272_v39 = vpack.c.bf16 %v616_v37, %v614_v36  ;;  %v613_v40 = vld [vmem:[%s1850_s6 + $0x160] sm:$0xff]  ;;  %v615_v41 = vld [vmem:[%s1850_s6 + $0x170] sm:$0xff]  ;;  %v618_v42 = vld [vmem:[%s1850_s6 + $0x188] sm:$0xff] }
  0x93   : > { %1245 = vmatprep.subr.bf16.mxu0 %v1244_v59  ;;  %1296 = vmatprep.subr.bf16.mxu1 %v1244_v59  ;;  %v620_v43 = vld [vmem:[%s1850_s6 + $0x198] sm:$0xff]  ;;  %v1274_v44 = vpack.c.bf16 %v615_v41, %v613_v40  ;;  %v617_v46 = vld [vmem:[%s1850_s6 + $0x180] sm:$0xff]  ;;  %v619_v47 = vld [vmem:[%s1850_s6 + $0x190] sm:$0xff] }
  0x94   : > { %v1276_v45 = vpack.c.bf16 %v620_v43, %v618_v42  ;;  %v622_v48 = vld [vmem:[%s1850_s6 + $0x1a8] sm:$0xff]  ;;  %v624_v49 = vld [vmem:[%s1850_s6 + $0x1b8] sm:$0xff]  ;;  %v1278_v50 = vpack.c.bf16 %v619_v47, %v617_v46  ;;  %v621_v52 = vld [vmem:[%s1850_s6 + $0x1a0] sm:$0xff] }
  0x95   : > { %v1280_v51 = vpack.c.bf16 %v624_v49, %v622_v48  ;;  %v623_v53 = vld [vmem:[%s1850_s6 + $0x1b0] sm:$0xff]  ;;  %v626_v54 = vld [vmem:[%s1850_s6 + $0x1c8] sm:$0xff]  ;;  %v628_v55 = vld [vmem:[%s1850_s6 + $0x1d8] sm:$0xff] }
  0x96   : > { %1247 = vmatpush1.bf16.msra.mxu0 %v1246_v0  ;;  %1312 = vmatpush1.bf16.msra.mxu1 %v1246_v0  ;;  %v1282_v56 = vpack.c.bf16 %v623_v53, %v621_v52  ;;  %v1284_v57 = vpack.c.bf16 %v628_v55, %v626_v54  ;;  %v625_v58 = vld [vmem:[%s1850_s6 + $0x1c0] sm:$0xff]  ;;  %v627_v59 = vld [vmem:[%s1850_s6 + $0x1d0] sm:$0xff]  ;;  %v630_v60 = vld [vmem:[%s1850_s6 + $0x1e8] sm:$0xff] }
  0x97   : > { %1249 = vmatprep.subr.bf16.mxu0 %v1248_v1  ;;  %1297 = vmatprep.subr.bf16.mxu1 %v1248_v1  ;;  %v632_v61 = vld [vmem:[%s1850_s6 + $0x1f8] sm:$0xff]  ;;  %v1286_v62 = vpack.c.bf16 %v627_v59, %v625_v58  ;;  %v629_v0 = vld [vmem:[%s1850_s6 + $0x1e0] sm:$0xff]  ;;  %v631_v1 = vld [vmem:[%s1850_s6 + $0x1f0] sm:$0xff] }
  0x98   : > { %v1288_v63 = vpack.c.bf16 %v632_v61, %v630_v60  ;;  %v1290_v2 = vpack.c.bf16 %v631_v1, %v629_v0  ;;  %v537_v3 = vld [vmem:[%s1848_s4] sm:$0xff]  ;;  %v540_v5 = vld [vmem:[%s1848_s4 + $0x18] sm:$0xff]  ;;  %v539_v7 = vld [vmem:[%s1848_s4 + $0x10] sm:$0xff] }
  0x99   : > { %v553_v4 = vld [vmem:[%s1848_s4 + $0x80] sm:$0xff]  ;;  %v542_v9 = vld [vmem:[%s1848_s4 + $0x28] sm:$0xff]  ;;  %v544_v13 = vld [vmem:[%s1848_s4 + $0x38] sm:$0xff] }
  0x9a   : > { %1251 = vmatpush1.bf16.msra.mxu0 %v1250_v6  ;;  %1313 = vmatpush1.bf16.msra.mxu1 %v1250_v6  ;;  %v556_v6 = vld [vmem:[%s1848_s4 + $0x98] sm:$0xff]  ;;  %v558_v10 = vld [vmem:[%s1848_s4 + $0xa8] sm:$0xff]  ;;  %v541_v11 = vld [vmem:[%s1848_s4 + $0x20] sm:$0xff] }
  0x9b   : > { %1253 = vmatprep.subr.bf16.mxu0 %v1252_v8  ;;  %1298 = vmatprep.subr.bf16.mxu1 %v1252_v8  ;;  %v555_v8 = vld [vmem:[%s1848_s4 + $0x90] sm:$0xff]  ;;  %v557_v12 = vld [vmem:[%s1848_s4 + $0xa0] sm:$0xff]  ;;  %v546_v17 = vld [vmem:[%s1848_s4 + $0x48] sm:$0xff] }
  0x9c   : > { %v559_v16 = vld [vmem:[%s1848_s4 + $0xb0] sm:$0xff]  ;;  %v562_v18 = vld [vmem:[%s1848_s4 + $0xc8] sm:$0xff]  ;;  %v545_v19 = vld [vmem:[%s1848_s4 + $0x40] sm:$0xff] }
  0x9d   : > { %v564_v22 = vld [vmem:[%s1848_s4 + $0xd8] sm:$0xff]  ;;  %v547_v23 = vld [vmem:[%s1848_s4 + $0x50] sm:$0xff]  ;;  %v550_v25 = vld [vmem:[%s1848_s4 + $0x68] sm:$0xff] }
  0x9e   : > { %1255 = vmatpush1.bf16.msra.mxu0 %v1254_v14  ;;  %1314 = vmatpush1.bf16.msra.mxu1 %v1254_v14  ;;  %v560_v14 = vld [vmem:[%s1848_s4 + $0xb8] sm:$0xff]  ;;  %v563_v24 = vld [vmem:[%s1848_s4 + $0xd0] sm:$0xff]  ;;  %v565_v28 = vld [vmem:[%s1848_s4 + $0xe0] sm:$0xff] }
  0x9f   : > { %1257 = vmatprep.subr.bf16.mxu0 %v1256_v15  ;;  %1299 = vmatprep.subr.bf16.mxu1 %v1256_v15  ;;  %v543_v15 = vld [vmem:[%s1848_s4 + $0x30] sm:$0xff]  ;;  %v552_v29 = vld [vmem:[%s1848_s4 + $0x78] sm:$0xff]  ;;  %v521_v34 = vld [vmem:[#allocation2 + $0x80] sm:$0xff] }
  0xa0   : > { %v568_v30 = vld [vmem:[%s1848_s4 + $0xf8] sm:$0xff]  ;;  %v551_v31 = vld [vmem:[%s1848_s4 + $0x70] sm:$0xff]  ;;  %v506_v35 = vld [vmem:[#allocation2 + $0x8] sm:$0xff] }
  0xa1   : > { %v522_v36 = vld [vmem:[#allocation2 + $0x88] sm:$0xff]  ;;  %v523_v46 = vld [vmem:[#allocation2 + $0x90] sm:$0xff]  ;;  %v508_v47 = vld [vmem:[#allocation2 + $0x18] sm:$0xff] }
  0xa2   : > { %1259 = vmatpush1.bf16.msra.mxu0 %v1258_v20  ;;  %1315 = vmatpush1.bf16.msra.mxu1 %v1258_v20  ;;  %v561_v20 = vld [vmem:[%s1848_s4 + $0xc0] sm:$0xff]  ;;  %v524_v48 = vld [vmem:[#allocation2 + $0x98] sm:$0xff]  ;;  %v510_v59 = vld [vmem:[#allocation2 + $0x28] sm:$0xff] }
  0xa3   : > { %1261 = vmatprep.subr.bf16.mxu0 %v1260_v21  ;;  %1300 = vmatprep.subr.bf16.mxu1 %v1260_v21  ;;  %v548_v21 = vld [vmem:[%s1848_s4 + $0x58] sm:$0xff]  ;;  %v525_v58 = vld [vmem:[#allocation2 + $0xa0] sm:$0xff]  ;;  %v526_v60 = vld [vmem:[#allocation2 + $0xa8] sm:$0xff] }
  0xa6   : > { %1263 = vmatpush1.bf16.msra.mxu0 %v1262_v26  ;;  %1316 = vmatpush1.bf16.msra.mxu1 %v1262_v26  ;;  %v566_v26 = vld [vmem:[%s1848_s4 + $0xe8] sm:$0xff] }
  0xa7   : > { %1265 = vmatprep.subr.bf16.mxu0 %v1264_v27  ;;  %1301 = vmatprep.subr.bf16.mxu1 %v1264_v27  ;;  %v549_v27 = vld [vmem:[%s1848_s4 + $0x60] sm:$0xff] }
  0xaa   : > { %1267 = vmatpush1.bf16.msra.mxu0 %v1266_v32  ;;  %1317 = vmatpush1.bf16.msra.mxu1 %v1266_v32  ;;  %v567_v32 = vld [vmem:[%s1848_s4 + $0xf0] sm:$0xff] }
  0xab   : > { %1269 = vmatprep.subr.bf16.mxu0 %v1268_v33  ;;  %1302 = vmatprep.subr.bf16.mxu1 %v1268_v33  ;;  %v505_v33 = vld [vmem:[#allocation2] sm:$0xff] }
  0xae   : > { %1271 = vmatpush1.bf16.msra.mxu0 %v1270_v38  ;;  %1318 = vmatpush1.bf16.msra.mxu1 %v1270_v38 }
  0xaf   : > { %1273 = vmatprep.subr.bf16.mxu0 %v1272_v39  ;;  %1303 = vmatprep.subr.bf16.mxu1 %v1272_v39 }
  0xb2   : > { %1275 = vmatpush1.bf16.msra.mxu0 %v1274_v44  ;;  %1319 = vmatpush1.bf16.msra.mxu1 %v1274_v44 }
  0xb3   : > { %1277 = vmatprep.subr.bf16.mxu0 %v1276_v45  ;;  %1304 = vmatprep.subr.bf16.mxu1 %v1276_v45  ;;  %v507_v45 = vld [vmem:[#allocation2 + $0x10] sm:$0xff] }
  0xb6   : > { %1279 = vmatpush1.bf16.msra.mxu0 %v1278_v50  ;;  %1320 = vmatpush1.bf16.msra.mxu1 %v1278_v50 }
  0xb7   : > { %1281 = vmatprep.subr.bf16.mxu0 %v1280_v51  ;;  %1305 = vmatprep.subr.bf16.mxu1 %v1280_v51 }
  0xba   : > { %1283 = vmatpush1.bf16.msra.mxu0 %v1282_v56  ;;  %1321 = vmatpush1.bf16.msra.mxu1 %v1282_v56 }
  0xbb   : > { %1285 = vmatprep.subr.bf16.mxu0 %v1284_v57  ;;  %1306 = vmatprep.subr.bf16.mxu1 %v1284_v57  ;;  %v509_v57 = vld [vmem:[#allocation2 + $0x20] sm:$0xff] }
  0xbe   : > { %1287 = vmatpush1.bf16.msra.mxu0 %v1286_v62  ;;  %1322 = vmatpush1.bf16.msra.mxu1 %v1286_v62 }
  0xbf   : > { %1289 = vmatprep.subr.bf16.mxu0 %v1288_v63  ;;  %1307 = vmatprep.subr.bf16.mxu1 %v1288_v63 }
  0xc2   : > { %1291 = vmatpush1.bf16.msra.mxu0 %v1290_v2  ;;  %1323 = vmatpush1.bf16.msra.mxu1 %v1290_v2 }
  0xc5   : > { %698 = vmatmul.mubr.f32.vlgmr.msra.gmra.mrb[0].mxu0 %v537_v3  ;;  %746 = vmatmul.mubr.f32.vlgmr.msra.gmra.mrb[0].mxu1 %v553_v4 }
  0xc6   : > { %703 = vmatprep.mubr.f32.mxu0 %v540_v5  ;;  %751 = vmatprep.mubr.f32.mxu1 %v556_v6  ;;  %v511_v5 = vld [vmem:[#allocation2 + $0x30] sm:$0xff] }
  0xc7   : > { %v527_v6 = vld [vmem:[#allocation2 + $0xb0] sm:$0xff] }
  0xc9   : > { %704 = vmatmul.mubr.f32.gmra.mrb[2].mxu0 %v539_v7  ;;  %752 = vmatmul.mubr.f32.gmra.mrb[2].mxu1 %v555_v8  ;;  %v512_v7 = vld [vmem:[#allocation2 + $0x38] sm:$0xff] }
  0xca   : > { %709 = vmatprep.mubr.f32.mxu0 %v542_v9  ;;  %757 = vmatprep.mubr.f32.mxu1 %v558_v10  ;;  %v528_v8 = vld [vmem:[#allocation2 + $0xb8] sm:$0xff] }
  0xcd   : > { %710 = vmatmul.mubr.f32.gmra.mrb[4].mxu0 %v541_v11  ;;  %758 = vmatmul.mubr.f32.gmra.mrb[4].mxu1 %v557_v12 }
  0xce   : > { %715 = vmatprep.mubr.f32.mxu0 %v544_v13  ;;  %763 = vmatprep.mubr.f32.mxu1 %v560_v14 }
  0xd1   : > { %716 = vmatmul.mubr.f32.gmra.mrb[6].mxu0 %v543_v15  ;;  %764 = vmatmul.mubr.f32.gmra.mrb[6].mxu1 %v559_v16 }
  0xd2   : > { %721 = vmatprep.mubr.f32.mxu0 %v546_v17  ;;  %769 = vmatprep.mubr.f32.mxu1 %v562_v18  ;;  %v513_v17 = vld [vmem:[#allocation2 + $0x40] sm:$0xff] }
  0xd3   : > { %v529_v18 = vld [vmem:[#allocation2 + $0xc0] sm:$0xff] }
  0xd5   : > { %722 = vmatmul.mubr.f32.gmra.mrb[8].mxu0 %v545_v19  ;;  %770 = vmatmul.mubr.f32.gmra.mrb[8].mxu1 %v561_v20  ;;  %v514_v19 = vld [vmem:[#allocation2 + $0x48] sm:$0xff] }
  0xd6   : > { %727 = vmatprep.mubr.f32.mxu0 %v548_v21  ;;  %775 = vmatprep.mubr.f32.mxu1 %v564_v22  ;;  %v530_v20 = vld [vmem:[#allocation2 + $0xc8] sm:$0xff] }
  0xd9   : > { %728 = vmatmul.mubr.f32.gmra.mrb[10].mxu0 %v547_v23  ;;  %776 = vmatmul.mubr.f32.gmra.mrb[10].mxu1 %v563_v24 }
  0xda   : > { %733 = vmatprep.mubr.f32.mxu0 %v550_v25  ;;  %781 = vmatprep.mubr.f32.mxu1 %v566_v26 }
  0xdd   : > { %734 = vmatmul.mubr.f32.gmra.mrb[12].mxu0 %v549_v27  ;;  %782 = vmatmul.mubr.f32.gmra.mrb[12].mxu1 %v565_v28 }
  0xde   : > { %739 = vmatprep.mubr.f32.mxu0 %v552_v29  ;;  %787 = vmatprep.mubr.f32.mxu1 %v568_v30  ;;  %v515_v29 = vld [vmem:[#allocation2 + $0x50] sm:$0xff] }
  0xdf   : > { %v531_v30 = vld [vmem:[#allocation2 + $0xd0] sm:$0xff] }
  0xe1   : > { %740 = vmatmul.mubr.f32.gmra.mrb[14].mxu0 %v551_v31  ;;  %788 = vmatmul.mubr.f32.gmra.mrb[14].mxu1 %v567_v32  ;;  %v516_v31 = vld [vmem:[#allocation2 + $0x58] sm:$0xff] }
  0xe2   : > { %v532_v32 = vld [vmem:[#allocation2 + $0xd8] sm:$0xff] }
 0x198   : > { %v699_v37 = vpop.f32.mrb[0].mxu0  ;;  %v747_v38 = vpop.f32.mrb[0].mxu1 }
 0x199   : > { %v794_v39 = vadd.f32 %v699_v37, %v505_v33  ;;  %v810_v40 = vadd.f32 %v747_v38, %v521_v34  ;;  %v701_v41 = vpop.f32.mrb[1].mxu0  ;;  %v749_v42 = vpop.f32.mrb[1].mxu1 }
 0x19a   : > { %v795_v43 = vadd.f32 %v701_v41, %v506_v35  ;;  %v811_v44 = vadd.f32 %v749_v42, %v522_v36  ;;  %v517_v41 = vld [vmem:[#allocation2 + $0x60] sm:$0xff] }
 0x19b   : > { %826 = vst [vmem:[#allocation2] sm:$0xff] %v794_v39  ;;  %842 = vst [vmem:[#allocation2 + $0x80] sm:$0xff] %v810_v40  ;;  %v533_v42 = vld [vmem:[#allocation2 + $0xe0] sm:$0xff] }
 0x19c   : > { %827 = vst [vmem:[#allocation2 + $0x8] sm:$0xff] %v795_v43  ;;  %843 = vst [vmem:[#allocation2 + $0x88] sm:$0xff] %v811_v44  ;;  %v705_v49 = vpop.f32.mrb[2].mxu0  ;;  %v753_v50 = vpop.f32.mrb[2].mxu1  ;;  %v518_v43 = vld [vmem:[#allocation2 + $0x68] sm:$0xff] }
 0x19d   : > { %v796_v51 = vadd.f32 %v705_v49, %v507_v45  ;;  %v812_v52 = vadd.f32 %v753_v50, %v523_v46  ;;  %v707_v53 = vpop.f32.mrb[3].mxu0  ;;  %v755_v54 = vpop.f32.mrb[3].mxu1  ;;  %v534_v44 = vld [vmem:[#allocation2 + $0xe8] sm:$0xff] }
 0x19e   : > { %v797_v55 = vadd.f32 %v707_v53, %v508_v47  ;;  %v813_v56 = vadd.f32 %v755_v54, %v524_v48  ;;  %v519_v53 = vld [vmem:[#allocation2 + $0x70] sm:$0xff] }
 0x19f   : > { %828 = vst [vmem:[#allocation2 + $0x10] sm:$0xff] %v796_v51  ;;  %844 = vst [vmem:[#allocation2 + $0x90] sm:$0xff] %v812_v52  ;;  %v535_v54 = vld [vmem:[#allocation2 + $0xf0] sm:$0xff] }
 0x1a0   : > { %829 = vst [vmem:[#allocation2 + $0x18] sm:$0xff] %v797_v55  ;;  %845 = vst [vmem:[#allocation2 + $0x98] sm:$0xff] %v813_v56  ;;  %v711_v61 = vpop.f32.mrb[4].mxu0  ;;  %v759_v62 = vpop.f32.mrb[4].mxu1  ;;  %v520_v55 = vld [vmem:[#allocation2 + $0x78] sm:$0xff] }
 0x1a1   : > { %v798_v63 = vadd.f32 %v711_v61, %v509_v57  ;;  %v814_v0 = vadd.f32 %v759_v62, %v525_v58  ;;  %v713_v1 = vpop.f32.mrb[5].mxu0  ;;  %v761_v2 = vpop.f32.mrb[5].mxu1  ;;  %v536_v56 = vld [vmem:[#allocation2 + $0xf8] sm:$0xff] }
 0x1a2   : > { %v799_v3 = vadd.f32 %v713_v1, %v510_v59  ;;  %v815_v4 = vadd.f32 %v761_v2, %v526_v60  ;;  %v896_v1 = vlaneseq (!%p1219_p5) }
 0x1a3   : > { %830 = vst [vmem:[#allocation2 + $0x20] sm:$0xff] %v798_v63  ;;  %846 = vst [vmem:[#allocation2 + $0xa0] sm:$0xff] %v814_v0 }
 0x1a4   : > { %831 = vst [vmem:[#allocation2 + $0x28] sm:$0xff] %v799_v3  ;;  %847 = vst [vmem:[#allocation2 + $0xa8] sm:$0xff] %v815_v4  ;;  %v717_v9 = vpop.f32.mrb[6].mxu0  ;;  %v765_v10 = vpop.f32.mrb[6].mxu1  ;;  %v897_v2 = vshrl.u32 (!%p1219_p5), %v896_v1, 7  ;;  %v862_v4 = vld [vmem:[#allocation2] sm:$0xff] (!%p1219_p5) }
 0x1a5   : > { %v800_v11 = vadd.f32 %v717_v9, %v511_v5  ;;  %v816_v12 = vadd.f32 %v765_v10, %v527_v6  ;;  %v719_v13 = vpop.f32.mrb[7].mxu0  ;;  %v767_v14 = vpop.f32.mrb[7].mxu1  ;;  %v894_v3 = vld [vmem:[%s465_s29] sm:$0x3] (!%p1219_p5)  ;;  %v863_v6 = vld [vmem:[#allocation2 + $0x8] sm:$0xff] (!%p1219_p5) }
 0x1a6   : > { %v801_v15 = vadd.f32 %v719_v13, %v512_v7  ;;  %v817_v16 = vadd.f32 %v767_v14, %v528_v8  ;;  %v898_v5 = vsub.s32 (!%p1219_p5), 0, %v897_v2  ;;  %v902_v7 = vsub.s32 (!%p1219_p5), 1, %v897_v2  ;;  %v864_v8 = vld [vmem:[#allocation2 + $0x10] sm:$0xff] (!%p1219_p5) }
 0x1a7   : > { %832 = vst [vmem:[#allocation2 + $0x30] sm:$0xff] %v800_v11  ;;  %848 = vst [vmem:[#allocation2 + $0xb0] sm:$0xff] %v816_v12  ;;  %v865_v9 = vld [vmem:[#allocation2 + $0x18] sm:$0xff] (!%p1219_p5) }
 0x1a8   : > { %833 = vst [vmem:[#allocation2 + $0x38] sm:$0xff] %v801_v15  ;;  %849 = vst [vmem:[#allocation2 + $0xb8] sm:$0xff] %v817_v16  ;;  %v723_v21 = vpop.f32.mrb[8].mxu0  ;;  %v771_v22 = vpop.f32.mrb[8].mxu1  ;;  %v1957_v11 = vrot.slane (!%p1219_p5), %v894_v3, %v898_v5  ;;  %v1959_v12 = vrot.slane (!%p1219_p5), %v894_v3, %v902_v7 }
 0x1a9   : > { %v802_v23 = vadd.f32 %v723_v21, %v513_v17  ;;  %v818_v24 = vadd.f32 %v771_v22, %v529_v18  ;;  %v725_v25 = vpop.f32.mrb[9].mxu0  ;;  %v773_v26 = vpop.f32.mrb[9].mxu1 }
 0x1aa   : > { %v803_v27 = vadd.f32 %v725_v25, %v514_v19  ;;  %v819_v28 = vadd.f32 %v773_v26, %v530_v20  ;;  %v866_v10 = vld [vmem:[#allocation2 + $0x20] sm:$0xff] (!%p1219_p5)  ;;  %v906_v16 = vadd.f32 (!%p1219_p5), %v1957_v11, %v862_v4  ;;  %v907_v17 = vadd.f32 (!%p1219_p5), %v1959_v12, %v863_v6 }
 0x1ab   : > { %834 = vst [vmem:[#allocation2 + $0x40] sm:$0xff] %v802_v23  ;;  %850 = vst [vmem:[#allocation2 + $0xc0] sm:$0xff] %v818_v24  ;;  %v867_v13 = vld [vmem:[#allocation2 + $0x28] sm:$0xff] (!%p1219_p5)  ;;  %v908_v18 = vadd.f32 (!%p1219_p5), %v1957_v11, %v864_v8  ;;  %v909_v19 = vadd.f32 (!%p1219_p5), %v1959_v12, %v865_v9  ;;  %v910_v23 = vadd.f32 (!%p1219_p5), %v1957_v11, %v866_v10 }
 0x1ac   : > { %835 = vst [vmem:[#allocation2 + $0x48] sm:$0xff] %v803_v27  ;;  %851 = vst [vmem:[#allocation2 + $0xc8] sm:$0xff] %v819_v28  ;;  %v729_v33 = vpop.f32.mrb[10].mxu0  ;;  %v777_v34 = vpop.f32.mrb[10].mxu1  ;;  %v911_v24 = vadd.f32 (!%p1219_p5), %v1959_v12, %v867_v13 }
 0x1ad   : > { %v804_v35 = vadd.f32 %v729_v33, %v515_v29  ;;  %v820_v36 = vadd.f32 %v777_v34, %v531_v30  ;;  %v731_v37 = vpop.f32.mrb[11].mxu0  ;;  %v779_v38 = vpop.f32.mrb[11].mxu1  ;;  %v938_v30 = vmax.f32 (!%p1219_p5), %v906_v16, 0.0  ;;  %v941_v33 = vmax.f32 (!%p1219_p5), %v909_v19, 0.0 }
 0x1ae   : > { %v805_v39 = vadd.f32 %v731_v37, %v516_v31  ;;  %v821_v40 = vadd.f32 %v779_v38, %v532_v32  ;;  %v868_v14 = vld [vmem:[#allocation2 + $0x30] sm:$0xff] (!%p1219_p5)  ;;  %v939_v31 = vmax.f32 (!%p1219_p5), %v907_v17, 0.0  ;;  %v940_v32 = vmax.f32 (!%p1219_p5), %v908_v18, 0.0 }
 0x1af   : > { %836 = vst [vmem:[#allocation2 + $0x50] sm:$0xff] %v804_v35  ;;  %852 = vst [vmem:[#allocation2 + $0xd0] sm:$0xff] %v820_v36  ;;  %v869_v15 = vld [vmem:[#allocation2 + $0x38] sm:$0xff] (!%p1219_p5)  ;;  %v912_v25 = vadd.f32 (!%p1219_p5), %v1957_v11, %v868_v14  ;;  %v942_v36 = vmax.f32 (!%p1219_p5), %v910_v23, 0.0  ;;  %v943_v37 = vmax.f32 (!%p1219_p5), %v911_v24, 0.0 }
 0x1b0   : > { %837 = vst [vmem:[#allocation2 + $0x58] sm:$0xff] %v805_v39  ;;  %853 = vst [vmem:[#allocation2 + $0xd8] sm:$0xff] %v821_v40  ;;  %v735_v45 = vpop.f32.mrb[12].mxu0  ;;  %v783_v46 = vpop.f32.mrb[12].mxu1  ;;  %v913_v26 = vadd.f32 (!%p1219_p5), %v1959_v12, %v869_v15 }
 0x1b1   : > { %v806_v47 = vadd.f32 %v735_v45, %v517_v41  ;;  %v822_v48 = vadd.f32 %v783_v46, %v533_v42  ;;  %v737_v49 = vpop.f32.mrb[13].mxu0  ;;  %v785_v50 = vpop.f32.mrb[13].mxu1  ;;  %v944_v38 = vmax.f32 (!%p1219_p5), %v912_v25, 0.0  ;;  %970 = vst [vmem:[%s1852_s1] sm:$0xff] (!%p1219_p5), %v938_v30  ;;  %971 = vst [vmem:[%s1852_s1 + $0x8] sm:$0xff] (!%p1219_p5), %v939_v31  ;;  %v879_v45 = vld [vmem:[#allocation2 + $0x88] sm:$0xff] (!%p1219_p5)  ;;  %v880_v46 = vld [vmem:[#allocation2 + $0x90] sm:$0xff] (!%p1219_p5) }
 0x1b2   : > { %v807_v51 = vadd.f32 %v737_v49, %v518_v43  ;;  %v823_v52 = vadd.f32 %v785_v50, %v534_v44  ;;  %861 = sbr.rel (%p1219_p5) target bundleno = 454 (0x1c6), region = 86  ;;  %v870_v20 = vld [vmem:[#allocation2 + $0x40] sm:$0xff] (!%p1219_p5)  ;;  %v945_v39 = vmax.f32 (!%p1219_p5), %v913_v26, 0.0  ;;  %972 = vst [vmem:[%s1852_s1 + $0x10] sm:$0xff] (!%p1219_p5), %v940_v32  ;;  %973 = vst [vmem:[%s1852_s1 + $0x18] sm:$0xff] (!%p1219_p5), %v941_v33  ;;  %v923_v1 = vadd.f32 (!%p1219_p5), %v1959_v12, %v879_v45 }
 0x1b3   : > { %838 = vst [vmem:[#allocation2 + $0x60] sm:$0xff] %v806_v47  ;;  %854 = vst [vmem:[#allocation2 + $0xe0] sm:$0xff] %v822_v48  ;;  %v871_v21 = vld [vmem:[#allocation2 + $0x48] sm:$0xff] (!%p1219_p5)  ;;  %v914_v40 = vadd.f32 (!%p1219_p5), %v1957_v11, %v870_v20  ;;  %v878_v44 = vld [vmem:[#allocation2 + $0x80] sm:$0xff] (!%p1219_p5)  ;;  %v924_v2 = vadd.f32 (!%p1219_p5), %v1957_v11, %v880_v46 }
 0x1b4   : > { %839 = vst [vmem:[#allocation2 + $0x68] sm:$0xff] %v807_v51  ;;  %855 = vst [vmem:[#allocation2 + $0xe8] sm:$0xff] %v823_v52  ;;  %v741_v57 = vpop.f32.mrb[14].mxu0  ;;  %v789_v58 = vpop.f32.mrb[14].mxu1  ;;  %v915_v41 = vadd.f32 (!%p1219_p5), %v1959_v12, %v871_v21  ;;  %v881_v51 = vld [vmem:[#allocation2 + $0x98] sm:$0xff] (!%p1219_p5)  ;;  %v882_v52 = vld [vmem:[#allocation2 + $0xa0] sm:$0xff] (!%p1219_p5) }
 0x1b5   : > { %v808_v59 = vadd.f32 %v741_v57, %v519_v53  ;;  %v824_v60 = vadd.f32 %v789_v58, %v535_v54  ;;  %v743_v61 = vpop.f32.mrb[15].mxu0  ;;  %v791_v62 = vpop.f32.mrb[15].mxu1  ;;  %974 = vst [vmem:[%s1852_s1 + $0x20] sm:$0xff] (!%p1219_p5), %v942_v36  ;;  %975 = vst [vmem:[%s1852_s1 + $0x28] sm:$0xff] (!%p1219_p5), %v943_v37  ;;  %v883_v53 = vld [vmem:[#allocation2 + $0xa8] sm:$0xff] (!%p1219_p5)  ;;  %v946_v54 = vmax.f32 (!%p1219_p5), %v914_v40, 0.0  ;;  %v925_v3 = vadd.f32 (!%p1219_p5), %v1959_v12, %v881_v51 }
 0x1b6   : > { %v809_v63 = vadd.f32 %v743_v61, %v520_v55  ;;  %v825_v0 = vadd.f32 %v791_v62, %v536_v56  ;;  %v872_v22 = vld [vmem:[#allocation2 + $0x50] sm:$0xff] (!%p1219_p5)  ;;  %976 = vst [vmem:[%s1852_s1 + $0x30] sm:$0xff] (!%p1219_p5), %v944_v38  ;;  %977 = vst [vmem:[%s1852_s1 + $0x38] sm:$0xff] (!%p1219_p5), %v945_v39  ;;  %v947_v55 = vmax.f32 (!%p1219_p5), %v915_v41, 0.0  ;;  %v886_v4 = vld [vmem:[#allocation2 + $0xc0] sm:$0xff] (!%p1219_p5)  ;;  %v926_v7 = vadd.f32 (!%p1219_p5), %v1957_v11, %v882_v52 }
 0x1b7   : > { %840 = vst [vmem:[#allocation2 + $0x70] sm:$0xff] %v808_v59  ;;  %856 = vst [vmem:[#allocation2 + $0xf0] sm:$0xff] %v824_v60  ;;  %v873_v27 = vld [vmem:[#allocation2 + $0x58] sm:$0xff] (!%p1219_p5)  ;;  %v916_v42 = vadd.f32 (!%p1219_p5), %v1957_v11, %v872_v22  ;;  %v884_v58 = vld [vmem:[#allocation2 + $0xb0] sm:$0xff] (!%p1219_p5)  ;;  %v927_v8 = vadd.f32 (!%p1219_p5), %v1959_v12, %v883_v53  ;;  %v955_v17 = vmax.f32 (!%p1219_p5), %v923_v1, 0.0  ;;  %v956_v18 = vmax.f32 (!%p1219_p5), %v924_v2, 0.0 }
 0x1b8   : > { %841 = vst [vmem:[#allocation2 + $0x78] sm:$0xff] %v809_v63  ;;  %857 = vst [vmem:[#allocation2 + $0xf8] sm:$0xff] %v825_v0  ;;  %v917_v43 = vadd.f32 (!%p1219_p5), %v1959_v12, %v873_v27  ;;  %v885_v59 = vld [vmem:[#allocation2 + $0xb8] sm:$0xff] (!%p1219_p5)  ;;  %v922_v0 = vadd.f32 (!%p1219_p5), %v1957_v11, %v878_v44  ;;  %v887_v5 = vld [vmem:[#allocation2 + $0xc8] sm:$0xff] (!%p1219_p5)  ;;  %v928_v9 = vadd.f32 (!%p1219_p5), %v1957_v11, %v884_v58  ;;  %v957_v19 = vmax.f32 (!%p1219_p5), %v925_v3, 0.0 }
 0x1b9   : > { %v948_v56 = vmax.f32 %v916_v42, 0.0  ;;  %978 = vst [vmem:[%s1852_s1 + $0x40] sm:$0xff] %v946_v54  ;;  %979 = vst [vmem:[%s1852_s1 + $0x48] sm:$0xff] %v947_v55  ;;  %v888_v6 = vld [vmem:[#allocation2 + $0xd0] sm:$0xff]  ;;  %v929_v10 = vadd.f32 %v1959_v12, %v885_v59  ;;  %v889_v13 = vld [vmem:[#allocation2 + $0xd8] sm:$0xff]  ;;  %v958_v22 = vmax.f32 %v926_v7, 0.0  ;;  %v930_v26 = vadd.f32 %v1957_v11, %v886_v4 }
 0x1ba   : > { %v874_v28 = vld [vmem:[#allocation2 + $0x60] sm:$0xff]  ;;  %v949_v57 = vmax.f32 %v917_v43, 0.0  ;;  %v954_v16 = vmax.f32 %v922_v0, 0.0  ;;  %v959_v23 = vmax.f32 %v927_v8, 0.0  ;;  %v960_v24 = vmax.f32 %v928_v9, 0.0  ;;  %987 = vst [vmem:[%s1852_s1 + $0x88] sm:$0xff] %v955_v17 }
 0x1bb   : > { %v875_v29 = vld [vmem:[#allocation2 + $0x68] sm:$0xff]  ;;  %v918_v47 = vadd.f32 %v1957_v11, %v874_v28  ;;  %980 = vst [vmem:[%s1852_s1 + $0x50] sm:$0xff] %v948_v56  ;;  %v890_v14 = vld [vmem:[#allocation2 + $0xe0] sm:$0xff]  ;;  %v961_v25 = vmax.f32 %v929_v10, 0.0  ;;  %988 = vst [vmem:[%s1852_s1 + $0x90] sm:$0xff] %v956_v18  ;;  %v931_v27 = vadd.f32 %v1959_v12, %v887_v5  ;;  %v932_v28 = vadd.f32 %v1957_v11, %v888_v6 }
 0x1bc   : > { %v919_v48 = vadd.f32 %v1959_v12, %v875_v29  ;;  %981 = vst [vmem:[%s1852_s1 + $0x58] sm:$0xff] %v949_v57  ;;  %v891_v15 = vld [vmem:[#allocation2 + $0xe8] sm:$0xff]  ;;  %986 = vst [vmem:[%s1852_s1 + $0x80] sm:$0xff] %v954_v16  ;;  %v933_v29 = vadd.f32 %v1959_v12, %v889_v13  ;;  %v934_v30 = vadd.f32 %v1957_v11, %v890_v14 }
 0x1bd   : > { %v950_v60 = vmax.f32 %v918_v47, 0.0  ;;  %989 = vst [vmem:[%s1852_s1 + $0x98] sm:$0xff] %v957_v19  ;;  %990 = vst [vmem:[%s1852_s1 + $0xa0] sm:$0xff] %v958_v22  ;;  %v935_v31 = vadd.f32 %v1959_v12, %v891_v15  ;;  %v964_v36 = vmax.f32 %v932_v28, 0.0 }
 0x1be   : > { %v876_v34 = vld [vmem:[#allocation2 + $0x70] sm:$0xff]  ;;  %v951_v61 = vmax.f32 %v919_v48, 0.0  ;;  %991 = vst [vmem:[%s1852_s1 + $0xa8] sm:$0xff] %v959_v23  ;;  %992 = vst [vmem:[%s1852_s1 + $0xb0] sm:$0xff] %v960_v24  ;;  %v965_v37 = vmax.f32 %v933_v29, 0.0  ;;  %v966_v38 = vmax.f32 %v934_v30, 0.0 }
 0x1bf   : > { %v877_v35 = vld [vmem:[#allocation2 + $0x78] sm:$0xff]  ;;  %v920_v49 = vadd.f32 %v1957_v11, %v876_v34  ;;  %982 = vst [vmem:[%s1852_s1 + $0x60] sm:$0xff] %v950_v60  ;;  %v892_v20 = vld [vmem:[#allocation2 + $0xf0] sm:$0xff]  ;;  %993 = vst [vmem:[%s1852_s1 + $0xb8] sm:$0xff] %v961_v25  ;;  %v962_v34 = vmax.f32 %v930_v26, 0.0  ;;  %v967_v39 = vmax.f32 %v935_v31, 0.0 }
 0x1c0   : > { %v921_v50 = vadd.f32 %v1959_v12, %v877_v35  ;;  %983 = vst [vmem:[%s1852_s1 + $0x68] sm:$0xff] %v951_v61  ;;  %v893_v21 = vld [vmem:[#allocation2 + $0xf8] sm:$0xff]  ;;  %v936_v32 = vadd.f32 %v1957_v11, %v892_v20  ;;  %v963_v35 = vmax.f32 %v931_v27, 0.0  ;;  %996 = vst [vmem:[%s1852_s1 + $0xd0] sm:$0xff] %v964_v36 }
 0x1c1   : > { %v952_v62 = vmax.f32 %v920_v49, 0.0  ;;  %v937_v33 = vadd.f32 %v1959_v12, %v893_v21  ;;  %994 = vst [vmem:[%s1852_s1 + $0xc0] sm:$0xff] %v962_v34  ;;  %997 = vst [vmem:[%s1852_s1 + $0xd8] sm:$0xff] %v965_v37 }
 0x1c2   : > { %v953_v63 = vmax.f32 %v921_v50, 0.0  ;;  %v968_v40 = vmax.f32 %v936_v32, 0.0  ;;  %995 = vst [vmem:[%s1852_s1 + $0xc8] sm:$0xff] %v963_v35  ;;  %998 = vst [vmem:[%s1852_s1 + $0xe0] sm:$0xff] %v966_v38 }
 0x1c3   : > { %984 = vst [vmem:[%s1852_s1 + $0x70] sm:$0xff] %v952_v62  ;;  %v969_v41 = vmax.f32 %v937_v33, 0.0  ;;  %999 = vst [vmem:[%s1852_s1 + $0xe8] sm:$0xff] %v967_v39 }
 0x1c4   : > { %985 = vst [vmem:[%s1852_s1 + $0x78] sm:$0xff] %v953_v63  ;;  %1000 = vst [vmem:[%s1852_s1 + $0xf0] sm:$0xff] %v968_v40 }
 0x1c5   : > { %1001 = vst [vmem:[%s1852_s1 + $0xf8] sm:$0xff] %v969_v41 }
 0x1c6 PF: > { %1008 = sbr.rel (!%p1616_p12) target bundleno = 472 (0x1d8), region = 90  ;;  %s1227_s16 = sshll.u32 (%p1616_p12), %s1487_s19, 4  ;;  %v1027_v11 = vld [vmem:[%s1852_s1] sm:$0xff] (%p1616_p12)  ;;  %v1029_v12 = vld [vmem:[%s1852_s1 + $0x8] sm:$0xff] (%p1616_p12)  ;;  %v1031_v42 = vld [vmem:[%s1852_s1 + $0x10] sm:$0xff] (%p1616_p12) }
 0x1c7   : > { %s2034_s5 = scalar_lea.vmem (%p1616_p12), %s2133_s3, %s1227_s16  ;;  %v1033_v43 = vld [vmem:[%s1852_s1 + $0x18] sm:$0xff] (%p1616_p12)  ;;  %v1047_v50 = vld [vmem:[%s1852_s1 + $0x50] sm:$0xff] (%p1616_p12)  ;;  %v1051_v52 = vld [vmem:[%s1852_s1 + $0x60] sm:$0xff] (%p1616_p12) }
 0x1c8   : > { %1028 = vst [vmem:[%s2034_s5] sm:$0xff] (%p1616_p12), %v1027_v11  ;;  %1030 = vst [vmem:[%s2034_s5 + $0x8] sm:$0xff] (%p1616_p12), %v1029_v12  ;;  %v1049_v51 = vld [vmem:[%s1852_s1 + $0x58] sm:$0xff] (%p1616_p12)  ;;  %v1053_v53 = vld [vmem:[%s1852_s1 + $0x68] sm:$0xff] (%p1616_p12) }
 0x1c9   : > { %v1035_v44 = vld [vmem:[%s1852_s1 + $0x20] sm:$0xff] (%p1616_p12)  ;;  %v1037_v45 = vld [vmem:[%s1852_s1 + $0x28] sm:$0xff] (%p1616_p12)  ;;  %1032 = vst [vmem:[%s2034_s5 + $0x20] sm:$0xff] (%p1616_p12), %v1031_v42  ;;  %1034 = vst [vmem:[%s2034_s5 + $0x28] sm:$0xff] (%p1616_p12), %v1033_v43 }
 0x1ca   : > { %1036 = vst [vmem:[%s2034_s5 + $0x40] sm:$0xff] (%p1616_p12), %v1035_v44  ;;  %1038 = vst [vmem:[%s2034_s5 + $0x48] sm:$0xff] (%p1616_p12), %v1037_v45  ;;  %v1039_v46 = vld [vmem:[%s1852_s1 + $0x30] sm:$0xff] (%p1616_p12)  ;;  %v1041_v47 = vld [vmem:[%s1852_s1 + $0x38] sm:$0xff] (%p1616_p12) }
 0x1cb   : > { %1040 = vst [vmem:[%s2034_s5 + $0x60] sm:$0xff] (%p1616_p12), %v1039_v46  ;;  %1042 = vst [vmem:[%s2034_s5 + $0x68] sm:$0xff] (%p1616_p12), %v1041_v47  ;;  %v1055_v54 = vld [vmem:[%s1852_s1 + $0x70] sm:$0xff] (%p1616_p12)  ;;  %v1057_v55 = vld [vmem:[%s1852_s1 + $0x78] sm:$0xff] (%p1616_p12) }
 0x1cc   : > { %1048 = vst [vmem:[%s2034_s5 + $0xa0] sm:$0xff] (%p1616_p12), %v1047_v50  ;;  %1050 = vst [vmem:[%s2034_s5 + $0xa8] sm:$0xff] (%p1616_p12), %v1049_v51  ;;  %v1059_v56 = vld [vmem:[%s1852_s1 + $0x80] sm:$0xff] (%p1616_p12)  ;;  %v1061_v57 = vld [vmem:[%s1852_s1 + $0x88] sm:$0xff] (%p1616_p12) }
 0x1cd   : > { %v1043_v48 = vld [vmem:[%s1852_s1 + $0x40] sm:$0xff]  ;;  %v1045_v49 = vld [vmem:[%s1852_s1 + $0x48] sm:$0xff]  ;;  %1052 = vst [vmem:[%s2034_s5 + $0xc0] sm:$0xff] %v1051_v52  ;;  %1054 = vst [vmem:[%s2034_s5 + $0xc8] sm:$0xff] %v1053_v53 }
 0x1ce   : > { %1044 = vst [vmem:[%s2034_s5 + $0x80] sm:$0xff] %v1043_v48  ;;  %1046 = vst [vmem:[%s2034_s5 + $0x88] sm:$0xff] %v1045_v49  ;;  %v1063_v58 = vld [vmem:[%s1852_s1 + $0x90] sm:$0xff]  ;;  %v1065_v59 = vld [vmem:[%s1852_s1 + $0x98] sm:$0xff] }
 0x1cf   : > { %1056 = vst [vmem:[%s2034_s5 + $0xe0] sm:$0xff] %v1055_v54  ;;  %1058 = vst [vmem:[%s2034_s5 + $0xe8] sm:$0xff] %v1057_v55  ;;  %v1067_v60 = vld [vmem:[%s1852_s1 + $0xa0] sm:$0xff]  ;;  %v1069_v61 = vld [vmem:[%s1852_s1 + $0xa8] sm:$0xff] }
 0x1d0   : > { %1060 = vst [vmem:[%s2034_s5 + $0x100] sm:$0xff] %v1059_v56  ;;  %1062 = vst [vmem:[%s2034_s5 + $0x108] sm:$0xff] %v1061_v57  ;;  %v1071_v62 = vld [vmem:[%s1852_s1 + $0xb0] sm:$0xff]  ;;  %v1073_v63 = vld [vmem:[%s1852_s1 + $0xb8] sm:$0xff] }
 0x1d1   : > { %1064 = vst [vmem:[%s2034_s5 + $0x120] sm:$0xff] %v1063_v58  ;;  %1066 = vst [vmem:[%s2034_s5 + $0x128] sm:$0xff] %v1065_v59  ;;  %v1075_v0 = vld [vmem:[%s1852_s1 + $0xc0] sm:$0xff]  ;;  %v1077_v1 = vld [vmem:[%s1852_s1 + $0xc8] sm:$0xff] }
 0x1d2   : > { %1068 = vst [vmem:[%s2034_s5 + $0x140] sm:$0xff] %v1067_v60  ;;  %1070 = vst [vmem:[%s2034_s5 + $0x148] sm:$0xff] %v1069_v61  ;;  %v1079_v2 = vld [vmem:[%s1852_s1 + $0xd0] sm:$0xff]  ;;  %v1081_v3 = vld [vmem:[%s1852_s1 + $0xd8] sm:$0xff] }
 0x1d3   : > { %1072 = vst [vmem:[%s2034_s5 + $0x160] sm:$0xff] %v1071_v62  ;;  %1074 = vst [vmem:[%s2034_s5 + $0x168] sm:$0xff] %v1073_v63  ;;  %v1083_v4 = vld [vmem:[%s1852_s1 + $0xe0] sm:$0xff]  ;;  %v1085_v5 = vld [vmem:[%s1852_s1 + $0xe8] sm:$0xff] }
 0x1d4   : > { %1076 = vst [vmem:[%s2034_s5 + $0x180] sm:$0xff] %v1075_v0  ;;  %1078 = vst [vmem:[%s2034_s5 + $0x188] sm:$0xff] %v1077_v1  ;;  %v1087_v6 = vld [vmem:[%s1852_s1 + $0xf0] sm:$0xff]  ;;  %v1089_v7 = vld [vmem:[%s1852_s1 + $0xf8] sm:$0xff] }
 0x1d5   : > { %1080 = vst [vmem:[%s2034_s5 + $0x1a0] sm:$0xff] %v1079_v2  ;;  %1082 = vst [vmem:[%s2034_s5 + $0x1a8] sm:$0xff] %v1081_v3 }
 0x1d6   : > { %1084 = vst [vmem:[%s2034_s5 + $0x1c0] sm:$0xff] %v1083_v4  ;;  %1086 = vst [vmem:[%s2034_s5 + $0x1c8] sm:$0xff] %v1085_v5 }
 0x1d7   : > { %1088 = vst [vmem:[%s2034_s5 + $0x1e0] sm:$0xff] %v1087_v6  ;;  %1090 = vst [vmem:[%s2034_s5 + $0x1e8] sm:$0xff] %v1089_v7 }
 0x1d8 PF: > { %s13_s22 = sadd.s32 1, %s1499_s22   ;;  %s2143_s10 = sld [smem:[#allocation6_spill]] }
 0x1d9   : > { %p10_p6 = scmp.ge.s32.totalorder %s13_s22, 20   ;;  %s2144_s12 = smov %s1463_s13 }
 0x1da   : > { %s2145_s13 = smov %s1614_s9  ;;  %s2146_s14 = smov %s1471_s15 }
 0x1db   : > { %s2147_s15 = smov %s1611_s8  ;;  %s2148_s16 = smov %s1479_s17 }
 0x1dc   : > { %s2149_s17 = smov %s1597_s30  ;;  %s2150_s18 = smov %s1491_s20 }
 0x1dd   : > { %s2151_s19 = smov %s1495_s21  ;;  %s2152_s20 = smov %s2155_s24 }
 0x1de   : > { %s2153_s21 = smov %s2143_s10  ;;  %12 = sbr.rel (!%p10_p6) target bundleno = 9 (0x9), region = 155 }

// kernel: _pallas_forward.34
= control target key start
LH: loop header
LB: loop body
LE: loop exit
PB: predicated region body
PF: predicated region fallthrough
CT: control target
= control target key end

     0   :  { %s2130_s0 = inlined_call_operand.vmem [shape: f32[128,4608], index: 0, kind: input, shape index: {}]   ;;  %s2131_s1 = inlined_call_operand.vmem [shape: f32[4608,512], index: 1, kind: input, shape index: {}]   ;;  %s2132_s2 = inlined_call_operand.vmem [shape: f32[1,512], index: 2, kind: input, shape index: {}]   ;;  %s2133_s3 = inlined_call_operand.vmem [shape: f32[128,512], index: 3, kind: output, shape index: {}]  }
   0x1   :  { %2135 = sst [smem:[#allocation7_spill]] %s2130_s0 }
   0x2   :  { %2136 = sst [smem:[#allocation8_spill]] %s2131_s1 }
   0x3   :  { %s1522_s12 = smov 0   ;;  %s1524_s13 = smov 0  }
   0x4   :  { %s1526_s14 = smov 0   ;;  %s1528_s15 = smov 0  }
   0x5   :  { %s1530_s16 = smov 0   ;;  %s1532_s17 = smov 0  }
   0x6   :  { %s1534_s18 = smov 0   ;;  %s1536_s19 = smov 0  }
   0x7   :  { %s1538_s20 = smov 0   ;;  %s1540_s21 = smov 0  }
   0x8   :  { %s1542_s22 = smov 0  }
   0x9 LB: > { %s1201_s23 = sadd.s32 4294967295, %s1499_s22   ;;  %s25_s24 = sadd.s32 1, %s1491_s20  ;;  %s1499_s22 = sphi %s1542_s22, %s13_s22   ;;  %s1495_s21 = sphi %s1540_s21, %s2153_s21   ;;  %s1491_s20 = sphi %s1538_s20, %s2152_s20   ;;  %s1487_s19 = sphi %s1536_s19, %s2151_s19   ;;  %s1483_s18 = sphi %s1534_s18, %s2150_s18   ;;  %s1479_s17 = sphi %s1532_s17, %s2149_s17   ;;  %s1475_s16 = sphi %s1530_s16, %s2148_s16   ;;  %s1471_s15 = sphi %s1528_s15, %s2147_s15   ;;  %s1467_s14 = sphi %s1526_s14, %s2146_s14   ;;  %s1463_s13 = sphi %s1524_s13, %s2145_s13   ;;  %s1459_s12 = sphi %s1522_s12, %s2144_s12  }
   0xa   : > { %p26_p0 = scmp.ge.s32.totalorder %s25_s24, 18  ;;  %s28_s25 = sadd.s32 1, %s1495_s21 }
   0xb   : > { %s41_s26 = sadd.s32 1, %s1479_s17  ;;  %p48_p1 = scmp.ne.s32.totalorder %s1479_s17, %s1475_s16 }
   0xc   : > { %s2155_s24 = smov (%p26_p0, %s25_s24), 0  ;;  %s2157_s25 = smov (!%p26_p0, %s28_s25), %s1495_s21 }
   0xd   : > { %s37_s27 = ssub.s32 %s1491_s20, %s2155_s24  ;;  %p49_p2 = scmp.eq.s32.totalorder %s1499_s22, 0 }
   0xe   : > { %p30_p3 = scmp.ge.s32.totalorder %s2157_s25, 2  ;;  %p39_p4 = scmp.eq.s32.totalorder %s37_s27, 0 }
   0xf   : > { %p1589_p5 = por %p49_p2, %p48_p1  ;;  %s69_s29 = sadd.s32 1, %s1471_s15 }
  0x10   : > { %s2159_s25 = smov (%p30_p3, %s2157_s25), 0  ;;  %p76_p6 = scmp.ne.s32.totalorder %s1471_s15, %s1467_s14 }
  0x11   : > { %2138 = sst [smem:[#allocation6_spill]] %s2159_s25  ;;  %s65_s4 = ssub.s32 %s1495_s21, %s2159_s25 }
  0x12   : > { %s1597_s30 = scalar_select %p39_p4, %s1479_s17, %s41_s26  }
  0x13   : > { %s66_s5 = sor.u32 %s65_s4, %s37_s27  ;;  %p121_p7 = scmp.eq.s32.totalorder %s65_s4, 0 }
  0x14   : > { %p67_p8 = scmp.eq.s32.totalorder %s66_s5, 0  ;;  %p1603_p9 = por %p76_p6, %p49_p2 }
  0x15   : > { %s123_s7 = sadd.s32 1, %s1463_s13  ;;  %p133_p10 = scmp.ne.s32.totalorder %s1463_s13, %s1459_s12 }
  0x16   : > { %s1611_s8 = scalar_select %p67_p8, %s1471_s15, %s69_s29  }
  0x17   : > { %s1614_s9 = scalar_select %p121_p7, %s1463_s13, %s123_s7  }
  0x18   : > { %p134_p11 = scmp.eq.s32.totalorder %s1201_s23, 35  ;;  %p1204_p13 = scmp.ge.s32.totalorder %s1499_s22, 36 }
  0x1a   : > { %p1616_p12 = por %p134_p11, %p133_p10  ;;  %156 = sbr.rel (%p1204_p13) target bundleno = 101 (0x65), region = 16 }
  0x21   : > { %159 = sbr.rel (!%p1589_p5) target bundleno = 59 (0x3b), region = 20  ;;  %s161_s11 = sand.u32 (%p1589_p5), 1, %s1479_s17  }
  0x22   : > { %s1225_s26 = sshll.u32 (%p1589_p5), %s1491_s20, 4  ;;  %s1205_s27 = sshll.u32 (%p1589_p5), %s161_s11, 8 }
  0x23   : > { %s2141_s0 = sld [smem:[#allocation7_spill]] (%p1589_p5)  ;;  %s1633_s23 = scalar_lea.vmem (%p1589_p5), [#allocation3], %s1205_s27 }
  0x29   : > { %s1628_s5 = scalar_lea.vmem %s2141_s0, %s1225_s26 }
  0x2a   : > { %v182_v0 = vld [vmem:[%s1628_s5] sm:$0xff]  ;;  %v184_v1 = vld [vmem:[%s1628_s5 + $0x8] sm:$0xff] }
  0x2b   : > { %v186_v2 = vld [vmem:[%s1628_s5 + $0x120] sm:$0xff]  ;;  %183 = vst [vmem:[%s1633_s23] sm:$0xff] %v182_v0  ;;  %185 = vst [vmem:[%s1633_s23 + $0x8] sm:$0xff] %v184_v1  ;;  %v188_v3 = vld [vmem:[%s1628_s5 + $0x128] sm:$0xff] }
  0x2c   : > { %187 = vst [vmem:[%s1633_s23 + $0x10] sm:$0xff] %v186_v2  ;;  %v190_v4 = vld [vmem:[%s1628_s5 + $0x240] sm:$0xff]  ;;  %v192_v5 = vld [vmem:[%s1628_s5 + $0x248] sm:$0xff]  ;;  %189 = vst [vmem:[%s1633_s23 + $0x18] sm:$0xff] %v188_v3 }
  0x2d   : > { %191 = vst [vmem:[%s1633_s23 + $0x20] sm:$0xff] %v190_v4  ;;  %193 = vst [vmem:[%s1633_s23 + $0x28] sm:$0xff] %v192_v5  ;;  %v194_v6 = vld [vmem:[%s1628_s5 + $0x360] sm:$0xff]  ;;  %v196_v7 = vld [vmem:[%s1628_s5 + $0x368] sm:$0xff] }
  0x2e   : > { %v198_v8 = vld [vmem:[%s1628_s5 + $0x480] sm:$0xff]  ;;  %195 = vst [vmem:[%s1633_s23 + $0x30] sm:$0xff] %v194_v6  ;;  %197 = vst [vmem:[%s1633_s23 + $0x38] sm:$0xff] %v196_v7  ;;  %v200_v9 = vld [vmem:[%s1628_s5 + $0x488] sm:$0xff] }
  0x2f   : > { %199 = vst [vmem:[%s1633_s23 + $0x40] sm:$0xff] %v198_v8  ;;  %v202_v10 = vld [vmem:[%s1628_s5 + $0x5a0] sm:$0xff]  ;;  %v204_v11 = vld [vmem:[%s1628_s5 + $0x5a8] sm:$0xff]  ;;  %201 = vst [vmem:[%s1633_s23 + $0x48] sm:$0xff] %v200_v9 }
  0x30   : > { %203 = vst [vmem:[%s1633_s23 + $0x50] sm:$0xff] %v202_v10  ;;  %205 = vst [vmem:[%s1633_s23 + $0x58] sm:$0xff] %v204_v11  ;;  %v206_v12 = vld [vmem:[%s1628_s5 + $0x6c0] sm:$0xff]  ;;  %v208_v13 = vld [vmem:[%s1628_s5 + $0x6c8] sm:$0xff] }
  0x31   : > { %v210_v14 = vld [vmem:[%s1628_s5 + $0x7e0] sm:$0xff]  ;;  %207 = vst [vmem:[%s1633_s23 + $0x60] sm:$0xff] %v206_v12  ;;  %209 = vst [vmem:[%s1633_s23 + $0x68] sm:$0xff] %v208_v13  ;;  %v212_v15 = vld [vmem:[%s1628_s5 + $0x7e8] sm:$0xff] }
  0x32   : > { %211 = vst [vmem:[%s1633_s23 + $0x70] sm:$0xff] %v210_v14  ;;  %v214_v16 = vld [vmem:[%s1628_s5 + $0x900] sm:$0xff]  ;;  %v216_v17 = vld [vmem:[%s1628_s5 + $0x908] sm:$0xff]  ;;  %213 = vst [vmem:[%s1633_s23 + $0x78] sm:$0xff] %v212_v15 }
  0x33   : > { %215 = vst [vmem:[%s1633_s23 + $0x80] sm:$0xff] %v214_v16  ;;  %217 = vst [vmem:[%s1633_s23 + $0x88] sm:$0xff] %v216_v17  ;;  %v218_v18 = vld [vmem:[%s1628_s5 + $0xa20] sm:$0xff]  ;;  %v220_v19 = vld [vmem:[%s1628_s5 + $0xa28] sm:$0xff] }
  0x34   : > { %v222_v20 = vld [vmem:[%s1628_s5 + $0xb40] sm:$0xff]  ;;  %219 = vst [vmem:[%s1633_s23 + $0x90] sm:$0xff] %v218_v18  ;;  %221 = vst [vmem:[%s1633_s23 + $0x98] sm:$0xff] %v220_v19  ;;  %v224_v21 = vld [vmem:[%s1628_s5 + $0xb48] sm:$0xff] }
  0x35   : > { %223 = vst [vmem:[%s1633_s23 + $0xa0] sm:$0xff] %v222_v20  ;;  %v226_v22 = vld [vmem:[%s1628_s5 + $0xc60] sm:$0xff]  ;;  %v228_v23 = vld [vmem:[%s1628_s5 + $0xc68] sm:$0xff]  ;;  %225 = vst [vmem:[%s1633_s23 + $0xa8] sm:$0xff] %v224_v21 }
  0x36   : > { %227 = vst [vmem:[%s1633_s23 + $0xb0] sm:$0xff] %v226_v22  ;;  %229 = vst [vmem:[%s1633_s23 + $0xb8] sm:$0xff] %v228_v23  ;;  %v230_v24 = vld [vmem:[%s1628_s5 + $0xd80] sm:$0xff]  ;;  %v232_v25 = vld [vmem:[%s1628_s5 + $0xd88] sm:$0xff] }
  0x37   : > { %v234_v26 = vld [vmem:[%s1628_s5 + $0xea0] sm:$0xff]  ;;  %231 = vst [vmem:[%s1633_s23 + $0xc0] sm:$0xff] %v230_v24  ;;  %233 = vst [vmem:[%s1633_s23 + $0xc8] sm:$0xff] %v232_v25  ;;  %v236_v27 = vld [vmem:[%s1628_s5 + $0xea8] sm:$0xff] }
  0x38   : > { %235 = vst [vmem:[%s1633_s23 + $0xd0] sm:$0xff] %v234_v26  ;;  %v238_v28 = vld [vmem:[%s1628_s5 + $0xfc0] sm:$0xff]  ;;  %v240_v29 = vld [vmem:[%s1628_s5 + $0xfc8] sm:$0xff]  ;;  %237 = vst [vmem:[%s1633_s23 + $0xd8] sm:$0xff] %v236_v27 }
  0x39   : > { %239 = vst [vmem:[%s1633_s23 + $0xe0] sm:$0xff] %v238_v28  ;;  %241 = vst [vmem:[%s1633_s23 + $0xe8] sm:$0xff] %v240_v29  ;;  %v242_v30 = vld [vmem:[%s1628_s5 + $0x10e0] sm:$0xff]  ;;  %v244_v31 = vld [vmem:[%s1628_s5 + $0x10e8] sm:$0xff] }
  0x3a   : > { %243 = vst [vmem:[%s1633_s23 + $0xf0] sm:$0xff] %v242_v30  ;;  %245 = vst [vmem:[%s1633_s23 + $0xf8] sm:$0xff] %v244_v31 }
  0x3b PF: > { %251 = sbr.rel (!%p1603_p9) target bundleno = 101 (0x65), region = 43  ;;  %s253_s28 = sand.u32 (%p1603_p9), 1, %s1471_s15  }
  0x3c   : > { %s1210_s7 = sshll.u32 (%p1603_p9), %s1495_s21, 1  ;;  %s1208_s11 = sshll.u32 (%p1603_p9), %s253_s28, 9 }
  0x3d   : > { %s1226_s26 = sshll.u32 (%p1603_p9), %s1491_s20, 7  ;;  %s2142_s1 = sld [smem:[#allocation8_spill]] (%p1603_p9) }
  0x3e   : > { %s259_s27 = sadd.s32 (%p1603_p9), %s1226_s26, %s1210_s7  ;;  %s1709_s6 = scalar_lea.vmem (%p1603_p9), [#allocation4], %s1208_s11 }
  0x3f   : > { %s1212_s29 = sshll.u32 (%p1603_p9), %s259_s27, 3 }
  0x43   : > { %s1704_s25 = scalar_lea.vmem %s2142_s1, %s1212_s29 }
  0x44   : > { %v274_v32 = vld [vmem:[%s1704_s25] sm:$0xff]  ;;  %v276_v33 = vld [vmem:[%s1704_s25 + $0x8] sm:$0xff] }
  0x45   : > { %v278_v34 = vld [vmem:[%s1704_s25 + $0x20] sm:$0xff]  ;;  %275 = vst [vmem:[%s1709_s6] sm:$0xff] %v274_v32  ;;  %277 = vst [vmem:[%s1709_s6 + $0x8] sm:$0xff] %v276_v33  ;;  %v280_v35 = vld [vmem:[%s1704_s25 + $0x28] sm:$0xff] }
  0x46   : > { %279 = vst [vmem:[%s1709_s6 + $0x10] sm:$0xff] %v278_v34  ;;  %v282_v36 = vld [vmem:[%s1704_s25 + $0x40] sm:$0xff]  ;;  %v284_v37 = vld [vmem:[%s1704_s25 + $0x48] sm:$0xff]  ;;  %281 = vst [vmem:[%s1709_s6 + $0x18] sm:$0xff] %v280_v35 }
  0x47   : > { %283 = vst [vmem:[%s1709_s6 + $0x20] sm:$0xff] %v282_v36  ;;  %285 = vst [vmem:[%s1709_s6 + $0x28] sm:$0xff] %v284_v37  ;;  %v286_v38 = vld [vmem:[%s1704_s25 + $0x60] sm:$0xff]  ;;  %v288_v39 = vld [vmem:[%s1704_s25 + $0x68] sm:$0xff] }
  0x48   : > { %v290_v40 = vld [vmem:[%s1704_s25 + $0x80] sm:$0xff]  ;;  %287 = vst [vmem:[%s1709_s6 + $0x30] sm:$0xff] %v286_v38  ;;  %289 = vst [vmem:[%s1709_s6 + $0x38] sm:$0xff] %v288_v39  ;;  %v292_v41 = vld [vmem:[%s1704_s25 + $0x88] sm:$0xff] }
  0x49   : > { %291 = vst [vmem:[%s1709_s6 + $0x40] sm:$0xff] %v290_v40  ;;  %v294_v42 = vld [vmem:[%s1704_s25 + $0xa0] sm:$0xff]  ;;  %v296_v43 = vld [vmem:[%s1704_s25 + $0xa8] sm:$0xff]  ;;  %293 = vst [vmem:[%s1709_s6 + $0x48] sm:$0xff] %v292_v41 }
  0x4a   : > { %295 = vst [vmem:[%s1709_s6 + $0x50] sm:$0xff] %v294_v42  ;;  %297 = vst [vmem:[%s1709_s6 + $0x58] sm:$0xff] %v296_v43  ;;  %v298_v44 = vld [vmem:[%s1704_s25 + $0xc0] sm:$0xff]  ;;  %v300_v45 = vld [vmem:[%s1704_s25 + $0xc8] sm:$0xff] }
  0x4b   : > { %v302_v46 = vld [vmem:[%s1704_s25 + $0xe0] sm:$0xff]  ;;  %299 = vst [vmem:[%s1709_s6 + $0x60] sm:$0xff] %v298_v44  ;;  %301 = vst [vmem:[%s1709_s6 + $0x68] sm:$0xff] %v300_v45  ;;  %v304_v47 = vld [vmem:[%s1704_s25 + $0xe8] sm:$0xff] }
  0x4c   : > { %303 = vst [vmem:[%s1709_s6 + $0x70] sm:$0xff] %v302_v46  ;;  %v306_v48 = vld [vmem:[%s1704_s25 + $0x100] sm:$0xff]  ;;  %v308_v49 = vld [vmem:[%s1704_s25 + $0x108] sm:$0xff]  ;;  %305 = vst [vmem:[%s1709_s6 + $0x78] sm:$0xff] %v304_v47 }
  0x4d   : > { %307 = vst [vmem:[%s1709_s6 + $0x80] sm:$0xff] %v306_v48  ;;  %309 = vst [vmem:[%s1709_s6 + $0x88] sm:$0xff] %v308_v49  ;;  %v310_v50 = vld [vmem:[%s1704_s25 + $0x120] sm:$0xff]  ;;  %v312_v51 = vld [vmem:[%s1704_s25 + $0x128] sm:$0xff] }
  0x4e   : > { %v314_v52 = vld [vmem:[%s1704_s25 + $0x140] sm:$0xff]  ;;  %311 = vst [vmem:[%s1709_s6 + $0x90] sm:$0xff] %v310_v50  ;;  %313 = vst [vmem:[%s1709_s6 + $0x98] sm:$0xff] %v312_v51  ;;  %v316_v53 = vld [vmem:[%s1704_s25 + $0x148] sm:$0xff] }
  0x4f   : > { %315 = vst [vmem:[%s1709_s6 + $0xa0] sm:$0xff] %v314_v52  ;;  %v318_v54 = vld [vmem:[%s1704_s25 + $0x160] sm:$0xff]  ;;  %v320_v55 = vld [vmem:[%s1704_s25 + $0x168] sm:$0xff]  ;;  %317 = vst [vmem:[%s1709_s6 + $0xa8] sm:$0xff] %v316_v53 }
  0x50   : > { %319 = vst [vmem:[%s1709_s6 + $0xb0] sm:$0xff] %v318_v54  ;;  %321 = vst [vmem:[%s1709_s6 + $0xb8] sm:$0xff] %v320_v55  ;;  %v322_v56 = vld [vmem:[%s1704_s25 + $0x180] sm:$0xff]  ;;  %v324_v57 = vld [vmem:[%s1704_s25 + $0x188] sm:$0xff] }
  0x51   : > { %v326_v58 = vld [vmem:[%s1704_s25 + $0x1a0] sm:$0xff]  ;;  %323 = vst [vmem:[%s1709_s6 + $0xc0] sm:$0xff] %v322_v56  ;;  %325 = vst [vmem:[%s1709_s6 + $0xc8] sm:$0xff] %v324_v57  ;;  %v328_v59 = vld [vmem:[%s1704_s25 + $0x1a8] sm:$0xff] }
  0x52   : > { %327 = vst [vmem:[%s1709_s6 + $0xd0] sm:$0xff] %v326_v58  ;;  %v330_v60 = vld [vmem:[%s1704_s25 + $0x1c0] sm:$0xff]  ;;  %v332_v61 = vld [vmem:[%s1704_s25 + $0x1c8] sm:$0xff]  ;;  %329 = vst [vmem:[%s1709_s6 + $0xd8] sm:$0xff] %v328_v59 }
  0x53   : > { %331 = vst [vmem:[%s1709_s6 + $0xe0] sm:$0xff] %v330_v60  ;;  %333 = vst [vmem:[%s1709_s6 + $0xe8] sm:$0xff] %v332_v61  ;;  %v334_v62 = vld [vmem:[%s1704_s25 + $0x1e0] sm:$0xff]  ;;  %v336_v63 = vld [vmem:[%s1704_s25 + $0x1e8] sm:$0xff] }
  0x54   : > { %v338_v0 = vld [vmem:[%s1704_s25 + $0x200] sm:$0xff]  ;;  %335 = vst [vmem:[%s1709_s6 + $0xf0] sm:$0xff] %v334_v62  ;;  %337 = vst [vmem:[%s1709_s6 + $0xf8] sm:$0xff] %v336_v63  ;;  %v340_v1 = vld [vmem:[%s1704_s25 + $0x208] sm:$0xff] }
  0x55   : > { %339 = vst [vmem:[%s1709_s6 + $0x100] sm:$0xff] %v338_v0  ;;  %v342_v2 = vld [vmem:[%s1704_s25 + $0x220] sm:$0xff]  ;;  %v344_v3 = vld [vmem:[%s1704_s25 + $0x228] sm:$0xff]  ;;  %341 = vst [vmem:[%s1709_s6 + $0x108] sm:$0xff] %v340_v1 }
  0x56   : > { %343 = vst [vmem:[%s1709_s6 + $0x110] sm:$0xff] %v342_v2  ;;  %345 = vst [vmem:[%s1709_s6 + $0x118] sm:$0xff] %v344_v3  ;;  %v346_v4 = vld [vmem:[%s1704_s25 + $0x240] sm:$0xff]  ;;  %v348_v5 = vld [vmem:[%s1704_s25 + $0x248] sm:$0xff] }
  0x57   : > { %v350_v6 = vld [vmem:[%s1704_s25 + $0x260] sm:$0xff]  ;;  %347 = vst [vmem:[%s1709_s6 + $0x120] sm:$0xff] %v346_v4  ;;  %349 = vst [vmem:[%s1709_s6 + $0x128] sm:$0xff] %v348_v5  ;;  %v352_v7 = vld [vmem:[%s1704_s25 + $0x268] sm:$0xff] }
  0x58   : > { %351 = vst [vmem:[%s1709_s6 + $0x130] sm:$0xff] %v350_v6  ;;  %v354_v8 = vld [vmem:[%s1704_s25 + $0x280] sm:$0xff]  ;;  %v356_v9 = vld [vmem:[%s1704_s25 + $0x288] sm:$0xff]  ;;  %353 = vst [vmem:[%s1709_s6 + $0x138] sm:$0xff] %v352_v7 }
  0x59   : > { %355 = vst [vmem:[%s1709_s6 + $0x140] sm:$0xff] %v354_v8  ;;  %357 = vst [vmem:[%s1709_s6 + $0x148] sm:$0xff] %v356_v9  ;;  %v358_v10 = vld [vmem:[%s1704_s25 + $0x2a0] sm:$0xff]  ;;  %v360_v11 = vld [vmem:[%s1704_s25 + $0x2a8] sm:$0xff] }
  0x5a   : > { %v362_v12 = vld [vmem:[%s1704_s25 + $0x2c0] sm:$0xff]  ;;  %359 = vst [vmem:[%s1709_s6 + $0x150] sm:$0xff] %v358_v10  ;;  %361 = vst [vmem:[%s1709_s6 + $0x158] sm:$0xff] %v360_v11  ;;  %v364_v13 = vld [vmem:[%s1704_s25 + $0x2c8] sm:$0xff] }
  0x5b   : > { %363 = vst [vmem:[%s1709_s6 + $0x160] sm:$0xff] %v362_v12  ;;  %v366_v14 = vld [vmem:[%s1704_s25 + $0x2e0] sm:$0xff]  ;;  %v368_v15 = vld [vmem:[%s1704_s25 + $0x2e8] sm:$0xff]  ;;  %365 = vst [vmem:[%s1709_s6 + $0x168] sm:$0xff] %v364_v13 }
  0x5c   : > { %367 = vst [vmem:[%s1709_s6 + $0x170] sm:$0xff] %v366_v14  ;;  %369 = vst [vmem:[%s1709_s6 + $0x178] sm:$0xff] %v368_v15  ;;  %v370_v16 = vld [vmem:[%s1704_s25 + $0x300] sm:$0xff]  ;;  %v372_v17 = vld [vmem:[%s1704_s25 + $0x308] sm:$0xff] }
  0x5d   : > { %v374_v18 = vld [vmem:[%s1704_s25 + $0x320] sm:$0xff]  ;;  %371 = vst [vmem:[%s1709_s6 + $0x180] sm:$0xff] %v370_v16  ;;  %373 = vst [vmem:[%s1709_s6 + $0x188] sm:$0xff] %v372_v17  ;;  %v376_v19 = vld [vmem:[%s1704_s25 + $0x328] sm:$0xff] }
  0x5e   : > { %375 = vst [vmem:[%s1709_s6 + $0x190] sm:$0xff] %v374_v18  ;;  %v378_v20 = vld [vmem:[%s1704_s25 + $0x340] sm:$0xff]  ;;  %v380_v21 = vld [vmem:[%s1704_s25 + $0x348] sm:$0xff]  ;;  %377 = vst [vmem:[%s1709_s6 + $0x198] sm:$0xff] %v376_v19 }
  0x5f   : > { %379 = vst [vmem:[%s1709_s6 + $0x1a0] sm:$0xff] %v378_v20  ;;  %381 = vst [vmem:[%s1709_s6 + $0x1a8] sm:$0xff] %v380_v21  ;;  %v382_v22 = vld [vmem:[%s1704_s25 + $0x360] sm:$0xff]  ;;  %v384_v23 = vld [vmem:[%s1704_s25 + $0x368] sm:$0xff] }
  0x60   : > { %v386_v24 = vld [vmem:[%s1704_s25 + $0x380] sm:$0xff]  ;;  %383 = vst [vmem:[%s1709_s6 + $0x1b0] sm:$0xff] %v382_v22  ;;  %385 = vst [vmem:[%s1709_s6 + $0x1b8] sm:$0xff] %v384_v23  ;;  %v388_v25 = vld [vmem:[%s1704_s25 + $0x388] sm:$0xff] }
  0x61   : > { %387 = vst [vmem:[%s1709_s6 + $0x1c0] sm:$0xff] %v386_v24  ;;  %v390_v26 = vld [vmem:[%s1704_s25 + $0x3a0] sm:$0xff]  ;;  %v392_v27 = vld [vmem:[%s1704_s25 + $0x3a8] sm:$0xff]  ;;  %389 = vst [vmem:[%s1709_s6 + $0x1c8] sm:$0xff] %v388_v25 }
  0x62   : > { %391 = vst [vmem:[%s1709_s6 + $0x1d0] sm:$0xff] %v390_v26  ;;  %393 = vst [vmem:[%s1709_s6 + $0x1d8] sm:$0xff] %v392_v27  ;;  %v394_v28 = vld [vmem:[%s1704_s25 + $0x3c0] sm:$0xff]  ;;  %v396_v29 = vld [vmem:[%s1704_s25 + $0x3c8] sm:$0xff] }
  0x63   : > { %v398_v30 = vld [vmem:[%s1704_s25 + $0x3e0] sm:$0xff]  ;;  %395 = vst [vmem:[%s1709_s6 + $0x1e0] sm:$0xff] %v394_v28  ;;  %397 = vst [vmem:[%s1709_s6 + $0x1e8] sm:$0xff] %v396_v29  ;;  %v400_v31 = vld [vmem:[%s1704_s25 + $0x3e8] sm:$0xff] }
  0x64   : > { %399 = vst [vmem:[%s1709_s6 + $0x1f0] sm:$0xff] %v398_v30  ;;  %401 = vst [vmem:[%s1709_s6 + $0x1f8] sm:$0xff] %v400_v31 }
  0x65 PF: > { %p1213_p0 = scmp.ge.s32.totalorder %s1499_s22, 1  ;;  %p414_p1 = scmp.lt.s32.totalorder %s1499_s22, 37 }
  0x67   : > { %p415_p2 = pnand %p1213_p0, %p414_p1 }
  0x68   : > { %s421_s0 = sand.u32 (!%p415_p2), 1, %s1475_s16   ;;  %s428_s5 = sand.u32 (!%p415_p2), 1, %s1467_s14  }
  0x69   : > { %418 = sbr.rel (%p415_p2) target bundleno = 472 (0x1d8), region = 70  ;;  %s1214_s23 = sshll.u32 (!%p415_p2), %s421_s0, 8 }
  0x6a   : > { %s1215_s28 = sshll.u32 (!%p415_p2), %s428_s5, 9  ;;  %s455_s7 = sand.u32 (!%p415_p2), 1, %s1459_s12  }
  0x6b   : > { %s1217_s11 = sshll.u32 (!%p415_p2), %s1487_s19, 1  ;;  %s1216_s25 = sshll.u32 (!%p415_p2), %s455_s7, 8 }
  0x6c   : > { %p463_p3 = scmp.lt.s32.totalorder (!%p415_p2), %s1217_s11, 3  ;;  %s1848_s4 = scalar_lea.vmem (!%p415_p2), [#allocation3], %s1214_s23 }
  0x6d   : > { %s1850_s6 = scalar_lea.vmem (!%p415_p2), [#allocation4], %s1215_s28  ;;  %s1852_s1 = scalar_lea.vmem (!%p415_p2), [#allocation5], %s1216_s25 }
  0x6e   : > { %p1218_p4 = scmp.ne.s32.totalorder (!%p415_p2), %s1483_s18, 0 }
  0x70   : > { %s2161_s11 = smov (!%p463_p3, %s1217_s11), 3  ;;  %472 = sbr.rel (%p1218_p4) target bundleno = 130 (0x82), region = 82 }
  0x71   : > { %s465_s29 = scalar_lea.vmem %s2132_s2, %s2161_s11  ;;  %v1501_v32 = vmov (!%p1218_p4), 0.0  }
  0x72   : > { %473 = vst [vmem:[#allocation2] sm:$0xff] (!%p1218_p4), %v1501_v32  ;;  %474 = vst [vmem:[#allocation2 + $0x8] sm:$0xff] (!%p1218_p4), %v1501_v32 }
  0x73   : > { %475 = vst [vmem:[#allocation2 + $0x10] sm:$0xff] (!%p1218_p4), %v1501_v32  ;;  %476 = vst [vmem:[#allocation2 + $0x18] sm:$0xff] (!%p1218_p4), %v1501_v32 }
  0x74   : > { %477 = vst [vmem:[#allocation2 + $0x20] sm:$0xff] (!%p1218_p4), %v1501_v32  ;;  %478 = vst [vmem:[#allocation2 + $0x28] sm:$0xff] (!%p1218_p4), %v1501_v32 }
  0x75   : > { %479 = vst [vmem:[#allocation2 + $0x30] sm:$0xff] (!%p1218_p4), %v1501_v32  ;;  %480 = vst [vmem:[#allocation2 + $0x38] sm:$0xff] (!%p1218_p4), %v1501_v32 }
  0x76   : > { %481 = vst [vmem:[#allocation2 + $0x40] sm:$0xff] (!%p1218_p4), %v1501_v32  ;;  %482 = vst [vmem:[#allocation2 + $0x48] sm:$0xff] (!%p1218_p4), %v1501_v32 }
  0x77   : > { %483 = vst [vmem:[#allocation2 + $0x50] sm:$0xff] %v1501_v32  ;;  %484 = vst [vmem:[#allocation2 + $0x58] sm:$0xff] %v1501_v32 }
  0x78   : > { %485 = vst [vmem:[#allocation2 + $0x60] sm:$0xff] %v1501_v32  ;;  %486 = vst [vmem:[#allocation2 + $0x68] sm:$0xff] %v1501_v32 }
  0x79   : > { %487 = vst [vmem:[#allocation2 + $0x70] sm:$0xff] %v1501_v32  ;;  %488 = vst [vmem:[#allocation2 + $0x78] sm:$0xff] %v1501_v32 }
  0x7a   : > { %489 = vst [vmem:[#allocation2 + $0x80] sm:$0xff] %v1501_v32  ;;  %490 = vst [vmem:[#allocation2 + $0x88] sm:$0xff] %v1501_v32 }
  0x7b   : > { %491 = vst [vmem:[#allocation2 + $0x90] sm:$0xff] %v1501_v32  ;;  %492 = vst [vmem:[#allocation2 + $0x98] sm:$0xff] %v1501_v32 }
  0x7c   : > { %493 = vst [vmem:[#allocation2 + $0xa0] sm:$0xff] %v1501_v32  ;;  %494 = vst [vmem:[#allocation2 + $0xa8] sm:$0xff] %v1501_v32 }
  0x7d   : > { %495 = vst [vmem:[#allocation2 + $0xb0] sm:$0xff] %v1501_v32  ;;  %496 = vst [vmem:[#allocation2 + $0xb8] sm:$0xff] %v1501_v32 }
  0x7e   : > { %497 = vst [vmem:[#allocation2 + $0xc0] sm:$0xff] %v1501_v32  ;;  %498 = vst [vmem:[#allocation2 + $0xc8] sm:$0xff] %v1501_v32 }
  0x7f   : > { %499 = vst [vmem:[#allocation2 + $0xd0] sm:$0xff] %v1501_v32  ;;  %500 = vst [vmem:[#allocation2 + $0xd8] sm:$0xff] %v1501_v32 }
  0x80   : > { %501 = vst [vmem:[#allocation2 + $0xe0] sm:$0xff] %v1501_v32  ;;  %502 = vst [vmem:[#allocation2 + $0xe8] sm:$0xff] %v1501_v32 }
  0x81   : > { %503 = vst [vmem:[#allocation2 + $0xf0] sm:$0xff] %v1501_v32  ;;  %504 = vst [vmem:[#allocation2 + $0xf8] sm:$0xff] %v1501_v32 }
  0x82 PF: > { %v570_v33 = vld [vmem:[%s1850_s6 + $0x8] sm:$0xff]  ;;  %v572_v34 = vld [vmem:[%s1850_s6 + $0x18] sm:$0xff]  ;;  %v569_v35 = vld [vmem:[%s1850_s6] sm:$0xff]  ;;  %p1219_p5 = scmp.ne.s32.totalorder %s1483_s18, 17 }
  0x83   : > { %v1228_v36 = vpack.c.bf16 %v572_v34, %v570_v33  ;;  %v571_v37 = vld [vmem:[%s1850_s6 + $0x10] sm:$0xff]  ;;  %v574_v38 = vld [vmem:[%s1850_s6 + $0x28] sm:$0xff]  ;;  %v576_v39 = vld [vmem:[%s1850_s6 + $0x38] sm:$0xff] }
  0x84   : > { %v1230_v40 = vpack.c.bf16 %v571_v37, %v569_v35  ;;  %v1232_v41 = vpack.c.bf16 %v576_v39, %v574_v38  ;;  %v573_v42 = vld [vmem:[%s1850_s6 + $0x20] sm:$0xff]  ;;  %v575_v43 = vld [vmem:[%s1850_s6 + $0x30] sm:$0xff]  ;;  %v578_v44 = vld [vmem:[%s1850_s6 + $0x48] sm:$0xff] }
  0x85   : > { %1229 = vmatprep.subr.bf16.mxu0 %v1228_v36  ;;  %1292 = vmatprep.subr.bf16.mxu1 %v1228_v36  ;;  %v580_v45 = vld [vmem:[%s1850_s6 + $0x58] sm:$0xff]  ;;  %v1234_v46 = vpack.c.bf16 %v575_v43, %v573_v42  ;;  %v577_v48 = vld [vmem:[%s1850_s6 + $0x40] sm:$0xff]  ;;  %v579_v49 = vld [vmem:[%s1850_s6 + $0x50] sm:$0xff] }
  0x86   : > { %1231 = vmatpush1.bf16.msra.mxu0 %v1230_v40  ;;  %1308 = vmatpush1.bf16.msra.mxu1 %v1230_v40  ;;  %v1236_v47 = vpack.c.bf16 %v580_v45, %v578_v44  ;;  %v582_v50 = vld [vmem:[%s1850_s6 + $0x68] sm:$0xff]  ;;  %v584_v51 = vld [vmem:[%s1850_s6 + $0x78] sm:$0xff]  ;;  %v1238_v52 = vpack.c.bf16 %v579_v49, %v577_v48  ;;  %v581_v54 = vld [vmem:[%s1850_s6 + $0x60] sm:$0xff] }
  0x87   : > { %1233 = vmatprep.subr.bf16.mxu0 %v1232_v41  ;;  %1293 = vmatprep.subr.bf16.mxu1 %v1232_v41  ;;  %v1240_v53 = vpack.c.bf16 %v584_v51, %v582_v50  ;;  %v583_v55 = vld [vmem:[%s1850_s6 + $0x70] sm:$0xff]  ;;  %v586_v56 = vld [vmem:[%s1850_s6 + $0x88] sm:$0xff]  ;;  %v588_v57 = vld [vmem:[%s1850_s6 + $0x98] sm:$0xff] }
  0x88   : > { %v1242_v58 = vpack.c.bf16 %v583_v55, %v581_v54  ;;  %v1244_v59 = vpack.c.bf16 %v588_v57, %v586_v56  ;;  %v585_v60 = vld [vmem:[%s1850_s6 + $0x80] sm:$0xff]  ;;  %v587_v61 = vld [vmem:[%s1850_s6 + $0x90] sm:$0xff]  ;;  %v590_v62 = vld [vmem:[%s1850_s6 + $0xa8] sm:$0xff] }
  0x89   : > { %v592_v63 = vld [vmem:[%s1850_s6 + $0xb8] sm:$0xff]  ;;  %v1246_v0 = vpack.c.bf16 %v587_v61, %v585_v60  ;;  %v589_v2 = vld [vmem:[%s1850_s6 + $0xa0] sm:$0xff]  ;;  %v591_v3 = vld [vmem:[%s1850_s6 + $0xb0] sm:$0xff] }
  0x8a   : > { %1235 = vmatpush1.bf16.msra.mxu0 %v1234_v46  ;;  %1309 = vmatpush1.bf16.msra.mxu1 %v1234_v46  ;;  %v1248_v1 = vpack.c.bf16 %v592_v63, %v590_v62  ;;  %v594_v4 = vld [vmem:[%s1850_s6 + $0xc8] sm:$0xff]  ;;  %v596_v5 = vld [vmem:[%s1850_s6 + $0xd8] sm:$0xff]  ;;  %v1250_v6 = vpack.c.bf16 %v591_v3, %v589_v2  ;;  %v593_v7 = vld [vmem:[%s1850_s6 + $0xc0] sm:$0xff] }
  0x8b   : > { %1237 = vmatprep.subr.bf16.mxu0 %v1236_v47  ;;  %1294 = vmatprep.subr.bf16.mxu1 %v1236_v47  ;;  %v1252_v8 = vpack.c.bf16 %v596_v5, %v594_v4  ;;  %v595_v9 = vld [vmem:[%s1850_s6 + $0xd0] sm:$0xff]  ;;  %v538_v10 = vld [vmem:[%s1848_s4 + $0x8] sm:$0xff]  ;;  %v600_v13 = vld [vmem:[%s1850_s6 + $0xf8] sm:$0xff] }
  0x8c   : > { %v554_v11 = vld [vmem:[%s1848_s4 + $0x88] sm:$0xff]  ;;  %697 = vmatprep.mubr.f32.mxu0 %v538_v10  ;;  %v1254_v14 = vpack.c.bf16 %v595_v9, %v593_v7  ;;  %v597_v16 = vld [vmem:[%s1850_s6 + $0xe0] sm:$0xff]  ;;  %v599_v17 = vld [vmem:[%s1850_s6 + $0xf0] sm:$0xff] }
  0x8d   : > { %v598_v12 = vld [vmem:[%s1850_s6 + $0xe8] sm:$0xff]  ;;  %745 = vmatprep.mubr.f32.mxu1 %v554_v11  ;;  %v604_v19 = vld [vmem:[%s1850_s6 + $0x118] sm:$0xff]  ;;  %v1258_v20 = vpack.c.bf16 %v599_v17, %v597_v16  ;;  %v601_v22 = vld [vmem:[%s1850_s6 + $0x100] sm:$0xff] }
  0x8e   : > { %1239 = vmatpush1.bf16.msra.mxu0 %v1238_v52  ;;  %1310 = vmatpush1.bf16.msra.mxu1 %v1238_v52  ;;  %v1256_v15 = vpack.c.bf16 %v600_v13, %v598_v12  ;;  %v602_v18 = vld [vmem:[%s1850_s6 + $0x108] sm:$0xff]  ;;  %v603_v23 = vld [vmem:[%s1850_s6 + $0x110] sm:$0xff]  ;;  %v608_v25 = vld [vmem:[%s1850_s6 + $0x138] sm:$0xff] }
  0x8f   : > { %1241 = vmatprep.subr.bf16.mxu0 %v1240_v53  ;;  %1295 = vmatprep.subr.bf16.mxu1 %v1240_v53  ;;  %v1260_v21 = vpack.c.bf16 %v604_v19, %v602_v18  ;;  %v606_v24 = vld [vmem:[%s1850_s6 + $0x128] sm:$0xff]  ;;  %v1262_v26 = vpack.c.bf16 %v603_v23, %v601_v22  ;;  %v605_v28 = vld [vmem:[%s1850_s6 + $0x120] sm:$0xff]  ;;  %v607_v29 = vld [vmem:[%s1850_s6 + $0x130] sm:$0xff] }
  0x90   : > { %v1264_v27 = vpack.c.bf16 %v608_v25, %v606_v24  ;;  %v610_v30 = vld [vmem:[%s1850_s6 + $0x148] sm:$0xff]  ;;  %v612_v31 = vld [vmem:[%s1850_s6 + $0x158] sm:$0xff]  ;;  %v1266_v32 = vpack.c.bf16 %v607_v29, %v605_v28  ;;  %v609_v34 = vld [vmem:[%s1850_s6 + $0x140] sm:$0xff] }
  0x91   : > { %v1268_v33 = vpack.c.bf16 %v612_v31, %v610_v30  ;;  %v611_v35 = vld [vmem:[%s1850_s6 + $0x150] sm:$0xff]  ;;  %v614_v36 = vld [vmem:[%s1850_s6 + $0x168] sm:$0xff]  ;;  %v616_v37 = vld [vmem:[%s1850_s6 + $0x178] sm:$0xff] }
  0x92   : > { %1243 = vmatpush1.bf16.msra.mxu0 %v1242_v58  ;;  %1311 = vmatpush1.bf16.msra.mxu1 %v1242_v58  ;;  %v1270_v38 = vpack.c.bf16 %v611_v35, %v609_v34  ;;  %v1272_v39 = vpack.c.bf16 %v616_v37, %v614_v36  ;;  %v613_v40 = vld [vmem:[%s1850_s6 + $0x160] sm:$0xff]  ;;  %v615_v41 = vld [vmem:[%s1850_s6 + $0x170] sm:$0xff]  ;;  %v618_v42 = vld [vmem:[%s1850_s6 + $0x188] sm:$0xff] }
  0x93   : > { %1245 = vmatprep.subr.bf16.mxu0 %v1244_v59  ;;  %1296 = vmatprep.subr.bf16.mxu1 %v1244_v59  ;;  %v620_v43 = vld [vmem:[%s1850_s6 + $0x198] sm:$0xff]  ;;  %v1274_v44 = vpack.c.bf16 %v615_v41, %v613_v40  ;;  %v617_v46 = vld [vmem:[%s1850_s6 + $0x180] sm:$0xff]  ;;  %v619_v47 = vld [vmem:[%s1850_s6 + $0x190] sm:$0xff] }
  0x94   : > { %v1276_v45 = vpack.c.bf16 %v620_v43, %v618_v42  ;;  %v622_v48 = vld [vmem:[%s1850_s6 + $0x1a8] sm:$0xff]  ;;  %v624_v49 = vld [vmem:[%s1850_s6 + $0x1b8] sm:$0xff]  ;;  %v1278_v50 = vpack.c.bf16 %v619_v47, %v617_v46  ;;  %v621_v52 = vld [vmem:[%s1850_s6 + $0x1a0] sm:$0xff] }
  0x95   : > { %v1280_v51 = vpack.c.bf16 %v624_v49, %v622_v48  ;;  %v623_v53 = vld [vmem:[%s1850_s6 + $0x1b0] sm:$0xff]  ;;  %v626_v54 = vld [vmem:[%s1850_s6 + $0x1c8] sm:$0xff]  ;;  %v628_v55 = vld [vmem:[%s1850_s6 + $0x1d8] sm:$0xff] }
  0x96   : > { %1247 = vmatpush1.bf16.msra.mxu0 %v1246_v0  ;;  %1312 = vmatpush1.bf16.msra.mxu1 %v1246_v0  ;;  %v1282_v56 = vpack.c.bf16 %v623_v53, %v621_v52  ;;  %v1284_v57 = vpack.c.bf16 %v628_v55, %v626_v54  ;;  %v625_v58 = vld [vmem:[%s1850_s6 + $0x1c0] sm:$0xff]  ;;  %v627_v59 = vld [vmem:[%s1850_s6 + $0x1d0] sm:$0xff]  ;;  %v630_v60 = vld [vmem:[%s1850_s6 + $0x1e8] sm:$0xff] }
  0x97   : > { %1249 = vmatprep.subr.bf16.mxu0 %v1248_v1  ;;  %1297 = vmatprep.subr.bf16.mxu1 %v1248_v1  ;;  %v632_v61 = vld [vmem:[%s1850_s6 + $0x1f8] sm:$0xff]  ;;  %v1286_v62 = vpack.c.bf16 %v627_v59, %v625_v58  ;;  %v629_v0 = vld [vmem:[%s1850_s6 + $0x1e0] sm:$0xff]  ;;  %v631_v1 = vld [vmem:[%s1850_s6 + $0x1f0] sm:$0xff] }
  0x98   : > { %v1288_v63 = vpack.c.bf16 %v632_v61, %v630_v60  ;;  %v1290_v2 = vpack.c.bf16 %v631_v1, %v629_v0  ;;  %v537_v3 = vld [vmem:[%s1848_s4] sm:$0xff]  ;;  %v540_v5 = vld [vmem:[%s1848_s4 + $0x18] sm:$0xff]  ;;  %v539_v7 = vld [vmem:[%s1848_s4 + $0x10] sm:$0xff] }
  0x99   : > { %v553_v4 = vld [vmem:[%s1848_s4 + $0x80] sm:$0xff]  ;;  %v542_v9 = vld [vmem:[%s1848_s4 + $0x28] sm:$0xff]  ;;  %v544_v13 = vld [vmem:[%s1848_s4 + $0x38] sm:$0xff] }
  0x9a   : > { %1251 = vmatpush1.bf16.msra.mxu0 %v1250_v6  ;;  %1313 = vmatpush1.bf16.msra.mxu1 %v1250_v6  ;;  %v556_v6 = vld [vmem:[%s1848_s4 + $0x98] sm:$0xff]  ;;  %v558_v10 = vld [vmem:[%s1848_s4 + $0xa8] sm:$0xff]  ;;  %v541_v11 = vld [vmem:[%s1848_s4 + $0x20] sm:$0xff] }
  0x9b   : > { %1253 = vmatprep.subr.bf16.mxu0 %v1252_v8  ;;  %1298 = vmatprep.subr.bf16.mxu1 %v1252_v8  ;;  %v555_v8 = vld [vmem:[%s1848_s4 + $0x90] sm:$0xff]  ;;  %v557_v12 = vld [vmem:[%s1848_s4 + $0xa0] sm:$0xff]  ;;  %v546_v17 = vld [vmem:[%s1848_s4 + $0x48] sm:$0xff] }
  0x9c   : > { %v559_v16 = vld [vmem:[%s1848_s4 + $0xb0] sm:$0xff]  ;;  %v562_v18 = vld [vmem:[%s1848_s4 + $0xc8] sm:$0xff]  ;;  %v545_v19 = vld [vmem:[%s1848_s4 + $0x40] sm:$0xff] }
  0x9d   : > { %v564_v22 = vld [vmem:[%s1848_s4 + $0xd8] sm:$0xff]  ;;  %v547_v23 = vld [vmem:[%s1848_s4 + $0x50] sm:$0xff]  ;;  %v550_v25 = vld [vmem:[%s1848_s4 + $0x68] sm:$0xff] }
  0x9e   : > { %1255 = vmatpush1.bf16.msra.mxu0 %v1254_v14  ;;  %1314 = vmatpush1.bf16.msra.mxu1 %v1254_v14  ;;  %v560_v14 = vld [vmem:[%s1848_s4 + $0xb8] sm:$0xff]  ;;  %v563_v24 = vld [vmem:[%s1848_s4 + $0xd0] sm:$0xff]  ;;  %v565_v28 = vld [vmem:[%s1848_s4 + $0xe0] sm:$0xff] }
  0x9f   : > { %1257 = vmatprep.subr.bf16.mxu0 %v1256_v15  ;;  %1299 = vmatprep.subr.bf16.mxu1 %v1256_v15  ;;  %v543_v15 = vld [vmem:[%s1848_s4 + $0x30] sm:$0xff]  ;;  %v552_v29 = vld [vmem:[%s1848_s4 + $0x78] sm:$0xff]  ;;  %v521_v34 = vld [vmem:[#allocation2 + $0x80] sm:$0xff] }
  0xa0   : > { %v568_v30 = vld [vmem:[%s1848_s4 + $0xf8] sm:$0xff]  ;;  %v551_v31 = vld [vmem:[%s1848_s4 + $0x70] sm:$0xff]  ;;  %v506_v35 = vld [vmem:[#allocation2 + $0x8] sm:$0xff] }
  0xa1   : > { %v522_v36 = vld [vmem:[#allocation2 + $0x88] sm:$0xff]  ;;  %v523_v46 = vld [vmem:[#allocation2 + $0x90] sm:$0xff]  ;;  %v508_v47 = vld [vmem:[#allocation2 + $0x18] sm:$0xff] }
  0xa2   : > { %1259 = vmatpush1.bf16.msra.mxu0 %v1258_v20  ;;  %1315 = vmatpush1.bf16.msra.mxu1 %v1258_v20  ;;  %v561_v20 = vld [vmem:[%s1848_s4 + $0xc0] sm:$0xff]  ;;  %v524_v48 = vld [vmem:[#allocation2 + $0x98] sm:$0xff]  ;;  %v510_v59 = vld [vmem:[#allocation2 + $0x28] sm:$0xff] }
  0xa3   : > { %1261 = vmatprep.subr.bf16.mxu0 %v1260_v21  ;;  %1300 = vmatprep.subr.bf16.mxu1 %v1260_v21  ;;  %v548_v21 = vld [vmem:[%s1848_s4 + $0x58] sm:$0xff]  ;;  %v525_v58 = vld [vmem:[#allocation2 + $0xa0] sm:$0xff]  ;;  %v526_v60 = vld [vmem:[#allocation2 + $0xa8] sm:$0xff] }
  0xa6   : > { %1263 = vmatpush1.bf16.msra.mxu0 %v1262_v26  ;;  %1316 = vmatpush1.bf16.msra.mxu1 %v1262_v26  ;;  %v566_v26 = vld [vmem:[%s1848_s4 + $0xe8] sm:$0xff] }
  0xa7   : > { %1265 = vmatprep.subr.bf16.mxu0 %v1264_v27  ;;  %1301 = vmatprep.subr.bf16.mxu1 %v1264_v27  ;;  %v549_v27 = vld [vmem:[%s1848_s4 + $0x60] sm:$0xff] }
  0xaa   : > { %1267 = vmatpush1.bf16.msra.mxu0 %v1266_v32  ;;  %1317 = vmatpush1.bf16.msra.mxu1 %v1266_v32  ;;  %v567_v32 = vld [vmem:[%s1848_s4 + $0xf0] sm:$0xff] }
  0xab   : > { %1269 = vmatprep.subr.bf16.mxu0 %v1268_v33  ;;  %1302 = vmatprep.subr.bf16.mxu1 %v1268_v33  ;;  %v505_v33 = vld [vmem:[#allocation2] sm:$0xff] }
  0xae   : > { %1271 = vmatpush1.bf16.msra.mxu0 %v1270_v38  ;;  %1318 = vmatpush1.bf16.msra.mxu1 %v1270_v38 }
  0xaf   : > { %1273 = vmatprep.subr.bf16.mxu0 %v1272_v39  ;;  %1303 = vmatprep.subr.bf16.mxu1 %v1272_v39 }
  0xb2   : > { %1275 = vmatpush1.bf16.msra.mxu0 %v1274_v44  ;;  %1319 = vmatpush1.bf16.msra.mxu1 %v1274_v44 }
  0xb3   : > { %1277 = vmatprep.subr.bf16.mxu0 %v1276_v45  ;;  %1304 = vmatprep.subr.bf16.mxu1 %v1276_v45  ;;  %v507_v45 = vld [vmem:[#allocation2 + $0x10] sm:$0xff] }
  0xb6   : > { %1279 = vmatpush1.bf16.msra.mxu0 %v1278_v50  ;;  %1320 = vmatpush1.bf16.msra.mxu1 %v1278_v50 }
  0xb7   : > { %1281 = vmatprep.subr.bf16.mxu0 %v1280_v51  ;;  %1305 = vmatprep.subr.bf16.mxu1 %v1280_v51 }
  0xba   : > { %1283 = vmatpush1.bf16.msra.mxu0 %v1282_v56  ;;  %1321 = vmatpush1.bf16.msra.mxu1 %v1282_v56 }
  0xbb   : > { %1285 = vmatprep.subr.bf16.mxu0 %v1284_v57  ;;  %1306 = vmatprep.subr.bf16.mxu1 %v1284_v57  ;;  %v509_v57 = vld [vmem:[#allocation2 + $0x20] sm:$0xff] }
  0xbe   : > { %1287 = vmatpush1.bf16.msra.mxu0 %v1286_v62  ;;  %1322 = vmatpush1.bf16.msra.mxu1 %v1286_v62 }
  0xbf   : > { %1289 = vmatprep.subr.bf16.mxu0 %v1288_v63  ;;  %1307 = vmatprep.subr.bf16.mxu1 %v1288_v63 }
  0xc2   : > { %1291 = vmatpush1.bf16.msra.mxu0 %v1290_v2  ;;  %1323 = vmatpush1.bf16.msra.mxu1 %v1290_v2 }
  0xc5   : > { %698 = vmatmul.mubr.f32.vlgmr.msra.gmra.mrb[0].mxu0 %v537_v3  ;;  %746 = vmatmul.mubr.f32.vlgmr.msra.gmra.mrb[0].mxu1 %v553_v4 }
  0xc6   : > { %703 = vmatprep.mubr.f32.mxu0 %v540_v5  ;;  %751 = vmatprep.mubr.f32.mxu1 %v556_v6  ;;  %v511_v5 = vld [vmem:[#allocation2 + $0x30] sm:$0xff] }
  0xc7   : > { %v527_v6 = vld [vmem:[#allocation2 + $0xb0] sm:$0xff] }
  0xc9   : > { %704 = vmatmul.mubr.f32.gmra.mrb[2].mxu0 %v539_v7  ;;  %752 = vmatmul.mubr.f32.gmra.mrb[2].mxu1 %v555_v8  ;;  %v512_v7 = vld [vmem:[#allocation2 + $0x38] sm:$0xff] }
  0xca   : > { %709 = vmatprep.mubr.f32.mxu0 %v542_v9  ;;  %757 = vmatprep.mubr.f32.mxu1 %v558_v10  ;;  %v528_v8 = vld [vmem:[#allocation2 + $0xb8] sm:$0xff] }
  0xcd   : > { %710 = vmatmul.mubr.f32.gmra.mrb[4].mxu0 %v541_v11  ;;  %758 = vmatmul.mubr.f32.gmra.mrb[4].mxu1 %v557_v12 }
  0xce   : > { %715 = vmatprep.mubr.f32.mxu0 %v544_v13  ;;  %763 = vmatprep.mubr.f32.mxu1 %v560_v14 }
  0xd1   : > { %716 = vmatmul.mubr.f32.gmra.mrb[6].mxu0 %v543_v15  ;;  %764 = vmatmul.mubr.f32.gmra.mrb[6].mxu1 %v559_v16 }
  0xd2   : > { %721 = vmatprep.mubr.f32.mxu0 %v546_v17  ;;  %769 = vmatprep.mubr.f32.mxu1 %v562_v18  ;;  %v513_v17 = vld [vmem:[#allocation2 + $0x40] sm:$0xff] }
  0xd3   : > { %v529_v18 = vld [vmem:[#allocation2 + $0xc0] sm:$0xff] }
  0xd5   : > { %722 = vmatmul.mubr.f32.gmra.mrb[8].mxu0 %v545_v19  ;;  %770 = vmatmul.mubr.f32.gmra.mrb[8].mxu1 %v561_v20  ;;  %v514_v19 = vld [vmem:[#allocation2 + $0x48] sm:$0xff] }
  0xd6   : > { %727 = vmatprep.mubr.f32.mxu0 %v548_v21  ;;  %775 = vmatprep.mubr.f32.mxu1 %v564_v22  ;;  %v530_v20 = vld [vmem:[#allocation2 + $0xc8] sm:$0xff] }
  0xd9   : > { %728 = vmatmul.mubr.f32.gmra.mrb[10].mxu0 %v547_v23  ;;  %776 = vmatmul.mubr.f32.gmra.mrb[10].mxu1 %v563_v24 }
  0xda   : > { %733 = vmatprep.mubr.f32.mxu0 %v550_v25  ;;  %781 = vmatprep.mubr.f32.mxu1 %v566_v26 }
  0xdd   : > { %734 = vmatmul.mubr.f32.gmra.mrb[12].mxu0 %v549_v27  ;;  %782 = vmatmul.mubr.f32.gmra.mrb[12].mxu1 %v565_v28 }
  0xde   : > { %739 = vmatprep.mubr.f32.mxu0 %v552_v29  ;;  %787 = vmatprep.mubr.f32.mxu1 %v568_v30  ;;  %v515_v29 = vld [vmem:[#allocation2 + $0x50] sm:$0xff] }
  0xdf   : > { %v531_v30 = vld [vmem:[#allocation2 + $0xd0] sm:$0xff] }
  0xe1   : > { %740 = vmatmul.mubr.f32.gmra.mrb[14].mxu0 %v551_v31  ;;  %788 = vmatmul.mubr.f32.gmra.mrb[14].mxu1 %v567_v32  ;;  %v516_v31 = vld [vmem:[#allocation2 + $0x58] sm:$0xff] }
  0xe2   : > { %v532_v32 = vld [vmem:[#allocation2 + $0xd8] sm:$0xff] }
 0x198   : > { %v699_v37 = vpop.f32.mrb[0].mxu0  ;;  %v747_v38 = vpop.f32.mrb[0].mxu1 }
 0x199   : > { %v794_v39 = vadd.f32 %v699_v37, %v505_v33  ;;  %v810_v40 = vadd.f32 %v747_v38, %v521_v34  ;;  %v701_v41 = vpop.f32.mrb[1].mxu0  ;;  %v749_v42 = vpop.f32.mrb[1].mxu1 }
 0x19a   : > { %v795_v43 = vadd.f32 %v701_v41, %v506_v35  ;;  %v811_v44 = vadd.f32 %v749_v42, %v522_v36  ;;  %v517_v41 = vld [vmem:[#allocation2 + $0x60] sm:$0xff] }
 0x19b   : > { %826 = vst [vmem:[#allocation2] sm:$0xff] %v794_v39  ;;  %842 = vst [vmem:[#allocation2 + $0x80] sm:$0xff] %v810_v40  ;;  %v533_v42 = vld [vmem:[#allocation2 + $0xe0] sm:$0xff] }
 0x19c   : > { %827 = vst [vmem:[#allocation2 + $0x8] sm:$0xff] %v795_v43  ;;  %843 = vst [vmem:[#allocation2 + $0x88] sm:$0xff] %v811_v44  ;;  %v705_v49 = vpop.f32.mrb[2].mxu0  ;;  %v753_v50 = vpop.f32.mrb[2].mxu1  ;;  %v518_v43 = vld [vmem:[#allocation2 + $0x68] sm:$0xff] }
 0x19d   : > { %v796_v51 = vadd.f32 %v705_v49, %v507_v45  ;;  %v812_v52 = vadd.f32 %v753_v50, %v523_v46  ;;  %v707_v53 = vpop.f32.mrb[3].mxu0  ;;  %v755_v54 = vpop.f32.mrb[3].mxu1  ;;  %v534_v44 = vld [vmem:[#allocation2 + $0xe8] sm:$0xff] }
 0x19e   : > { %v797_v55 = vadd.f32 %v707_v53, %v508_v47  ;;  %v813_v56 = vadd.f32 %v755_v54, %v524_v48  ;;  %v519_v53 = vld [vmem:[#allocation2 + $0x70] sm:$0xff] }
 0x19f   : > { %828 = vst [vmem:[#allocation2 + $0x10] sm:$0xff] %v796_v51  ;;  %844 = vst [vmem:[#allocation2 + $0x90] sm:$0xff] %v812_v52  ;;  %v535_v54 = vld [vmem:[#allocation2 + $0xf0] sm:$0xff] }
 0x1a0   : > { %829 = vst [vmem:[#allocation2 + $0x18] sm:$0xff] %v797_v55  ;;  %845 = vst [vmem:[#allocation2 + $0x98] sm:$0xff] %v813_v56  ;;  %v711_v61 = vpop.f32.mrb[4].mxu0  ;;  %v759_v62 = vpop.f32.mrb[4].mxu1  ;;  %v520_v55 = vld [vmem:[#allocation2 + $0x78] sm:$0xff] }
 0x1a1   : > { %v798_v63 = vadd.f32 %v711_v61, %v509_v57  ;;  %v814_v0 = vadd.f32 %v759_v62, %v525_v58  ;;  %v713_v1 = vpop.f32.mrb[5].mxu0  ;;  %v761_v2 = vpop.f32.mrb[5].mxu1  ;;  %v536_v56 = vld [vmem:[#allocation2 + $0xf8] sm:$0xff] }
 0x1a2   : > { %v799_v3 = vadd.f32 %v713_v1, %v510_v59  ;;  %v815_v4 = vadd.f32 %v761_v2, %v526_v60  ;;  %v896_v1 = vlaneseq (!%p1219_p5) }
 0x1a3   : > { %830 = vst [vmem:[#allocation2 + $0x20] sm:$0xff] %v798_v63  ;;  %846 = vst [vmem:[#allocation2 + $0xa0] sm:$0xff] %v814_v0 }
 0x1a4   : > { %831 = vst [vmem:[#allocation2 + $0x28] sm:$0xff] %v799_v3  ;;  %847 = vst [vmem:[#allocation2 + $0xa8] sm:$0xff] %v815_v4  ;;  %v717_v9 = vpop.f32.mrb[6].mxu0  ;;  %v765_v10 = vpop.f32.mrb[6].mxu1  ;;  %v897_v2 = vshrl.u32 (!%p1219_p5), %v896_v1, 7  ;;  %v862_v4 = vld [vmem:[#allocation2] sm:$0xff] (!%p1219_p5) }
 0x1a5   : > { %v800_v11 = vadd.f32 %v717_v9, %v511_v5  ;;  %v816_v12 = vadd.f32 %v765_v10, %v527_v6  ;;  %v719_v13 = vpop.f32.mrb[7].mxu0  ;;  %v767_v14 = vpop.f32.mrb[7].mxu1  ;;  %v894_v3 = vld [vmem:[%s465_s29] sm:$0x3] (!%p1219_p5)  ;;  %v863_v6 = vld [vmem:[#allocation2 + $0x8] sm:$0xff] (!%p1219_p5) }
 0x1a6   : > { %v801_v15 = vadd.f32 %v719_v13, %v512_v7  ;;  %v817_v16 = vadd.f32 %v767_v14, %v528_v8  ;;  %v898_v5 = vsub.s32 (!%p1219_p5), 0, %v897_v2  ;;  %v902_v7 = vsub.s32 (!%p1219_p5), 1, %v897_v2  ;;  %v864_v8 = vld [vmem:[#allocation2 + $0x10] sm:$0xff] (!%p1219_p5) }
 0x1a7   : > { %832 = vst [vmem:[#allocation2 + $0x30] sm:$0xff] %v800_v11  ;;  %848 = vst [vmem:[#allocation2 + $0xb0] sm:$0xff] %v816_v12  ;;  %v865_v9 = vld [vmem:[#allocation2 + $0x18] sm:$0xff] (!%p1219_p5) }
 0x1a8   : > { %833 = vst [vmem:[#allocation2 + $0x38] sm:$0xff] %v801_v15  ;;  %849 = vst [vmem:[#allocation2 + $0xb8] sm:$0xff] %v817_v16  ;;  %v723_v21 = vpop.f32.mrb[8].mxu0  ;;  %v771_v22 = vpop.f32.mrb[8].mxu1  ;;  %v1957_v11 = vrot.slane (!%p1219_p5), %v894_v3, %v898_v5  ;;  %v1959_v12 = vrot.slane (!%p1219_p5), %v894_v3, %v902_v7 }
 0x1a9   : > { %v802_v23 = vadd.f32 %v723_v21, %v513_v17  ;;  %v818_v24 = vadd.f32 %v771_v22, %v529_v18  ;;  %v725_v25 = vpop.f32.mrb[9].mxu0  ;;  %v773_v26 = vpop.f32.mrb[9].mxu1 }
 0x1aa   : > { %v803_v27 = vadd.f32 %v725_v25, %v514_v19  ;;  %v819_v28 = vadd.f32 %v773_v26, %v530_v20  ;;  %v866_v10 = vld [vmem:[#allocation2 + $0x20] sm:$0xff] (!%p1219_p5)  ;;  %v906_v16 = vadd.f32 (!%p1219_p5), %v1957_v11, %v862_v4  ;;  %v907_v17 = vadd.f32 (!%p1219_p5), %v1959_v12, %v863_v6 }
 0x1ab   : > { %834 = vst [vmem:[#allocation2 + $0x40] sm:$0xff] %v802_v23  ;;  %850 = vst [vmem:[#allocation2 + $0xc0] sm:$0xff] %v818_v24  ;;  %v867_v13 = vld [vmem:[#allocation2 + $0x28] sm:$0xff] (!%p1219_p5)  ;;  %v908_v18 = vadd.f32 (!%p1219_p5), %v1957_v11, %v864_v8  ;;  %v909_v19 = vadd.f32 (!%p1219_p5), %v1959_v12, %v865_v9  ;;  %v910_v23 = vadd.f32 (!%p1219_p5), %v1957_v11, %v866_v10 }
 0x1ac   : > { %835 = vst [vmem:[#allocation2 + $0x48] sm:$0xff] %v803_v27  ;;  %851 = vst [vmem:[#allocation2 + $0xc8] sm:$0xff] %v819_v28  ;;  %v729_v33 = vpop.f32.mrb[10].mxu0  ;;  %v777_v34 = vpop.f32.mrb[10].mxu1  ;;  %v911_v24 = vadd.f32 (!%p1219_p5), %v1959_v12, %v867_v13 }
 0x1ad   : > { %v804_v35 = vadd.f32 %v729_v33, %v515_v29  ;;  %v820_v36 = vadd.f32 %v777_v34, %v531_v30  ;;  %v731_v37 = vpop.f32.mrb[11].mxu0  ;;  %v779_v38 = vpop.f32.mrb[11].mxu1  ;;  %v938_v30 = vmax.f32 (!%p1219_p5), %v906_v16, 0.0  ;;  %v941_v33 = vmax.f32 (!%p1219_p5), %v909_v19, 0.0 }
 0x1ae   : > { %v805_v39 = vadd.f32 %v731_v37, %v516_v31  ;;  %v821_v40 = vadd.f32 %v779_v38, %v532_v32  ;;  %v868_v14 = vld [vmem:[#allocation2 + $0x30] sm:$0xff] (!%p1219_p5)  ;;  %v939_v31 = vmax.f32 (!%p1219_p5), %v907_v17, 0.0  ;;  %v940_v32 = vmax.f32 (!%p1219_p5), %v908_v18, 0.0 }
 0x1af   : > { %836 = vst [vmem:[#allocation2 + $0x50] sm:$0xff] %v804_v35  ;;  %852 = vst [vmem:[#allocation2 + $0xd0] sm:$0xff] %v820_v36  ;;  %v869_v15 = vld [vmem:[#allocation2 + $0x38] sm:$0xff] (!%p1219_p5)  ;;  %v912_v25 = vadd.f32 (!%p1219_p5), %v1957_v11, %v868_v14  ;;  %v942_v36 = vmax.f32 (!%p1219_p5), %v910_v23, 0.0  ;;  %v943_v37 = vmax.f32 (!%p1219_p5), %v911_v24, 0.0 }
 0x1b0   : > { %837 = vst [vmem:[#allocation2 + $0x58] sm:$0xff] %v805_v39  ;;  %853 = vst [vmem:[#allocation2 + $0xd8] sm:$0xff] %v821_v40  ;;  %v735_v45 = vpop.f32.mrb[12].mxu0  ;;  %v783_v46 = vpop.f32.mrb[12].mxu1  ;;  %v913_v26 = vadd.f32 (!%p1219_p5), %v1959_v12, %v869_v15 }
 0x1b1   : > { %v806_v47 = vadd.f32 %v735_v45, %v517_v41  ;;  %v822_v48 = vadd.f32 %v783_v46, %v533_v42  ;;  %v737_v49 = vpop.f32.mrb[13].mxu0  ;;  %v785_v50 = vpop.f32.mrb[13].mxu1  ;;  %v944_v38 = vmax.f32 (!%p1219_p5), %v912_v25, 0.0  ;;  %970 = vst [vmem:[%s1852_s1] sm:$0xff] (!%p1219_p5), %v938_v30  ;;  %971 = vst [vmem:[%s1852_s1 + $0x8] sm:$0xff] (!%p1219_p5), %v939_v31  ;;  %v879_v45 = vld [vmem:[#allocation2 + $0x88] sm:$0xff] (!%p1219_p5)  ;;  %v880_v46 = vld [vmem:[#allocation2 + $0x90] sm:$0xff] (!%p1219_p5) }
 0x1b2   : > { %v807_v51 = vadd.f32 %v737_v49, %v518_v43  ;;  %v823_v52 = vadd.f32 %v785_v50, %v534_v44  ;;  %861 = sbr.rel (%p1219_p5) target bundleno = 454 (0x1c6), region = 86  ;;  %v870_v20 = vld [vmem:[#allocation2 + $0x40] sm:$0xff] (!%p1219_p5)  ;;  %v945_v39 = vmax.f32 (!%p1219_p5), %v913_v26, 0.0  ;;  %972 = vst [vmem:[%s1852_s1 + $0x10] sm:$0xff] (!%p1219_p5), %v940_v32  ;;  %973 = vst [vmem:[%s1852_s1 + $0x18] sm:$0xff] (!%p1219_p5), %v941_v33  ;;  %v923_v1 = vadd.f32 (!%p1219_p5), %v1959_v12, %v879_v45 }
 0x1b3   : > { %838 = vst [vmem:[#allocation2 + $0x60] sm:$0xff] %v806_v47  ;;  %854 = vst [vmem:[#allocation2 + $0xe0] sm:$0xff] %v822_v48  ;;  %v871_v21 = vld [vmem:[#allocation2 + $0x48] sm:$0xff] (!%p1219_p5)  ;;  %v914_v40 = vadd.f32 (!%p1219_p5), %v1957_v11, %v870_v20  ;;  %v878_v44 = vld [vmem:[#allocation2 + $0x80] sm:$0xff] (!%p1219_p5)  ;;  %v924_v2 = vadd.f32 (!%p1219_p5), %v1957_v11, %v880_v46 }
 0x1b4   : > { %839 = vst [vmem:[#allocation2 + $0x68] sm:$0xff] %v807_v51  ;;  %855 = vst [vmem:[#allocation2 + $0xe8] sm:$0xff] %v823_v52  ;;  %v741_v57 = vpop.f32.mrb[14].mxu0  ;;  %v789_v58 = vpop.f32.mrb[14].mxu1  ;;  %v915_v41 = vadd.f32 (!%p1219_p5), %v1959_v12, %v871_v21  ;;  %v881_v51 = vld [vmem:[#allocation2 + $0x98] sm:$0xff] (!%p1219_p5)  ;;  %v882_v52 = vld [vmem:[#allocation2 + $0xa0] sm:$0xff] (!%p1219_p5) }
 0x1b5   : > { %v808_v59 = vadd.f32 %v741_v57, %v519_v53  ;;  %v824_v60 = vadd.f32 %v789_v58, %v535_v54  ;;  %v743_v61 = vpop.f32.mrb[15].mxu0  ;;  %v791_v62 = vpop.f32.mrb[15].mxu1  ;;  %974 = vst [vmem:[%s1852_s1 + $0x20] sm:$0xff] (!%p1219_p5), %v942_v36  ;;  %975 = vst [vmem:[%s1852_s1 + $0x28] sm:$0xff] (!%p1219_p5), %v943_v37  ;;  %v883_v53 = vld [vmem:[#allocation2 + $0xa8] sm:$0xff] (!%p1219_p5)  ;;  %v946_v54 = vmax.f32 (!%p1219_p5), %v914_v40, 0.0  ;;  %v925_v3 = vadd.f32 (!%p1219_p5), %v1959_v12, %v881_v51 }
 0x1b6   : > { %v809_v63 = vadd.f32 %v743_v61, %v520_v55  ;;  %v825_v0 = vadd.f32 %v791_v62, %v536_v56  ;;  %v872_v22 = vld [vmem:[#allocation2 + $0x50] sm:$0xff] (!%p1219_p5)  ;;  %976 = vst [vmem:[%s1852_s1 + $0x30] sm:$0xff] (!%p1219_p5), %v944_v38  ;;  %977 = vst [vmem:[%s1852_s1 + $0x38] sm:$0xff] (!%p1219_p5), %v945_v39  ;;  %v947_v55 = vmax.f32 (!%p1219_p5), %v915_v41, 0.0  ;;  %v886_v4 = vld [vmem:[#allocation2 + $0xc0] sm:$0xff] (!%p1219_p5)  ;;  %v926_v7 = vadd.f32 (!%p1219_p5), %v1957_v11, %v882_v52 }
 0x1b7   : > { %840 = vst [vmem:[#allocation2 + $0x70] sm:$0xff] %v808_v59  ;;  %856 = vst [vmem:[#allocation2 + $0xf0] sm:$0xff] %v824_v60  ;;  %v873_v27 = vld [vmem:[#allocation2 + $0x58] sm:$0xff] (!%p1219_p5)  ;;  %v916_v42 = vadd.f32 (!%p1219_p5), %v1957_v11, %v872_v22  ;;  %v884_v58 = vld [vmem:[#allocation2 + $0xb0] sm:$0xff] (!%p1219_p5)  ;;  %v927_v8 = vadd.f32 (!%p1219_p5), %v1959_v12, %v883_v53  ;;  %v955_v17 = vmax.f32 (!%p1219_p5), %v923_v1, 0.0  ;;  %v956_v18 = vmax.f32 (!%p1219_p5), %v924_v2, 0.0 }
 0x1b8   : > { %841 = vst [vmem:[#allocation2 + $0x78] sm:$0xff] %v809_v63  ;;  %857 = vst [vmem:[#allocation2 + $0xf8] sm:$0xff] %v825_v0  ;;  %v917_v43 = vadd.f32 (!%p1219_p5), %v1959_v12, %v873_v27  ;;  %v885_v59 = vld [vmem:[#allocation2 + $0xb8] sm:$0xff] (!%p1219_p5)  ;;  %v922_v0 = vadd.f32 (!%p1219_p5), %v1957_v11, %v878_v44  ;;  %v887_v5 = vld [vmem:[#allocation2 + $0xc8] sm:$0xff] (!%p1219_p5)  ;;  %v928_v9 = vadd.f32 (!%p1219_p5), %v1957_v11, %v884_v58  ;;  %v957_v19 = vmax.f32 (!%p1219_p5), %v925_v3, 0.0 }
 0x1b9   : > { %v948_v56 = vmax.f32 %v916_v42, 0.0  ;;  %978 = vst [vmem:[%s1852_s1 + $0x40] sm:$0xff] %v946_v54  ;;  %979 = vst [vmem:[%s1852_s1 + $0x48] sm:$0xff] %v947_v55  ;;  %v888_v6 = vld [vmem:[#allocation2 + $0xd0] sm:$0xff]  ;;  %v929_v10 = vadd.f32 %v1959_v12, %v885_v59  ;;  %v889_v13 = vld [vmem:[#allocation2 + $0xd8] sm:$0xff]  ;;  %v958_v22 = vmax.f32 %v926_v7, 0.0  ;;  %v930_v26 = vadd.f32 %v1957_v11, %v886_v4 }
 0x1ba   : > { %v874_v28 = vld [vmem:[#allocation2 + $0x60] sm:$0xff]  ;;  %v949_v57 = vmax.f32 %v917_v43, 0.0  ;;  %v954_v16 = vmax.f32 %v922_v0, 0.0  ;;  %v959_v23 = vmax.f32 %v927_v8, 0.0  ;;  %v960_v24 = vmax.f32 %v928_v9, 0.0  ;;  %987 = vst [vmem:[%s1852_s1 + $0x88] sm:$0xff] %v955_v17 }
 0x1bb   : > { %v875_v29 = vld [vmem:[#allocation2 + $0x68] sm:$0xff]  ;;  %v918_v47 = vadd.f32 %v1957_v11, %v874_v28  ;;  %980 = vst [vmem:[%s1852_s1 + $0x50] sm:$0xff] %v948_v56  ;;  %v890_v14 = vld [vmem:[#allocation2 + $0xe0] sm:$0xff]  ;;  %v961_v25 = vmax.f32 %v929_v10, 0.0  ;;  %988 = vst [vmem:[%s1852_s1 + $0x90] sm:$0xff] %v956_v18  ;;  %v931_v27 = vadd.f32 %v1959_v12, %v887_v5  ;;  %v932_v28 = vadd.f32 %v1957_v11, %v888_v6 }
 0x1bc   : > { %v919_v48 = vadd.f32 %v1959_v12, %v875_v29  ;;  %981 = vst [vmem:[%s1852_s1 + $0x58] sm:$0xff] %v949_v57  ;;  %v891_v15 = vld [vmem:[#allocation2 + $0xe8] sm:$0xff]  ;;  %986 = vst [vmem:[%s1852_s1 + $0x80] sm:$0xff] %v954_v16  ;;  %v933_v29 = vadd.f32 %v1959_v12, %v889_v13  ;;  %v934_v30 = vadd.f32 %v1957_v11, %v890_v14 }
 0x1bd   : > { %v950_v60 = vmax.f32 %v918_v47, 0.0  ;;  %989 = vst [vmem:[%s1852_s1 + $0x98] sm:$0xff] %v957_v19  ;;  %990 = vst [vmem:[%s1852_s1 + $0xa0] sm:$0xff] %v958_v22  ;;  %v935_v31 = vadd.f32 %v1959_v12, %v891_v15  ;;  %v964_v36 = vmax.f32 %v932_v28, 0.0 }
 0x1be   : > { %v876_v34 = vld [vmem:[#allocation2 + $0x70] sm:$0xff]  ;;  %v951_v61 = vmax.f32 %v919_v48, 0.0  ;;  %991 = vst [vmem:[%s1852_s1 + $0xa8] sm:$0xff] %v959_v23  ;;  %992 = vst [vmem:[%s1852_s1 + $0xb0] sm:$0xff] %v960_v24  ;;  %v965_v37 = vmax.f32 %v933_v29, 0.0  ;;  %v966_v38 = vmax.f32 %v934_v30, 0.0 }
 0x1bf   : > { %v877_v35 = vld [vmem:[#allocation2 + $0x78] sm:$0xff]  ;;  %v920_v49 = vadd.f32 %v1957_v11, %v876_v34  ;;  %982 = vst [vmem:[%s1852_s1 + $0x60] sm:$0xff] %v950_v60  ;;  %v892_v20 = vld [vmem:[#allocation2 + $0xf0] sm:$0xff]  ;;  %993 = vst [vmem:[%s1852_s1 + $0xb8] sm:$0xff] %v961_v25  ;;  %v962_v34 = vmax.f32 %v930_v26, 0.0  ;;  %v967_v39 = vmax.f32 %v935_v31, 0.0 }
 0x1c0   : > { %v921_v50 = vadd.f32 %v1959_v12, %v877_v35  ;;  %983 = vst [vmem:[%s1852_s1 + $0x68] sm:$0xff] %v951_v61  ;;  %v893_v21 = vld [vmem:[#allocation2 + $0xf8] sm:$0xff]  ;;  %v936_v32 = vadd.f32 %v1957_v11, %v892_v20  ;;  %v963_v35 = vmax.f32 %v931_v27, 0.0  ;;  %996 = vst [vmem:[%s1852_s1 + $0xd0] sm:$0xff] %v964_v36 }
 0x1c1   : > { %v952_v62 = vmax.f32 %v920_v49, 0.0  ;;  %v937_v33 = vadd.f32 %v1959_v12, %v893_v21  ;;  %994 = vst [vmem:[%s1852_s1 + $0xc0] sm:$0xff] %v962_v34  ;;  %997 = vst [vmem:[%s1852_s1 + $0xd8] sm:$0xff] %v965_v37 }
 0x1c2   : > { %v953_v63 = vmax.f32 %v921_v50, 0.0  ;;  %v968_v40 = vmax.f32 %v936_v32, 0.0  ;;  %995 = vst [vmem:[%s1852_s1 + $0xc8] sm:$0xff] %v963_v35  ;;  %998 = vst [vmem:[%s1852_s1 + $0xe0] sm:$0xff] %v966_v38 }
 0x1c3   : > { %984 = vst [vmem:[%s1852_s1 + $0x70] sm:$0xff] %v952_v62  ;;  %v969_v41 = vmax.f32 %v937_v33, 0.0  ;;  %999 = vst [vmem:[%s1852_s1 + $0xe8] sm:$0xff] %v967_v39 }
 0x1c4   : > { %985 = vst [vmem:[%s1852_s1 + $0x78] sm:$0xff] %v953_v63  ;;  %1000 = vst [vmem:[%s1852_s1 + $0xf0] sm:$0xff] %v968_v40 }
 0x1c5   : > { %1001 = vst [vmem:[%s1852_s1 + $0xf8] sm:$0xff] %v969_v41 }
 0x1c6 PF: > { %1008 = sbr.rel (!%p1616_p12) target bundleno = 472 (0x1d8), region = 90  ;;  %s1227_s16 = sshll.u32 (%p1616_p12), %s1487_s19, 4  ;;  %v1027_v11 = vld [vmem:[%s1852_s1] sm:$0xff] (%p1616_p12)  ;;  %v1029_v12 = vld [vmem:[%s1852_s1 + $0x8] sm:$0xff] (%p1616_p12)  ;;  %v1031_v42 = vld [vmem:[%s1852_s1 + $0x10] sm:$0xff] (%p1616_p12) }
 0x1c7   : > { %s2034_s5 = scalar_lea.vmem (%p1616_p12), %s2133_s3, %s1227_s16  ;;  %v1033_v43 = vld [vmem:[%s1852_s1 + $0x18] sm:$0xff] (%p1616_p12)  ;;  %v1047_v50 = vld [vmem:[%s1852_s1 + $0x50] sm:$0xff] (%p1616_p12)  ;;  %v1051_v52 = vld [vmem:[%s1852_s1 + $0x60] sm:$0xff] (%p1616_p12) }
 0x1c8   : > { %1028 = vst [vmem:[%s2034_s5] sm:$0xff] (%p1616_p12), %v1027_v11  ;;  %1030 = vst [vmem:[%s2034_s5 + $0x8] sm:$0xff] (%p1616_p12), %v1029_v12  ;;  %v1049_v51 = vld [vmem:[%s1852_s1 + $0x58] sm:$0xff] (%p1616_p12)  ;;  %v1053_v53 = vld [vmem:[%s1852_s1 + $0x68] sm:$0xff] (%p1616_p12) }
 0x1c9   : > { %v1035_v44 = vld [vmem:[%s1852_s1 + $0x20] sm:$0xff] (%p1616_p12)  ;;  %v1037_v45 = vld [vmem:[%s1852_s1 + $0x28] sm:$0xff] (%p1616_p12)  ;;  %1032 = vst [vmem:[%s2034_s5 + $0x20] sm:$0xff] (%p1616_p12), %v1031_v42  ;;  %1034 = vst [vmem:[%s2034_s5 + $0x28] sm:$0xff] (%p1616_p12), %v1033_v43 }
 0x1ca   : > { %1036 = vst [vmem:[%s2034_s5 + $0x40] sm:$0xff] (%p1616_p12), %v1035_v44  ;;  %1038 = vst [vmem:[%s2034_s5 + $0x48] sm:$0xff] (%p1616_p12), %v1037_v45  ;;  %v1039_v46 = vld [vmem:[%s1852_s1 + $0x30] sm:$0xff] (%p1616_p12)  ;;  %v1041_v47 = vld [vmem:[%s1852_s1 + $0x38] sm:$0xff] (%p1616_p12) }
 0x1cb   : > { %1040 = vst [vmem:[%s2034_s5 + $0x60] sm:$0xff] (%p1616_p12), %v1039_v46  ;;  %1042 = vst [vmem:[%s2034_s5 + $0x68] sm:$0xff] (%p1616_p12), %v1041_v47  ;;  %v1055_v54 = vld [vmem:[%s1852_s1 + $0x70] sm:$0xff] (%p1616_p12)  ;;  %v1057_v55 = vld [vmem:[%s1852_s1 + $0x78] sm:$0xff] (%p1616_p12) }
 0x1cc   : > { %1048 = vst [vmem:[%s2034_s5 + $0xa0] sm:$0xff] (%p1616_p12), %v1047_v50  ;;  %1050 = vst [vmem:[%s2034_s5 + $0xa8] sm:$0xff] (%p1616_p12), %v1049_v51  ;;  %v1059_v56 = vld [vmem:[%s1852_s1 + $0x80] sm:$0xff] (%p1616_p12)  ;;  %v1061_v57 = vld [vmem:[%s1852_s1 + $0x88] sm:$0xff] (%p1616_p12) }
 0x1cd   : > { %v1043_v48 = vld [vmem:[%s1852_s1 + $0x40] sm:$0xff]  ;;  %v1045_v49 = vld [vmem:[%s1852_s1 + $0x48] sm:$0xff]  ;;  %1052 = vst [vmem:[%s2034_s5 + $0xc0] sm:$0xff] %v1051_v52  ;;  %1054 = vst [vmem:[%s2034_s5 + $0xc8] sm:$0xff] %v1053_v53 }
 0x1ce   : > { %1044 = vst [vmem:[%s2034_s5 + $0x80] sm:$0xff] %v1043_v48  ;;  %1046 = vst [vmem:[%s2034_s5 + $0x88] sm:$0xff] %v1045_v49  ;;  %v1063_v58 = vld [vmem:[%s1852_s1 + $0x90] sm:$0xff]  ;;  %v1065_v59 = vld [vmem:[%s1852_s1 + $0x98] sm:$0xff] }
 0x1cf   : > { %1056 = vst [vmem:[%s2034_s5 + $0xe0] sm:$0xff] %v1055_v54  ;;  %1058 = vst [vmem:[%s2034_s5 + $0xe8] sm:$0xff] %v1057_v55  ;;  %v1067_v60 = vld [vmem:[%s1852_s1 + $0xa0] sm:$0xff]  ;;  %v1069_v61 = vld [vmem:[%s1852_s1 + $0xa8] sm:$0xff] }
 0x1d0   : > { %1060 = vst [vmem:[%s2034_s5 + $0x100] sm:$0xff] %v1059_v56  ;;  %1062 = vst [vmem:[%s2034_s5 + $0x108] sm:$0xff] %v1061_v57  ;;  %v1071_v62 = vld [vmem:[%s1852_s1 + $0xb0] sm:$0xff]  ;;  %v1073_v63 = vld [vmem:[%s1852_s1 + $0xb8] sm:$0xff] }
 0x1d1   : > { %1064 = vst [vmem:[%s2034_s5 + $0x120] sm:$0xff] %v1063_v58  ;;  %1066 = vst [vmem:[%s2034_s5 + $0x128] sm:$0xff] %v1065_v59  ;;  %v1075_v0 = vld [vmem:[%s1852_s1 + $0xc0] sm:$0xff]  ;;  %v1077_v1 = vld [vmem:[%s1852_s1 + $0xc8] sm:$0xff] }
 0x1d2   : > { %1068 = vst [vmem:[%s2034_s5 + $0x140] sm:$0xff] %v1067_v60  ;;  %1070 = vst [vmem:[%s2034_s5 + $0x148] sm:$0xff] %v1069_v61  ;;  %v1079_v2 = vld [vmem:[%s1852_s1 + $0xd0] sm:$0xff]  ;;  %v1081_v3 = vld [vmem:[%s1852_s1 + $0xd8] sm:$0xff] }
 0x1d3   : > { %1072 = vst [vmem:[%s2034_s5 + $0x160] sm:$0xff] %v1071_v62  ;;  %1074 = vst [vmem:[%s2034_s5 + $0x168] sm:$0xff] %v1073_v63  ;;  %v1083_v4 = vld [vmem:[%s1852_s1 + $0xe0] sm:$0xff]  ;;  %v1085_v5 = vld [vmem:[%s1852_s1 + $0xe8] sm:$0xff] }
 0x1d4   : > { %1076 = vst [vmem:[%s2034_s5 + $0x180] sm:$0xff] %v1075_v0  ;;  %1078 = vst [vmem:[%s2034_s5 + $0x188] sm:$0xff] %v1077_v1  ;;  %v1087_v6 = vld [vmem:[%s1852_s1 + $0xf0] sm:$0xff]  ;;  %v1089_v7 = vld [vmem:[%s1852_s1 + $0xf8] sm:$0xff] }
 0x1d5   : > { %1080 = vst [vmem:[%s2034_s5 + $0x1a0] sm:$0xff] %v1079_v2  ;;  %1082 = vst [vmem:[%s2034_s5 + $0x1a8] sm:$0xff] %v1081_v3 }
 0x1d6   : > { %1084 = vst [vmem:[%s2034_s5 + $0x1c0] sm:$0xff] %v1083_v4  ;;  %1086 = vst [vmem:[%s2034_s5 + $0x1c8] sm:$0xff] %v1085_v5 }
 0x1d7   : > { %1088 = vst [vmem:[%s2034_s5 + $0x1e0] sm:$0xff] %v1087_v6  ;;  %1090 = vst [vmem:[%s2034_s5 + $0x1e8] sm:$0xff] %v1089_v7 }
 0x1d8 PF: > { %s13_s22 = sadd.s32 1, %s1499_s22   ;;  %s2143_s10 = sld [smem:[#allocation6_spill]] }
 0x1d9   : > { %p10_p6 = scmp.ge.s32.totalorder %s13_s22, 38   ;;  %s2144_s12 = smov %s1463_s13 }
 0x1da   : > { %s2145_s13 = smov %s1614_s9  ;;  %s2146_s14 = smov %s1471_s15 }
 0x1db   : > { %s2147_s15 = smov %s1611_s8  ;;  %s2148_s16 = smov %s1479_s17 }
 0x1dc   : > { %s2149_s17 = smov %s1597_s30  ;;  %s2150_s18 = smov %s1491_s20 }
 0x1dd   : > { %s2151_s19 = smov %s1495_s21  ;;  %s2152_s20 = smov %s2155_s24 }
 0x1de   : > { %s2153_s21 = smov %s2143_s10  ;;  %12 = sbr.rel (!%p10_p6) target bundleno = 9 (0x9), region = 155 }

// kernel: _pallas_forward.37
= control target key start
LH: loop header
LB: loop body
LE: loop exit
PB: predicated region body
PF: predicated region fallthrough
CT: control target
= control target key end

     0   :  { %s138_s0 = inlined_call_operand.vmem [shape: f32[4,1024], index: 0, kind: input, shape index: {}]   ;;  %s139_s1 = inlined_call_operand.vmem [shape: f32[4,1024], index: 1, kind: input, shape index: {}]   ;;  %s140_s2 = inlined_call_operand.vmem [shape: f32[4,1024], index: 2, kind: input, shape index: {}]   ;;  %s141_s3 = inlined_call_operand.vmem [shape: f32[4,1024], index: 3, kind: input, shape index: {}]   ;;  %s142_s4 = inlined_call_operand.vmem [shape: f32[4,1024], index: 4, kind: output, shape index: {}]  }
   0x1   :  { %v17_v0 = vld [vmem:[%s138_s0] sm:$0xff]  ;;  %v18_v5 = vld [vmem:[%s138_s0 + $0x8] sm:$0xff]  ;;  %v19_v11 = vld [vmem:[%s138_s0 + $0x10] sm:$0xff] }
   0x2   :  { %v21_v1 = vld [vmem:[%s139_s1] sm:$0xff]  ;;  %v22_v6 = vld [vmem:[%s139_s1 + $0x8] sm:$0xff]  ;;  %v23_v13 = vld [vmem:[%s139_s1 + $0x10] sm:$0xff] }
   0x3   :  { %v29_v2 = vld [vmem:[%s140_s2] sm:$0xff]  ;;  %v25_v3 = vmax.f32 %v17_v0, %v21_v1  ;;  %v26_v8 = vmax.f32 %v18_v5, %v22_v6  ;;  %v30_v9 = vld [vmem:[%s140_s2 + $0x8] sm:$0xff]  ;;  %v31_v14 = vld [vmem:[%s140_s2 + $0x10] sm:$0xff]  ;;  %v27_v17 = vmax.f32 %v19_v11, %v23_v13 }
   0x4   :  { %v33_v4 = vld [vmem:[%s141_s3] sm:$0xff]  ;;  %v34_v10 = vld [vmem:[%s141_s3 + $0x8] sm:$0xff]  ;;  %v35_v15 = vld [vmem:[%s141_s3 + $0x10] sm:$0xff] }
   0x5   :  { %v37_v7 = vmax.f32 %v29_v2, %v33_v4  ;;  %v38_v12 = vmax.f32 %v30_v9, %v34_v10  ;;  %v39_v18 = vmax.f32 %v31_v14, %v35_v15  ;;  %v20_v19 = vld [vmem:[%s138_s0 + $0x18] sm:$0xff] }
   0x6   :  { %v24_v20 = vld [vmem:[%s139_s1 + $0x18] sm:$0xff] }
   0x7   :  { %v41_v16 = vmax.f32 %v25_v3, %v37_v7  ;;  %v32_v21 = vld [vmem:[%s140_s2 + $0x18] sm:$0xff]  ;;  %v42_v22 = vmax.f32 %v26_v8, %v38_v12  ;;  %v28_v23 = vmax.f32 %v20_v19, %v24_v20  ;;  %v43_v25 = vmax.f32 %v27_v17, %v39_v18 }
   0x8   :  { %v36_v24 = vld [vmem:[%s141_s3 + $0x18] sm:$0xff] }
   0x9   :  { %45 = vst [vmem:[%s142_s4] sm:$0xff] %v41_v16  ;;  %v40_v26 = vmax.f32 %v32_v21, %v36_v24  ;;  %46 = vst [vmem:[%s142_s4 + $0x8] sm:$0xff] %v42_v22 }
   0xa   :  { %47 = vst [vmem:[%s142_s4 + $0x10] sm:$0xff] %v43_v25 }
   0xb   :  { %v44_v27 = vmax.f32 %v28_v23, %v40_v26 }
   0xd   :  { %48 = vst [vmem:[%s142_s4 + $0x18] sm:$0xff] %v44_v27 }

</bundles_post_ra>
